<compile_context>
chip_gen: v7x
topology: tpu7x:2x2x1
jax: 0.10.0
libtpu: 0.0.40
codegen_flags: <defaults>
</compile_context>

<pallas_src>
import functools

import jax
import jax.numpy as jnp
from jax.experimental import pallas as pl
from jax.experimental.pallas import tpu as pltpu  # noqa: F401  (TPU backend assumed)

BN_EPS = 1e-5


def _batchnorm(y, gamma, beta):
    """BatchNorm1d, training mode (biased batch statistics over (N, L))."""
    n, L, c = y.shape
    y2 = y.reshape(n * L, c)
    mean = jnp.mean(y2, axis=0, keepdims=True)                        # (1, C)
    var = jnp.mean(jnp.square(y2 - mean), axis=0, keepdims=True)      # (1, C)
    scale = jax.lax.rsqrt(var + BN_EPS) * gamma                       # (1, C)
    return (y - mean) * scale + beta


def _stage(x, idx_nlc, wfull, wb, gamma, beta, *, kmax, cbn3):
    """One InceptionTranspose: branches + conv_to_maxpool + unpool + bottleneck
    + BatchNorm + ReLU.  x: (N, L, Cin) f32, idx_nlc: (N, L, Cout) int32."""
    n, L, cin = x.shape
    cout = wb.shape[1]
    p = (kmax - 1) // 2

    # im2col of the zero-padded input: u[n*L + l, j*Cin + ci] = xpad[n, l+j, ci].
    zpad = jnp.zeros((n, p, cin), x.dtype)
    xpad = jnp.concatenate([zpad, x, zpad], axis=1)          # (N, L + Kmax - 1, Cin)
    cols = [xpad[:, j:j + L, :] for j in range(kmax)]        # static tap slices
    u = jnp.concatenate(cols, axis=-1).reshape(n * L, kmax * cin)

    # Single MXU matmul: all three ConvTranspose branches plus the 1x1
    # conv_to_maxpool (embedded at tap p of wfull) in one lane-dense product.
    zz = jnp.dot(u.astype(jnp.bfloat16), wfull,
                 preferred_element_type=jnp.float32)         # (N*L, 3*Cbn + Cout)
    zcat = zz[:, :cbn3]                                      # concat(Z1, Z2, Z3)
    z4 = zz[:, cbn3:].reshape(n, L, cout)                    # Z4 (pre-unpool)

    # MaxUnpool1d(kernel=3, stride=1, padding=1) as one-hot compare + masked sum:
    #   mup[n, l, c] = sum_{l'} z4[n, l', c] * (idx[n, l', c] == l)
    # TODO(synk): duplicate pooling indices accumulate here; PyTorch's scatter
    #             behaviour under duplicates is implementation-defined.
    iota_l = jax.lax.broadcasted_iota(jnp.int32, (n, L, L, cout), 1)
    mask = idx_nlc[:, None, :, :] == iota_l                  # (n, l_out, l_in, c)
    mup = jnp.sum(jnp.where(mask, z4[:, None, :, :], 0.0), axis=2)   # (n, L, cout)

    # 1x1 bottleneck + unpooled add + BatchNorm(batch stats) + ReLU.
    y = jnp.dot(zcat.astype(jnp.bfloat16), wb,
                preferred_element_type=jnp.float32).reshape(n, L, cout) + mup
    return jnp.maximum(_batchnorm(y, gamma, beta), 0.0)


def _block_kernel(x_ref, i1_ref, i2_ref, i3_ref,
                  wf1_ref, wb1_ref, g1_ref, b1_ref,
                  wf2_ref, wb2_ref, g2_ref, b2_ref,
                  wf3_ref, wb3_ref, g3_ref, b3_ref,
                  wr_ref, brb_ref, gr_ref, betar_ref,
                  out_ref, *, kmax, cbn3):
    x0 = x_ref[...]                                          # (N, L, Cin) f32

    z = _stage(x0, i1_ref[...], wf1_ref[...], wb1_ref[...], g1_ref[...],
               b1_ref[...], kmax=kmax, cbn3=cbn3)
    z = _stage(z, i2_ref[...], wf2_ref[...], wb2_ref[...], g2_ref[...],
               b2_ref[...], kmax=kmax, cbn3=cbn3)
    z = _stage(z, i3_ref[...], wf3_ref[...], wb3_ref[...], g3_ref[...],
               b3_ref[...], kmax=kmax, cbn3=cbn3)

    # Residual: 1x1 ConvTranspose (matmul) + bias + BatchNorm, add, ReLU.
    n, L, cin = x0.shape
    cout = wr_ref.shape[1]
    r = jnp.dot(x0.reshape(n * L, cin).astype(jnp.bfloat16), wr_ref[...],
                preferred_element_type=jnp.float32).reshape(n, L, cout)
    r = r + brb_ref[...]
    rn = _batchnorm(r, gr_ref[...], betar_ref[...])
    out_ref[...] = jnp.maximum(z + rn, 0.0)


@jax.jit
def inception_transpose_block(x_ncl, idx0, idx1, idx2, params):
    """InceptionTransposeBlock forward.
    x_ncl: (N, Cin, L); idx*: (N, C, L) MaxPool indices (PyTorch layout)."""
    x = jnp.transpose(x_ncl, (0, 2, 1)).astype(jnp.float32)          # (N, L, Cin)
    # Unpool indices transposed once at the boundary to (N, L, C) layout.
    i1 = jnp.transpose(idx2, (0, 2, 1)).astype(jnp.int32)            # stage 1 uses indices[2]
    i2 = jnp.transpose(idx1, (0, 2, 1)).astype(jnp.int32)
    i3 = jnp.transpose(idx0, (0, 2, 1)).astype(jnp.int32)

    p1, p2, p3, pr = params["inc1"], params["inc2"], params["inc3"], params["res"]
    n, L, cin = x.shape
    cout = pr["wr"].shape[1]
    cbn3 = p1["wb"].shape[0]
    kmax = p1["wfull"].shape[0] // cin

    kernel = functools.partial(_block_kernel, kmax=kmax, cbn3=cbn3)
    out = pl.pallas_call(
        kernel,
        out_shape=jax.ShapeDtypeStruct((n, L, cout), jnp.float32),
        compiler_params=pltpu.CompilerParams(vmem_limit_bytes=64 << 20),
    )(x, i1, i2, i3,
      p1["wfull"], p1["wb"], p1["gamma"], p1["beta"],
      p2["wfull"], p2["wb"], p2["gamma"], p2["beta"],
      p3["wfull"], p3["wb"], p3["gamma"], p3["beta"],
      pr["wr"], pr["br"], pr["gamma"], pr["beta"])

    return jnp.transpose(out, (0, 2, 1))                             # (N, Cout, L)


# ---------------------------------------------------------------------------
# Deterministic parameter construction (synthetic weights, PyTorch-like shapes)
# ---------------------------------------------------------------------------
def _init_inception_params(key, cin, cout, cbn, kernel_sizes):
    kmax = max(kernel_sizes)
    p = (kmax - 1) // 2
    keys = jax.random.split(key, 5)
    # ConvTranspose1d weights: (in_channels, out_channels, k)
    wcts = [jax.random.normal(keys[i], (cin, cbn, k), jnp.float32) * 0.1
            for i, k in enumerate(kernel_sizes)]
    w_mp = jax.random.normal(keys[3], (cout, cin, 1), jnp.float32) * 0.1       # conv_to_maxpool
    w_bneck = jax.random.normal(keys[4], (cout, 3 * cbn, 1), jnp.float32) * 0.1

    # Flip + centre each ConvTranspose1d weight into a shared Kmax-tap stack.
    wcat = jnp.zeros((kmax, cin, 3 * cbn), jnp.float32)
    for i, (k, w) in enumerate(zip(kernel_sizes, wcts)):
        off = (kmax - k) // 2
        we = jnp.transpose(w[:, :, ::-1], (2, 0, 1))        # (k, Cin, Cbn), flipped
        wcat = wcat.at[off:off + k, :, i * cbn:(i + 1) * cbn].set(we)
    wcat_flat = wcat.reshape(kmax * cin, 3 * cbn)           # im2col weight

    # Embed the 1x1 conv_to_maxpool weight at tap p -> one fused matmul.
    w4 = jnp.transpose(w_mp[:, :, 0])                       # (Cin, Cout)
    w4_embed = jnp.zeros((kmax * cin, cout), jnp.float32)
    w4_embed = w4_embed.at[p * cin:(p + 1) * cin, :].set(w4)

    wfull = jnp.concatenate([wcat_flat, w4_embed], axis=1).astype(jnp.bfloat16)
    wb = jnp.transpose(w_bneck[:, :, 0]).astype(jnp.bfloat16)   # (3*Cbn, Cout)
    return dict(
        wfull=wfull,
        wb=wb,
        gamma=jnp.ones((1, cout), jnp.float32),              # BatchNorm1d init
        beta=jnp.zeros((1, cout), jnp.float32),
    )


def init_block_params(key, cin, cout, cbn, kernel_sizes):
    k1, k2, k3, k4, k5 = jax.random.split(key, 5)
    return dict(
        inc1=_init_inception_params(k1, cin, cin, cbn, kernel_sizes),
        inc2=_init_inception_params(k2, cin, cin, cbn, kernel_sizes),
        inc3=_init_inception_params(k3, cin, cout, cbn, kernel_sizes),
        res=dict(
            wr=(jax.random.normal(k4, (cin, cout), jnp.float32) * 0.1).astype(jnp.bfloat16),
            br=jax.random.normal(k5, (1, cout), jnp.float32) * 0.1,
            gamma=jnp.ones((1, cout), jnp.float32),
            beta=jnp.zeros((1, cout), jnp.float32),
        ),
    )


if __name__ == "__main__":
    key = jax.random.PRNGKey(0)
    N, C_in, L = 2, 4, 16
    C_out, C_bn = 8, 8
    kernel_sizes = (9, 19, 39)

    kp, kx = jax.random.split(key, 2)
    params = init_block_params(kp, C_in, C_out, C_bn, kernel_sizes)
    X = jax.random.normal(kx, (N, C_in, L), jnp.float32)

    # Valid MaxPool1d(k=3, s=1, p=1) indices: swap adjacent positions (a
    # permutation -> no duplicate indices, so unpool semantics are unambiguous).
    base = jnp.arange(L, dtype=jnp.int32) ^ 1
    idx0 = jnp.broadcast_to(base, (N, C_out, L))
    idx1 = jnp.broadcast_to(base, (N, C_in, L))
    idx2 = jnp.broadcast_to(base, (N, C_in, L))

    out = inception_transpose_block(X, idx0, idx1, idx2, params)
    out = jax.block_until_ready(out)
    assert out.shape == (N, C_out, L), out.shape
    assert bool(jnp.all(jnp.isfinite(out))), "non-finite output"
    print("KERNEL_OK")
</pallas_src>

<mosaic_0001>
module attributes {stable_mosaic.version = 11 : i64} {
  func.func @_block_kernel(%arg0: memref<2x16x4xf32, #tpu.memory_space<vmem>>, %arg1: memref<2x16x4xi32, #tpu.memory_space<vmem>>, %arg2: memref<2x16x4xi32, #tpu.memory_space<vmem>>, %arg3: memref<2x16x8xi32, #tpu.memory_space<vmem>>, %arg4: memref<156x28xbf16, #tpu.memory_space<vmem>>, %arg5: memref<24x4xbf16, #tpu.memory_space<vmem>>, %arg6: memref<1x4xf32, #tpu.memory_space<vmem>>, %arg7: memref<1x4xf32, #tpu.memory_space<vmem>>, %arg8: memref<156x28xbf16, #tpu.memory_space<vmem>>, %arg9: memref<24x4xbf16, #tpu.memory_space<vmem>>, %arg10: memref<1x4xf32, #tpu.memory_space<vmem>>, %arg11: memref<1x4xf32, #tpu.memory_space<vmem>>, %arg12: memref<156x32xbf16, #tpu.memory_space<vmem>>, %arg13: memref<24x8xbf16, #tpu.memory_space<vmem>>, %arg14: memref<1x8xf32, #tpu.memory_space<vmem>>, %arg15: memref<1x8xf32, #tpu.memory_space<vmem>>, %arg16: memref<4x8xbf16, #tpu.memory_space<vmem>>, %arg17: memref<1x8xf32, #tpu.memory_space<vmem>>, %arg18: memref<1x8xf32, #tpu.memory_space<vmem>>, %arg19: memref<1x8xf32, #tpu.memory_space<vmem>>, %arg20: memref<2x16x8xf32, #tpu.memory_space<vmem>>) attributes {dimension_semantics = [], scalar_prefetch = 0 : i64, scratch_operands = 0 : i64, tpu.core_type = #tpu.core_type<tc>} {
    %c0 = arith.constant 0 : index
    %c0_0 = arith.constant 0 : index
    %c0_1 = arith.constant 0 : index
    %0 = vector.load %arg0[%c0, %c0_0, %c0_1] : memref<2x16x4xf32, #tpu.memory_space<vmem>>, vector<2x16x4xf32>
    %c0_2 = arith.constant 0 : index
    %c0_3 = arith.constant 0 : index
    %c0_4 = arith.constant 0 : index
    %1 = vector.load %arg1[%c0_2, %c0_3, %c0_4] : memref<2x16x4xi32, #tpu.memory_space<vmem>>, vector<2x16x4xi32>
    %c0_5 = arith.constant 0 : index
    %c0_6 = arith.constant 0 : index
    %2 = vector.load %arg4[%c0_5, %c0_6] : memref<156x28xbf16, #tpu.memory_space<vmem>>, vector<156x28xbf16>
    %c0_7 = arith.constant 0 : index
    %c0_8 = arith.constant 0 : index
    %3 = vector.load %arg5[%c0_7, %c0_8] : memref<24x4xbf16, #tpu.memory_space<vmem>>, vector<24x4xbf16>
    %c0_9 = arith.constant 0 : index
    %c0_10 = arith.constant 0 : index
    %4 = vector.load %arg6[%c0_9, %c0_10] : memref<1x4xf32, #tpu.memory_space<vmem>>, vector<1x4xf32>
    %c0_11 = arith.constant 0 : index
    %c0_12 = arith.constant 0 : index
    %5 = vector.load %arg7[%c0_11, %c0_12] : memref<1x4xf32, #tpu.memory_space<vmem>>, vector<1x4xf32>
    %cst = arith.constant 0.000000e+00 : f32
    %6 = vector.broadcast %cst : f32 to vector<2x19x4xf32>
    %7 = tpu.concatenate %6, %0, %6 in 1 : vector<2x19x4xf32>, vector<2x16x4xf32>, vector<2x19x4xf32> -> vector<2x54x4xf32>
    %8 = vector.extract_strided_slice %7 {offsets = [0, 0, 0], sizes = [2, 16, 4], strides = [1, 1, 1]} : vector<2x54x4xf32> to vector<2x16x4xf32>
    %9 = vector.extract_strided_slice %7 {offsets = [0, 1, 0], sizes = [2, 16, 4], strides = [1, 1, 1]} : vector<2x54x4xf32> to vector<2x16x4xf32>
    %10 = vector.extract_strided_slice %7 {offsets = [0, 2, 0], sizes = [2, 16, 4], strides = [1, 1, 1]} : vector<2x54x4xf32> to vector<2x16x4xf32>
    %11 = vector.extract_strided_slice %7 {offsets = [0, 3, 0], sizes = [2, 16, 4], strides = [1, 1, 1]} : vector<2x54x4xf32> to vector<2x16x4xf32>
    %12 = vector.extract_strided_slice %7 {offsets = [0, 4, 0], sizes = [2, 16, 4], strides = [1, 1, 1]} : vector<2x54x4xf32> to vector<2x16x4xf32>
    %13 = vector.extract_strided_slice %7 {offsets = [0, 5, 0], sizes = [2, 16, 4], strides = [1, 1, 1]} : vector<2x54x4xf32> to vector<2x16x4xf32>
    %14 = vector.extract_strided_slice %7 {offsets = [0, 6, 0], sizes = [2, 16, 4], strides = [1, 1, 1]} : vector<2x54x4xf32> to vector<2x16x4xf32>
    %15 = vector.extract_strided_slice %7 {offsets = [0, 7, 0], sizes = [2, 16, 4], strides = [1, 1, 1]} : vector<2x54x4xf32> to vector<2x16x4xf32>
    %16 = vector.extract_strided_slice %7 {offsets = [0, 8, 0], sizes = [2, 16, 4], strides = [1, 1, 1]} : vector<2x54x4xf32> to vector<2x16x4xf32>
    %17 = vector.extract_strided_slice %7 {offsets = [0, 9, 0], sizes = [2, 16, 4], strides = [1, 1, 1]} : vector<2x54x4xf32> to vector<2x16x4xf32>
    %18 = vector.extract_strided_slice %7 {offsets = [0, 10, 0], sizes = [2, 16, 4], strides = [1, 1, 1]} : vector<2x54x4xf32> to vector<2x16x4xf32>
    %19 = vector.extract_strided_slice %7 {offsets = [0, 11, 0], sizes = [2, 16, 4], strides = [1, 1, 1]} : vector<2x54x4xf32> to vector<2x16x4xf32>
    %20 = vector.extract_strided_slice %7 {offsets = [0, 12, 0], sizes = [2, 16, 4], strides = [1, 1, 1]} : vector<2x54x4xf32> to vector<2x16x4xf32>
    %21 = vector.extract_strided_slice %7 {offsets = [0, 13, 0], sizes = [2, 16, 4], strides = [1, 1, 1]} : vector<2x54x4xf32> to vector<2x16x4xf32>
    %22 = vector.extract_strided_slice %7 {offsets = [0, 14, 0], sizes = [2, 16, 4], strides = [1, 1, 1]} : vector<2x54x4xf32> to vector<2x16x4xf32>
    %23 = vector.extract_strided_slice %7 {offsets = [0, 15, 0], sizes = [2, 16, 4], strides = [1, 1, 1]} : vector<2x54x4xf32> to vector<2x16x4xf32>
    %24 = vector.extract_strided_slice %7 {offsets = [0, 16, 0], sizes = [2, 16, 4], strides = [1, 1, 1]} : vector<2x54x4xf32> to vector<2x16x4xf32>
    %25 = vector.extract_strided_slice %7 {offsets = [0, 17, 0], sizes = [2, 16, 4], strides = [1, 1, 1]} : vector<2x54x4xf32> to vector<2x16x4xf32>
    %26 = vector.extract_strided_slice %7 {offsets = [0, 18, 0], sizes = [2, 16, 4], strides = [1, 1, 1]} : vector<2x54x4xf32> to vector<2x16x4xf32>
    %27 = vector.extract_strided_slice %7 {offsets = [0, 19, 0], sizes = [2, 16, 4], strides = [1, 1, 1]} : vector<2x54x4xf32> to vector<2x16x4xf32>
    %28 = vector.extract_strided_slice %7 {offsets = [0, 20, 0], sizes = [2, 16, 4], strides = [1, 1, 1]} : vector<2x54x4xf32> to vector<2x16x4xf32>
    %29 = vector.extract_strided_slice %7 {offsets = [0, 21, 0], sizes = [2, 16, 4], strides = [1, 1, 1]} : vector<2x54x4xf32> to vector<2x16x4xf32>
    %30 = vector.extract_strided_slice %7 {offsets = [0, 22, 0], sizes = [2, 16, 4], strides = [1, 1, 1]} : vector<2x54x4xf32> to vector<2x16x4xf32>
    %31 = vector.extract_strided_slice %7 {offsets = [0, 23, 0], sizes = [2, 16, 4], strides = [1, 1, 1]} : vector<2x54x4xf32> to vector<2x16x4xf32>
    %32 = vector.extract_strided_slice %7 {offsets = [0, 24, 0], sizes = [2, 16, 4], strides = [1, 1, 1]} : vector<2x54x4xf32> to vector<2x16x4xf32>
    %33 = vector.extract_strided_slice %7 {offsets = [0, 25, 0], sizes = [2, 16, 4], strides = [1, 1, 1]} : vector<2x54x4xf32> to vector<2x16x4xf32>
    %34 = vector.extract_strided_slice %7 {offsets = [0, 26, 0], sizes = [2, 16, 4], strides = [1, 1, 1]} : vector<2x54x4xf32> to vector<2x16x4xf32>
    %35 = vector.extract_strided_slice %7 {offsets = [0, 27, 0], sizes = [2, 16, 4], strides = [1, 1, 1]} : vector<2x54x4xf32> to vector<2x16x4xf32>
    %36 = vector.extract_strided_slice %7 {offsets = [0, 28, 0], sizes = [2, 16, 4], strides = [1, 1, 1]} : vector<2x54x4xf32> to vector<2x16x4xf32>
    %37 = vector.extract_strided_slice %7 {offsets = [0, 29, 0], sizes = [2, 16, 4], strides = [1, 1, 1]} : vector<2x54x4xf32> to vector<2x16x4xf32>
    %38 = vector.extract_strided_slice %7 {offsets = [0, 30, 0], sizes = [2, 16, 4], strides = [1, 1, 1]} : vector<2x54x4xf32> to vector<2x16x4xf32>
    %39 = vector.extract_strided_slice %7 {offsets = [0, 31, 0], sizes = [2, 16, 4], strides = [1, 1, 1]} : vector<2x54x4xf32> to vector<2x16x4xf32>
    %40 = vector.extract_strided_slice %7 {offsets = [0, 32, 0], sizes = [2, 16, 4], strides = [1, 1, 1]} : vector<2x54x4xf32> to vector<2x16x4xf32>
    %41 = vector.extract_strided_slice %7 {offsets = [0, 33, 0], sizes = [2, 16, 4], strides = [1, 1, 1]} : vector<2x54x4xf32> to vector<2x16x4xf32>
    %42 = vector.extract_strided_slice %7 {offsets = [0, 34, 0], sizes = [2, 16, 4], strides = [1, 1, 1]} : vector<2x54x4xf32> to vector<2x16x4xf32>
    %43 = vector.extract_strided_slice %7 {offsets = [0, 35, 0], sizes = [2, 16, 4], strides = [1, 1, 1]} : vector<2x54x4xf32> to vector<2x16x4xf32>
    %44 = vector.extract_strided_slice %7 {offsets = [0, 36, 0], sizes = [2, 16, 4], strides = [1, 1, 1]} : vector<2x54x4xf32> to vector<2x16x4xf32>
    %45 = vector.extract_strided_slice %7 {offsets = [0, 37, 0], sizes = [2, 16, 4], strides = [1, 1, 1]} : vector<2x54x4xf32> to vector<2x16x4xf32>
    %46 = vector.extract_strided_slice %7 {offsets = [0, 38, 0], sizes = [2, 16, 4], strides = [1, 1, 1]} : vector<2x54x4xf32> to vector<2x16x4xf32>
    %47 = tpu.concatenate %8, %9, %10, %11, %12, %13, %14, %15, %16, %17, %18, %19, %20, %21, %22, %23 in 2 : vector<2x16x4xf32>, vector<2x16x4xf32>, vector<2x16x4xf32>, vector<2x16x4xf32>, vector<2x16x4xf32>, vector<2x16x4xf32>, vector<2x16x4xf32>, vector<2x16x4xf32>, vector<2x16x4xf32>, vector<2x16x4xf32>, vector<2x16x4xf32>, vector<2x16x4xf32>, vector<2x16x4xf32>, vector<2x16x4xf32>, vector<2x16x4xf32>, vector<2x16x4xf32> -> vector<2x16x64xf32>
    %48 = tpu.concatenate %24, %25, %26, %27, %28, %29, %30, %31, %32, %33, %34, %35, %36, %37, %38, %39 in 2 : vector<2x16x4xf32>, vector<2x16x4xf32>, vector<2x16x4xf32>, vector<2x16x4xf32>, vector<2x16x4xf32>, vector<2x16x4xf32>, vector<2x16x4xf32>, vector<2x16x4xf32>, vector<2x16x4xf32>, vector<2x16x4xf32>, vector<2x16x4xf32>, vector<2x16x4xf32>, vector<2x16x4xf32>, vector<2x16x4xf32>, vector<2x16x4xf32>, vector<2x16x4xf32> -> vector<2x16x64xf32>
    %49 = tpu.concatenate %40, %41, %42, %43, %44, %45, %46 in 2 : vector<2x16x4xf32>, vector<2x16x4xf32>, vector<2x16x4xf32>, vector<2x16x4xf32>, vector<2x16x4xf32>, vector<2x16x4xf32>, vector<2x16x4xf32> -> vector<2x16x28xf32>
    %50 = tpu.concatenate %47, %48, %49 in 2 : vector<2x16x64xf32>, vector<2x16x64xf32>, vector<2x16x28xf32> -> vector<2x16x156xf32>
    %51 = vector.shape_cast %50 : vector<2x16x156xf32> to vector<32x156xf32>
    %52 = arith.truncf %51 : vector<32x156xf32> to vector<32x156xbf16>
    %cst_13 = arith.constant dense<0.000000e+00> : vector<32x28xf32>
    %53 = tpu.matmul %52, %2, %cst_13 {dimension_numbers = #tpu.dot_dimension_numbers<[1], [0], [0], [1], [0, 0, 1, 1], [], []>} : vector<32x156xbf16>, vector<156x28xbf16>, vector<32x28xf32> -> vector<32x28xf32>
    %54 = vector.extract_strided_slice %53 {offsets = [0, 0], sizes = [32, 24], strides = [1, 1]} : vector<32x28xf32> to vector<32x24xf32>
    %55 = vector.extract_strided_slice %53 {offsets = [0, 24], sizes = [32, 4], strides = [1, 1]} : vector<32x28xf32> to vector<32x4xf32>
    %56 = vector.shape_cast %55 : vector<32x4xf32> to vector<2x16x4xf32>
    %57 = tpu.iota {dimensions = array<i32: 1>} : vector<2x16x16x4xi32>
    %58 = vector.shape_cast %1 : vector<2x16x4xi32> to vector<2x1x16x4xi32>
    %59 = vector.broadcast %58 : vector<2x1x16x4xi32> to vector<2x16x16x4xi32>
    %60 = arith.cmpi eq, %59, %57 : vector<2x16x16x4xi32>
    %61 = vector.shape_cast %56 : vector<2x16x4xf32> to vector<2x1x16x4xf32>
    %cst_14 = arith.constant 0.000000e+00 : f32
    %62 = vector.shape_cast %61 : vector<2x1x16x4xf32> to vector<2x1x16x4xf32>
    %63 = vector.broadcast %62 : vector<2x1x16x4xf32> to vector<2x16x16x4xf32>
    %64 = vector.broadcast %cst_14 : f32 to vector<2x16x16x4xf32>
    %65 = arith.select %60, %63, %64 : vector<2x16x16x4xi1>, vector<2x16x16x4xf32>
    %cst_15 = arith.constant dense<0.000000e+00> : vector<2x16x4xf32>
    %66 = vector.multi_reduction <add>, %65, %cst_15 [2] : vector<2x16x16x4xf32> to vector<2x16x4xf32>
    %67 = arith.truncf %54 : vector<32x24xf32> to vector<32x24xbf16>
    %cst_16 = arith.constant dense<0.000000e+00> : vector<32x4xf32>
    %68 = tpu.matmul %67, %3, %cst_16 {dimension_numbers = #tpu.dot_dimension_numbers<[1], [0], [0], [1], [0, 0, 1, 1], [], []>} : vector<32x24xbf16>, vector<24x4xbf16>, vector<32x4xf32> -> vector<32x4xf32>
    %69 = vector.shape_cast %68 : vector<32x4xf32> to vector<2x16x4xf32>
    %70 = arith.addf %69, %66 : vector<2x16x4xf32>
    %71 = vector.shape_cast %70 : vector<2x16x4xf32> to vector<32x4xf32>
    %cst_17 = arith.constant dense<0.000000e+00> : vector<4xf32>
    %72 = vector.multi_reduction <add>, %71, %cst_17 [0] : vector<32x4xf32> to vector<4xf32>
    %73 = vector.shape_cast %72 : vector<4xf32> to vector<1x4xf32>
    %cst_18 = arith.constant 3.200000e+01 : f32
    %74 = vector.broadcast %cst_18 : f32 to vector<1x4xf32>
    %75 = arith.divf %73, %74 : vector<1x4xf32>
    %76 = vector.broadcast %75 : vector<1x4xf32> to vector<32x4xf32>
    %77 = arith.subf %71, %76 : vector<32x4xf32>
    %78 = arith.mulf %77, %77 : vector<32x4xf32>
    %cst_19 = arith.constant dense<0.000000e+00> : vector<4xf32>
    %79 = vector.multi_reduction <add>, %78, %cst_19 [0] : vector<32x4xf32> to vector<4xf32>
    %80 = vector.shape_cast %79 : vector<4xf32> to vector<1x4xf32>
    %cst_20 = arith.constant 3.200000e+01 : f32
    %81 = vector.broadcast %cst_20 : f32 to vector<1x4xf32>
    %82 = arith.divf %80, %81 : vector<1x4xf32>
    %cst_21 = arith.constant 9.99999974E-6 : f32
    %83 = vector.broadcast %cst_21 : f32 to vector<1x4xf32>
    %84 = arith.addf %82, %83 : vector<1x4xf32>
    %85 = math.rsqrt %84 : vector<1x4xf32>
    %86 = arith.mulf %85, %4 : vector<1x4xf32>
    %87 = vector.shape_cast %75 : vector<1x4xf32> to vector<1x1x4xf32>
    %88 = vector.broadcast %87 : vector<1x1x4xf32> to vector<2x16x4xf32>
    %89 = arith.subf %70, %88 : vector<2x16x4xf32>
    %90 = vector.shape_cast %86 : vector<1x4xf32> to vector<1x1x4xf32>
    %91 = vector.broadcast %90 : vector<1x1x4xf32> to vector<2x16x4xf32>
    %92 = arith.mulf %89, %91 : vector<2x16x4xf32>
    %93 = vector.shape_cast %5 : vector<1x4xf32> to vector<1x1x4xf32>
    %94 = vector.broadcast %93 : vector<1x1x4xf32> to vector<2x16x4xf32>
    %95 = arith.addf %92, %94 : vector<2x16x4xf32>
    %cst_22 = arith.constant 0.000000e+00 : f32
    %96 = vector.broadcast %cst_22 : f32 to vector<2x16x4xf32>
    %97 = arith.maximumf %95, %96 : vector<2x16x4xf32>
    %c0_23 = arith.constant 0 : index
    %c0_24 = arith.constant 0 : index
    %c0_25 = arith.constant 0 : index
    %98 = vector.load %arg2[%c0_23, %c0_24, %c0_25] : memref<2x16x4xi32, #tpu.memory_space<vmem>>, vector<2x16x4xi32>
    %c0_26 = arith.constant 0 : index
    %c0_27 = arith.constant 0 : index
    %99 = vector.load %arg8[%c0_26, %c0_27] : memref<156x28xbf16, #tpu.memory_space<vmem>>, vector<156x28xbf16>
    %c0_28 = arith.constant 0 : index
    %c0_29 = arith.constant 0 : index
    %100 = vector.load %arg9[%c0_28, %c0_29] : memref<24x4xbf16, #tpu.memory_space<vmem>>, vector<24x4xbf16>
    %c0_30 = arith.constant 0 : index
    %c0_31 = arith.constant 0 : index
    %101 = vector.load %arg10[%c0_30, %c0_31] : memref<1x4xf32, #tpu.memory_space<vmem>>, vector<1x4xf32>
    %c0_32 = arith.constant 0 : index
    %c0_33 = arith.constant 0 : index
    %102 = vector.load %arg11[%c0_32, %c0_33] : memref<1x4xf32, #tpu.memory_space<vmem>>, vector<1x4xf32>
    %cst_34 = arith.constant 0.000000e+00 : f32
    %103 = vector.broadcast %cst_34 : f32 to vector<2x19x4xf32>
    %104 = tpu.concatenate %103, %97, %103 in 1 : vector<2x19x4xf32>, vector<2x16x4xf32>, vector<2x19x4xf32> -> vector<2x54x4xf32>
    %105 = vector.extract_strided_slice %104 {offsets = [0, 0, 0], sizes = [2, 16, 4], strides = [1, 1, 1]} : vector<2x54x4xf32> to vector<2x16x4xf32>
    %106 = vector.extract_strided_slice %104 {offsets = [0, 1, 0], sizes = [2, 16, 4], strides = [1, 1, 1]} : vector<2x54x4xf32> to vector<2x16x4xf32>
    %107 = vector.extract_strided_slice %104 {offsets = [0, 2, 0], sizes = [2, 16, 4], strides = [1, 1, 1]} : vector<2x54x4xf32> to vector<2x16x4xf32>
    %108 = vector.extract_strided_slice %104 {offsets = [0, 3, 0], sizes = [2, 16, 4], strides = [1, 1, 1]} : vector<2x54x4xf32> to vector<2x16x4xf32>
    %109 = vector.extract_strided_slice %104 {offsets = [0, 4, 0], sizes = [2, 16, 4], strides = [1, 1, 1]} : vector<2x54x4xf32> to vector<2x16x4xf32>
    %110 = vector.extract_strided_slice %104 {offsets = [0, 5, 0], sizes = [2, 16, 4], strides = [1, 1, 1]} : vector<2x54x4xf32> to vector<2x16x4xf32>
    %111 = vector.extract_strided_slice %104 {offsets = [0, 6, 0], sizes = [2, 16, 4], strides = [1, 1, 1]} : vector<2x54x4xf32> to vector<2x16x4xf32>
    %112 = vector.extract_strided_slice %104 {offsets = [0, 7, 0], sizes = [2, 16, 4], strides = [1, 1, 1]} : vector<2x54x4xf32> to vector<2x16x4xf32>
    %113 = vector.extract_strided_slice %104 {offsets = [0, 8, 0], sizes = [2, 16, 4], strides = [1, 1, 1]} : vector<2x54x4xf32> to vector<2x16x4xf32>
    %114 = vector.extract_strided_slice %104 {offsets = [0, 9, 0], sizes = [2, 16, 4], strides = [1, 1, 1]} : vector<2x54x4xf32> to vector<2x16x4xf32>
    %115 = vector.extract_strided_slice %104 {offsets = [0, 10, 0], sizes = [2, 16, 4], strides = [1, 1, 1]} : vector<2x54x4xf32> to vector<2x16x4xf32>
    %116 = vector.extract_strided_slice %104 {offsets = [0, 11, 0], sizes = [2, 16, 4], strides = [1, 1, 1]} : vector<2x54x4xf32> to vector<2x16x4xf32>
    %117 = vector.extract_strided_slice %104 {offsets = [0, 12, 0], sizes = [2, 16, 4], strides = [1, 1, 1]} : vector<2x54x4xf32> to vector<2x16x4xf32>
    %118 = vector.extract_strided_slice %104 {offsets = [0, 13, 0], sizes = [2, 16, 4], strides = [1, 1, 1]} : vector<2x54x4xf32> to vector<2x16x4xf32>
    %119 = vector.extract_strided_slice %104 {offsets = [0, 14, 0], sizes = [2, 16, 4], strides = [1, 1, 1]} : vector<2x54x4xf32> to vector<2x16x4xf32>
    %120 = vector.extract_strided_slice %104 {offsets = [0, 15, 0], sizes = [2, 16, 4], strides = [1, 1, 1]} : vector<2x54x4xf32> to vector<2x16x4xf32>
    %121 = vector.extract_strided_slice %104 {offsets = [0, 16, 0], sizes = [2, 16, 4], strides = [1, 1, 1]} : vector<2x54x4xf32> to vector<2x16x4xf32>
    %122 = vector.extract_strided_slice %104 {offsets = [0, 17, 0], sizes = [2, 16, 4], strides = [1, 1, 1]} : vector<2x54x4xf32> to vector<2x16x4xf32>
    %123 = vector.extract_strided_slice %104 {offsets = [0, 18, 0], sizes = [2, 16, 4], strides = [1, 1, 1]} : vector<2x54x4xf32> to vector<2x16x4xf32>
    %124 = vector.extract_strided_slice %104 {offsets = [0, 19, 0], sizes = [2, 16, 4], strides = [1, 1, 1]} : vector<2x54x4xf32> to vector<2x16x4xf32>
    %125 = vector.extract_strided_slice %104 {offsets = [0, 20, 0], sizes = [2, 16, 4], strides = [1, 1, 1]} : vector<2x54x4xf32> to vector<2x16x4xf32>
    %126 = vector.extract_strided_slice %104 {offsets = [0, 21, 0], sizes = [2, 16, 4], strides = [1, 1, 1]} : vector<2x54x4xf32> to vector<2x16x4xf32>
    %127 = vector.extract_strided_slice %104 {offsets = [0, 22, 0], sizes = [2, 16, 4], strides = [1, 1, 1]} : vector<2x54x4xf32> to vector<2x16x4xf32>
    %128 = vector.extract_strided_slice %104 {offsets = [0, 23, 0], sizes = [2, 16, 4], strides = [1, 1, 1]} : vector<2x54x4xf32> to vector<2x16x4xf32>
    %129 = vector.extract_strided_slice %104 {offsets = [0, 24, 0], sizes = [2, 16, 4], strides = [1, 1, 1]} : vector<2x54x4xf32> to vector<2x16x4xf32>
    %130 = vector.extract_strided_slice %104 {offsets = [0, 25, 0], sizes = [2, 16, 4], strides = [1, 1, 1]} : vector<2x54x4xf32> to vector<2x16x4xf32>
    %131 = vector.extract_strided_slice %104 {offsets = [0, 26, 0], sizes = [2, 16, 4], strides = [1, 1, 1]} : vector<2x54x4xf32> to vector<2x16x4xf32>
    %132 = vector.extract_strided_slice %104 {offsets = [0, 27, 0], sizes = [2, 16, 4], strides = [1, 1, 1]} : vector<2x54x4xf32> to vector<2x16x4xf32>
    %133 = vector.extract_strided_slice %104 {offsets = [0, 28, 0], sizes = [2, 16, 4], strides = [1, 1, 1]} : vector<2x54x4xf32> to vector<2x16x4xf32>
    %134 = vector.extract_strided_slice %104 {offsets = [0, 29, 0], sizes = [2, 16, 4], strides = [1, 1, 1]} : vector<2x54x4xf32> to vector<2x16x4xf32>
    %135 = vector.extract_strided_slice %104 {offsets = [0, 30, 0], sizes = [2, 16, 4], strides = [1, 1, 1]} : vector<2x54x4xf32> to vector<2x16x4xf32>
    %136 = vector.extract_strided_slice %104 {offsets = [0, 31, 0], sizes = [2, 16, 4], strides = [1, 1, 1]} : vector<2x54x4xf32> to vector<2x16x4xf32>
    %137 = vector.extract_strided_slice %104 {offsets = [0, 32, 0], sizes = [2, 16, 4], strides = [1, 1, 1]} : vector<2x54x4xf32> to vector<2x16x4xf32>
    %138 = vector.extract_strided_slice %104 {offsets = [0, 33, 0], sizes = [2, 16, 4], strides = [1, 1, 1]} : vector<2x54x4xf32> to vector<2x16x4xf32>
    %139 = vector.extract_strided_slice %104 {offsets = [0, 34, 0], sizes = [2, 16, 4], strides = [1, 1, 1]} : vector<2x54x4xf32> to vector<2x16x4xf32>
    %140 = vector.extract_strided_slice %104 {offsets = [0, 35, 0], sizes = [2, 16, 4], strides = [1, 1, 1]} : vector<2x54x4xf32> to vector<2x16x4xf32>
    %141 = vector.extract_strided_slice %104 {offsets = [0, 36, 0], sizes = [2, 16, 4], strides = [1, 1, 1]} : vector<2x54x4xf32> to vector<2x16x4xf32>
    %142 = vector.extract_strided_slice %104 {offsets = [0, 37, 0], sizes = [2, 16, 4], strides = [1, 1, 1]} : vector<2x54x4xf32> to vector<2x16x4xf32>
    %143 = vector.extract_strided_slice %104 {offsets = [0, 38, 0], sizes = [2, 16, 4], strides = [1, 1, 1]} : vector<2x54x4xf32> to vector<2x16x4xf32>
    %144 = tpu.concatenate %105, %106, %107, %108, %109, %110, %111, %112, %113, %114, %115, %116, %117, %118, %119, %120 in 2 : vector<2x16x4xf32>, vector<2x16x4xf32>, vector<2x16x4xf32>, vector<2x16x4xf32>, vector<2x16x4xf32>, vector<2x16x4xf32>, vector<2x16x4xf32>, vector<2x16x4xf32>, vector<2x16x4xf32>, vector<2x16x4xf32>, vector<2x16x4xf32>, vector<2x16x4xf32>, vector<2x16x4xf32>, vector<2x16x4xf32>, vector<2x16x4xf32>, vector<2x16x4xf32> -> vector<2x16x64xf32>
    %145 = tpu.concatenate %121, %122, %123, %124, %125, %126, %127, %128, %129, %130, %131, %132, %133, %134, %135, %136 in 2 : vector<2x16x4xf32>, vector<2x16x4xf32>, vector<2x16x4xf32>, vector<2x16x4xf32>, vector<2x16x4xf32>, vector<2x16x4xf32>, vector<2x16x4xf32>, vector<2x16x4xf32>, vector<2x16x4xf32>, vector<2x16x4xf32>, vector<2x16x4xf32>, vector<2x16x4xf32>, vector<2x16x4xf32>, vector<2x16x4xf32>, vector<2x16x4xf32>, vector<2x16x4xf32> -> vector<2x16x64xf32>
    %146 = tpu.concatenate %137, %138, %139, %140, %141, %142, %143 in 2 : vector<2x16x4xf32>, vector<2x16x4xf32>, vector<2x16x4xf32>, vector<2x16x4xf32>, vector<2x16x4xf32>, vector<2x16x4xf32>, vector<2x16x4xf32> -> vector<2x16x28xf32>
    %147 = tpu.concatenate %144, %145, %146 in 2 : vector<2x16x64xf32>, vector<2x16x64xf32>, vector<2x16x28xf32> -> vector<2x16x156xf32>
    %148 = vector.shape_cast %147 : vector<2x16x156xf32> to vector<32x156xf32>
    %149 = arith.truncf %148 : vector<32x156xf32> to vector<32x156xbf16>
    %cst_35 = arith.constant dense<0.000000e+00> : vector<32x28xf32>
    %150 = tpu.matmul %149, %99, %cst_35 {dimension_numbers = #tpu.dot_dimension_numbers<[1], [0], [0], [1], [0, 0, 1, 1], [], []>} : vector<32x156xbf16>, vector<156x28xbf16>, vector<32x28xf32> -> vector<32x28xf32>
    %151 = vector.extract_strided_slice %150 {offsets = [0, 0], sizes = [32, 24], strides = [1, 1]} : vector<32x28xf32> to vector<32x24xf32>
    %152 = vector.extract_strided_slice %150 {offsets = [0, 24], sizes = [32, 4], strides = [1, 1]} : vector<32x28xf32> to vector<32x4xf32>
    %153 = vector.shape_cast %152 : vector<32x4xf32> to vector<2x16x4xf32>
    %154 = tpu.iota {dimensions = array<i32: 1>} : vector<2x16x16x4xi32>
    %155 = vector.shape_cast %98 : vector<2x16x4xi32> to vector<2x1x16x4xi32>
    %156 = vector.broadcast %155 : vector<2x1x16x4xi32> to vector<2x16x16x4xi32>
    %157 = arith.cmpi eq, %156, %154 : vector<2x16x16x4xi32>
    %158 = vector.shape_cast %153 : vector<2x16x4xf32> to vector<2x1x16x4xf32>
    %cst_36 = arith.constant 0.000000e+00 : f32
    %159 = vector.shape_cast %158 : vector<2x1x16x4xf32> to vector<2x1x16x4xf32>
    %160 = vector.broadcast %159 : vector<2x1x16x4xf32> to vector<2x16x16x4xf32>
    %161 = vector.broadcast %cst_36 : f32 to vector<2x16x16x4xf32>
    %162 = arith.select %157, %160, %161 : vector<2x16x16x4xi1>, vector<2x16x16x4xf32>
    %cst_37 = arith.constant dense<0.000000e+00> : vector<2x16x4xf32>
    %163 = vector.multi_reduction <add>, %162, %cst_37 [2] : vector<2x16x16x4xf32> to vector<2x16x4xf32>
    %164 = arith.truncf %151 : vector<32x24xf32> to vector<32x24xbf16>
    %cst_38 = arith.constant dense<0.000000e+00> : vector<32x4xf32>
    %165 = tpu.matmul %164, %100, %cst_38 {dimension_numbers = #tpu.dot_dimension_numbers<[1], [0], [0], [1], [0, 0, 1, 1], [], []>} : vector<32x24xbf16>, vector<24x4xbf16>, vector<32x4xf32> -> vector<32x4xf32>
    %166 = vector.shape_cast %165 : vector<32x4xf32> to vector<2x16x4xf32>
    %167 = arith.addf %166, %163 : vector<2x16x4xf32>
    %168 = vector.shape_cast %167 : vector<2x16x4xf32> to vector<32x4xf32>
    %cst_39 = arith.constant dense<0.000000e+00> : vector<4xf32>
    %169 = vector.multi_reduction <add>, %168, %cst_39 [0] : vector<32x4xf32> to vector<4xf32>
    %170 = vector.shape_cast %169 : vector<4xf32> to vector<1x4xf32>
    %cst_40 = arith.constant 3.200000e+01 : f32
    %171 = vector.broadcast %cst_40 : f32 to vector<1x4xf32>
    %172 = arith.divf %170, %171 : vector<1x4xf32>
    %173 = vector.broadcast %172 : vector<1x4xf32> to vector<32x4xf32>
    %174 = arith.subf %168, %173 : vector<32x4xf32>
    %175 = arith.mulf %174, %174 : vector<32x4xf32>
    %cst_41 = arith.constant dense<0.000000e+00> : vector<4xf32>
    %176 = vector.multi_reduction <add>, %175, %cst_41 [0] : vector<32x4xf32> to vector<4xf32>
    %177 = vector.shape_cast %176 : vector<4xf32> to vector<1x4xf32>
    %cst_42 = arith.constant 3.200000e+01 : f32
    %178 = vector.broadcast %cst_42 : f32 to vector<1x4xf32>
    %179 = arith.divf %177, %178 : vector<1x4xf32>
    %cst_43 = arith.constant 9.99999974E-6 : f32
    %180 = vector.broadcast %cst_43 : f32 to vector<1x4xf32>
    %181 = arith.addf %179, %180 : vector<1x4xf32>
    %182 = math.rsqrt %181 : vector<1x4xf32>
    %183 = arith.mulf %182, %101 : vector<1x4xf32>
    %184 = vector.shape_cast %172 : vector<1x4xf32> to vector<1x1x4xf32>
    %185 = vector.broadcast %184 : vector<1x1x4xf32> to vector<2x16x4xf32>
    %186 = arith.subf %167, %185 : vector<2x16x4xf32>
    %187 = vector.shape_cast %183 : vector<1x4xf32> to vector<1x1x4xf32>
    %188 = vector.broadcast %187 : vector<1x1x4xf32> to vector<2x16x4xf32>
    %189 = arith.mulf %186, %188 : vector<2x16x4xf32>
    %190 = vector.shape_cast %102 : vector<1x4xf32> to vector<1x1x4xf32>
    %191 = vector.broadcast %190 : vector<1x1x4xf32> to vector<2x16x4xf32>
    %192 = arith.addf %189, %191 : vector<2x16x4xf32>
    %cst_44 = arith.constant 0.000000e+00 : f32
    %193 = vector.broadcast %cst_44 : f32 to vector<2x16x4xf32>
    %194 = arith.maximumf %192, %193 : vector<2x16x4xf32>
    %c0_45 = arith.constant 0 : index
    %c0_46 = arith.constant 0 : index
    %c0_47 = arith.constant 0 : index
    %195 = vector.load %arg3[%c0_45, %c0_46, %c0_47] : memref<2x16x8xi32, #tpu.memory_space<vmem>>, vector<2x16x8xi32>
    %c0_48 = arith.constant 0 : index
    %c0_49 = arith.constant 0 : index
    %196 = vector.load %arg12[%c0_48, %c0_49] : memref<156x32xbf16, #tpu.memory_space<vmem>>, vector<156x32xbf16>
    %c0_50 = arith.constant 0 : index
    %c0_51 = arith.constant 0 : index
    %197 = vector.load %arg13[%c0_50, %c0_51] : memref<24x8xbf16, #tpu.memory_space<vmem>>, vector<24x8xbf16>
    %c0_52 = arith.constant 0 : index
    %c0_53 = arith.constant 0 : index
    %198 = vector.load %arg14[%c0_52, %c0_53] : memref<1x8xf32, #tpu.memory_space<vmem>>, vector<1x8xf32>
    %c0_54 = arith.constant 0 : index
    %c0_55 = arith.constant 0 : index
    %199 = vector.load %arg15[%c0_54, %c0_55] : memref<1x8xf32, #tpu.memory_space<vmem>>, vector<1x8xf32>
    %cst_56 = arith.constant 0.000000e+00 : f32
    %200 = vector.broadcast %cst_56 : f32 to vector<2x19x4xf32>
    %201 = tpu.concatenate %200, %194, %200 in 1 : vector<2x19x4xf32>, vector<2x16x4xf32>, vector<2x19x4xf32> -> vector<2x54x4xf32>
    %202 = vector.extract_strided_slice %201 {offsets = [0, 0, 0], sizes = [2, 16, 4], strides = [1, 1, 1]} : vector<2x54x4xf32> to vector<2x16x4xf32>
    %203 = vector.extract_strided_slice %201 {offsets = [0, 1, 0], sizes = [2, 16, 4], strides = [1, 1, 1]} : vector<2x54x4xf32> to vector<2x16x4xf32>
    %204 = vector.extract_strided_slice %201 {offsets = [0, 2, 0], sizes = [2, 16, 4], strides = [1, 1, 1]} : vector<2x54x4xf32> to vector<2x16x4xf32>
    %205 = vector.extract_strided_slice %201 {offsets = [0, 3, 0], sizes = [2, 16, 4], strides = [1, 1, 1]} : vector<2x54x4xf32> to vector<2x16x4xf32>
    %206 = vector.extract_strided_slice %201 {offsets = [0, 4, 0], sizes = [2, 16, 4], strides = [1, 1, 1]} : vector<2x54x4xf32> to vector<2x16x4xf32>
    %207 = vector.extract_strided_slice %201 {offsets = [0, 5, 0], sizes = [2, 16, 4], strides = [1, 1, 1]} : vector<2x54x4xf32> to vector<2x16x4xf32>
    %208 = vector.extract_strided_slice %201 {offsets = [0, 6, 0], sizes = [2, 16, 4], strides = [1, 1, 1]} : vector<2x54x4xf32> to vector<2x16x4xf32>
    %209 = vector.extract_strided_slice %201 {offsets = [0, 7, 0], sizes = [2, 16, 4], strides = [1, 1, 1]} : vector<2x54x4xf32> to vector<2x16x4xf32>
    %210 = vector.extract_strided_slice %201 {offsets = [0, 8, 0], sizes = [2, 16, 4], strides = [1, 1, 1]} : vector<2x54x4xf32> to vector<2x16x4xf32>
    %211 = vector.extract_strided_slice %201 {offsets = [0, 9, 0], sizes = [2, 16, 4], strides = [1, 1, 1]} : vector<2x54x4xf32> to vector<2x16x4xf32>
    %212 = vector.extract_strided_slice %201 {offsets = [0, 10, 0], sizes = [2, 16, 4], strides = [1, 1, 1]} : vector<2x54x4xf32> to vector<2x16x4xf32>
    %213 = vector.extract_strided_slice %201 {offsets = [0, 11, 0], sizes = [2, 16, 4], strides = [1, 1, 1]} : vector<2x54x4xf32> to vector<2x16x4xf32>
    %214 = vector.extract_strided_slice %201 {offsets = [0, 12, 0], sizes = [2, 16, 4], strides = [1, 1, 1]} : vector<2x54x4xf32> to vector<2x16x4xf32>
    %215 = vector.extract_strided_slice %201 {offsets = [0, 13, 0], sizes = [2, 16, 4], strides = [1, 1, 1]} : vector<2x54x4xf32> to vector<2x16x4xf32>
    %216 = vector.extract_strided_slice %201 {offsets = [0, 14, 0], sizes = [2, 16, 4], strides = [1, 1, 1]} : vector<2x54x4xf32> to vector<2x16x4xf32>
    %217 = vector.extract_strided_slice %201 {offsets = [0, 15, 0], sizes = [2, 16, 4], strides = [1, 1, 1]} : vector<2x54x4xf32> to vector<2x16x4xf32>
    %218 = vector.extract_strided_slice %201 {offsets = [0, 16, 0], sizes = [2, 16, 4], strides = [1, 1, 1]} : vector<2x54x4xf32> to vector<2x16x4xf32>
    %219 = vector.extract_strided_slice %201 {offsets = [0, 17, 0], sizes = [2, 16, 4], strides = [1, 1, 1]} : vector<2x54x4xf32> to vector<2x16x4xf32>
    %220 = vector.extract_strided_slice %201 {offsets = [0, 18, 0], sizes = [2, 16, 4], strides = [1, 1, 1]} : vector<2x54x4xf32> to vector<2x16x4xf32>
    %221 = vector.extract_strided_slice %201 {offsets = [0, 19, 0], sizes = [2, 16, 4], strides = [1, 1, 1]} : vector<2x54x4xf32> to vector<2x16x4xf32>
    %222 = vector.extract_strided_slice %201 {offsets = [0, 20, 0], sizes = [2, 16, 4], strides = [1, 1, 1]} : vector<2x54x4xf32> to vector<2x16x4xf32>
    %223 = vector.extract_strided_slice %201 {offsets = [0, 21, 0], sizes = [2, 16, 4], strides = [1, 1, 1]} : vector<2x54x4xf32> to vector<2x16x4xf32>
    %224 = vector.extract_strided_slice %201 {offsets = [0, 22, 0], sizes = [2, 16, 4], strides = [1, 1, 1]} : vector<2x54x4xf32> to vector<2x16x4xf32>
    %225 = vector.extract_strided_slice %201 {offsets = [0, 23, 0], sizes = [2, 16, 4], strides = [1, 1, 1]} : vector<2x54x4xf32> to vector<2x16x4xf32>
    %226 = vector.extract_strided_slice %201 {offsets = [0, 24, 0], sizes = [2, 16, 4], strides = [1, 1, 1]} : vector<2x54x4xf32> to vector<2x16x4xf32>
    %227 = vector.extract_strided_slice %201 {offsets = [0, 25, 0], sizes = [2, 16, 4], strides = [1, 1, 1]} : vector<2x54x4xf32> to vector<2x16x4xf32>
    %228 = vector.extract_strided_slice %201 {offsets = [0, 26, 0], sizes = [2, 16, 4], strides = [1, 1, 1]} : vector<2x54x4xf32> to vector<2x16x4xf32>
    %229 = vector.extract_strided_slice %201 {offsets = [0, 27, 0], sizes = [2, 16, 4], strides = [1, 1, 1]} : vector<2x54x4xf32> to vector<2x16x4xf32>
    %230 = vector.extract_strided_slice %201 {offsets = [0, 28, 0], sizes = [2, 16, 4], strides = [1, 1, 1]} : vector<2x54x4xf32> to vector<2x16x4xf32>
    %231 = vector.extract_strided_slice %201 {offsets = [0, 29, 0], sizes = [2, 16, 4], strides = [1, 1, 1]} : vector<2x54x4xf32> to vector<2x16x4xf32>
    %232 = vector.extract_strided_slice %201 {offsets = [0, 30, 0], sizes = [2, 16, 4], strides = [1, 1, 1]} : vector<2x54x4xf32> to vector<2x16x4xf32>
    %233 = vector.extract_strided_slice %201 {offsets = [0, 31, 0], sizes = [2, 16, 4], strides = [1, 1, 1]} : vector<2x54x4xf32> to vector<2x16x4xf32>
    %234 = vector.extract_strided_slice %201 {offsets = [0, 32, 0], sizes = [2, 16, 4], strides = [1, 1, 1]} : vector<2x54x4xf32> to vector<2x16x4xf32>
    %235 = vector.extract_strided_slice %201 {offsets = [0, 33, 0], sizes = [2, 16, 4], strides = [1, 1, 1]} : vector<2x54x4xf32> to vector<2x16x4xf32>
    %236 = vector.extract_strided_slice %201 {offsets = [0, 34, 0], sizes = [2, 16, 4], strides = [1, 1, 1]} : vector<2x54x4xf32> to vector<2x16x4xf32>
    %237 = vector.extract_strided_slice %201 {offsets = [0, 35, 0], sizes = [2, 16, 4], strides = [1, 1, 1]} : vector<2x54x4xf32> to vector<2x16x4xf32>
    %238 = vector.extract_strided_slice %201 {offsets = [0, 36, 0], sizes = [2, 16, 4], strides = [1, 1, 1]} : vector<2x54x4xf32> to vector<2x16x4xf32>
    %239 = vector.extract_strided_slice %201 {offsets = [0, 37, 0], sizes = [2, 16, 4], strides = [1, 1, 1]} : vector<2x54x4xf32> to vector<2x16x4xf32>
    %240 = vector.extract_strided_slice %201 {offsets = [0, 38, 0], sizes = [2, 16, 4], strides = [1, 1, 1]} : vector<2x54x4xf32> to vector<2x16x4xf32>
    %241 = tpu.concatenate %202, %203, %204, %205, %206, %207, %208, %209, %210, %211, %212, %213, %214, %215, %216, %217 in 2 : vector<2x16x4xf32>, vector<2x16x4xf32>, vector<2x16x4xf32>, vector<2x16x4xf32>, vector<2x16x4xf32>, vector<2x16x4xf32>, vector<2x16x4xf32>, vector<2x16x4xf32>, vector<2x16x4xf32>, vector<2x16x4xf32>, vector<2x16x4xf32>, vector<2x16x4xf32>, vector<2x16x4xf32>, vector<2x16x4xf32>, vector<2x16x4xf32>, vector<2x16x4xf32> -> vector<2x16x64xf32>
    %242 = tpu.concatenate %218, %219, %220, %221, %222, %223, %224, %225, %226, %227, %228, %229, %230, %231, %232, %233 in 2 : vector<2x16x4xf32>, vector<2x16x4xf32>, vector<2x16x4xf32>, vector<2x16x4xf32>, vector<2x16x4xf32>, vector<2x16x4xf32>, vector<2x16x4xf32>, vector<2x16x4xf32>, vector<2x16x4xf32>, vector<2x16x4xf32>, vector<2x16x4xf32>, vector<2x16x4xf32>, vector<2x16x4xf32>, vector<2x16x4xf32>, vector<2x16x4xf32>, vector<2x16x4xf32> -> vector<2x16x64xf32>
    %243 = tpu.concatenate %234, %235, %236, %237, %238, %239, %240 in 2 : vector<2x16x4xf32>, vector<2x16x4xf32>, vector<2x16x4xf32>, vector<2x16x4xf32>, vector<2x16x4xf32>, vector<2x16x4xf32>, vector<2x16x4xf32> -> vector<2x16x28xf32>
    %244 = tpu.concatenate %241, %242, %243 in 2 : vector<2x16x64xf32>, vector<2x16x64xf32>, vector<2x16x28xf32> -> vector<2x16x156xf32>
    %245 = vector.shape_cast %244 : vector<2x16x156xf32> to vector<32x156xf32>
    %246 = arith.truncf %245 : vector<32x156xf32> to vector<32x156xbf16>
    %cst_57 = arith.constant dense<0.000000e+00> : vector<32x32xf32>
    %247 = tpu.matmul %246, %196, %cst_57 {dimension_numbers = #tpu.dot_dimension_numbers<[1], [0], [0], [1], [0, 0, 1, 1], [], []>} : vector<32x156xbf16>, vector<156x32xbf16>, vector<32x32xf32> -> vector<32x32xf32>
    %248 = vector.extract_strided_slice %247 {offsets = [0, 0], sizes = [32, 24], strides = [1, 1]} : vector<32x32xf32> to vector<32x24xf32>
    %249 = vector.extract_strided_slice %247 {offsets = [0, 24], sizes = [32, 8], strides = [1, 1]} : vector<32x32xf32> to vector<32x8xf32>
    %250 = vector.shape_cast %249 : vector<32x8xf32> to vector<2x16x8xf32>
    %251 = tpu.iota {dimensions = array<i32: 1>} : vector<2x16x16x8xi32>
    %252 = vector.shape_cast %195 : vector<2x16x8xi32> to vector<2x1x16x8xi32>
    %253 = vector.broadcast %252 : vector<2x1x16x8xi32> to vector<2x16x16x8xi32>
    %254 = arith.cmpi eq, %253, %251 : vector<2x16x16x8xi32>
    %255 = vector.shape_cast %250 : vector<2x16x8xf32> to vector<2x1x16x8xf32>
    %cst_58 = arith.constant 0.000000e+00 : f32
    %256 = vector.shape_cast %255 : vector<2x1x16x8xf32> to vector<2x1x16x8xf32>
    %257 = vector.broadcast %256 : vector<2x1x16x8xf32> to vector<2x16x16x8xf32>
    %258 = vector.broadcast %cst_58 : f32 to vector<2x16x16x8xf32>
    %259 = arith.select %254, %257, %258 : vector<2x16x16x8xi1>, vector<2x16x16x8xf32>
    %cst_59 = arith.constant dense<0.000000e+00> : vector<2x16x8xf32>
    %260 = vector.multi_reduction <add>, %259, %cst_59 [2] : vector<2x16x16x8xf32> to vector<2x16x8xf32>
    %261 = arith.truncf %248 : vector<32x24xf32> to vector<32x24xbf16>
    %cst_60 = arith.constant dense<0.000000e+00> : vector<32x8xf32>
    %262 = tpu.matmul %261, %197, %cst_60 {dimension_numbers = #tpu.dot_dimension_numbers<[1], [0], [0], [1], [0, 0, 1, 1], [], []>} : vector<32x24xbf16>, vector<24x8xbf16>, vector<32x8xf32> -> vector<32x8xf32>
    %263 = vector.shape_cast %262 : vector<32x8xf32> to vector<2x16x8xf32>
    %264 = arith.addf %263, %260 : vector<2x16x8xf32>
    %265 = vector.shape_cast %264 : vector<2x16x8xf32> to vector<32x8xf32>
    %cst_61 = arith.constant dense<0.000000e+00> : vector<8xf32>
    %266 = vector.multi_reduction <add>, %265, %cst_61 [0] : vector<32x8xf32> to vector<8xf32>
    %267 = vector.shape_cast %266 : vector<8xf32> to vector<1x8xf32>
    %cst_62 = arith.constant 3.200000e+01 : f32
    %268 = vector.broadcast %cst_62 : f32 to vector<1x8xf32>
    %269 = arith.divf %267, %268 : vector<1x8xf32>
    %270 = vector.broadcast %269 : vector<1x8xf32> to vector<32x8xf32>
    %271 = arith.subf %265, %270 : vector<32x8xf32>
    %272 = arith.mulf %271, %271 : vector<32x8xf32>
    %cst_63 = arith.constant dense<0.000000e+00> : vector<8xf32>
    %273 = vector.multi_reduction <add>, %272, %cst_63 [0] : vector<32x8xf32> to vector<8xf32>
    %274 = vector.shape_cast %273 : vector<8xf32> to vector<1x8xf32>
    %cst_64 = arith.constant 3.200000e+01 : f32
    %275 = vector.broadcast %cst_64 : f32 to vector<1x8xf32>
    %276 = arith.divf %274, %275 : vector<1x8xf32>
    %cst_65 = arith.constant 9.99999974E-6 : f32
    %277 = vector.broadcast %cst_65 : f32 to vector<1x8xf32>
    %278 = arith.addf %276, %277 : vector<1x8xf32>
    %279 = math.rsqrt %278 : vector<1x8xf32>
    %280 = arith.mulf %279, %198 : vector<1x8xf32>
    %281 = vector.shape_cast %269 : vector<1x8xf32> to vector<1x1x8xf32>
    %282 = vector.broadcast %281 : vector<1x1x8xf32> to vector<2x16x8xf32>
    %283 = arith.subf %264, %282 : vector<2x16x8xf32>
    %284 = vector.shape_cast %280 : vector<1x8xf32> to vector<1x1x8xf32>
    %285 = vector.broadcast %284 : vector<1x1x8xf32> to vector<2x16x8xf32>
    %286 = arith.mulf %283, %285 : vector<2x16x8xf32>
    %287 = vector.shape_cast %199 : vector<1x8xf32> to vector<1x1x8xf32>
    %288 = vector.broadcast %287 : vector<1x1x8xf32> to vector<2x16x8xf32>
    %289 = arith.addf %286, %288 : vector<2x16x8xf32>
    %cst_66 = arith.constant 0.000000e+00 : f32
    %290 = vector.broadcast %cst_66 : f32 to vector<2x16x8xf32>
    %291 = arith.maximumf %289, %290 : vector<2x16x8xf32>
    %292 = vector.shape_cast %0 : vector<2x16x4xf32> to vector<32x4xf32>
    %293 = arith.truncf %292 : vector<32x4xf32> to vector<32x4xbf16>
    %c0_67 = arith.constant 0 : index
    %c0_68 = arith.constant 0 : index
    %294 = vector.load %arg16[%c0_67, %c0_68] : memref<4x8xbf16, #tpu.memory_space<vmem>>, vector<4x8xbf16>
    %cst_69 = arith.constant dense<0.000000e+00> : vector<32x8xf32>
    %295 = tpu.matmul %293, %294, %cst_69 {dimension_numbers = #tpu.dot_dimension_numbers<[1], [0], [0], [1], [0, 0, 1, 1], [], []>} : vector<32x4xbf16>, vector<4x8xbf16>, vector<32x8xf32> -> vector<32x8xf32>
    %296 = vector.shape_cast %295 : vector<32x8xf32> to vector<2x16x8xf32>
    %c0_70 = arith.constant 0 : index
    %c0_71 = arith.constant 0 : index
    %297 = vector.load %arg17[%c0_70, %c0_71] : memref<1x8xf32, #tpu.memory_space<vmem>>, vector<1x8xf32>
    %298 = vector.shape_cast %297 : vector<1x8xf32> to vector<1x1x8xf32>
    %299 = vector.broadcast %298 : vector<1x1x8xf32> to vector<2x16x8xf32>
    %300 = arith.addf %296, %299 : vector<2x16x8xf32>
    %c0_72 = arith.constant 0 : index
    %c0_73 = arith.constant 0 : index
    %301 = vector.load %arg18[%c0_72, %c0_73] : memref<1x8xf32, #tpu.memory_space<vmem>>, vector<1x8xf32>
    %c0_74 = arith.constant 0 : index
    %c0_75 = arith.constant 0 : index
    %302 = vector.load %arg19[%c0_74, %c0_75] : memref<1x8xf32, #tpu.memory_space<vmem>>, vector<1x8xf32>
    %303 = vector.shape_cast %300 : vector<2x16x8xf32> to vector<32x8xf32>
    %cst_76 = arith.constant dense<0.000000e+00> : vector<8xf32>
    %304 = vector.multi_reduction <add>, %303, %cst_76 [0] : vector<32x8xf32> to vector<8xf32>
    %305 = vector.shape_cast %304 : vector<8xf32> to vector<1x8xf32>
    %cst_77 = arith.constant 3.200000e+01 : f32
    %306 = vector.broadcast %cst_77 : f32 to vector<1x8xf32>
    %307 = arith.divf %305, %306 : vector<1x8xf32>
    %308 = vector.broadcast %307 : vector<1x8xf32> to vector<32x8xf32>
    %309 = arith.subf %303, %308 : vector<32x8xf32>
    %310 = arith.mulf %309, %309 : vector<32x8xf32>
    %cst_78 = arith.constant dense<0.000000e+00> : vector<8xf32>
    %311 = vector.multi_reduction <add>, %310, %cst_78 [0] : vector<32x8xf32> to vector<8xf32>
    %312 = vector.shape_cast %311 : vector<8xf32> to vector<1x8xf32>
    %cst_79 = arith.constant 3.200000e+01 : f32
    %313 = vector.broadcast %cst_79 : f32 to vector<1x8xf32>
    %314 = arith.divf %312, %313 : vector<1x8xf32>
    %cst_80 = arith.constant 9.99999974E-6 : f32
    %315 = vector.broadcast %cst_80 : f32 to vector<1x8xf32>
    %316 = arith.addf %314, %315 : vector<1x8xf32>
    %317 = math.rsqrt %316 : vector<1x8xf32>
    %318 = arith.mulf %317, %301 : vector<1x8xf32>
    %319 = vector.shape_cast %307 : vector<1x8xf32> to vector<1x1x8xf32>
    %320 = vector.broadcast %319 : vector<1x1x8xf32> to vector<2x16x8xf32>
    %321 = arith.subf %300, %320 : vector<2x16x8xf32>
    %322 = vector.shape_cast %318 : vector<1x8xf32> to vector<1x1x8xf32>
    %323 = vector.broadcast %322 : vector<1x1x8xf32> to vector<2x16x8xf32>
    %324 = arith.mulf %321, %323 : vector<2x16x8xf32>
    %325 = vector.shape_cast %302 : vector<1x8xf32> to vector<1x1x8xf32>
    %326 = vector.broadcast %325 : vector<1x1x8xf32> to vector<2x16x8xf32>
    %327 = arith.addf %324, %326 : vector<2x16x8xf32>
    %328 = arith.addf %291, %327 : vector<2x16x8xf32>
    %cst_81 = arith.constant 0.000000e+00 : f32
    %329 = vector.broadcast %cst_81 : f32 to vector<2x16x8xf32>
    %330 = arith.maximumf %328, %329 : vector<2x16x8xf32>
    %c0_82 = arith.constant 0 : index
    %c0_83 = arith.constant 0 : index
    %c0_84 = arith.constant 0 : index
    %331 = vector.load %arg20[%c0_82, %c0_83, %c0_84] : memref<2x16x8xf32, #tpu.memory_space<vmem>>, vector<2x16x8xf32>
    tpu.vector_store %arg20[%c0_82, %c0_83, %c0_84], %330 {strides = array<i32>} : memref<2x16x8xf32, #tpu.memory_space<vmem>>, vector<2x16x8xf32>,
    return
  }
}

</mosaic_0001>

<bundles_post_ra>
// kernel: inception_transpose_block.1
= control target key start
LH: loop header
LB: loop body
LE: loop exit
PB: predicated region body
PF: predicated region fallthrough
CT: control target
= control target key end

     0   :  { %s9973_s0 = inlined_call_operand.hbm [shape: f32[2,16,4], index: 0, kind: input, shape index: {}]   ;;  %s9974_s1 = inlined_call_operand.hbm [shape: s32[2,16,4], index: 1, kind: input, shape index: {}]   ;;  %s9975_s2 = inlined_call_operand.hbm [shape: s32[2,16,4], index: 2, kind: input, shape index: {}]   ;;  %s9976_s3 = inlined_call_operand.hbm [shape: s32[2,16,8], index: 3, kind: input, shape index: {}]   ;;  %s9977_s4 = inlined_call_operand.hbm [shape: bf16[156,28], index: 4, kind: input, shape index: {}]   ;;  %s9978_s5 = inlined_call_operand.hbm [shape: bf16[24,4], index: 5, kind: input, shape index: {}]   ;;  %s9979_s6 = inlined_call_operand.hbm [shape: f32[1,4], index: 6, kind: input, shape index: {}]   ;;  %s9980_s7 = inlined_call_operand.hbm [shape: f32[1,4], index: 7, kind: input, shape index: {}]   ;;  %s9981_s8 = inlined_call_operand.hbm [shape: bf16[156,28], index: 8, kind: input, shape index: {}]   ;;  %s9982_s9 = inlined_call_operand.hbm [shape: bf16[24,4], index: 9, kind: input, shape index: {}]   ;;  %s9983_s10 = inlined_call_operand.hbm [shape: f32[1,4], index: 10, kind: input, shape index: {}]   ;;  %s9984_s11 = inlined_call_operand.hbm [shape: f32[1,4], index: 11, kind: input, shape index: {}]   ;;  %s9985_s12 = inlined_call_operand.hbm [shape: bf16[156,32], index: 12, kind: input, shape index: {}]   ;;  %s9986_s13 = inlined_call_operand.hbm [shape: bf16[24,8], index: 13, kind: input, shape index: {}]   ;;  %s9987_s14 = inlined_call_operand.hbm [shape: f32[1,8], index: 14, kind: input, shape index: {}]   ;;  %s9988_s15 = inlined_call_operand.hbm [shape: f32[1,8], index: 15, kind: input, shape index: {}]   ;;  %s9989_s16 = inlined_call_operand.hbm [shape: bf16[4,8], index: 16, kind: input, shape index: {}]   ;;  %s9990_s17 = inlined_call_operand.hbm [shape: f32[1,8], index: 17, kind: input, shape index: {}]   ;;  %s9991_s18 = inlined_call_operand.hbm [shape: f32[1,8], index: 18, kind: input, shape index: {}]   ;;  %s9992_s19 = inlined_call_operand.hbm [shape: f32[1,8], index: 19, kind: input, shape index: {}]   ;;  %s9993_s20 = inlined_call_operand.hbm [shape: f32[2,16,8], index: 20, kind: output, shape index: {}]  }
   0x1   :  { %10058 = sst [smem:[#allocation49_spill]] %s9973_s0 }
   0x2   :  { %10059 = sst [smem:[#allocation50_spill]] %s9974_s1 }
   0x3   :  { %10060 = sst [smem:[#allocation51_spill]] %s9975_s2 }
   0x4   :  { %10061 = sst [smem:[#allocation52_spill]] %s9976_s3 }
   0x5   :  { %10062 = sst [smem:[#allocation53_spill]] %s9977_s4 }
   0x6   :  { %10063 = sst [smem:[#allocation54_spill]] %s9992_s19 }
   0x7   :  { %10064 = sst [smem:[#allocation55_spill]] %s9993_s20 }
   0x8   :  { %25 = vsyncpa [#allocation3], 0 }
   0x9   :  { %26 = vsyncpa [#allocation6], 0 }
   0xa   :  { %27 = vsyncpa [#allocation9], 0 }
   0xb   :  { %28 = vsyncpa [#allocation12], 0 }
   0xc   :  { %29 = vsyncpa [#allocation15], 0 }
   0xd   :  { %30 = vsyncpa [#allocation18], 0 }
   0xe   :  { %31 = vsyncpa [#allocation21], 0 }
   0xf   :  { %32 = vsyncpa [#allocation24], 0 }
  0x10   :  { %33 = vsyncpa [#allocation27], 0 }
  0x11   :  { %34 = vsyncpa [#allocation30], 0 }
  0x12   :  { %35 = vsyncpa [#allocation33], 0 }
  0x13   :  { %36 = vsyncpa [#allocation4], 0  ;;  %s6297_s1 = smov [#allocation5]   ;;  %s6298_s23 = smov [#allocation8]  }
  0x14   :  { %s54_s22 = sshll.u32 %s6297_s1, 4  ;;  %s78_s24 = sshll.u32 %s6298_s23, 4  ;;  %s55_s22 = int_to_ptr.vmem [resolvable:$true] %s54_s22  ;;  %s6443_s24 = int_to_ptr.vmem [resolvable:$true] %s78_s24 }
  0x15   :  { %s10065_s3 = sld [smem:[#allocation50_spill]] }
  0x1b   :  { %s5811_s26 = scalar_lea.hbm %s10065_s3, 512 }
  0x1c   :  { %p5812_p0 = scmp.ne.s32.totalorder %s10065_s3, %s5811_s26  ;;  %p5815_p1 = scmp.lt.u32.totalorder %s5811_s26, %s10065_s3 }
  0x1e   :  { %p5817_p2 = pnand %p5815_p1, %p5812_p0 }
  0x20   :  { %5820 = shalt.err (!%p5817_p2)
}
  0x21   :  { %s5821_s30 = scalar_lea.vmem %s55_s22, 512  ;;  %p5826_p4 = scmp.lt.s32.totalorder %s55_s22, %s55_s22 }
  0x22   :  { %p5822_p3 = scmp.ne.s32.totalorder %s55_s22, %s5821_s30  ;;  %p5827_p5 = scmp.lt.s32.totalorder %s5821_s30, %s5821_s30 }
  0x24   :  { %p5828_p6 = por %p5827_p5, %p5826_p4 }
  0x26   :  { %p5829_p7 = pnand %p5828_p6, %p5822_p3 }
  0x28   :  { %5832 = shalt.err (!%p5829_p7)
}
  0x29   :  { %s6299_s0 = smov 128   ;;  %s6300_s21 = smov 8  }
  0x2a   :  { %60 = dma.hbm_to_vmem [thread:$0]  %s10065_s3, 512, %s55_s22, [#allocation6], %s6299_s0, %s6299_s0, %s6300_s21  }
  0x2b   :  { %s10066_s26 = sld [smem:[#allocation52_spill]] }
  0x31   :  { %s5833_s27 = scalar_lea.hbm %s10066_s26, 512 }
  0x32   :  { %p5834_p8 = scmp.ne.s32.totalorder %s10066_s26, %s5833_s27  ;;  %p5837_p9 = scmp.lt.u32.totalorder %s5833_s27, %s10066_s26 }
  0x34   :  { %p5839_p10 = pnand %p5837_p9, %p5834_p8 }
  0x36   :  { %5842 = shalt.err (!%p5839_p10)
}
  0x37   :  { %s5843_s20 = scalar_lea.vmem %s6443_s24, 512  ;;  %p5848_p12 = scmp.lt.s32.totalorder %s6443_s24, %s6443_s24 }
  0x38   :  { %p5844_p11 = scmp.ne.s32.totalorder %s6443_s24, %s5843_s20  ;;  %p5849_p13 = scmp.lt.s32.totalorder %s5843_s20, %s5843_s20 }
  0x3a   :  { %p5850_p0 = por %p5849_p13, %p5848_p12 }
  0x3c   :  { %p5851_p1 = pnand %p5850_p0, %p5844_p11 }
  0x3e   :  { %5854 = shalt.err (!%p5851_p1)
}
  0x3f   :  { %84 = dma.hbm_to_vmem [thread:$0]  %s10066_s26, 512, %s6443_s24, [#allocation9], %s6299_s0, %s6299_s0, %s6300_s21  }
  0x40   :  { %s6301_s1 = smov [#allocation11]   ;;  %s6302_s2 = smov [#allocation14]  }
  0x41   :  { %s102_s23 = sshll.u32 %s6301_s1, 4  ;;  %s125_s25 = sshll.u32 %s6302_s2, 4  ;;  %s103_s23 = int_to_ptr.vmem [resolvable:$true] %s102_s23  ;;  %s6480_s25 = int_to_ptr.vmem [resolvable:$true] %s125_s25 }
  0x42   :  { %s5855_s28 = scalar_lea.hbm %s9978_s5, 192 }
  0x43   :  { %p5856_p2 = scmp.ne.s32.totalorder %s9978_s5, %s5855_s28  ;;  %p5859_p3 = scmp.lt.u32.totalorder %s5855_s28, %s9978_s5 }
  0x45   :  { %p5861_p4 = pnand %p5859_p3, %p5856_p2 }
  0x47   :  { %5864 = shalt.err (!%p5861_p4)
}
  0x48   :  { %s5865_s24 = scalar_lea.vmem %s103_s23, 192  ;;  %p5870_p6 = scmp.lt.s32.totalorder %s103_s23, %s103_s23 }
  0x49   :  { %p5866_p5 = scmp.ne.s32.totalorder %s103_s23, %s5865_s24  ;;  %p5871_p7 = scmp.lt.s32.totalorder %s5865_s24, %s5865_s24 }
  0x4b   :  { %p5872_p8 = por %p5871_p7, %p5870_p6 }
  0x4d   :  { %p5873_p9 = pnand %p5872_p8, %p5866_p5 }
  0x4f   :  { %5876 = shalt.err (!%p5873_p9)
}
  0x50   :  { %s6303_s26 = smov 64   ;;  %s6304_s22 = smov 4  }
  0x51   :  { %108 = dma.hbm_to_vmem [thread:$0]  %s9978_s5, 192, %s103_s23, [#allocation12], %s6303_s26, %s6303_s26, %s6304_s22  }
  0x52   :  { %s5877_s27 = scalar_lea.hbm %s9980_s7, 16 }
  0x53   :  { %p5878_p10 = scmp.ne.s32.totalorder %s9980_s7, %s5877_s27  ;;  %p5881_p11 = scmp.lt.u32.totalorder %s5877_s27, %s9980_s7 }
  0x55   :  { %p5883_p12 = pnand %p5881_p11, %p5878_p10 }
  0x57   :  { %5886 = shalt.err (!%p5883_p12)
}
  0x58   :  { %s5887_s30 = scalar_lea.vmem %s6480_s25, 16  ;;  %s5891_s5 = scalar_lea.vmem %s6480_s25, 32 }
  0x59   :  { %p5888_p13 = scmp.ne.s32.totalorder %s6480_s25, %s5887_s30  ;;  %p5892_p0 = scmp.lt.s32.totalorder %s6480_s25, %s6480_s25 }
  0x5a   :  { %p5893_p1 = scmp.lt.s32.totalorder %s5891_s5, %s5887_s30 }
  0x5c   :  { %p5894_p2 = por %p5893_p1, %p5892_p0 }
  0x5e   :  { %p5895_p3 = pnand %p5894_p2, %p5888_p13 }
  0x60   :  { %5898 = shalt.err (!%p5895_p3)
}
  0x61   :  { %128 = dma.hbm_to_vmem [thread:$0]  %s9980_s7, 16, %s6480_s25, [#allocation15]  }
  0x62   :  { %s6305_s3 = smov [#allocation17]   ;;  %s6306_s19 = smov [#allocation20]  }
  0x63   :  { %s146_s1 = sshll.u32 %s6305_s3, 4  ;;  %s169_s2 = sshll.u32 %s6306_s19, 4  ;;  %s147_s1 = int_to_ptr.vmem [resolvable:$true] %s146_s1  ;;  %s170_s2 = int_to_ptr.vmem [resolvable:$true] %s169_s2 }
  0x64   :  { %s5899_s28 = scalar_lea.hbm %s9982_s9, 192 }
  0x65   :  { %p5900_p4 = scmp.ne.s32.totalorder %s9982_s9, %s5899_s28  ;;  %p5903_p5 = scmp.lt.u32.totalorder %s5899_s28, %s9982_s9 }
  0x67   :  { %p5905_p6 = pnand %p5903_p5, %p5900_p4 }
  0x69   :  { %5908 = shalt.err (!%p5905_p6)
}
  0x6a   :  { %s5909_s7 = scalar_lea.vmem %s147_s1, 192  ;;  %p5914_p8 = scmp.lt.s32.totalorder %s147_s1, %s147_s1 }
  0x6b   :  { %p5910_p7 = scmp.ne.s32.totalorder %s147_s1, %s5909_s7  ;;  %p5915_p9 = scmp.lt.s32.totalorder %s5909_s7, %s5909_s7 }
  0x6d   :  { %p5916_p10 = por %p5915_p9, %p5914_p8 }
  0x6f   :  { %p5917_p11 = pnand %p5916_p10, %p5910_p7 }
  0x71   :  { %5920 = shalt.err (!%p5917_p11)
}
  0x72   :  { %152 = dma.hbm_to_vmem [thread:$0]  %s9982_s9, 192, %s147_s1, [#allocation18], %s6303_s26, %s6303_s26, %s6304_s22  }
  0x73   :  { %s5921_s19 = scalar_lea.hbm %s9984_s11, 16 }
  0x74   :  { %p5922_p12 = scmp.ne.s32.totalorder %s9984_s11, %s5921_s19  ;;  %p5925_p13 = scmp.lt.u32.totalorder %s5921_s19, %s9984_s11 }
  0x76   :  { %p5927_p0 = pnand %p5925_p13, %p5922_p12 }
  0x78   :  { %5930 = shalt.err (!%p5927_p0)
}
  0x79   :  { %s5931_s29 = scalar_lea.vmem %s170_s2, 16  ;;  %s5935_s30 = scalar_lea.vmem %s170_s2, 32 }
  0x7a   :  { %p5932_p1 = scmp.ne.s32.totalorder %s170_s2, %s5931_s29  ;;  %p5936_p2 = scmp.lt.s32.totalorder %s170_s2, %s170_s2 }
  0x7b   :  { %p5937_p3 = scmp.lt.s32.totalorder %s5935_s30, %s5931_s29 }
  0x7d   :  { %p5938_p4 = por %p5937_p3, %p5936_p2 }
  0x7f   :  { %p5939_p5 = pnand %p5938_p4, %p5932_p1 }
  0x81   :  { %5942 = shalt.err (!%p5939_p5)
}
  0x82   :  { %172 = dma.hbm_to_vmem [thread:$0]  %s9984_s11, 16, %s170_s2, [#allocation21]  }
  0x83   :  { %s6307_s5 = smov [#allocation23]   ;;  %s6308_s25 = smov [#allocation26]  }
  0x84   :  { %s190_s7 = sshll.u32 %s6307_s5, 4  ;;  %s213_s23 = sshll.u32 %s6308_s25, 4  ;;  %s191_s7 = int_to_ptr.vmem [resolvable:$true] %s190_s7  ;;  %s214_s23 = int_to_ptr.vmem [resolvable:$true] %s213_s23 }
  0x85   :  { %s5943_s19 = scalar_lea.hbm %s9986_s13, 192 }
  0x86   :  { %p5944_p6 = scmp.ne.s32.totalorder %s9986_s13, %s5943_s19  ;;  %p5947_p7 = scmp.lt.u32.totalorder %s5943_s19, %s9986_s13 }
  0x88   :  { %p5949_p8 = pnand %p5947_p7, %p5944_p6 }
  0x8a   :  { %5952 = shalt.err (!%p5949_p8)
}
  0x8b   :  { %s5953_s11 = scalar_lea.vmem %s191_s7, 192  ;;  %p5958_p10 = scmp.lt.s32.totalorder %s191_s7, %s191_s7 }
  0x8c   :  { %p5954_p9 = scmp.ne.s32.totalorder %s191_s7, %s5953_s11  ;;  %p5959_p11 = scmp.lt.s32.totalorder %s5953_s11, %s5953_s11 }
  0x8e   :  { %p5960_p12 = por %p5959_p11, %p5958_p10 }
  0x90   :  { %p5961_p13 = pnand %p5960_p12, %p5954_p9 }
  0x92   :  { %5964 = shalt.err (!%p5961_p13)
}
  0x93   :  { %196 = dma.hbm_to_vmem [thread:$0]  %s9986_s13, 192, %s191_s7, [#allocation24], %s6303_s26, %s6303_s26, %s6304_s22  }
  0x94   :  { %s5965_s1 = scalar_lea.hbm %s9988_s15, 16 }
  0x95   :  { %p5966_p0 = scmp.ne.s32.totalorder %s9988_s15, %s5965_s1  ;;  %p5969_p1 = scmp.lt.u32.totalorder %s5965_s1, %s9988_s15 }
  0x97   :  { %p5971_p2 = pnand %p5969_p1, %p5966_p0 }
  0x99   :  { %5974 = shalt.err (!%p5971_p2)
}
  0x9a   :  { %s5975_s19 = scalar_lea.vmem %s214_s23, 16  ;;  %s5979_s27 = scalar_lea.vmem %s214_s23, 32 }
  0x9b   :  { %p5976_p3 = scmp.ne.s32.totalorder %s214_s23, %s5975_s19  ;;  %p5980_p4 = scmp.lt.s32.totalorder %s214_s23, %s214_s23 }
  0x9c   :  { %p5981_p5 = scmp.lt.s32.totalorder %s5979_s27, %s5975_s19 }
  0x9e   :  { %p5982_p6 = por %p5981_p5, %p5980_p4 }
  0xa0   :  { %p5983_p7 = pnand %p5982_p6, %p5976_p3 }
  0xa2   :  { %5986 = shalt.err (!%p5983_p7)
}
  0xa3   :  { %216 = dma.hbm_to_vmem [thread:$0]  %s9988_s15, 16, %s214_s23, [#allocation27]  }
  0xa4   :  { %s6309_s20 = smov [#allocation29]   ;;  %s6310_s4 = smov [#allocation2]  }
  0xa5   :  { %s233_s28 = sshll.u32 %s6309_s20, 4  ;;  %s42_s11 = sshll.u32 %s6310_s4, 4  ;;  %s234_s28 = int_to_ptr.vmem [resolvable:$true] %s233_s28  ;;  %s6569_s11 = int_to_ptr.vmem [resolvable:$true] %s42_s11 }
  0xa6   :  { %s5987_s30 = scalar_lea.hbm %s9990_s17, 16 }
  0xa7   :  { %p5988_p8 = scmp.ne.s32.totalorder %s9990_s17, %s5987_s30  ;;  %p5991_p9 = scmp.lt.u32.totalorder %s5987_s30, %s9990_s17 }
  0xa9   :  { %p5993_p10 = pnand %p5991_p9, %p5988_p8 }
  0xab   :  { %5996 = shalt.err (!%p5993_p10)
}
  0xac   :  { %s5997_s15 = scalar_lea.vmem %s234_s28, 16  ;;  %s6001_s23 = scalar_lea.vmem %s234_s28, 32 }
  0xad   :  { %p5998_p11 = scmp.ne.s32.totalorder %s234_s28, %s5997_s15  ;;  %p6002_p12 = scmp.lt.s32.totalorder %s234_s28, %s234_s28 }
  0xae   :  { %p6003_p13 = scmp.lt.s32.totalorder %s6001_s23, %s5997_s15 }
  0xb0   :  { %p6004_p0 = por %p6003_p13, %p6002_p12 }
  0xb2   :  { %p6005_p1 = pnand %p6004_p0, %p5998_p11 }
  0xb4   :  { %6008 = shalt.err (!%p6005_p1)
}
  0xb5   :  { %236 = dma.hbm_to_vmem [thread:$0]  %s9990_s17, 16, %s234_s28, [#allocation30]  }
  0xb6   :  { %s10067_s13 = sld [smem:[#allocation49_spill]] }
  0xbc   :  { %s6009_s7 = scalar_lea.hbm %s10067_s13, 512 }
  0xbd   :  { %p6010_p2 = scmp.ne.s32.totalorder %s10067_s13, %s6009_s7  ;;  %p6013_p3 = scmp.lt.u32.totalorder %s6009_s7, %s10067_s13 }
  0xbf   :  { %p6015_p4 = pnand %p6013_p3, %p6010_p2 }
  0xc1   :  { %6018 = shalt.err (!%p6015_p4)
}
  0xc2   :  { %s6019_s30 = scalar_lea.vmem %s6569_s11, 512  ;;  %p6024_p6 = scmp.lt.s32.totalorder %s6569_s11, %s6569_s11 }
  0xc3   :  { %p6020_p5 = scmp.ne.s32.totalorder %s6569_s11, %s6019_s30  ;;  %p6025_p7 = scmp.lt.s32.totalorder %s6019_s30, %s6019_s30 }
  0xc5   :  { %p6026_p8 = por %p6025_p7, %p6024_p6 }
  0xc7   :  { %p6027_p9 = pnand %p6026_p8, %p6020_p5 }
  0xc9   :  { %6030 = shalt.err (!%p6027_p9)
}
  0xca   :  { %48 = dma.hbm_to_vmem [thread:$0]  %s10067_s13, 512, %s6569_s11, [#allocation3], %s6299_s0, %s6299_s0, %s6300_s21  }
  0xcb   :  { %s6311_s9 = smov [#allocation7]   ;;  %s6312_s5 = smov [#allocation10]  }
  0xcc   :  { %s66_s1 = sshll.u32 %s6311_s9, 4  ;;  %s90_s25 = sshll.u32 %s6312_s5, 4  ;;  %s67_s1 = int_to_ptr.vmem [resolvable:$true] %s66_s1  ;;  %s6603_s25 = int_to_ptr.vmem [resolvable:$true] %s90_s25 }
  0xcd   :  { %s10068_s24 = sld [smem:[#allocation51_spill]] }
  0xd3   :  { %s6031_s3 = scalar_lea.hbm %s10068_s24, 512 }
  0xd4   :  { %p6032_p10 = scmp.ne.s32.totalorder %s10068_s24, %s6031_s3  ;;  %p6035_p11 = scmp.lt.u32.totalorder %s6031_s3, %s10068_s24 }
  0xd6   :  { %p6037_p12 = pnand %p6035_p11, %p6032_p10 }
  0xd8   :  { %6040 = shalt.err (!%p6037_p12)
}
  0xd9   :  { %s6041_s11 = scalar_lea.vmem %s67_s1, 512  ;;  %p6046_p0 = scmp.lt.s32.totalorder %s67_s1, %s67_s1 }
  0xda   :  { %p6042_p13 = scmp.ne.s32.totalorder %s67_s1, %s6041_s11  ;;  %p6047_p1 = scmp.lt.s32.totalorder %s6041_s11, %s6041_s11 }
  0xdc   :  { %p6048_p2 = por %p6047_p1, %p6046_p0 }
  0xde   :  { %p6049_p3 = pnand %p6048_p2, %p6042_p13 }
  0xe0   :  { %6052 = shalt.err (!%p6049_p3)
}
  0xe1   :  { %72 = dma.hbm_to_vmem [thread:$0]  %s10068_s24, 512, %s67_s1, [#allocation6], %s6299_s0, %s6299_s0, %s6300_s21  }
  0xe2   :  { %s10069_s30 = sld [smem:[#allocation53_spill]] }
  0xe8   :  { %s6053_s17 = scalar_lea.hbm %s10069_s30, 1280 }
  0xe9   :  { %p6054_p4 = scmp.ne.s32.totalorder %s10069_s30, %s6053_s17  ;;  %p6057_p5 = scmp.lt.u32.totalorder %s6053_s17, %s10069_s30 }
  0xeb   :  { %p6059_p6 = pnand %p6057_p5, %p6054_p4 }
  0xed   :  { %6062 = shalt.err (!%p6059_p6)
}
  0xee   :  { %s6063_s23 = scalar_lea.vmem %s6603_s25, 1280  ;;  %p6068_p8 = scmp.lt.s32.totalorder %s6603_s25, %s6603_s25 }
  0xef   :  { %p6064_p7 = scmp.ne.s32.totalorder %s6603_s25, %s6063_s23  ;;  %p6069_p9 = scmp.lt.s32.totalorder %s6063_s23, %s6063_s23 }
  0xf1   :  { %p6070_p10 = por %p6069_p9, %p6068_p8 }
  0xf3   :  { %p6071_p11 = pnand %p6070_p10, %p6064_p7 }
  0xf5   :  { %6074 = shalt.err (!%p6071_p11)
}
  0xf6   :  { %96 = dma.hbm_to_vmem [thread:$0]  %s10069_s30, 1280, %s6603_s25, [#allocation9], %s6303_s26, %s6303_s26, %s6304_s22  }
  0xf7   :  { %s6313_s3 = smov [#allocation13]   ;;  %s6314_s27 = smov [#allocation16]  }
  0xf8   :  { %s115_s19 = sshll.u32 %s6313_s3, 4  ;;  %s134_s7 = sshll.u32 %s6314_s27, 4  ;;  %s116_s19 = int_to_ptr.vmem [resolvable:$true] %s115_s19  ;;  %s6640_s7 = int_to_ptr.vmem [resolvable:$true] %s134_s7 }
  0xf9   :  { %s6075_s13 = scalar_lea.hbm %s9979_s6, 16 }
  0xfa   :  { %p6076_p12 = scmp.ne.s32.totalorder %s9979_s6, %s6075_s13  ;;  %p6079_p13 = scmp.lt.u32.totalorder %s6075_s13, %s9979_s6 }
  0xfc   :  { %p6081_p0 = pnand %p6079_p13, %p6076_p12 }
  0xfe   :  { %6084 = shalt.err (!%p6081_p0)
}
  0xff   :  { %s6085_s25 = scalar_lea.vmem %s116_s19, 16  ;;  %s6089_s30 = scalar_lea.vmem %s116_s19, 32 }
 0x100   :  { %p6086_p1 = scmp.ne.s32.totalorder %s116_s19, %s6085_s25  ;;  %p6090_p2 = scmp.lt.s32.totalorder %s116_s19, %s116_s19 }
 0x101   :  { %p6091_p3 = scmp.lt.s32.totalorder %s6089_s30, %s6085_s25 }
 0x103   :  { %p6092_p4 = por %p6091_p3, %p6090_p2 }
 0x105   :  { %p6093_p5 = pnand %p6092_p4, %p6086_p1 }
 0x107   :  { %6096 = shalt.err (!%p6093_p5)
}
 0x108   :  { %118 = dma.hbm_to_vmem [thread:$0]  %s9979_s6, 16, %s116_s19, [#allocation12]  }
 0x109   :  { %s6097_s23 = scalar_lea.hbm %s9981_s8, 1280 }
 0x10a   :  { %p6098_p6 = scmp.ne.s32.totalorder %s9981_s8, %s6097_s23  ;;  %p6101_p7 = scmp.lt.u32.totalorder %s6097_s23, %s9981_s8 }
 0x10c   :  { %p6103_p8 = pnand %p6101_p7, %p6098_p6 }
 0x10e   :  { %6106 = shalt.err (!%p6103_p8)
}
 0x10f   :  { %s6107_s20 = scalar_lea.vmem %s6640_s7, 1280  ;;  %p6112_p10 = scmp.lt.s32.totalorder %s6640_s7, %s6640_s7 }
 0x110   :  { %p6108_p9 = scmp.ne.s32.totalorder %s6640_s7, %s6107_s20  ;;  %p6113_p11 = scmp.lt.s32.totalorder %s6107_s20, %s6107_s20 }
 0x112   :  { %p6114_p12 = por %p6113_p11, %p6112_p10 }
 0x114   :  { %p6115_p13 = pnand %p6114_p12, %p6108_p9 }
 0x116   :  { %6118 = shalt.err (!%p6115_p13)
}
 0x117   :  { %140 = dma.hbm_to_vmem [thread:$0]  %s9981_s8, 1280, %s6640_s7, [#allocation15], %s6303_s26, %s6303_s26, %s6304_s22  }
 0x118   :  { %s6315_s11 = smov [#allocation19]   ;;  %s6316_s4 = smov [#allocation22]  }
 0x119   :  { %s159_s13 = sshll.u32 %s6315_s11, 4  ;;  %s178_s2 = sshll.u32 %s6316_s4, 4  ;;  %s160_s13 = int_to_ptr.vmem [resolvable:$true] %s159_s13  ;;  %s6674_s2 = int_to_ptr.vmem [resolvable:$true] %s178_s2 }
 0x11a   :  { %s6119_s25 = scalar_lea.hbm %s9983_s10, 16 }
 0x11b   :  { %p6120_p0 = scmp.ne.s32.totalorder %s9983_s10, %s6119_s25  ;;  %p6123_p1 = scmp.lt.u32.totalorder %s6119_s25, %s9983_s10 }
 0x11d   :  { %p6125_p2 = pnand %p6123_p1, %p6120_p0 }
 0x11f   :  { %6128 = shalt.err (!%p6125_p2)
}
 0x120   :  { %s6129_s8 = scalar_lea.vmem %s160_s13, 16  ;;  %s6133_s7 = scalar_lea.vmem %s160_s13, 32 }
 0x121   :  { %p6130_p3 = scmp.ne.s32.totalorder %s160_s13, %s6129_s8  ;;  %p6134_p4 = scmp.lt.s32.totalorder %s160_s13, %s160_s13 }
 0x122   :  { %p6135_p5 = scmp.lt.s32.totalorder %s6133_s7, %s6129_s8 }
 0x124   :  { %p6136_p6 = por %p6135_p5, %p6134_p4 }
 0x126   :  { %p6137_p7 = pnand %p6136_p6, %p6130_p3 }
 0x128   :  { %6140 = shalt.err (!%p6137_p7)
}
 0x129   :  { %162 = dma.hbm_to_vmem [thread:$0]  %s9983_s10, 16, %s160_s13, [#allocation18]  }
 0x12a   :  { %s6141_s3 = scalar_lea.hbm %s9985_s12, 1280 }
 0x12b   :  { %p6142_p8 = scmp.ne.s32.totalorder %s9985_s12, %s6141_s3  ;;  %p6145_p9 = scmp.lt.u32.totalorder %s6141_s3, %s9985_s12 }
 0x12d   :  { %p6147_p10 = pnand %p6145_p9, %p6142_p8 }
 0x12f   :  { %6150 = shalt.err (!%p6147_p10)
}
 0x130   :  { %s6151_s11 = scalar_lea.vmem %s6674_s2, 1280  ;;  %p6156_p12 = scmp.lt.s32.totalorder %s6674_s2, %s6674_s2 }
 0x131   :  { %p6152_p11 = scmp.ne.s32.totalorder %s6674_s2, %s6151_s11  ;;  %p6157_p13 = scmp.lt.s32.totalorder %s6151_s11, %s6151_s11 }
 0x133   :  { %p6158_p0 = por %p6157_p13, %p6156_p12 }
 0x135   :  { %p6159_p1 = pnand %p6158_p0, %p6152_p11 }
 0x137   :  { %6162 = shalt.err (!%p6159_p1)
}
 0x138   :  { %184 = dma.hbm_to_vmem [thread:$0]  %s9985_s12, 1280, %s6674_s2, [#allocation21], %s6303_s26, %s6303_s26, %s6304_s22  }
 0x139   :  { %s6317_s4 = smov [#allocation25]   ;;  %s6318_s17 = smov [#allocation28]  }
 0x13a   :  { %s203_s29 = sshll.u32 %s6317_s4, 4  ;;  %s223_s25 = sshll.u32 %s6318_s17, 4  ;;  %s204_s29 = int_to_ptr.vmem [resolvable:$true] %s203_s29  ;;  %s224_s25 = int_to_ptr.vmem [resolvable:$true] %s223_s25 }
 0x13b   :  { %s6163_s9 = scalar_lea.hbm %s9987_s14, 16 }
 0x13c   :  { %p6164_p2 = scmp.ne.s32.totalorder %s9987_s14, %s6163_s9  ;;  %p6167_p3 = scmp.lt.u32.totalorder %s6163_s9, %s9987_s14 }
 0x13e   :  { %p6169_p4 = pnand %p6167_p3, %p6164_p2 }
 0x140   :  { %6172 = shalt.err (!%p6169_p4)
}
 0x141   :  { %s6173_s12 = scalar_lea.vmem %s204_s29, 16  ;;  %s6177_s2 = scalar_lea.vmem %s204_s29, 32 }
 0x142   :  { %p6174_p5 = scmp.ne.s32.totalorder %s204_s29, %s6173_s12  ;;  %p6178_p6 = scmp.lt.s32.totalorder %s204_s29, %s204_s29 }
 0x143   :  { %p6179_p7 = scmp.lt.s32.totalorder %s6177_s2, %s6173_s12 }
 0x145   :  { %p6180_p8 = por %p6179_p7, %p6178_p6 }
 0x147   :  { %p6181_p9 = pnand %p6180_p8, %p6174_p5 }
 0x149   :  { %6184 = shalt.err (!%p6181_p9)
}
 0x14a   :  { %206 = dma.hbm_to_vmem [thread:$0]  %s9987_s14, 16, %s204_s29, [#allocation24]  }
 0x14b   :  { %s6185_s27 = scalar_lea.hbm %s9989_s16, 32 }
 0x14c   :  { %p6186_p10 = scmp.ne.s32.totalorder %s9989_s16, %s6185_s27  ;;  %p6189_p11 = scmp.lt.u32.totalorder %s6185_s27, %s9989_s16 }
 0x14e   :  { %p6191_p12 = pnand %p6189_p11, %p6186_p10 }
 0x150   :  { %6194 = shalt.err (!%p6191_p12)
}
 0x151   :  { %s6195_s10 = scalar_lea.vmem %s224_s25, 32  ;;  %p6200_p0 = scmp.lt.s32.totalorder %s224_s25, %s224_s25 }
 0x152   :  { %p6196_p13 = scmp.ne.s32.totalorder %s224_s25, %s6195_s10  ;;  %p6201_p1 = scmp.lt.s32.totalorder %s6195_s10, %s6195_s10 }
 0x154   :  { %p6202_p2 = por %p6201_p1, %p6200_p0 }
 0x156   :  { %p6203_p3 = pnand %p6202_p2, %p6196_p13 }
 0x158   :  { %6206 = shalt.err (!%p6203_p3)
}
 0x159   :  { %226 = dma.hbm_to_vmem [thread:$0]  %s9989_s16, 32, %s224_s25, [#allocation27]  }
 0x15a   :  { %s6319_s4 = smov [#allocation31]   ;;  %s6320_s17 = smov [#allocation32]  }
 0x15b   :  { %s243_s29 = sshll.u32 %s6319_s4, 4  ;;  %s253_s30 = sshll.u32 %s6320_s17, 4  ;;  %s244_s29 = int_to_ptr.vmem [resolvable:$true] %s243_s29  ;;  %s254_s30 = int_to_ptr.vmem [resolvable:$true] %s253_s30 }
 0x15c   :  { %s6207_s5 = scalar_lea.hbm %s9991_s18, 16 }
 0x15d   :  { %p6208_p4 = scmp.ne.s32.totalorder %s9991_s18, %s6207_s5  ;;  %p6211_p5 = scmp.lt.u32.totalorder %s6207_s5, %s9991_s18 }
 0x15f   :  { %p6213_p6 = pnand %p6211_p5, %p6208_p4 }
 0x161   :  { %6216 = shalt.err (!%p6213_p6)
}
 0x162   :  { %s6217_s16 = scalar_lea.vmem %s244_s29, 16  ;;  %s6221_s25 = scalar_lea.vmem %s244_s29, 32 }
 0x163   :  { %p6218_p7 = scmp.ne.s32.totalorder %s244_s29, %s6217_s16  ;;  %p6222_p8 = scmp.lt.s32.totalorder %s244_s29, %s244_s29 }
 0x164   :  { %p6223_p9 = scmp.lt.s32.totalorder %s6221_s25, %s6217_s16 }
 0x166   :  { %p6224_p10 = por %p6223_p9, %p6222_p8 }
 0x168   :  { %p6225_p11 = pnand %p6224_p10, %p6218_p7 }
 0x16a   :  { %6228 = shalt.err (!%p6225_p11)
}
 0x16b   :  { %246 = dma.hbm_to_vmem [thread:$0]  %s9991_s18, 16, %s244_s29, [#allocation30]  }
 0x16c   :  { %s10070_s3 = sld [smem:[#allocation54_spill]] }
 0x172   :  { %s6229_s27 = scalar_lea.hbm %s10070_s3, 16 }
 0x173   :  { %p6230_p12 = scmp.ne.s32.totalorder %s10070_s3, %s6229_s27  ;;  %p6233_p13 = scmp.lt.u32.totalorder %s6229_s27, %s10070_s3 }
 0x175   :  { %p6235_p0 = pnand %p6233_p13, %p6230_p12 }
 0x177   :  { %6238 = shalt.err (!%p6235_p0)
}
 0x178   :  { %s6239_s10 = scalar_lea.vmem %s254_s30, 16  ;;  %s6243_s14 = scalar_lea.vmem %s254_s30, 32 }
 0x179   :  { %p6240_p1 = scmp.ne.s32.totalorder %s254_s30, %s6239_s10  ;;  %p6244_p2 = scmp.lt.s32.totalorder %s254_s30, %s254_s30 }
 0x17a   :  { %p6245_p3 = scmp.lt.s32.totalorder %s6243_s14, %s6239_s10 }
 0x17c   :  { %p6246_p4 = por %p6245_p3, %p6244_p2 }
 0x17e   :  { %p6247_p5 = pnand %p6246_p4, %p6240_p1 }
 0x180   :  { %6250 = shalt.err (!%p6247_p5)
}
 0x181   :  { %256 = dma.hbm_to_vmem [thread:$0]  %s10070_s3, 16, %s254_s30, [#allocation33]  }
 0x182   :  { %6273 = dma.done.wait [#allocation3], 512  }
 0x183   :  { %6274 = vsyncadd [#allocation3], 4294966784 }
 0x184   :  { %6275 = dma.done.wait [#allocation6], 1024  }
 0x185   :  { %6276 = vsyncadd [#allocation6], 4294966272 }
 0x186   :  { %6277 = dma.done.wait [#allocation9], 1792  }
 0x187   :  { %6278 = vsyncadd [#allocation9], 4294965504 }
 0x188   :  { %6279 = dma.done.wait [#allocation12], 208  }
 0x189   :  { %6280 = vsyncadd [#allocation12], 4294967088 }
 0x18a   :  { %6281 = dma.done.wait [#allocation15], 1296  }
 0x18b   :  { %6282 = vsyncadd [#allocation15], 4294966000 }
 0x18c   :  { %6283 = dma.done.wait [#allocation18], 208  }
 0x18d   :  { %6284 = vsyncadd [#allocation18], 4294967088 }
 0x18e   :  { %6285 = dma.done.wait [#allocation21], 1296  }
 0x18f   :  { %6286 = vsyncadd [#allocation21], 4294966000 }
 0x190   :  { %6287 = dma.done.wait [#allocation24], 208  }
 0x191   :  { %6288 = vsyncadd [#allocation24], 4294967088 }
 0x192   :  { %6289 = dma.done.wait [#allocation27], 48  }
 0x193   :  { %6290 = vsyncadd [#allocation27], 4294967248 }
 0x194   :  { %6291 = dma.done.wait [#allocation30], 32  }
 0x195   :  { %6292 = vsyncadd [#allocation30], 4294967264 }
 0x196   :  { %6293 = dma.done.wait [#allocation33], 16  }
 0x197   :  { %6294 = vsyncadd [#allocation33], 4294967280  ;;  %vm10012_vm0 = vcmask 1042432   ;;  %vm10011_vm1 = vcmask 1046528   ;;  %v318_v0 = vld [vmem:[#allocation2] sm:$0xff]  ;;  %v319_v1 = vld [vmem:[#allocation2 + $0x8] sm:$0xff] }
 0x198   :  { %v10007_v2 = vmov 0.0   ;;  %vm10010_vm2 = vcmask 1044480   ;;  %v320_v4 = vld [vmem:[#allocation2 + $0x10] sm:$0xff]  ;;  %v356_v5 = vrot.slane %v318_v0, 5  ;;  %v357_v6 = vrot.slane %v319_v1, 5  ;;  %v321_v7 = vld [vmem:[#allocation2 + $0x18] sm:$0xff] }
 0x199   :  { %v6757_v3 = vrot.slane %v10007_v2, 1  ;;  %vm10029_vm3 = vcmask 1045504   ;;  %v6760_v8 = vrot.slane %v10007_v2, 2  ;;  %vm10013_vm4 = vcmask 1043456   ;;  %s6322_s4 = smov 32   ;;  %s6323_s29 = smov 12  }
 0x19a   :  { %v359_v9 = vrot.slane %v320_v4, 5  ;;  %v6763_v10 = vrot.slane %v10007_v2, 3  ;;  %v6766_v11 = vsel %vm10012_vm0, %v356_v5, %v357_v6  ;;  %v6769_v12 = vsel %vm10012_vm0, %v357_v6, 0.0  ;;  %s6324_s17 = smov 16   ;;  %s6325_s30 = smov 20  }
 0x19b   :  { %v6772_v13 = vsel %vm10012_vm0, 0.0, %v356_v5  ;;  %v360_v14 = vrot.slane %v321_v7, 5  ;;  %v4873_v15 = vpack.i.bf16 %v6769_v12, %v6766_v11  ;;  %v495_v17 = vrot.slane %v6766_v11, 1  ;;  %s6326_s28 = smov 24   ;;  %s6327_s9 = smov 28  }
 0x19c   :  { %v378_v16 = vrot.slane %v6772_v13, 1  ;;  %v676_v18 = vrot.slane %v6769_v12, 1  ;;  %vm10009_vm5 = vcmask 1041408   ;;  %vm10008_vm6 = vcmask 1040384   ;;  %s6328_s5 = smov 36   ;;  %s6329_s8 = smov 40  }
 0x19d   :  { %v410_v19 = vrot.slane %v6772_v13, 3  ;;  %v527_v20 = vrot.slane %v6766_v11, 3  ;;  %v708_v21 = vrot.slane %v6769_v12, 3  ;;  %v394_v22 = vrot.slane %v6772_v13, 2  ;;  %4874 = vrot.lane.b32.xlu1 %v4873_v15, %s6322_s4  ;;  %s6330_s7 = smov 44   ;;  %s6331_s15 = smov 48  }
 0x19e   :  { %v6785_v23 = vsel %vm10011_vm1, %v495_v17, %v676_v18  ;;  %v6790_v24 = vsel %vm10011_vm1, %v378_v16, %v495_v17  ;;  %v511_v28 = vrot.slane %v6766_v11, 2  ;;  %v692_v29 = vrot.slane %v6769_v12, 2  ;;  %s6332_s12 = smov 52   ;;  %s6333_s16 = smov 56  }
 0x19f   :  { %v4878_v25 = vpack.i.bf16 %v6785_v23, %v6790_v24  ;;  %v6797_v26 = vsel %vm10010_vm2, %v410_v19, %v527_v20  ;;  %v6802_v27 = vsel %vm10010_vm2, %v527_v20, %v708_v21  ;;  %v426_v30 = vrot.slane %v6772_v13, 4  ;;  %s6334_s25 = smov 60   ;;  %s6336_s2 = smov 104  }
 0x1a0   :  { %v4888_v31 = vpack.i.bf16 %v6802_v27, %v6797_v26  ;;  %v543_v32 = vrot.slane %v6766_v11, 4  ;;  %v724_v33 = vrot.slane %v6769_v12, 4  ;;  %v441_v34 = vrot.slane %v6772_v13, 5 }
 0x1a1   :  { %4879 = vrot.lane.b32.xlu0 %v4878_v25, %s6304_s22  ;;  %v6814_v35 = vsel %vm10029_vm3, %v511_v28, %v692_v29  ;;  %v6819_v36 = vsel %vm10029_vm3, %v394_v22, %v511_v28  ;;  %v559_v37 = vrot.slane %v6766_v11, 5  ;;  %v6823_v38 = vsel %vm10012_vm0, 0.0, %v359_v9 }
 0x1a2   :  { %v6827_v39 = vsel %vm10011_vm1, %v676_v18, %v6757_v3  ;;  %4889 = vrot.lane.b32.xlu1 %v4888_v31, %s6323_s29  ;;  %v4883_v40 = vpack.i.bf16 %v6814_v35, %v6819_v36  ;;  %v6835_v41 = vsel %vm10013_vm4, %v426_v30, %v543_v32  ;;  %v6840_v42 = vsel %vm10013_vm4, %v543_v32, %v724_v33 }
 0x1a3   :  { %v4893_v43 = vpack.i.bf16 %v6840_v42, %v6835_v41  ;;  %v6847_v44 = vsel %vm10012_vm0, %v441_v34, %v559_v37  ;;  %v740_v45 = vrot.slane %v6769_v12, 5  ;;  %v457_v46 = vrot.slane %v6772_v13, 6 }
 0x1a4   :  { %v575_v47 = vrot.slane %v6766_v11, 6  ;;  %v756_v48 = vrot.slane %v6769_v12, 6  ;;  %v473_v49 = vrot.slane %v6772_v13, 7  ;;  %v591_v50 = vrot.slane %v6766_v11, 7 }
 0x1a5   :  { %4884 = vrot.lane.b32.xlu0 %v4883_v40, %s6300_s21  ;;  %v6859_v51 = vsel %vm10012_vm0, %v559_v37, %v740_v45  ;;  %v772_v52 = vrot.slane %v6769_v12, 7  ;;  %v6863_v53 = vsel %vm10012_vm0, %v359_v9, %v360_v14  ;;  %v6866_v54 = vsel %vm10012_vm0, %v360_v14, 0.0 }
 0x1a6   :  { %4894 = vrot.lane.b32.xlu1 %v4893_v43, %s6324_s17  ;;  %v4898_v55 = vpack.i.bf16 %v6859_v51, %v6847_v44  ;;  %v6874_v56 = vsel %vm10009_vm5, %v457_v46, %v575_v47  ;;  %v6879_v57 = vsel %vm10009_vm5, %v575_v47, %v756_v48  ;;  %v6884_v58 = vsel %vm10008_vm6, %v473_v49, %v591_v50 }
 0x1a7   :  { %v4903_v59 = vpack.i.bf16 %v6879_v57, %v6874_v56  ;;  %v6891_v60 = vsel %vm10008_vm6, %v591_v50, %v772_v52  ;;  %v10006_v61 = vrot.slane %v6823_v38, 1  ;;  %v497_v62 = vrot.slane %v6863_v53, 1 }
 0x1a8   :  { %v4908_v63 = vpack.i.bf16 %v6891_v60, %v6884_v58  ;;  %v678_v0 = vrot.slane %v6866_v54, 1  ;;  %v10004_v1 = vrot.slane %v6823_v38, 2  ;;  %v513_v4 = vrot.slane %v6863_v53, 2 }
 0x1a9   :  { %4899 = vrot.lane.b32.xlu0 %v4898_v55, %s6325_s30  ;;  %v6904_v5 = vsel %vm10011_vm1, %v10006_v61, %v497_v62  ;;  %v694_v6 = vrot.slane %v6866_v54, 2  ;;  %v10001_v7 = vrot.slane %v6823_v38, 3  ;;  %v4918_v9 = vpack.i.bf16 %v6827_v39, %v6785_v23 }
 0x1aa   :  { %4904 = vrot.lane.b32.xlu1 %v4903_v59, %s6326_s28  ;;  %v6914_v14 = vsel %vm10011_vm1, %v497_v62, %v678_v0  ;;  %v6918_v15 = vsel %vm10029_vm3, %v692_v29, %v6760_v8  ;;  %v529_v18 = vrot.slane %v6863_v53, 3  ;;  %v710_v20 = vrot.slane %v6866_v54, 3 }
 0x1ab   :  { %v4913_v17 = vpack.i.bf16 %v6914_v14, %v6904_v5  ;;  %v6928_v23 = vsel %vm10029_vm3, %v513_v4, %v694_v6  ;;  %v6933_v25 = vsel %vm10029_vm3, %v10004_v1, %v513_v4  ;;  %v6936_v28 = vrot.slane %v10007_v2, 4 }
 0x1ac   :  { %v6939_v29 = vrot.slane %v10007_v2, 5  ;;  %v4928_v31 = vpack.i.bf16 %v6918_v15, %v6814_v35  ;;  %v6948_v32 = vsel %vm10010_vm2, %v708_v21, %v6763_v10  ;;  %v4923_v37 = vpack.i.bf16 %v6928_v23, %v6933_v25 }
 0x1ad   :  { %4909 = vrot.lane.b32.xlu0 %v4908_v63, %s6327_s9  ;;  %v6956_v40 = vsel %vm10010_vm2, %v10001_v7, %v529_v18  ;;  %v6961_v35 = vsel %vm10010_vm2, %v529_v18, %v710_v20  ;;  %v6964_v43 = vrot.slane %v10007_v2, 6  ;;  %v10002_v21 = vrot.slane %v6823_v38, 4 }
 0x1ae   :  { %4919 = vrot.lane.b32.xlu1 %v4918_v9, %s6328_s5  ;;  %v545_v47 = vrot.slane %v6863_v53, 4  ;;  %v726_v50 = vrot.slane %v6866_v54, 4  ;;  %v10003_v55 = vrot.slane %v6823_v38, 5  ;;  %v4938_v59 = vpack.i.bf16 %v6948_v32, %v6802_v27 }
 0x1af   :  { %v4933_v62 = vpack.i.bf16 %v6961_v35, %v6956_v40  ;;  %v6979_v63 = vsel %vm10013_vm4, %v724_v33, %v6936_v28  ;;  %v561_v4 = vrot.slane %v6863_v53, 5  ;;  %v742_v9 = vrot.slane %v6866_v54, 5 }
 0x1b0   :  { %v577_v18 = vrot.slane %v6863_v53, 6  ;;  %v6989_v27 = vsel %vm10013_vm4, %v10002_v21, %v545_v47  ;;  %v4948_v33 = vpack.i.bf16 %v6979_v63, %v6840_v42  ;;  %v758_v21 = vrot.slane %v6866_v54, 6 }
 0x1b1   :  { %4914 = vrot.lane.b32.xlu0 %v4913_v17, %s6304_s22  ;;  %v10005_v17 = vrot.slane %v6823_v38, 6  ;;  %v593_v1 = vrot.slane %v6863_v53, 7  ;;  %vm10030_vm7 = vcmask 31744   ;;  %vm10028_vm8 = vcmask 64512  }
 0x1b2   :  { %4929 = vrot.lane.b32.xlu1 %v4928_v31, %s6329_s8  ;;  %v727_v31 = vsel %vm10013_vm4, %v545_v47, %v726_v50  ;;  %v7006_v47 = vsel %vm10012_vm0, %v10003_v55, %v561_v4  ;;  %v475_v55 = vrot.slane %v6823_v38, 7  ;;  %vm10014_vm9 = vcmask 97280  }
 0x1b3   :  { %v4943_v7 = vpack.i.bf16 %v727_v31, %v6989_v27  ;;  %vm10027_vm10 = vcmask 130048   ;;  %vm10026_vm11 = vcmask 162816   ;;  %vm10025_vm12 = vcmask 195584  }
 0x1b4   :  { %v7045_v61 = vsel %vm10008_vm6, %v475_v55, %v593_v1  ;;  %vm10024_vm13 = vcmask 228352   ;;  %vm10023_vm14 = vcmask 261120   ;;  %vm10022_vm15 = vcmask 293888  }
 0x1b5   :  { %4924 = vrot.lane.b32.xlu0 %v4923_v37, %s6300_s21  ;;  %v6999_v37 = vsel %vm10012_vm0, %v740_v45, %v6939_v29  ;;  %v7017_v45 = vsel %vm10009_vm5, %v756_v48, %v6964_v43  ;;  %v774_v48 = vrot.slane %v6866_v54, 7 }
 0x1b6   :  { %4939 = vrot.lane.b32.xlu1 %v4938_v59, %s6330_s7  ;;  %v743_v59 = vsel %vm10012_vm0, %v561_v4, %v742_v9  ;;  %v4958_v42 = vpack.i.bf16 %v6999_v37, %v6859_v51  ;;  %v759_v51 = vsel %vm10009_vm5, %v577_v18, %v758_v21 }
 0x1b7   :  { %v4953_v4 = vpack.i.bf16 %v743_v59, %v7006_v47 }
 0x1b9   :  { %4934 = vrot.lane.b32.xlu0 %v4933_v62, %s6323_s29  ;;  %v7020_v62 = vrot.slane %v10007_v2, 7  ;;  %v775_v2 = vsel %vm10008_vm6, %v593_v1, %v774_v48  ;;  %v7074_v1 = vsel %vm10029_vm3, %v694_v6, %v6760_v8 }
 0x1ba   :  { %4949 = vrot.lane.b32.xlu1 %v4948_v33, %s6331_s15  ;;  %v7027_v33 = vsel %vm10009_vm5, %v10005_v17, %v577_v18 }
 0x1bb   :  { %v884_v17 = vsel %vm10008_vm6, %v772_v52, %v7020_v62  ;;  %v4963_v18 = vpack.i.bf16 %v759_v51, %v7027_v33  ;;  %v7054_v52 = vsel %vm10011_vm1, %v678_v0, %v6757_v3  ;;  %v4983_v0 = vpack.i.bf16 %v6866_v54, %v6863_v53 }
 0x1bd   :  { %4944 = vrot.lane.b32.xlu0 %v4943_v7, %s6324_s17  ;;  %v4968_v7 = vpack.i.bf16 %v7017_v45, %v6879_v57  ;;  %v4978_v57 = vpack.i.bf16 %v884_v17, %v6891_v60  ;;  %v7065_v60 = vsel %vm10010_vm2, %v710_v20, %v6763_v10  ;;  %v7081_v20 = vsel %vm10012_vm0, %v742_v9, %v6939_v29 }
 0x1be   :  { %4959 = vrot.lane.b32.xlu1 %v4958_v42, %s6332_s12  ;;  %v4973_v42 = vpack.i.bf16 %v775_v2, %v7045_v61  ;;  %v4993_v17 = vpack.i.bf16 %v7074_v1, %v6928_v23  ;;  %v5008_v6 = vpack.i.bf16 %v7081_v20, %v743_v59  ;;  %v7098_v23 = vsel %vm10009_vm5, %v758_v21, %v6964_v43 }
 0x1bf   :  { %v5013_v59 = vpack.i.bf16 %v7098_v23, %v759_v51  ;;  %v411_v51 = vsel %vm10010_vm2, %v6763_v10, %v410_v19 }
 0x1c1   :  { %4954 = vrot.lane.b32.xlu0 %v4953_v4, %s6325_s30  ;;  %v4988_v4 = vpack.i.bf16 %v7054_v52, %v6914_v14  ;;  %v4998_v14 = vpack.i.bf16 %v7065_v60, %v6961_v35  ;;  %v885_v35 = vsel %vm10008_vm6, %v774_v48, %v7020_v62  ;;  %v458_v48 = vsel %vm10009_vm5, %v6964_v43, %v457_v46 }
 0x1c2   :  { %4969 = vrot.lane.b32.xlu1 %v4968_v7, %s6333_s16  ;;  %v7088_v7 = vsel %vm10013_vm4, %v726_v50, %v6936_v28  ;;  %v395_v50 = vsel %vm10029_vm3, %v6760_v8, %v394_v22  ;;  %v5048_v19 = vpack.i.bf16 %v458_v48, %v6964_v43  ;;  %v474_v46 = vsel %vm10008_vm6, %v7020_v62, %v473_v49 }
 0x1c3   :  { %v5003_v9 = vpack.i.bf16 %v7088_v7, %v727_v31  ;;  %v379_v31 = vsel %vm10011_vm1, %v6757_v3, %v378_v16  ;;  %v5028_v21 = vpack.i.bf16 %v395_v50, %v6760_v8 }
 0x1c4   :  { %v5023_v22 = vpack.i.bf16 %v379_v31, %v6757_v3 }
 0x1c5   :  { %4964 = vrot.lane.b32.xlu0 %v4963_v18, %s6326_s28  ;;  %v5018_v18 = vpack.i.bf16 %v885_v35, %v775_v2  ;;  %v427_v2 = vsel %vm10013_vm4, %v6936_v28, %v426_v30  ;;  %v5033_v30 = vpack.i.bf16 %v411_v51, %v6763_v10  ;;  %v10073_v35 = vrot.slane %v6823_v38, 2 }
 0x1c6   :  { %4979 = vrot.lane.b32.xlu1 %v4978_v57, %s6334_s25  ;;  %v5038_v16 = vpack.i.bf16 %v427_v2, %v6936_v28  ;;  %v442_v57 = vsel %vm10012_vm0, %v6939_v29, %v441_v34  ;;  %v5053_v34 = vpack.i.bf16 %v474_v46, %v7020_v62 }
 0x1c9   :  { %4974 = vrot.lane.b32.xlu0 %v4973_v42, %s6327_s9  ;;  %v5043_v42 = vpack.i.bf16 %v442_v57, %v6939_v29 }
 0x1ca   :  { %4989 = vrot.lane.b32.xlu1 %v4988_v4, %s6328_s5  ;;  %v10071_v4 = vmov 0.0  }
 0x1cd   :  { %4984 = vrot.lane.b32.xlu0 %v4983_v0, %s6322_s4  ;;  %v5058_v0 = vpack.i.bf16 %v6772_v13, %v10071_v4  ;;  %v5766_v4 = vld [vmem:[#allocation10 + $0x18] sm:$0xff]  }
 0x1ce   :  { %4999 = vrot.lane.b32.xlu1 %v4998_v14, %s6330_s7  ;;  %v10072_v14 = vrot.slane %v6823_v38, 1 }
 0x1d1   :  { %4994 = vrot.lane.b32.xlu0 %v4993_v17, %s6329_s8  ;;  %v381_v17 = vsel %vm10011_vm1, %v6757_v3, %v10072_v14  ;;  %vm10015_vm1 = vcmask 424960  }
 0x1d2   :  { %5009 = vrot.lane.b32.xlu1 %v5008_v6, %s6332_s12  ;;  %v5068_v6 = vpack.i.bf16 %v6790_v24, %v379_v31  ;;  %v5063_v49 = vpack.i.bf16 %v6827_v39, %v381_v17  ;;  %v10074_v24 = vrot.slane %v6823_v38, 3  ;;  %v5088_v39 = vpack.i.bf16 %v6797_v26, %v411_v51 }
 0x1d4   :  { %v413_v31 = vsel %vm10010_vm2, %v6763_v10, %v10074_v24  ;;  %vm10016_vm2 = vcmask 392192  }
 0x1d5   :  { %5004 = vrot.lane.b32.xlu0 %v5003_v9, %s6331_s15  ;;  %v397_v9 = vsel %vm10029_vm3, %v6760_v8, %v10073_v35 }
 0x1d6   :  { %5019 = vrot.lane.b32.xlu1 %v5018_v18, %s6334_s25  ;;  %v5078_v18 = vpack.i.bf16 %v6819_v36, %v395_v50  ;;  %v10075_v36 = vrot.slane %v6823_v38, 4 }
 0x1d8   :  { %v429_v50 = vsel %vm10013_vm4, %v6936_v28, %v10075_v36  ;;  %vm10018_vm4 = vcmask 490496  }
 0x1d9   :  { %5014 = vrot.lane.b32.xlu0 %v5013_v59, %s6333_s16  ;;  %v5073_v59 = vpack.i.bf16 %v6918_v15, %v397_v9  ;;  %v5098_v15 = vpack.i.bf16 %v6835_v41, %v427_v2 }
 0x1da   :  { %5029 = vrot.lane.b32.xlu1 %v5028_v21, %s6300_s21  ;;  %v5083_v21 = vpack.i.bf16 %v6948_v32, %v413_v31  ;;  %v5108_v32 = vpack.i.bf16 %v6847_v44, %v442_v57  ;;  %v5123_v44 = vpack.i.bf16 %v6884_v58, %v474_v46  ;;  %v5133_v57 = vpack.i.bf16 %v6933_v25, %v397_v9  ;;  %v5768_v9 = vld [vmem:[#allocation10 + $0x28] sm:$0xff]  }
 0x1db   :  { %v5128_v58 = vpack.i.bf16 %v6904_v5, %v381_v17  ;;  %v10035_v25 = vmov 0  }
 0x1dc   :  { %1099 = vmatprep.subr.bf16.mxu0 %v10035_v25  ;;  %2493 = vmatprep.subr.bf16.mxu1 %v10035_v25 }
 0x1dd   :  { %5024 = vrot.lane.b32.xlu0 %v5023_v22, %s6304_s22  ;;  %v5093_v22 = vpack.i.bf16 %v6979_v63, %v429_v50  ;;  %v5118_v63 = vpack.i.bf16 %v6874_v56, %v458_v48  ;;  %v5138_v56 = vpack.i.bf16 %v6956_v40, %v413_v31  ;;  %v5764_v48 = vld [vmem:[#allocation10 + $0x8] sm:$0xff]  }
 0x1de   :  { %5039 = vrot.lane.b32.xlu1 %v5038_v16, %s6324_s17  ;;  %v10076_v16 = vrot.slane %v6823_v38, 5 }
 0x1e0   :  { %v444_v26 = vsel %vm10012_vm0, %v6939_v29, %v10076_v16  ;;  %vm10019_vm0 = vcmask 457728  }
 0x1e1   :  { %5034 = vrot.lane.b32.xlu0 %v5033_v30, %s6323_s29  ;;  %v5103_v51 = vpack.i.bf16 %v6999_v37, %v444_v26  ;;  %v10077_v30 = vrot.slane %v6823_v38, 6  ;;  %v7203_v37 = vsel %vm10008_vm6, %v7020_v62, %v475_v55  ;;  %v5143_v55 = vpack.i.bf16 %v6989_v27, %v429_v50 }
 0x1e2   :  { %5049 = vrot.lane.b32.xlu1 %v5048_v19, %s6326_s28  ;;  %v5148_v5 = vpack.i.bf16 %v7006_v47, %v444_v26  ;;  %vm10021_vm6 = vcmask 326656  }
 0x1e3   :  { %v460_v41 = vsel %vm10009_vm5, %v6964_v43, %v10077_v30  ;;  %vm10020_vm5 = vcmask 359424  }
 0x1e4   :  { %v5113_v2 = vpack.i.bf16 %v7017_v45, %v460_v41  ;;  %v5763_v45 = vld [vmem:[#allocation10] sm:$0xff]   ;;  %v5153_v19 = vpack.i.bf16 %v7027_v33, %v460_v41 }
 0x1e5   :  { %5044 = vrot.lane.b32.xlu0 %v5043_v42, %s6325_s30  ;;  %1100 = vmatpush1.bf16.msra.mxu0 %v5763_v45  ;;  %v5765_v42 = vld [vmem:[#allocation10 + $0x10] sm:$0xff]  }
 0x1e6   :  { %5059 = vrot.lane.b32.xlu1 %v5058_v0, %s6322_s4  ;;  %1101 = vmatprep.subr.bf16.mxu0 %v10035_v25 }
 0x1e9   :  { %5054 = vrot.lane.b32.xlu0 %v5053_v34, %s6327_s9  ;;  %1102 = vmatpush1.bf16.msra.mxu0 %v5764_v48  ;;  %v5767_v34 = vld [vmem:[#allocation10 + $0x20] sm:$0xff]  }
 0x1ea   :  { %5069 = vrot.lane.b32.xlu1 %v5068_v6, %s6328_s5  ;;  %1103 = vmatprep.subr.bf16.mxu0 %v10035_v25 }
 0x1ed   :  { %5064 = vrot.lane.b32.xlu0 %v5063_v49, %s6304_s22  ;;  %1104 = vmatpush1.bf16.msra.mxu0 %v5765_v42 }
 0x1ee   :  { %5079 = vrot.lane.b32.xlu1 %v5078_v18, %s6329_s8  ;;  %1105 = vmatprep.subr.bf16.mxu0 %v10035_v25 }
 0x1f1   :  { %5074 = vrot.lane.b32.xlu0 %v5073_v59, %s6300_s21  ;;  %1106 = vmatpush1.bf16.msra.mxu0 %v5766_v4 }
 0x1f2   :  { %5089 = vrot.lane.b32.xlu1 %v5088_v39, %s6330_s7  ;;  %1107 = vmatprep.subr.bf16.mxu0 %v10035_v25 }
 0x1f5   :  { %5084 = vrot.lane.b32.xlu0 %v5083_v21, %s6323_s29  ;;  %1108 = vmatpush1.bf16.msra.mxu0 %v5767_v34 }
 0x1f6   :  { %5099 = vrot.lane.b32.xlu1 %v5098_v15, %s6331_s15  ;;  %1109 = vmatprep.subr.bf16.mxu0 %v10035_v25 }
 0x1f9   :  { %5094 = vrot.lane.b32.xlu0 %v5093_v22, %s6324_s17  ;;  %1110 = vmatpush1.bf16.msra.mxu0 %v5768_v9 }
 0x1fa   :  { %5109 = vrot.lane.b32.xlu1 %v5108_v32, %s6332_s12  ;;  %1111 = vmatprep.subr.bf16.mxu0 %v10035_v25 }
 0x1fd   :  { %5104 = vrot.lane.b32.xlu0 %v5103_v51, %s6325_s30  ;;  %v5770_v51 = vld [vmem:[#allocation10 + $0x38] sm:$0xff]  }
 0x1fe   :  { %5119 = vrot.lane.b32.xlu1 %v5118_v63, %s6333_s16 }
 0x201   :  { %5114 = vrot.lane.b32.xlu0 %v5113_v2, %s6326_s28 }
 0x202   :  { %5124 = vrot.lane.b32.xlu1 %v5123_v44, %s6334_s25 }
 0x205   :  { %481 = vrot.lane.b32.xlu0 %v7203_v37, %s6327_s9 }
 0x206   :  { %5134 = vrot.lane.b32.xlu1 %v5133_v57, %s6329_s8 }
 0x209   :  { %490 = vrot.lane.b32.xlu0 %v6823_v38, %s6322_s4 }
 0x20a   :  { %5139 = vrot.lane.b32.xlu1 %v5138_v56, %s6330_s7 }
 0x20d   :  { %5129 = vrot.lane.b32.xlu0 %v5128_v58, %s6328_s5  ;;  %v5771_v58 = vld [vmem:[#allocation10 + $0x40] sm:$0xff]  }
 0x20e   :  { %5144 = vrot.lane.b32.xlu1 %v5143_v55, %s6331_s15 }
 0x20f   :  { %v7222_v40 = vpop.permute.xlu1 %4874 }
 0x210   :  { %v4877_v42 = vunpack.i.h.bf16 %v7222_v40 }
 0x211   :  { %960 = vrot.lane.b32.xlu0 %v7054_v52, %s6304_s22 }
 0x212   :  { %5149 = vrot.lane.b32.xlu1 %v5148_v5, %s6332_s12 }
 0x213   :  { %v4880_v27 = vpop.permute.xlu0 %4879 }
 0x214   :  { %v4890_v46 = vpop.permute.xlu1 %4889  ;;  %v4881_v0 = vunpack.i.l.bf16 %v4880_v27  ;;  %v4882_v14 = vunpack.i.h.bf16 %v4880_v27  ;;  %v4876_v27 = vunpack.i.l.bf16 %v7222_v40 }
 0x215   :  { %966 = vrot.lane.b32.xlu0 %v7074_v1, %s6300_s21  ;;  %v4892_v59 = vunpack.i.h.bf16 %v4890_v46 }
 0x216   :  { %5154 = vrot.lane.b32.xlu1 %v5153_v19, %s6333_s16  ;;  %v898_v49 = vsel %vm10030_vm7, %v6772_v13, %v4881_v0  ;;  %v899_v18 = vsel %vm10030_vm7, %v6766_v11, %v4882_v14  ;;  %v5769_v11 = vld [vmem:[#allocation10 + $0x30] sm:$0xff]   ;;  %v5772_v14 = vld [vmem:[#allocation10 + $0x48] sm:$0x3f]  }
 0x217   :  { %v4885_v47 = vpop.permute.xlu0 %4884  ;;  %1112 = vmatpush1.bf16.msra.mxu0 %v5769_v11  ;;  %v1097_v9 = vsel %vm10029_vm3, %v5772_v14, 0 }
 0x218   :  { %v4895_v52 = vpop.permute.xlu1 %4894  ;;  %v4886_v17 = vunpack.i.l.bf16 %v4885_v47  ;;  %v4887_v1 = vunpack.i.h.bf16 %v4885_v47  ;;  %1113 = vmatprep.subr.bf16.mxu0 %v10035_v25 }
 0x219   :  { %972 = vrot.lane.b32.xlu0 %v7065_v60, %s6323_s29  ;;  %v4891_v60 = vunpack.i.l.bf16 %v4890_v46  ;;  %v4896_v13 = vunpack.i.l.bf16 %v4895_v52 }
 0x21a   :  { %v902_v24 = vsel %vm10028_vm8, %v898_v49, %v4886_v17  ;;  %v903_v31 = vsel %vm10028_vm8, %v899_v18, %v4887_v1 }
 0x21b   :  { %v4900_v33 = vpop.permute.xlu0 %4899  ;;  %v906_v21 = vsel %vm10014_vm9, %v902_v24, %v4891_v60  ;;  %v907_v50 = vsel %vm10014_vm9, %v903_v31, %v4892_v59  ;;  %1114 = vmatpush1.bf16.msra.mxu0 %v5770_v51 }
 0x21c   :  { %v4905_v6 = vpop.permute.xlu1 %4904  ;;  %v4901_v15 = vunpack.i.l.bf16 %v4900_v33  ;;  %v4902_v16 = vunpack.i.h.bf16 %v4900_v33  ;;  %1115 = vmatprep.subr.bf16.mxu0 %v10035_v25 }
 0x21d   :  { %978 = vrot.lane.b32.xlu0 %v7088_v7, %s6324_s17  ;;  %v4897_v7 = vunpack.i.h.bf16 %v4895_v52  ;;  %v4906_v30 = vunpack.i.l.bf16 %v4905_v6  ;;  %v4907_v63 = vunpack.i.h.bf16 %v4905_v6 }
 0x21f   :  { %v4910_v35 = vpop.permute.xlu0 %4909  ;;  %v911_v26 = vsel %vm10027_vm10, %v907_v50, %v4897_v7  ;;  %1116 = vmatpush1.bf16.msra.mxu0 %v5771_v58 }
 0x220   :  { %v7245_v39 = vpop.permute.xlu1 %4919  ;;  %v4911_v2 = vunpack.i.l.bf16 %v4910_v35  ;;  %v4912_v57 = vunpack.i.h.bf16 %v4910_v35  ;;  %1117 = vmatprep.subr.bf16.mxu0 %v10035_v25 }
 0x221   :  { %984 = vrot.lane.b32.xlu0 %v7081_v20, %s6325_s30  ;;  %v910_v20 = vsel %vm10027_vm10, %v906_v21, %v4896_v13  ;;  %v4921_v46 = vunpack.i.l.bf16 %v7245_v39  ;;  %v4922_v52 = vunpack.i.h.bf16 %v7245_v39 }
 0x222   :  { %v914_v41 = vsel %vm10026_vm11, %v910_v20, %v4901_v15 }
 0x223   :  { %v7250_v36 = vpop.permute.xlu0 %4914  ;;  %v918_v55 = vsel %vm10025_vm12, %v914_v41, %v4906_v30  ;;  %1118 = vmatpush1.bf16.msra.mxu0 %v1097_v9 }
 0x224   :  { %v7254_v22 = vpop.permute.xlu1 %4929  ;;  %v922_v5 = vsel %vm10024_vm13, %v918_v55, %v4911_v2  ;;  %v4917_v33 = vunpack.i.h.bf16 %v7250_v36  ;;  %v4916_v40 = vunpack.i.l.bf16 %v7250_v36 }
 0x225   :  { %990 = vrot.lane.b32.xlu0 %v7098_v23, %s6326_s28  ;;  %v915_v23 = vsel %vm10026_vm11, %v911_v26, %v4902_v16  ;;  %v926_v4 = vsel %vm10023_vm14, %v922_v5, %v4876_v27  ;;  %v4932_v17 = vunpack.i.h.bf16 %v7254_v22  ;;  %v4931_v1 = vunpack.i.l.bf16 %v7254_v22 }
 0x226   :  { %v919_v45 = vsel %vm10025_vm12, %v915_v23, %v4907_v63  ;;  %v930_v6 = vsel %vm10022_vm15, %v926_v4, %v4921_v46  ;;  %v901_v39 = vsel %vm10030_vm7, %v6863_v53, %v4917_v33  ;;  %v900_v13 = vsel %vm10030_vm7, %v6823_v38, %v4916_v40 }
 0x227   :  { %v7260_v32 = vpop.permute.xlu0 %4924  ;;  %v923_v19 = vsel %vm10024_vm13, %v919_v45, %v4912_v57  ;;  %v934_v11 = vsel %vm10021_vm6, %v930_v6, %v4931_v1  ;;  %v5163_v6 = vpack.i.bf16 %v7045_v61, %v7203_v37 }
 0x228   :  { %v7264_v44 = vpop.permute.xlu1 %4939  ;;  %v927_v0 = vsel %vm10023_vm14, %v923_v19, %v4877_v42  ;;  %v4927_v49 = vunpack.i.h.bf16 %v7260_v32  ;;  %v4926_v60 = vunpack.i.l.bf16 %v7260_v32 }
 0x229   :  { %v931_v18 = vsel %vm10022_vm15, %v927_v0, %v4922_v52  ;;  %v4942_v59 = vunpack.i.h.bf16 %v7264_v44  ;;  %v4941_v24 = vunpack.i.l.bf16 %v7264_v44 }
 0x22a   :  { %v935_v50 = vsel %vm10021_vm6, %v931_v18, %v4932_v17  ;;  %v904_v20 = vsel %vm10028_vm8, %v900_v13, %v4926_v60  ;;  %v905_v16 = vsel %vm10028_vm8, %v901_v39, %v4927_v49 }
 0x22b   :  { %v7267_v56 = vpop.permute.xlu0 %4934  ;;  %v938_v53 = vsel %vm10020_vm5, %v934_v11, %v4941_v24  ;;  %v939_v38 = vsel %vm10020_vm5, %v935_v50, %v4942_v59 }
 0x22c   :  { %v4950_v48 = vpop.permute.xlu1 %4949  ;;  %v4936_v31 = vunpack.i.l.bf16 %v7267_v56  ;;  %v4937_v30 = vunpack.i.h.bf16 %v7267_v56 }
 0x22d   :  { %v4952_v7 = vunpack.i.h.bf16 %v4950_v48  ;;  %v4951_v21 = vunpack.i.l.bf16 %v4950_v48 }
 0x22e   :  { %v908_v41 = vsel %vm10014_vm9, %v904_v20, %v4936_v31  ;;  %v909_v0 = vsel %vm10014_vm9, %v905_v16, %v4937_v30 }
 0x22f   :  { %v7277_v47 = vpop.permute.xlu0 %4944  ;;  %v942_v63 = vsel %vm10016_vm2, %v938_v53, %v4951_v21  ;;  %v943_v2 = vsel %vm10016_vm2, %v939_v38, %v4952_v7 }
 0x230   :  { %v4960_v34 = vpop.permute.xlu1 %4959  ;;  %v4947_v44 = vunpack.i.h.bf16 %v7277_v47  ;;  %v4946_v23 = vunpack.i.l.bf16 %v7277_v47 }
 0x231   :  { %v4962_v15 = vunpack.i.h.bf16 %v4960_v34  ;;  %v4961_v22 = vunpack.i.l.bf16 %v4960_v34 }
 0x232   :  { %v912_v17 = vsel %vm10027_vm10, %v908_v41, %v4946_v23  ;;  %v913_v1 = vsel %vm10027_vm10, %v909_v0, %v4947_v44 }
 0x233   :  { %v4955_v35 = vpop.permute.xlu0 %4954  ;;  %v946_v45 = vsel %vm10015_vm1, %v942_v63, %v4961_v22  ;;  %v947_v5 = vsel %vm10015_vm1, %v943_v2, %v4962_v15 }
 0x234   :  { %v4970_v36 = vpop.permute.xlu1 %4969  ;;  %v4957_v48 = vunpack.i.h.bf16 %v4955_v35  ;;  %v4956_v27 = vunpack.i.l.bf16 %v4955_v35 }
 0x235   :  { %v4972_v26 = vunpack.i.h.bf16 %v4970_v36  ;;  %v4971_v32 = vunpack.i.l.bf16 %v4970_v36 }
 0x236   :  { %v916_v49 = vsel %vm10026_vm11, %v912_v17, %v4956_v27  ;;  %v917_v60 = vsel %vm10026_vm11, %v913_v1, %v4957_v48 }
 0x237   :  { %v4965_v51 = vpop.permute.xlu0 %4964  ;;  %v950_v19 = vsel %vm10019_vm0, %v946_v45, %v4971_v32  ;;  %v951_v42 = vsel %vm10019_vm0, %v947_v5, %v4972_v26 }
 0x238   :  { %v4980_v57 = vpop.permute.xlu1 %4979  ;;  %v4967_v46 = vunpack.i.h.bf16 %v4965_v51  ;;  %v4966_v52 = vunpack.i.l.bf16 %v4965_v51 }
 0x239   :  { %v4982_v58 = vunpack.i.h.bf16 %v4980_v57  ;;  %v4981_v55 = vunpack.i.l.bf16 %v4980_v57 }
 0x23a   :  { %v920_v9 = vsel %vm10025_vm12, %v916_v49, %v4966_v52  ;;  %v921_v18 = vsel %vm10025_vm12, %v917_v60, %v4967_v46 }
 0x23b   :  { %v4975_v56 = vpop.permute.xlu0 %4974  ;;  %v954_v4 = vsel %vm10018_vm4, %v950_v19, %v4981_v55  ;;  %v955_v47 = vsel %vm10018_vm4, %v951_v42, %v4982_v58 }
 0x23c   :  { %v4977_v33 = vunpack.i.h.bf16 %v4975_v56  ;;  %v4976_v40 = vunpack.i.l.bf16 %v4975_v56  ;;  %v4990_v34 = vpop.permute.xlu1 %4989  ;;  %v5158_v14 = vpack.i.bf16 %v955_v47, %v954_v4 }
 0x23d   :  { %v4992_v13 = vunpack.i.h.bf16 %v4990_v34  ;;  %v4991_v7 = vunpack.i.l.bf16 %v4990_v34 }
 0x23e   :  { %5159 = vrot.lane.b32.xlu1 %v5158_v14, %s6303_s26  ;;  %v924_v31 = vsel %vm10024_vm13, %v920_v9, %v4976_v40  ;;  %v925_v39 = vsel %vm10024_vm13, %v921_v18, %v4977_v33 }
 0x23f   :  { %v4985_v35 = vpop.permute.xlu0 %4984 }
 0x240   :  { %v4987_v59 = vunpack.i.h.bf16 %v4985_v35  ;;  %v4986_v24 = vunpack.i.l.bf16 %v4985_v35  ;;  %v5000_v61 = vpop.permute.xlu1 %4999 }
 0x241   :  { %v5002_v15 = vunpack.i.h.bf16 %v5000_v61  ;;  %v5001_v22 = vunpack.i.l.bf16 %v5000_v61 }
 0x242   :  { %v928_v37 = vsel %vm10023_vm14, %v924_v31, %v4986_v24  ;;  %v929_v21 = vsel %vm10023_vm14, %v925_v39, %v4987_v59  ;;  %5164 = vrot.lane.b32.xlu1 %v5163_v6, %s6334_s25 }
 0x243   :  { %v4995_v36 = vpop.permute.xlu0 %4994  ;;  %v932_v20 = vsel %vm10022_vm15, %v928_v37, %v4991_v7  ;;  %v933_v16 = vsel %vm10022_vm15, %v929_v21, %v4992_v13 }
 0x244   :  { %v4997_v11 = vunpack.i.h.bf16 %v4995_v36  ;;  %v4996_v50 = vunpack.i.l.bf16 %v4995_v36  ;;  %v5010_v26 = vpop.permute.xlu1 %5009 }
 0x245   :  { %v5012_v41 = vunpack.i.h.bf16 %v5010_v26  ;;  %v5011_v63 = vunpack.i.l.bf16 %v5010_v26 }
 0x246   :  { %v936_v32 = vsel %vm10021_vm6, %v932_v20, %v4996_v50  ;;  %v937_v51 = vsel %vm10021_vm6, %v933_v16, %v4997_v11 }
 0x247   :  { %v5005_v53 = vpop.permute.xlu0 %5004  ;;  %v940_v2 = vsel %vm10020_vm5, %v936_v32, %v5001_v22  ;;  %v941_v44 = vsel %vm10020_vm5, %v937_v51, %v5002_v15 }
 0x248   :  { %v5007_v38 = vunpack.i.h.bf16 %v5005_v53  ;;  %v5006_v30 = vunpack.i.l.bf16 %v5005_v53  ;;  %v5020_v58 = vpop.permute.xlu1 %5019 }
 0x249   :  { %v5022_v55 = vunpack.i.h.bf16 %v5020_v58  ;;  %v5021_v45 = vunpack.i.l.bf16 %v5020_v58 }
 0x24a   :  { %v944_v23 = vsel %vm10016_vm2, %v940_v2, %v5006_v30  ;;  %v945_v57 = vsel %vm10016_vm2, %v941_v44, %v5007_v38 }
 0x24b   :  { %v5015_v5 = vpop.permute.xlu0 %5014  ;;  %v948_v56 = vsel %vm10015_vm1, %v944_v23, %v5011_v63  ;;  %v949_v19 = vsel %vm10015_vm1, %v945_v57, %v5012_v41 }
 0x24c   :  { %v5017_v48 = vunpack.i.h.bf16 %v5015_v5  ;;  %v5016_v27 = vunpack.i.l.bf16 %v5015_v5  ;;  %v5030_v33 = vpop.permute.xlu1 %5029 }
 0x24d   :  { %v5031_v9 = vunpack.i.l.bf16 %v5030_v33 }
 0x24e   :  { %v952_v42 = vsel %vm10019_vm0, %v948_v56, %v5016_v27  ;;  %v953_v46 = vsel %vm10019_vm0, %v949_v19, %v5017_v48  ;;  %v5032_v27 = vunpack.i.h.bf16 %v5030_v33 }
 0x24f   :  { %v5025_v52 = vpop.permute.xlu0 %5024  ;;  %v956_v4 = vsel %vm10018_vm4, %v952_v42, %v5021_v45  ;;  %v957_v47 = vsel %vm10018_vm4, %v953_v46, %v5022_v55 }
 0x250   :  { %v5168_v0 = vpack.i.bf16 %v957_v47, %v956_v4  ;;  %v5040_v14 = vpop.permute.xlu1 %5039  ;;  %v5026_v49 = vunpack.i.l.bf16 %v5025_v52  ;;  %v5027_v5 = vunpack.i.h.bf16 %v5025_v52 }
 0x251   :  { %v5041_v37 = vunpack.i.l.bf16 %v5040_v14  ;;  %v5042_v47 = vunpack.i.h.bf16 %v5040_v14 }
 0x252   :  { %5169 = vrot.lane.b32.xlu1 %v5168_v0, %s6303_s26  ;;  %v608_v18 = vsel %vm10030_vm7, 0.0, %v5026_v49  ;;  %v609_v56 = vsel %vm10030_vm7, 0.0, %v5027_v5 }
 0x253   :  { %v5035_v40 = vpop.permute.xlu0 %5034  ;;  %v612_v7 = vsel %vm10028_vm8, %v608_v18, %v5031_v9  ;;  %v613_v46 = vsel %vm10028_vm8, %v609_v56, %v5032_v27 }
 0x254   :  { %v5050_v1 = vpop.permute.xlu1 %5049  ;;  %v5036_v31 = vunpack.i.l.bf16 %v5035_v40  ;;  %v5037_v42 = vunpack.i.h.bf16 %v5035_v40 }
 0x255   :  { %v5051_v26 = vunpack.i.l.bf16 %v5050_v1  ;;  %v5052_v18 = vunpack.i.h.bf16 %v5050_v1 }
 0x256   :  { %v616_v36 = vsel %vm10014_vm9, %v612_v7, %v5036_v31  ;;  %v617_v0 = vsel %vm10014_vm9, %v613_v46, %v5037_v42 }
 0x257   :  { %v5045_v34 = vpop.permute.xlu0 %5044  ;;  %v620_v20 = vsel %vm10027_vm10, %v616_v36, %v5041_v37  ;;  %v621_v52 = vsel %vm10027_vm10, %v617_v0, %v5042_v47 }
 0x258   :  { %v7355_v59 = vpop.permute.xlu1 %5059  ;;  %v5046_v22 = vunpack.i.l.bf16 %v5045_v34 }
 0x259   :  { %v5062_v7 = vunpack.i.h.bf16 %v7355_v59 }
 0x25a   :  { %v624_v53 = vsel %vm10026_vm11, %v620_v20, %v5046_v22 }
 0x25b   :  { %v7347_v17 = vpop.permute.xlu0 %5054  ;;  %v7382_v63 = vsel %vm10025_vm12, %v624_v53, %v5051_v26 }
 0x25c   :  { %v7366_v11 = vpop.permute.xlu1 %5069  ;;  %10078 = vst [vmem:[#allocation47_spill] sm:$0xff] %v7382_v63  ;;  %v5057_v40 = vunpack.i.h.bf16 %v7347_v17  ;;  %v5056_v31 = vunpack.i.l.bf16 %v7347_v17 }
 0x25d   :  { %v5072_v36 = vunpack.i.h.bf16 %v7366_v11  ;;  %v5071_v17 = vunpack.i.l.bf16 %v7366_v11 }
 0x25e   :  { %v632_v1 = vsel %vm10024_vm13, %v7382_v63, %v5056_v31 }
 0x25f   :  { %v7349_v6 = vpop.permute.xlu0 %5064 }
 0x260   :  { %v5067_v60 = vunpack.i.h.bf16 %v7349_v6  ;;  %v5080_v38 = vpop.permute.xlu1 %5079 }
 0x261   :  { %v5082_v20 = vunpack.i.h.bf16 %v5080_v38  ;;  %v5081_v26 = vunpack.i.l.bf16 %v5080_v38 }
 0x262   :  { %v994_v39 = vsel %vm10030_vm7, %v6769_v12, %v5067_v60  ;;  %v5047_v60 = vunpack.i.h.bf16 %v5045_v34  ;;  %v5066_v34 = vunpack.i.l.bf16 %v7349_v6 }
 0x263   :  { %v7352_v35 = vpop.permute.xlu0 %5074 }
 0x264   :  { %v5077_v24 = vunpack.i.h.bf16 %v7352_v35  ;;  %v5090_v23 = vpop.permute.xlu1 %5089  ;;  %v625_v33 = vsel %vm10026_vm11, %v621_v52, %v5047_v60  ;;  %v610_v6 = vsel %vm10030_vm7, 0.0, %v5066_v34 }
 0x266   :  { %v996_v21 = vsel %vm10028_vm8, %v994_v39, %v5077_v24  ;;  %v629_v39 = vsel %vm10025_vm12, %v625_v33, %v5052_v18 }
 0x267   :  { %v7360_v13 = vpop.permute.xlu0 %5084  ;;  %v633_v37 = vsel %vm10024_vm13, %v629_v39, %v5057_v40 }
 0x268   :  { %v5087_v61 = vunpack.i.h.bf16 %v7360_v13  ;;  %v7388_v58 = vpop.permute.xlu1 %5099 }
 0x269   :  { %v5102_v56 = vunpack.i.h.bf16 %v7388_v58  ;;  %v5101_v42 = vunpack.i.l.bf16 %v7388_v58 }
 0x26a   :  { %v998_v12 = vsel %vm10014_vm9, %v996_v21, %v5087_v61  ;;  %v5061_v61 = vunpack.i.l.bf16 %v7355_v59  ;;  %v637_v59 = vsel %vm10023_vm14, %v633_v37, %v5062_v7 }
 0x26b   :  { %v7368_v50 = vpop.permute.xlu0 %5094  ;;  %v641_v53 = vsel %vm10022_vm15, %v637_v59, %v5072_v36 }
 0x26c   :  { %v5097_v15 = vunpack.i.h.bf16 %v7368_v50  ;;  %v7392_v45 = vpop.permute.xlu1 %5109  ;;  %v7424_v22 = vsel %vm10023_vm14, %v632_v1, %v5061_v61  ;;  %v646_v5 = vsel %vm10021_vm6, %v641_v53, %v5082_v20 }
 0x26d   :  { %10079 = vst [vmem:[#allocation48_spill] sm:$0xff] %v7424_v22  ;;  %v5112_v52 = vunpack.i.h.bf16 %v7392_v45 }
 0x26e   :  { %v1000_v51 = vsel %vm10027_vm10, %v998_v12, %v5097_v15  ;;  %v5076_v15 = vunpack.i.l.bf16 %v7352_v35 }
 0x26f   :  { %v7373_v16 = vpop.permute.xlu0 %5104 }
 0x270   :  { %v5107_v32 = vunpack.i.h.bf16 %v7373_v16  ;;  %v7397_v19 = vpop.permute.xlu1 %5119  ;;  %v614_v11 = vsel %vm10028_vm8, %v610_v6, %v5076_v15  ;;  %v5106_v46 = vunpack.i.l.bf16 %v7373_v16 }
 0x271   :  { %v5122_v31 = vunpack.i.h.bf16 %v7397_v19  ;;  %v5121_v39 = vunpack.i.l.bf16 %v7397_v19 }
 0x272   :  { %v1002_v41 = vsel %vm10026_vm11, %v1000_v51, %v5107_v32  ;;  %v5086_v32 = vunpack.i.l.bf16 %v7360_v13  ;;  %v640_v51 = vsel %vm10022_vm15, %v7424_v22, %v5071_v17 }
 0x273   :  { %v7378_v30 = vpop.permute.xlu0 %5114 }
 0x274   :  { %v5117_v2 = vunpack.i.h.bf16 %v7378_v30  ;;  %v7403_v49 = vpop.permute.xlu1 %5124  ;;  %v618_v38 = vsel %vm10014_vm9, %v614_v11, %v5086_v32 }
 0x275   :  { %v5127_v34 = vunpack.i.h.bf16 %v7403_v49  ;;  %v5126_v1 = vunpack.i.l.bf16 %v7403_v49 }
 0x276   :  { %v1004_v44 = vsel %vm10025_vm12, %v1002_v41, %v5117_v2  ;;  %v5092_v41 = vunpack.i.h.bf16 %v5090_v23  ;;  %v5091_v2 = vunpack.i.l.bf16 %v5090_v23 }
 0x277   :  { %v1028_v57 = vpack.c.bf16 %v7382_v63, %v1004_v44  ;;  %v7390_v55 = vpop.permute.xlu0 %481  ;;  %v5096_v44 = vunpack.i.l.bf16 %v7368_v50 }
 0x278   :  { %v7407_v24 = vpop.permute.xlu1 %5134  ;;  %v651_v50 = vsel %vm10020_vm5, %v646_v5, %v5092_v41 }
 0x279   :  { %4738 = vmatprep.mubr.msk.bf16.mxu0 %vm10024_vm13, %v1028_v57  ;;  %v645_v57 = vsel %vm10021_vm6, %v640_v51, %v5081_v26  ;;  %v622_v47 = vsel %vm10027_vm10, %v618_v38, %v5096_v44  ;;  %v656_v58 = vsel %vm10016_vm2, %v651_v50, %v5102_v56  ;;  %v5137_v41 = vunpack.i.h.bf16 %v7407_v24 }
 0x27a   :  { %v650_v23 = vsel %vm10020_vm5, %v645_v57, %v5091_v2  ;;  %v626_v16 = vsel %vm10026_vm11, %v622_v47, %v5106_v46  ;;  %v661_v7 = vsel %vm10015_vm1, %v656_v58, %v5112_v52  ;;  %v5136_v2 = vunpack.i.l.bf16 %v7407_v24 }
 0x27b   :  { %v7394_v48 = vpop.permute.xlu0 %490  ;;  %v655_v18 = vsel %vm10016_vm2, %v650_v23, %v5101_v42  ;;  %v666_v36 = vsel %vm10019_vm0, %v661_v7, %v5122_v31 }
 0x27c   :  { %v7418_v21 = vpop.permute.xlu1 %5139 }
 0x27d   :  { %v5142_v5 = vunpack.i.h.bf16 %v7418_v21  ;;  %v5141_v38 = vunpack.i.l.bf16 %v7418_v21 }
 0x27f   :  { %v7400_v4 = vpop.permute.xlu0 %5129 }
 0x280   :  { %v7433_v35 = vpop.permute.xlu1 %5144  ;;  %v5132_v6 = vunpack.i.h.bf16 %v7400_v4 }
 0x281   :  { %v5147_v24 = vunpack.i.h.bf16 %v7433_v35  ;;  %v5146_v56 = vunpack.i.l.bf16 %v7433_v35 }
 0x283   :  { %v961_v9 = vpop.permute.xlu0 %960 }
 0x284   :  { %v995_v13 = vsel %vm10030_vm7, %v6866_v54, %v961_v9  ;;  %v5150_v0 = vpop.permute.xlu1 %5149  ;;  %v5111_v54 = vunpack.i.l.bf16 %v7392_v45  ;;  %v5116_v9 = vunpack.i.l.bf16 %v7378_v30 }
 0x285   :  { %v5152_v23 = vunpack.i.h.bf16 %v5150_v0  ;;  %v5151_v50 = vunpack.i.l.bf16 %v5150_v0 }
 0x286   :  { %v630_v45 = vsel %vm10025_vm12, %v626_v16, %v5116_v9 }
 0x287   :  { %v967_v14 = vpop.permute.xlu0 %966  ;;  %v634_v19 = vsel %vm10024_vm13, %v630_v45, %v7390_v55  ;;  %v671_v55 = vsel %vm10018_vm4, %v666_v36, %v5127_v34  ;;  %v5774_v34 = vld [vmem:[#allocation11 + $0x8] ss:$0 sps:$4 sm:$0xff]  }
 0x288   :  { %v997_v60 = vsel %vm10028_vm8, %v995_v13, %v967_v14  ;;  %v660_v14 = vsel %vm10015_vm1, %v655_v18, %v5111_v54  ;;  %v5155_v30 = vpop.permute.xlu1 %5154  ;;  %v638_v49 = vsel %vm10023_vm14, %v634_v19, %v7394_v48 }
 0x289   :  { %v665_v37 = vsel %vm10019_vm0, %v660_v14, %v5121_v39  ;;  %v643_v48 = vsel %vm10022_vm15, %v638_v49, %v5132_v6  ;;  %v5157_v52 = vunpack.i.h.bf16 %v5155_v30  ;;  %v5156_v54 = vunpack.i.l.bf16 %v5155_v30  ;;  %v7510_v49 = vld [vmem:[#allocation5] sm:$0xff] }
 0x28a   :  { %v670_v51 = vsel %vm10018_vm4, %v665_v37, %v5126_v1 }
 0x28b   :  { %v973_v12 = vpop.permute.xlu0 %972 }
 0x28c   :  { %v999_v33 = vsel %vm10014_vm9, %v997_v60, %v973_v12  ;;  %vm10017_vm9 = vcmask 523264   ;;  %v5131_v12 = vunpack.i.l.bf16 %v7400_v4 }
 0x28e   :  { %v642_v44 = vsel %vm10022_vm15, %v7424_v22, %v5131_v12 }
 0x28f   :  { %v979_v27 = vpop.permute.xlu0 %978  ;;  %v647_v13 = vsel %vm10021_vm6, %v642_v44, %v5136_v2 }
 0x290   :  { %v1001_v61 = vsel %vm10027_vm10, %v999_v33, %v979_v27  ;;  %v648_v27 = vsel %vm10021_vm6, %v643_v48, %v5137_v41  ;;  %v652_v42 = vsel %vm10020_vm5, %v647_v13, %v5141_v38 }
 0x291   :  { %v653_v46 = vsel %vm10020_vm5, %v648_v27, %v5142_v5  ;;  %v657_v47 = vsel %vm10016_vm2, %v652_v42, %v5146_v56 }
 0x292   :  { %v658_v21 = vsel %vm10016_vm2, %v653_v46, %v5147_v24  ;;  %v662_v9 = vsel %vm10015_vm1, %v657_v47, %v5151_v50 }
 0x293   :  { %v985_v40 = vpop.permute.xlu0 %984  ;;  %v663_v18 = vsel %vm10015_vm1, %v658_v21, %v5152_v23  ;;  %v667_v33 = vsel %vm10019_vm0, %v662_v9, %v5156_v54  ;;  %vm10080_vm1 = vcmask 1043456  }
 0x294   :  { %v1003_v17 = vsel %vm10026_vm11, %v1001_v61, %v985_v40  ;;  %v668_v40 = vsel %vm10019_vm0, %v663_v18, %v5157_v52  ;;  %v5773_v61 = vld [vmem:[#allocation11] sm:$0xff]   ;;  %vm10081_vm2 = vmmov %vm10080_vm1 }
 0x295   :  { %4798 = vmatprep.subr.bf16.mxu0 %v5773_v61  ;;  %v1598_v1 = vsel %vm10081_vm2, %v5774_v34, 0  ;;  %vm1150_vm2 = vcmp.eq.s32.totalorder %v7510_v49, 1 }
 0x297   :  { %v991_v15 = vpop.permute.xlu0 %990 }
 0x298   :  { %v1005_v32 = vsel %vm10025_vm12, %v1003_v17, %v991_v15 }
 0x299   :  { %v1030_v57 = vpack.c.bf16 %v7382_v63, %v1005_v32 }
 0x2b0   :  { %v5160_v59 = vpop.permute.xlu1 %5159 }
 0x2b1   :  { %v5162_v20 = vunpack.i.h.bf16 %v5160_v59  ;;  %v5161_v26 = vunpack.i.l.bf16 %v5160_v59 }
 0x2b3   :  { %v1023_v53 = vsel %vm10017_vm9, %v670_v51, %v5161_v26  ;;  %v1024_v11 = vsel %vm10017_vm9, %v671_v55, %v5162_v20  ;;  %v7514_v51 = vld [vmem:[#allocation5 + $0x18] sm:$0xff]  ;;  %v7516_v55 = vld [vmem:[#allocation5 + $0x8] sm:$0xff] }
 0x2b4   :  { %v1027_v4 = vpack.c.bf16 %v1024_v11, %v1023_v53  ;;  %v5165_v60 = vpop.permute.xlu1 %5164  ;;  %v7523_v11 = vld [vmem:[#allocation5 + $0x10] sm:$0xff]  ;;  %vm1181_vm15 = vcmp.eq.s32.totalorder %v7514_v51, 0  ;;  %vm1183_vm14 = vcmp.eq.s32.totalorder %v7514_v51, 1  ;;  %vm1187_vm3 = vcmp.eq.s32.totalorder %v7514_v51, 3 }
 0x2b5   :  { %v5167_v58 = vunpack.i.h.bf16 %v5165_v60  ;;  %v5166_v16 = vunpack.i.l.bf16 %v5165_v60  ;;  %vm1180_vm6 = vcmp.eq.s32.totalorder %v7523_v11, 0  ;;  %vm1182_vm5 = vcmp.eq.s32.totalorder %v7523_v11, 1 }
 0x2b6   :  { %1132 = vmatmul.mubr.bf16.vlgmr.msra.gmra.mrb[0].mxu0 %v1027_v4  ;;  %vm1186_vm11 = vcmp.eq.s32.totalorder %v7523_v11, 3  ;;  %vm1189_vm8 = vcmp.eq.s32.totalorder %v7514_v51, 4  ;;  %vm1191_vm10 = vcmp.eq.s32.totalorder %v7514_v51, 5  ;;  %vm1190_vm0 = vcmp.eq.s32.totalorder %v7523_v11, 5 }
 0x2b7   :  { %4739 = vmatprep.mubr.msk.bf16.mxu0 %vm10024_vm13, %v1030_v57  ;;  %v672_v39 = vsel %vm10018_vm4, %v667_v33, %v5166_v16  ;;  %v673_v14 = vsel %vm10018_vm4, %v668_v40, %v5167_v58  ;;  %4799 = vmatpush3.bf16.msra.mxu0 %v5773_v61  ;;  %vm1154_vm4 = vcmp.eq.s32.totalorder %v7510_v49, 3  ;;  %vm1188_vm13 = vcmp.eq.s32.totalorder %v7523_v11, 4 }
 0x2b8   :  { %4828 = vmatprep.subr.msk.bf16.mxu0 %vm10080_vm1, %v5774_v34  ;;  %vm1148_vm1 = vcmp.eq.s32.totalorder %v7510_v49, 0 }
 0x2bb   :  { %4801 = vmatpush3.bf16.msra.mxu0 %v1598_v1 }
 0x2c4   :  { %v5170_v35 = vpop.permute.xlu1 %5169 }
 0x2c5   :  { %v5172_v31 = vunpack.i.h.bf16 %v5170_v35  ;;  %v5171_v0 = vunpack.i.l.bf16 %v5170_v35 }
 0x2c7   :  { %v1025_v7 = vsel %vm10017_vm9, %v672_v39, %v5171_v0  ;;  %v1026_v45 = vsel %vm10017_vm9, %v673_v14, %v5172_v31  ;;  %vm1152_vm9 = vcmp.eq.s32.totalorder %v7510_v49, 2 }
 0x2c8   :  { %v1029_v30 = vpack.c.bf16 %v1026_v45, %v1025_v7 }
 0x2ca   :  { %1140 = vmatmul.mubr.bf16.gmra.mrb[4].mxu0 %v1029_v30 }
 0x389   :  { %v1133_v37 = vpop.f32.mrb[0].mxu0 }
 0x38a   :  { %1216 = vrot.lane.b32.xlu0 %v1133_v37, %s6336_s2  ;;  %v1135_v36 = vpop.f32.mrb[1].mxu0 }
 0x38b   :  { %v1136_v19 = vpop.f32.mrb[2].mxu0 }
 0x38c   :  { %v1580_v17 = vpack.c.bf16 %v1136_v19, %v1133_v37  ;;  %1218 = vrot.lane.b32.xlu1 %v1136_v19, %s6336_s2  ;;  %v1138_v15 = vpop.f32.mrb[3].mxu0 }
 0x38e   :  { %4802 = vmatprep.mubr.msk.bf16.mxu0 %vm10025_vm12, %v1580_v17 }
 0x39d   :  { %v1141_v59 = vpop.f32.mrb[4].mxu0 }
 0x39e   :  { %1220 = vrot.lane.b32.xlu0 %v1141_v59, %s6336_s2  ;;  %v1143_v6 = vpop.f32.mrb[5].mxu0 }
 0x39f   :  { %v1144_v12 = vpop.f32.mrb[6].mxu0 }
 0x3a0   :  { %v1581_v20 = vpack.c.bf16 %v1144_v12, %v1141_v59  ;;  %1222 = vrot.lane.b32.xlu1 %v1144_v12, %s6336_s2  ;;  %v1146_v26 = vpop.f32.mrb[7].mxu0 }
 0x3a2   :  { %4803 = vmatmul.mubr.msk.bf16.vlgmr.msra.gmra.mrb[8].mxu0 %vm10025_vm12, %v1581_v20  ;;  %vm1185_vm12 = vcmp.eq.s32.totalorder %v7514_v51, 2 }
 0x3fc   :  { %v7518_v53 = vpop.permute.xlu0 %1216 }
 0x3fd   :  { %v1228_v48 = vsel %vm1148_vm1, %v7518_v53, 0.0  ;;  %v1230_v38 = vsel %vm1150_vm2, %v7518_v53, 0.0  ;;  %v1232_v13 = vsel %vm1152_vm9, %v7518_v53, 0.0  ;;  %v1234_v42 = vsel %vm1154_vm4, %v7518_v53, 0.0 }
 0x3fe   :  { %v7512_v32 = vpop.permute.xlu1 %1218  ;;  %vm10084_vm9 = vcmp.eq.s32.totalorder %v7510_v49, 5  ;;  %vm10086_vm4 = vcmp.eq.s32.totalorder %v7523_v11, 2  ;;  %vm10088_vm1 = vcmp.eq.s32.totalorder %v7516_v55, 2  ;;  %vm10089_vm2 = vcmp.eq.s32.totalorder %v7516_v55, 3 }
 0x3ff   :  { %v7580_v50 = vsel %vm10084_vm9, %v7518_v53, 0.0  ;;  %v1233_v16 = vsel %vm10088_vm1, %v7512_v32, 0.0  ;;  %v1235_v35 = vsel %vm10089_vm2, %v7512_v32, 0.0  ;;  %vm1163_vm9 = vcmp.eq.s32.totalorder %v7516_v55, 7 }
 0x400   :  { %v1292_v30 = vsel %vm10030_vm7, %v1228_v48, 0.0  ;;  %v1301_v61 = vsel %vm10030_vm7, %v1230_v38, 0.0  ;;  %v1311_v34 = vsel %vm10030_vm7, %v1233_v16, 0.0  ;;  %v1310_v6 = vsel %vm10030_vm7, %v1232_v13, 0.0 }
 0x401   :  { %v1312_v20 = vadd.f32 %v1311_v34, %v1310_v6  ;;  %v1320_v26 = vsel %vm10030_vm7, %v1235_v35, 0.0  ;;  %vm10033_vm1 = vcmask 1044484   ;;  %vm1198_vm2 = vcmp.eq.s32.totalorder %v7523_v11, 9 }
 0x410   :  { %v7539_v2 = vpop.permute.xlu0 %1220 }
 0x411   :  { %v1260_v57 = vsel %vm1180_vm6, %v7539_v2, 0.0  ;;  %v1262_v5 = vsel %vm1182_vm5, %v7539_v2, 0.0  ;;  %vm10082_vm5 = vcmp.eq.s32.totalorder %v7516_v55, 0  ;;  %vm10083_vm6 = vcmp.eq.s32.totalorder %v7510_v49, 4 }
 0x412   :  { %v7529_v41 = vpop.permute.xlu1 %1222  ;;  %v1229_v46 = vsel %vm10082_vm5, %v7512_v32, 0.0  ;;  %v1236_v23 = vsel %vm10083_vm6, %v7518_v53, 0.0  ;;  %v1264_v21 = vsel %vm10086_vm4, %v7539_v2, 0.0  ;;  %v1436_v60 = vsel %vm10030_vm7, %v1260_v57, 0.0 }
 0x413   :  { %v1261_v4 = vsel %vm1181_vm15, %v7529_v41, 0.0  ;;  %v1263_v44 = vsel %vm1183_vm14, %v7529_v41, 0.0  ;;  %v1265_v27 = vsel %vm1185_vm12, %v7529_v41, 0.0  ;;  %vm10085_vm12 = vcmp.eq.s32.totalorder %v7510_v49, 6 }
 0x414   :  { %v1437_v24 = vsel %vm10030_vm7, %v1261_v4, 0.0  ;;  %v1446_v56 = vsel %vm10030_vm7, %v1263_v44, 0.0  ;;  %v7585_v47 = vsel %vm10085_vm12, %v7518_v53, 0.0  ;;  %v1445_v52 = vsel %vm10030_vm7, %v1262_v5, 0.0 }
 0x415   :  { %vm10087_vm14 = vcmp.eq.s32.totalorder %v7516_v55, 1  ;;  %vm1193_vm15 = vcmp.eq.s32.totalorder %v7514_v51, 6  ;;  %v1438_v9 = vadd.f32 %v1437_v24, %v1436_v60  ;;  %v1447_v18 = vadd.f32 %v1446_v56, %v1445_v52 }
 0x416   :  { %v1231_v54 = vsel %vm10087_vm14, %v7512_v32, 0.0  ;;  %v1455_v58 = vsel %vm10030_vm7, %v1265_v27, 0.0  ;;  %vm10090_vm5 = vcmp.eq.s32.totalorder %v7516_v55, 4  ;;  %vm10091_vm6 = vcmp.eq.s32.totalorder %v7516_v55, 5 }
 0x417   :  { %v1237_v33 = vsel %vm10090_vm5, %v7512_v32, 0.0  ;;  %v1239_v40 = vsel %vm10091_vm6, %v7512_v32, 0.0  ;;  %v1293_v31 = vsel %vm10030_vm7, %v1229_v46, 0.0  ;;  %v1267_v0 = vsel %vm1187_vm3, %v7529_v41, 0.0 }
 0x418   :  { %v1454_v39 = vsel %vm10030_vm7, %v1264_v21, 0.0  ;;  %vm10092_vm12 = vcmp.eq.s32.totalorder %v7516_v55, 6  ;;  %v1302_v7 = vsel %vm10030_vm7, %v1231_v54, 0.0  ;;  %vm1192_vm3 = vcmp.eq.s32.totalorder %v7523_v11, 6 }
 0x419   :  { %v7618_v14 = vsel %vm10092_vm12, %v7512_v32, 0.0  ;;  %v1456_v45 = vadd.f32 %v1455_v58, %v1454_v39  ;;  %v1266_v1 = vsel %vm1186_vm11, %v7539_v2, 0.0  ;;  %v1439_v37 = vrot.slane %v1438_v9, 4 }
 0x41a   :  { %v1448_v36 = vrot.slane %v1447_v18, 4  ;;  %v1294_v19 = vadd.f32 %v1293_v31, %v1292_v30  ;;  %v1269_v17 = vsel %vm1189_vm8, %v7529_v41, 0.0  ;;  %v1464_v15 = vsel %vm10030_vm7, %v1267_v0, 0.0 }
 0x41b   :  { %v1303_v59 = vadd.f32 %v1302_v7, %v1301_v61  ;;  %v1271_v12 = vsel %vm1191_vm10, %v7529_v41, 0.0  ;;  %v1329_v4 = vsel %vm10030_vm7, %v1237_v33, 0.0  ;;  %vm1194_vm11 = vcmp.eq.s32.totalorder %v7523_v11, 7 }
 0x41c   :  { %v1268_v44 = vsel %vm1188_vm13, %v7539_v2, 0.0  ;;  %v1270_v48 = vsel %vm1190_vm0, %v7539_v2, 0.0  ;;  %v1457_v57 = vrot.slane %v1456_v45, 4  ;;  %v1463_v5 = vsel %vm10030_vm7, %v1266_v1, 0.0 }
 0x41d   :  { %vm1195_vm8 = vcmp.eq.s32.totalorder %v7514_v51, 7  ;;  %v1440_v38 = vadd.f32 %v1439_v37, %v1438_v9  ;;  %v1449_v13 = vadd.f32 %v1448_v36, %v1447_v18  ;;  %v1465_v27 = vadd.f32 %v1464_v15, %v1463_v5 }
 0x41e   :  { %v1473_v24 = vsel %vm10030_vm7, %v1269_v17, 0.0  ;;  %v1482_v56 = vsel %vm10030_vm7, %v1271_v12, 0.0  ;;  %v1295_v46 = vrot.slane %v1294_v19, 4  ;;  %v1319_v21 = vsel %vm10030_vm7, %v1234_v42, 0.0 }
 0x41f   :  { %v1328_v60 = vsel %vm10030_vm7, %v1236_v23, 0.0  ;;  %v1472_v52 = vsel %vm10030_vm7, %v1268_v44, 0.0  ;;  %v1304_v54 = vrot.slane %v1303_v59, 4  ;;  %v1321_v58 = vadd.f32 %v1320_v26, %v1319_v21 }
 0x420   :  { %v1330_v16 = vadd.f32 %v1329_v4, %v1328_v60  ;;  %v1273_v9 = vsel %vm1193_vm15, %v7529_v41, 0.0  ;;  %v1458_v18 = vadd.f32 %v1457_v57, %v1456_v45  ;;  %v1474_v35 = vadd.f32 %v1473_v24, %v1472_v52 }
 0x421   :  { %v1481_v33 = vsel %vm10030_vm7, %v1270_v48, 0.0  ;;  %v1441_v31 = vrot.slane %v1440_v38, 2  ;;  %v1450_v0 = vrot.slane %v1449_v13, 2  ;;  %v1466_v39 = vrot.slane %v1465_v27, 4 }
 0x422   :  { %v1483_v7 = vadd.f32 %v1482_v56, %v1481_v33  ;;  %v1243_v42 = vsel %vm1163_vm9, %v7512_v32, 0.0  ;;  %v1313_v23 = vrot.slane %v1312_v20, 4  ;;  %v1337_v30 = vsel %vm10030_vm7, %v7580_v50, 0.0 }
 0x423   :  { %v1338_v61 = vsel %vm10030_vm7, %v1239_v40, 0.0  ;;  %vm1162_vm0 = vcmp.eq.s32.totalorder %v7510_v49, 7  ;;  %v1296_v45 = vadd.f32 %v1295_v46, %v1294_v19  ;;  %v1305_v34 = vadd.f32 %v1304_v54, %v1303_v59 }
 0x424   :  { %v1322_v1 = vrot.slane %v1321_v58, 4  ;;  %v1331_v37 = vrot.slane %v1330_v16, 4  ;;  %v1272_v36 = vsel %vm1192_vm3, %v7539_v2, 0.0  ;;  %v1459_v17 = vrot.slane %v1458_v18, 2 }
 0x425   :  { %v1475_v15 = vrot.slane %v1474_v35, 4  ;;  %v1491_v6 = vsel %vm10030_vm7, %v1273_v9, 0.0  ;;  %v1442_v12 = vadd.f32 %v1441_v31, %v1440_v38  ;;  %v1451_v26 = vadd.f32 %v1450_v0, %v1449_v13 }
 0x426   :  { %v1467_v4 = vadd.f32 %v1466_v39, %v1465_v27  ;;  %v1484_v50 = vrot.slane %v1483_v7, 4  ;;  %v1314_v44 = vadd.f32 %v1313_v23, %v1312_v20  ;;  %v1339_v40 = vadd.f32 %v1338_v61, %v1337_v30 }
 0x427   :  { %v1346_v19 = vsel %vm10030_vm7, %v7585_v47, 0.0  ;;  %v1347_v59 = vsel %vm10030_vm7, %v7618_v14, 0.0  ;;  %v1274_v48 = vsel %vm1194_vm11, %v7539_v2, 0.0  ;;  %v1490_v57 = vsel %vm10030_vm7, %v1272_v36, 0.0 }
 0x428   :  { %v1323_v5 = vadd.f32 %v1322_v1, %v1321_v58  ;;  %v1332_v24 = vadd.f32 %v1331_v37, %v1330_v16  ;;  %v1275_v38 = vsel %vm1195_vm8, %v7529_v41, 0.0  ;;  %v1460_v20 = vadd.f32 %v1459_v17, %v1458_v18 }
 0x429   :  { %v1476_v13 = vadd.f32 %v1475_v15, %v1474_v35  ;;  %v1492_v27 = vadd.f32 %v1491_v6, %v1490_v57  ;;  %vm10034_vm10 = vcmask 1041409   ;;  %v1443_v47 = vrot.slane %v1442_v12, 1 }
 0x42a   :  { %v1452_v56 = vrot.slane %v1451_v26, 1  ;;  %v1468_v46 = vrot.slane %v1467_v4, 2  ;;  %v1485_v14 = vadd.f32 %v1484_v50, %v1483_v7  ;;  %v1297_v21 = vrot.slane %v1296_v45, 2 }
 0x42b   :  { %v1306_v60 = vrot.slane %v1305_v34, 2  ;;  %v1315_v52 = vrot.slane %v1314_v44, 2  ;;  %v1340_v54 = vrot.slane %v1339_v40, 4  ;;  %v1500_v9 = vsel %vm10030_vm7, %v1275_v38, 0.0 }
 0x42c   :  { %vm10031_vm13 = vcmask 1042434   ;;  %v1324_v58 = vrot.slane %v1323_v5, 2  ;;  %v1333_v16 = vrot.slane %v1332_v24, 2  ;;  %v1348_v33 = vadd.f32 %v1347_v59, %v1346_v19 }
 0x42d   :  { %v1461_v31 = vrot.slane %v1460_v20, 1  ;;  %v1477_v0 = vrot.slane %v1476_v13, 2  ;;  %v1493_v18 = vrot.slane %v1492_v27, 4  ;;  %v1499_v35 = vsel %vm10030_vm7, %v1274_v48, 0.0 }
 0x42e   :  { %v1444_v39 = vadd.f32 %v1443_v47, %v1442_v12  ;;  %v1453_v23 = vadd.f32 %v1452_v56, %v1451_v26  ;;  %v1469_v30 = vadd.f32 %v1468_v46, %v1467_v4  ;;  %v1486_v61 = vrot.slane %v1485_v14, 2 }
 0x42f   :  { %v1501_v7 = vadd.f32 %v1500_v9, %v1499_v35  ;;  %vm10032_vm4 = vcmask 1043459   ;;  %v1242_v1 = vsel %vm1162_vm0, %v7518_v53, 0.0  ;;  %v1298_v37 = vadd.f32 %v1297_v21, %v1296_v45 }
 0x430   :  { %v1341_v36 = vadd.f32 %v1340_v54, %v1339_v40  ;;  %v1307_v17 = vadd.f32 %v1306_v60, %v1305_v34  ;;  %v1316_v15 = vadd.f32 %v1315_v52, %v1314_v44  ;;  %v1349_v6 = vrot.slane %v1348_v33, 4 }
 0x431   :  { %v1356_v50 = vsel %vm10030_vm7, %v1243_v42, 0.0  ;;  %vm1197_vm14 = vcmp.eq.s32.totalorder %v7514_v51, 8  ;;  %v1462_v19 = vadd.f32 %v1461_v31, %v1460_v20  ;;  %v1478_v12 = vadd.f32 %v1477_v0, %v1476_v13 }
 0x432   :  { %v1325_v26 = vadd.f32 %v1324_v58, %v1323_v5  ;;  %v1334_v4 = vadd.f32 %v1333_v16, %v1332_v24  ;;  %vm1196_vm15 = vcmp.eq.s32.totalorder %v7523_v11, 8  ;;  %v1470_v59 = vrot.slane %v1469_v30, 1 }
 0x433   :  { %v1487_v48 = vadd.f32 %v1486_v61, %v1485_v14  ;;  %v1494_v57 = vadd.f32 %v1493_v18, %v1492_v27  ;;  %v1702_v45 = vsel %vm10034_vm10, %v1453_v23, %v1444_v39  ;;  %vm1199_vm5 = vcmp.eq.s32.totalorder %v7514_v51, 9 }
 0x434   :  { %vm1200_vm6 = vcmp.eq.s32.totalorder %v7523_v11, 10  ;;  %v1502_v42 = vrot.slane %v1501_v7, 4  ;;  %v1299_v34 = vrot.slane %v1298_v37, 1  ;;  %v1342_v44 = vrot.slane %v1341_v36, 2 }
 0x435   :  { %v1355_v40 = vsel %vm10030_vm7, %v1242_v1, 0.0  ;;  %v1308_v5 = vrot.slane %v1307_v17, 1  ;;  %v1350_v24 = vadd.f32 %v1349_v6, %v1348_v33  ;;  %vm1201_vm3 = vcmp.eq.s32.totalorder %v7514_v51, 10 }
 0x436   :  { %v1357_v38 = vadd.f32 %v1356_v50, %v1355_v40  ;;  %v1479_v20 = vrot.slane %v1478_v12, 1  ;;  %v1703_v13 = vsel %vm10031_vm13, %v1462_v19, %v1702_v45  ;;  %v1317_v27 = vrot.slane %v1316_v15, 1 }
 0x437   :  { %v1326_v47 = vrot.slane %v1325_v26, 1  ;;  %vm1164_vm8 = vcmp.eq.s32.totalorder %v7510_v49, 8  ;;  %vm1166_vm7 = vcmp.eq.s32.totalorder %v7510_v49, 9  ;;  %vm1167_vm12 = vcmp.eq.s32.totalorder %v7516_v55, 9 }
 0x438   :  { %v1471_v56 = vadd.f32 %v1470_v59, %v1469_v30  ;;  %v1488_v46 = vrot.slane %v1487_v48, 1  ;;  %v1495_v14 = vrot.slane %v1494_v57, 2  ;;  %v1335_v21 = vrot.slane %v1334_v4, 1 }
 0x439   :  { %v7702_v60 = vadd.f32 %v1502_v42, %v1501_v7  ;;  %v1300_v52 = vadd.f32 %v1299_v34, %v1298_v37  ;;  %v7704_v54 = vadd.f32 %v1342_v44, %v1341_v36  ;;  %vm1203_vm13 = vcmp.eq.s32.totalorder %v7514_v51, 11 }
 0x43a   :  { %v1704_v9 = vsel %vm10032_vm4, %v1471_v56, %v1703_v13  ;;  %v1309_v58 = vadd.f32 %v1308_v5, %v1307_v17  ;;  %v1351_v16 = vrot.slane %v1350_v24, 2  ;;  %v1358_v33 = vrot.slane %v1357_v38, 4 }
 0x43b   :  { %v1480_v31 = vadd.f32 %v1479_v20, %v1478_v12  ;;  %v7709_v0 = vadd.f32 %v1317_v27, %v1316_v15  ;;  %vm1205_vm9 = vcmp.eq.s32.totalorder %v7514_v51, 12  ;;  %vm1207_vm11 = vcmp.eq.s32.totalorder %v7514_v51, 13 }
 0x43c   :  { %v7713_v18 = vadd.f32 %v1488_v46, %v1487_v48  ;;  %v7715_v35 = vadd.f32 %v1495_v14, %v1494_v57  ;;  %v7717_v39 = vadd.f32 %v1326_v47, %v1325_v26  ;;  %v7719_v23 = vadd.f32 %v1335_v21, %v1334_v4 }
 0x43d   :  { %v7724_v61 = vsel %vm10033_vm1, %v1480_v31, %v1704_v9  ;;  %v1277_v1 = vsel %vm1197_vm14, %v7529_v41, 0.0  ;;  %vm1171_vm0 = vcmp.eq.s32.totalorder %v7516_v55, 11  ;;  %v7731_v37 = vadd.f32 %v1351_v16, %v1350_v24 }
 0x43e   :  { %v7733_v36 = vadd.f32 %v1358_v33, %v1357_v38  ;;  %v7736_v17 = vsel %vm10034_vm10, %v1309_v58, %v1300_v52  ;;  %vm1210_vm4 = vcmp.eq.s32.totalorder %v7523_v11, 15  ;;  %vm1211_vm1 = vcmp.eq.s32.totalorder %v7514_v51, 15 }
 0x43f   :  { %v1276_v15 = vsel %vm1196_vm15, %v7539_v2, 0.0  ;;  %v1278_v6 = vsel %vm1198_vm2, %v7539_v2, 0.0  ;;  %v1279_v50 = vsel %vm1199_vm5, %v7529_v41, 0.0  ;;  %v1280_v19 = vsel %vm1200_vm6, %v7539_v2, 0.0 }
 0x440   :  { %v1281_v12 = vsel %vm1201_vm3, %v7529_v41, 0.0  ;;  %vm1170_vm14 = vcmp.eq.s32.totalorder %v7510_v49, 11  ;;  %vm10093_vm15 = vcmp.eq.s32.totalorder %v7523_v11, 11  ;;  %v1283_v4 = vsel %vm1203_vm13, %v7529_v41, 0.0 }
 0x441   :  { %v1282_v26 = vsel %vm10093_vm15, %v7539_v2, 0.0  ;;  %vm10094_vm2 = vcmp.eq.s32.totalorder %v7523_v11, 12  ;;  %vm10095_vm5 = vcmask 31744   ;;  %vm1173_vm6 = vcmp.eq.s32.totalorder %v7516_v55, 12 }
 0x442   :  { %v1284_v59 = vsel %vm10094_vm2, %v7539_v2, 0.0  ;;  %v1509_v48 = vsel %vm10095_vm5, %v1277_v1, 0.0  ;;  %v1285_v57 = vsel %vm1205_vm9, %v7529_v41, 0.0  ;;  %vm10096_vm3 = vcmp.eq.s32.totalorder %v7523_v11, 13  ;;  %vm10097_vm13 = vmmov %vm10095_vm5 }
 0x443   :  { %v1286_v45 = vsel %vm10096_vm3, %v7539_v2, 0.0  ;;  %v1287_v42 = vsel %vm1207_vm11, %v7529_v41, 0.0  ;;  %v1508_v34 = vsel %vm10097_vm13, %v1276_v15, 0.0  ;;  %vm1172_vm15 = vcmp.eq.s32.totalorder %v7510_v49, 12  ;;  %vm10101_vm3 = vmmov %vm10095_vm5 }
 0x444   :  { %v1244_v44 = vsel %vm1164_vm8, %v7518_v53, 0.0  ;;  %vm10098_vm9 = vcmp.eq.s32.totalorder %v7516_v55, 8  ;;  %v1246_v5 = vsel %vm1166_vm7, %v7518_v53, 0.0  ;;  %v1247_v24 = vsel %vm1167_vm12, %v7512_v32, 0.0  ;;  %vm10102_vm13 = vmmov %vm10101_vm3 }
 0x445   :  { %v1245_v40 = vsel %vm10098_vm9, %v7512_v32, 0.0  ;;  %vm10099_vm11 = vcmp.eq.s32.totalorder %v7523_v11, 14  ;;  %v1510_v20 = vadd.f32 %v1509_v48, %v1508_v34  ;;  %v1518_v13 = vsel %vm10095_vm5, %v1279_v50, 0.0  ;;  %vm10103_vm7 = vmmov %vm10101_vm3 }
 0x446   :  { %v1288_v38 = vsel %vm10099_vm11, %v7539_v2, 0.0  ;;  %vm10100_vm8 = vcmp.eq.s32.totalorder %v7516_v55, 10  ;;  %v1517_v47 = vsel %vm10101_vm3, %v1278_v6, 0.0  ;;  %v1527_v56 = vsel %vm10102_vm13, %v1281_v12, 0.0  ;;  %vm10105_vm11 = vmmov %vm10101_vm3 }
 0x447   :  { %v1249_v27 = vsel %vm10100_vm8, %v7512_v32, 0.0  ;;  %v1536_v46 = vsel %vm10103_vm7, %v1283_v4, 0.0  ;;  %vm10104_vm12 = vcmp.eq.s32.totalorder %v7510_v49, 10  ;;  %vm1174_vm9 = vcmp.eq.s32.totalorder %v7510_v49, 13  ;;  %vm10106_vm10 = vmmov %vm10101_vm3 }
 0x448   :  { %v1248_v14 = vsel %vm10104_vm12, %v7518_v53, 0.0  ;;  %v1364_v21 = vsel %vm10105_vm11, %v1244_v44, 0.0  ;;  %v1365_v52 = vsel %vm10106_vm10, %v1245_v40, 0.0  ;;  %vm10107_vm5 = vmmov %vm10101_vm3  ;;  %v1519_v16 = vadd.f32 %v1518_v13, %v1517_v47 }
 0x449   :  { %v1373_v9 = vsel %vm10107_vm5, %v1246_v5, 0.0  ;;  %vm10108_vm2 = vmmov %vm10101_vm3  ;;  %vm1177_vm8 = vcmp.eq.s32.totalorder %v7516_v55, 14  ;;  %v1366_v33 = vadd.f32 %v1365_v52, %v1364_v21  ;;  %vm10110_vm13 = vcmp.eq.s32.totalorder %v7514_v51, 14 }
 0x44a   :  { %v1374_v58 = vsel %vm10108_vm2, %v1247_v24, 0.0  ;;  %vm10109_vm3 = vmmov %vm10108_vm2  ;;  %v1289_v15 = vsel %vm10110_vm13, %v7529_v41, 0.0  ;;  %v1511_v6 = vrot.slane %v1510_v20, 4  ;;  %vm1176_vm10 = vcmp.eq.s32.totalorder %v7510_v49, 14 }
 0x44b   :  { %v1375_v31 = vadd.f32 %v1374_v58, %v1373_v9  ;;  %v1383_v1 = vsel %vm10109_vm3, %v1249_v27, 0.0  ;;  %vm10111_vm7 = vmmov %vm10108_vm2  ;;  %v1251_v34 = vsel %vm1171_vm0, %v7512_v32, 0.0  ;;  %v1382_v44 = vsel %vm10108_vm2, %v1248_v14, 0.0 }
 0x44c   :  { %v1526_v50 = vsel %vm10111_vm7, %v1280_v19, 0.0  ;;  %vm10112_vm12 = vmmov %vm10108_vm2  ;;  %v7824_v40 = vsel %vm1210_vm4, %v7539_v2, 0.0  ;;  %v7829_v19 = vsel %vm1211_vm1, %v7529_v41, 0.0  ;;  %vm1179_vm5 = vcmp.eq.s32.totalorder %v7516_v55, 15 }
 0x44d   :  { %v1535_v12 = vsel %vm10112_vm12, %v1282_v26, 0.0  ;;  %v1528_v4 = vadd.f32 %v1527_v56, %v1526_v50  ;;  %vm10113_vm11 = vmmov %vm10108_vm2  ;;  %v1384_v5 = vadd.f32 %v1383_v1, %v1382_v44  ;;  %v1520_v24 = vrot.slane %v1519_v16, 4 }
 0x44e   :  { %v1537_v48 = vadd.f32 %v1536_v46, %v1535_v12  ;;  %v1544_v26 = vsel %vm10113_vm11, %v1284_v59, 0.0  ;;  %vm1178_vm0 = vcmp.eq.s32.totalorder %v7510_v49, 15  ;;  %v1250_v13 = vsel %vm1170_vm14, %v7518_v53, 0.0  ;;  %vm10114_vm4 = vmmov %vm10108_vm2 }
 0x44f   :  { %v1367_v11 = vrot.slane %v1366_v33, 4  ;;  %v1376_v2 = vrot.slane %v1375_v31, 4  ;;  %v1545_v27 = vsel %vm10114_vm4, %v1285_v57, 0.0  ;;  %vm10115_vm3 = vmmov %vm10108_vm2  ;;  %v1253_v41 = vsel %vm1173_vm6, %v7512_v32, 0.0 }
 0x450   :  { %v1553_v51 = vsel %vm10115_vm3, %v1286_v45, 0.0  ;;  %vm10116_vm1 = vmmov %vm10108_vm2  ;;  %v1512_v47 = vadd.f32 %v1511_v6, %v1510_v20  ;;  %v1529_v56 = vrot.slane %v1528_v4, 4  ;;  %v1538_v46 = vrot.slane %v1537_v48, 4 }
 0x451   :  { %v1392_v59 = vsel %vm10116_vm1, %v1251_v34, 0.0  ;;  %vm10117_vm13 = vmmov %vm10116_vm1  ;;  %v1252_v21 = vsel %vm1172_vm15, %v7518_v53, 0.0  ;;  %vm10118_vm14 = vcmp.eq.s32.totalorder %v7516_v55, 13  ;;  %v1385_v45 = vrot.slane %v1384_v5, 4 }
 0x452   :  { %v1554_v14 = vsel %vm10117_vm13, %v1287_v42, 0.0  ;;  %v1255_v57 = vsel %vm10118_vm14, %v7512_v32, 0.0  ;;  %vm10119_vm7 = vmmov %vm10116_vm1  ;;  %v1368_v9 = vadd.f32 %v1367_v11, %v1366_v33  ;;  %v1377_v58 = vadd.f32 %v1376_v2, %v1375_v31 }
 0x453   :  { %v1391_v52 = vsel %vm10119_vm7, %v1250_v13, 0.0  ;;  %vm10120_vm6 = vmmov %vm10116_vm1  ;;  %v1521_v6 = vadd.f32 %v1520_v24, %v1519_v16  ;;  %v1546_v50 = vadd.f32 %v1545_v27, %v1544_v26  ;;  %v1555_v12 = vadd.f32 %v1554_v14, %v1553_v51 }
 0x454   :  { %v1393_v1 = vadd.f32 %v1392_v59, %v1391_v52  ;;  %v1401_v20 = vsel %vm10120_vm6, %v1253_v41, 0.0  ;;  %vm10121_vm12 = vmmov %vm10116_vm1  ;;  %v1513_v34 = vrot.slane %v1512_v47, 2  ;;  %v1254_v25 = vsel %vm1174_vm9, %v7518_v53, 0.0 }
 0x455   :  { %v1562_v42 = vsel %vm10121_vm12, %v1288_v38, 0.0  ;;  %vm10122_vm2 = vmmov %vm10116_vm1  ;;  %v1257_v33 = vsel %vm1177_vm8, %v7512_v32, 0.0  ;;  %v1386_v31 = vadd.f32 %v1385_v45, %v1384_v5  ;;  %v1530_v26 = vadd.f32 %v1529_v56, %v1528_v4 }
 0x456   :  { %v1563_v44 = vsel %vm10122_vm2, %v1289_v15, 0.0  ;;  %vm10123_vm15 = vmmov %vm10116_vm1  ;;  %v1369_v24 = vrot.slane %v1368_v9, 2  ;;  %v1378_v38 = vrot.slane %v1377_v58, 2  ;;  %v1394_v11 = vrot.slane %v1393_v1, 4 }
 0x457   :  { %v1400_v30 = vsel %vm10123_vm15, %v1252_v21, 0.0  ;;  %vm10124_vm11 = vmmov %vm10116_vm1  ;;  %v1539_v2 = vadd.f32 %v1538_v46, %v1537_v48  ;;  %v1547_v15 = vrot.slane %v1546_v50, 4  ;;  %v1256_v27 = vsel %vm1176_vm10, %v7518_v53, 0.0 }
 0x458   :  { %v1402_v13 = vadd.f32 %v1401_v20, %v1400_v30  ;;  %v1410_v16 = vsel %vm10124_vm11, %v1255_v57, 0.0  ;;  %vm10125_vm9 = vmmov %vm10116_vm1  ;;  %v1522_v41 = vrot.slane %v1521_v6, 2  ;;  %v1259_v5 = vsel %vm1179_vm5, %v7512_v32, 0.0 }
 0x459   :  { %v1409_v51 = vsel %vm10125_vm9, %v1254_v25, 0.0  ;;  %vm10126_vm8 = vmmov %vm10116_vm1  ;;  %v1556_v4 = vrot.slane %v1555_v12, 4  ;;  %v1258_v48 = vsel %vm1178_vm0, %v7518_v53, 0.0  ;;  %v1387_v56 = vrot.slane %v1386_v31, 2 }
 0x45a   :  { %v1411_v30 = vadd.f32 %v1410_v16, %v1409_v51  ;;  %v1419_v59 = vsel %vm10126_vm8, %v1257_v33, 0.0  ;;  %v1403_v46 = vrot.slane %v1402_v13, 4  ;;  %v1370_v14 = vadd.f32 %v1369_v24, %v1368_v9  ;;  %vm10127_vm10 = vmmov %vm10116_vm1 }
 0x45b   :  { %v1379_v21 = vadd.f32 %v1378_v38, %v1377_v58  ;;  %v1395_v57 = vadd.f32 %v1394_v11, %v1393_v1  ;;  %v1418_v25 = vsel %vm10127_vm10, %v1256_v27, 0.0  ;;  %v1531_v45 = vrot.slane %v1530_v26, 2  ;;  %vm10128_vm4 = vmmov %vm10116_vm1 }
 0x45c   :  { %v1564_v52 = vadd.f32 %v1563_v44, %v1562_v42  ;;  %v1420_v20 = vadd.f32 %v1419_v59, %v1418_v25  ;;  %v1428_v32 = vsel %vm10128_vm4, %v1259_v5, 0.0  ;;  %v1514_v55 = vadd.f32 %v1513_v34, %v1512_v47  ;;  %vm10129_vm5 = vmmov %vm10116_vm1 }
 0x45d   :  { %v1523_v16 = vadd.f32 %v1522_v41, %v1521_v6  ;;  %v1571_v33 = vsel %vm10129_vm5, %v7824_v40, 0.0  ;;  %v1412_v51 = vrot.slane %v1411_v30, 4  ;;  %vm10130_vm0 = vmmov %vm10116_vm1  ;;  %v1388_v53 = vadd.f32 %v1387_v56, %v1386_v31 }
 0x45e   :  { %v1572_v49 = vsel %vm10130_vm0, %v7829_v19, 0.0  ;;  %v1404_v9 = vadd.f32 %v1403_v46, %v1402_v13  ;;  %vm10131_vm3 = vmmov %vm10130_vm0  ;;  %v1371_v1 = vrot.slane %v1370_v14, 1  ;;  %v1380_v24 = vrot.slane %v1379_v21, 1 }
 0x45f   :  { %v1427_v58 = vsel %vm10131_vm3, %v1258_v48, 0.0  ;;  %v1396_v38 = vrot.slane %v1395_v57, 2  ;;  %v1532_v44 = vadd.f32 %v1531_v45, %v1530_v26  ;;  %v1540_v11 = vrot.slane %v1539_v2, 2  ;;  %vm10145_vm3 = vmmov %vm10130_vm0 }
 0x460   :  { %v1429_v42 = vadd.f32 %v1428_v32, %v1427_v58  ;;  %v1548_v27 = vadd.f32 %v1547_v15, %v1546_v50  ;;  %v1421_v47 = vrot.slane %v1420_v20, 4  ;;  %v1515_v6 = vrot.slane %v1514_v55, 1 }
 0x461   :  { %v1524_v34 = vrot.slane %v1523_v16, 1  ;;  %v1573_v41 = vadd.f32 %v1572_v49, %v1571_v33  ;;  %v1413_v40 = vadd.f32 %v1412_v51, %v1411_v30  ;;  %v1557_v5 = vadd.f32 %v1556_v4, %v1555_v12 }
 0x462   :  { %v1565_v59 = vrot.slane %v1564_v52, 4  ;;  %v1389_v25 = vrot.slane %v1388_v53, 1  ;;  %v1405_v19 = vrot.slane %v1404_v9, 2  ;;  %v1372_v31 = vadd.f32 %v1371_v1, %v1370_v14 }
 0x463   :  { %v1381_v13 = vadd.f32 %v1380_v24, %v1379_v21  ;;  %v1397_v56 = vadd.f32 %v1396_v38, %v1395_v57  ;;  %v1430_v48 = vrot.slane %v1429_v42, 4  ;;  %v1533_v46 = vrot.slane %v1532_v44, 1 }
 0x464   :  { %v1541_v7 = vadd.f32 %v1540_v11, %v1539_v2  ;;  %v1549_v22 = vrot.slane %v1548_v27, 2  ;;  %v1422_v32 = vadd.f32 %v1421_v47, %v1420_v20  ;;  %v1516_v26 = vadd.f32 %v1515_v6, %v1514_v55 }
 0x465   :  { %v1525_v45 = vadd.f32 %v1524_v34, %v1523_v16  ;;  %v1574_v50 = vrot.slane %v1573_v41, 4  ;;  %v1414_v15 = vrot.slane %v1413_v40, 2  ;;  %vm10047_vm1 = vcmask 1045509  }
 0x466   :  { %vm10132_vm13 = vcmask 1042434   ;;  %v1566_v30 = vadd.f32 %v1565_v59, %v1564_v52  ;;  %v1390_v4 = vadd.f32 %v1389_v25, %v1388_v53  ;;  %v1406_v33 = vadd.f32 %v1405_v19, %v1404_v9 }
 0x467   :  { %v1684_v12 = vsel %vm10132_vm13, %v7709_v0, %v7736_v17  ;;  %v1558_v14 = vrot.slane %v1557_v5, 2  ;;  %v1398_v21 = vrot.slane %v1397_v56, 1  ;;  %v1431_v57 = vadd.f32 %v1430_v48, %v1429_v42  ;;  %vm10136_vm12 = vmmov %vm10132_vm13 }
 0x468   :  { %vm10133_vm14 = vcmask 1041409   ;;  %v1360_v2 = vrot.slane %v7733_v36, 2  ;;  %v1534_v20 = vadd.f32 %v1533_v46, %v1532_v44  ;;  %v1550_v55 = vadd.f32 %v1549_v22, %v1548_v27  ;;  %vm10138_vm15 = vmmov %vm10136_vm12 }
 0x469   :  { %v1695_v51 = vsel %vm10133_vm14, %v1381_v13, %v1372_v31  ;;  %v1423_v16 = vrot.slane %v1422_v32, 2  ;;  %vm10046_vm7 = vcmask 1046534   ;;  %v1542_v49 = vrot.slane %v1541_v7, 1  ;;  %vm10134_vm6 = vmmov %vm10133_vm14 }
 0x46a   :  { %v1575_v58 = vadd.f32 %v1574_v50, %v1573_v41  ;;  %v1709_v1 = vsel %vm10134_vm6, %v1525_v45, %v1516_v26  ;;  %v1415_v24 = vadd.f32 %v1414_v15, %v1413_v40  ;;  %v10135_v0 = vrot.slane %v7704_v54, 1  ;;  %vm10146_vm13 = vmmov %vm10130_vm0 }
 0x46b   :  { %v1567_v52 = vrot.slane %v1566_v30, 2  ;;  %v1407_v53 = vrot.slane %v1406_v33, 1  ;;  %v1696_v9 = vsel %vm10136_vm12, %v1390_v4, %v1695_v51  ;;  %vm10137_vm2 = vcmask 1043459   ;;  %vm10147_vm14 = vmmov %vm10130_vm0 }
 0x46c   :  { %v1345_v17 = vadd.f32 %v10135_v0, %v7704_v54  ;;  %v1686_v38 = vsel %vm10137_vm2, %v7717_v39, %v1684_v12  ;;  %v1559_v42 = vadd.f32 %v1558_v14, %v1557_v5  ;;  %v1399_v22 = vadd.f32 %v1398_v21, %v1397_v56  ;;  %vm10139_vm11 = vmmov %vm10137_vm2 }
 0x46d   :  { %v1432_v44 = vrot.slane %v1431_v57, 2  ;;  %v1361_v11 = vadd.f32 %v1360_v2, %v7733_v36  ;;  %v1551_v27 = vrot.slane %v1550_v55, 1  ;;  %v1710_v47 = vsel %vm10138_vm15, %v1534_v20, %v1709_v1  ;;  %vm10142_vm8 = vmmov %vm10137_vm2 }
 0x46e   :  { %v1424_v6 = vadd.f32 %v1423_v16, %v1422_v32  ;;  %v1543_v34 = vadd.f32 %v1542_v49, %v1541_v7  ;;  %v1576_v41 = vrot.slane %v1575_v58, 2  ;;  %v1416_v40 = vrot.slane %v1415_v24, 1  ;;  %vm10148_vm6 = vmmov %vm10130_vm0 }
 0x46f   :  { %v1697_v54 = vsel %vm10139_vm11, %v1399_v22, %v1696_v9  ;;  %v1353_v59 = vrot.slane %v7731_v37, 1  ;;  %vm10140_vm9 = vcmask 1044484   ;;  %v1568_v39 = vadd.f32 %v1567_v52, %v1566_v30  ;;  %vm10149_vm12 = vmmov %vm10130_vm0 }
 0x470   :  { %v1688_v25 = vsel %vm10140_vm9, %v7719_v23, %v1686_v38  ;;  %v1408_v5 = vadd.f32 %v1407_v53, %v1406_v33  ;;  %v10141_v19 = vrot.slane %v7702_v60, 2  ;;  %v1560_v31 = vrot.slane %v1559_v42, 1  ;;  %vm10143_vm10 = vmmov %vm10140_vm9 }
 0x471   :  { %v1711_v13 = vsel %vm10142_vm8, %v1543_v34, %v1710_v47  ;;  %v1433_v56 = vadd.f32 %v1432_v44, %v1431_v57  ;;  %v1497_v7 = vrot.slane %v7715_v35, 1  ;;  %v1552_v48 = vadd.f32 %v1551_v27, %v1550_v55  ;;  %vm10144_vm4 = vmmov %vm10140_vm9 }
 0x472   :  { %v1505_v36 = vadd.f32 %v10141_v19, %v7702_v60  ;;  %v1425_v46 = vrot.slane %v1424_v6, 1  ;;  %v1698_v32 = vsel %vm10143_vm10, %v1408_v5, %v1697_v54  ;;  %v1362_v26 = vrot.slane %v1361_v11, 1  ;;  %vm10150_vm2 = vmmov %vm10130_vm0 }
 0x473   :  { %v1690_v45 = vsel %vm10047_vm1, %v1345_v17, %v1688_v25  ;;  %v1577_v23 = vadd.f32 %v1576_v41, %v1575_v58  ;;  %v1417_v50 = vadd.f32 %v1416_v40, %v1415_v24  ;;  %v1706_v15 = vsel %vm10047_vm1, %v7713_v18, %v7724_v61  ;;  %vm10151_vm15 = vmmov %vm10130_vm0 }
 0x474   :  { %v1354_v60 = vadd.f32 %v1353_v59, %v7731_v37  ;;  %v1569_v12 = vrot.slane %v1568_v39, 1  ;;  %v1712_v30 = vsel %vm10144_vm4, %v1552_v48, %v1711_v13  ;;  %v1506_v4 = vrot.slane %v1505_v36, 1 }
 0x475   :  { %v1561_v33 = vadd.f32 %v1560_v31, %v1559_v42  ;;  %v1434_v14 = vrot.slane %v1433_v56, 1  ;;  %v1699_v21 = vsel %vm10047_vm1, %v1417_v50, %v1698_v32  ;;  %v1498_v57 = vadd.f32 %v1497_v7, %v7715_v35  ;;  %v4804_v61 = vpop.f32.mrb[8].mxu0 }
 0x476   :  { %vm10045_vm5 = vcmask 1047559   ;;  %v1692_v51 = vsel %vm10046_vm7, %v1354_v60, %v1690_v45  ;;  %v1426_v2 = vadd.f32 %v1425_v46, %v1424_v6  ;;  %v1363_v20 = vadd.f32 %v1362_v26, %v1361_v11  ;;  %v1634_v1 = vpop.f32.mrb[9].mxu0 }
 0x477   :  { %v1578_v55 = vrot.slane %v1577_v23, 1  ;;  %v1713_v18 = vsel %vm10047_vm1, %v1561_v33, %v1712_v30  ;;  %v1707_v37 = vsel %vm10046_vm7, %v1498_v57, %v1706_v15  ;;  %v1570_v16 = vadd.f32 %v1569_v12, %v1568_v39  ;;  %v4805_v17 = vpop.f32.mrb[10].mxu0 }
 0x478   :  { %v1700_v49 = vsel %vm10046_vm7, %v1426_v2, %v1699_v21  ;;  %v1507_v58 = vadd.f32 %v1506_v4, %v1505_v36  ;;  %v1694_v24 = vsel %vm10045_vm5, %v1363_v20, %v1692_v51  ;;  %v1435_v0 = vadd.f32 %v1434_v14, %v1433_v56  ;;  %v1637_v38 = vpop.f32.mrb[11].mxu0 }
 0x479   :  { %v1720_v35 = vadd.f32 %v1694_v24, %v1634_v1  ;;  %v1714_v52 = vsel %vm10046_vm7, %v1570_v16, %v1713_v18  ;;  %v1579_v9 = vadd.f32 %v1578_v55, %v1577_v23  ;;  %v349_v16 = vld [vmem:[#allocation13] sm:$0x1]  ;;  %vm10152_vm11 = vcmask 1042432  }
 0x47a   :  { %v1708_v53 = vsel %vm10045_vm5, %v1507_v58, %v1707_v37  ;;  %v1701_v42 = vsel %vm10045_vm5, %v1435_v0, %v1700_v49  ;;  %v4744_v0 = vld [vmem:[#allocation14] ss:$0 sm:$0xff]  ;;  %vm10153_vm9 = vmmov %vm10152_vm11 }
 0x47b   :  { %v1722_v22 = vadd.f32 %v4804_v61, %v1708_v53  ;;  %v1721_v44 = vadd.f32 %v1701_v42, %v1637_v38  ;;  %v1715_v11 = vsel %vm10045_vm5, %v1579_v9, %v1714_v52  ;;  %v1724_v27 = vsel %vm10130_vm0, %v1720_v35, 0.0  ;;  %vm10154_vm8 = vmmov %vm10153_vm9 }
 0x47c   :  { %v1723_v47 = vadd.f32 %v4805_v17, %v1715_v11  ;;  %v1764_v61 = vlaneseq  ;;  %vm10155_vm10 = vmmov %vm10154_vm8  ;;  %vm10157_vm0 = vcmask 1045504  }
 0x47d   :  { %v1725_v6 = vsel %vm10145_vm3, %v1721_v44, 0.0  ;;  %v1727_v41 = vsel %vm10146_vm13, %v1722_v22, 0.0  ;;  %vm10156_vm4 = vmmov %vm10154_vm8  ;;  %vm10159_vm13 = vcmask 1046528  }
 0x47e   :  { %v1726_v34 = vadd.f32 %v1725_v6, %v1724_v27  ;;  %v1729_v54 = vsel %vm10147_vm14, %v1723_v47, 0.0  ;;  %v1765_v37 = vshrl.u32 %v1764_v61, 7  ;;  %vm10158_vm3 = vmmov %vm10157_vm0 }
 0x47f   :  { %vm10160_vm14 = vmmov %vm10159_vm13 }
 0x480   :  { %v1728_v40 = vadd.f32 %v1727_v41, %v1726_v34  ;;  %v7929_v49 = vsub.s32 0, %v1765_v37 }
 0x482   :  { %v1730_v59 = vadd.f32 %v1729_v54, %v1728_v40 }
 0x484   :  { %v1731_v25 = vrot.slane %v1730_v59, 4 }
 0x486   :  { %v1732_v39 = vadd.f32 %v1731_v25, %v1730_v59 }
 0x488   :  { %v1733_v5 = vrot.slane %v1732_v39, 2 }
 0x48a   :  { %v1734_v19 = vadd.f32 %v1733_v5, %v1732_v39 }
 0x48c   :  { %v1735_v36 = vrot.slane %v1734_v19, 1 }
 0x48e   :  { %v1736_v31 = vadd.f32 %v1735_v36, %v1734_v19 }
 0x490   :  { %v1738_v13 = vmul.f32 0.03125, %v1736_v31 }
 0x492   :  { %v1739_v56 = vsub.f32 %v1720_v35, %v1738_v13  ;;  %v1740_v7 = vsub.f32 %v1721_v44, %v1738_v13  ;;  %v1741_v48 = vsub.f32 %v1722_v22, %v1738_v13  ;;  %v1742_v46 = vsub.f32 %v1723_v47, %v1738_v13 }
 0x494   :  { %v1743_v32 = vmul.f32 %v1739_v56, %v1739_v56  ;;  %v1744_v26 = vmul.f32 %v1740_v7, %v1740_v7  ;;  %v1745_v45 = vmul.f32 %v1741_v48, %v1741_v48  ;;  %v1746_v23 = vmul.f32 %v1742_v46, %v1742_v46 }
 0x496   :  { %v1747_v50 = vsel %vm10148_vm6, %v1743_v32, 0.0  ;;  %v1748_v15 = vsel %vm10149_vm12, %v1744_v26, 0.0  ;;  %v1750_v12 = vsel %vm10150_vm2, %v1745_v45, 0.0  ;;  %v1752_v4 = vsel %vm10151_vm15, %v1746_v23, 0.0 }
 0x497   :  { %v1749_v60 = vadd.f32 %v1748_v15, %v1747_v50  ;;  %vm10161_vm6 = vcmask 1043456   ;;  %vm10163_vm2 = vcmask 1044480  }
 0x498   :  { %vm10162_vm12 = vmmov %vm10161_vm6 }
 0x499   :  { %v1751_v30 = vadd.f32 %v1750_v12, %v1749_v60  ;;  %vm10164_vm15 = vmmov %vm10163_vm2 }
 0x49b   :  { %v1753_v33 = vadd.f32 %v1752_v4, %v1751_v30 }
 0x49d   :  { %v1754_v14 = vrot.slane %v1753_v33, 4 }
 0x49f   :  { %v1755_v21 = vadd.f32 %v1754_v14, %v1753_v33 }
 0x4a1   :  { %v1756_v57 = vrot.slane %v1755_v21, 2 }
 0x4a3   :  { %v1757_v51 = vadd.f32 %v1756_v57, %v1755_v21 }
 0x4a5   :  { %v1758_v2 = vrot.slane %v1757_v51, 1 }
 0x4a7   :  { %v1759_v20 = vadd.f32 %v1758_v2, %v1757_v51 }
 0x4a9   :  { %v1760_v55 = vmul.f32 0.03125, %v1759_v20 }
 0x4ab   :  { %v1761_v18 = vadd.f32 1e-05, %v1760_v55 }
 0x4ad   :  { %5799 = vrsqrt.f32 %v1761_v18 }
 0x4b7   :  { %v5800_v58 = vpop.eup %5799 }
 0x4b8   :  { %v1763_v1 = vmul.f32 %v5800_v58, %v349_v16 }
 0x4ba   :  { %v1767_v24 = vrot.slane %v1763_v1, %v7929_v49 }
 0x4bc   :  { %v1768_v35 = vmul.f32 %v1767_v24, %v1739_v56  ;;  %v1769_v17 = vmul.f32 %v1767_v24, %v1740_v7  ;;  %v1770_v52 = vmul.f32 %v1767_v24, %v1741_v48  ;;  %v1771_v53 = vmul.f32 %v1767_v24, %v1742_v46 }
 0x4be   :  { %v1778_v9 = vadd.f32 %v4744_v0, %v1768_v35  ;;  %v1779_v38 = vadd.f32 %v4744_v0, %v1769_v17  ;;  %v1780_v42 = vadd.f32 %v4744_v0, %v1770_v52  ;;  %v1781_v22 = vadd.f32 %v4744_v0, %v1771_v53 }
 0x4c0   :  { %v1782_v44 = vmax.f32 %v1778_v9, 0.0  ;;  %v1783_v11 = vmax.f32 %v1779_v38, 0.0  ;;  %v1784_v27 = vmax.f32 %v1780_v42, 0.0  ;;  %v1785_v47 = vmax.f32 %v1781_v22, 0.0 }
 0x4c2   :  { %v1819_v6 = vrot.slane %v1782_v44, 5  ;;  %v1820_v34 = vrot.slane %v1783_v11, 5  ;;  %v1822_v41 = vrot.slane %v1784_v27, 5  ;;  %v1823_v40 = vrot.slane %v1785_v47, 5 }
 0x4c4   :  { %v7933_v54 = vsel %vm10152_vm11, %v1819_v6, %v1820_v34  ;;  %v7936_v59 = vsel %vm10153_vm9, %v1822_v41, %v1823_v40  ;;  %v7939_v25 = vsel %vm10154_vm8, 0.0, %v1819_v6  ;;  %v7942_v39 = vsel %vm10155_vm10, %v1820_v34, 0.0  ;;  %vm10165_vm11 = vmmov %vm10156_vm4 }
 0x4c5   :  { %v7945_v5 = vsel %vm10156_vm4, %v1823_v40, 0.0  ;;  %v1847_v19 = vrot.slane %v7939_v25, 2  ;;  %v1929_v36 = vrot.slane %v7933_v54, 2  ;;  %v5173_v13 = vpack.i.bf16 %v7942_v39, %v7933_v54  ;;  %vm10168_vm10 = vmmov %vm10156_vm4 }
 0x4c6   :  { %v5178_v31 = vpack.i.bf16 %v7945_v5, %v7936_v59  ;;  %v2087_v56 = vrot.slane %v7942_v39, 2  ;;  %v1837_v7 = vrot.slane %v7939_v25, 1  ;;  %v1913_v46 = vrot.slane %v7933_v54, 1 }
 0x4c7   :  { %v7958_v48 = vsel %vm10157_vm0, %v1847_v19, %v1929_v36  ;;  %v2071_v32 = vrot.slane %v7942_v39, 1  ;;  %5174 = vrot.lane.b32.xlu1 %v5173_v13, %s6322_s4  ;;  %v10044_v45 = vrot.slane %v7939_v25, 4  ;;  %v1961_v60 = vrot.slane %v7933_v54, 4  ;;  %vm10169_vm0 = vmmov %vm10159_vm13 }
 0x4c8   :  { %5179 = vrot.lane.b32.xlu0 %v5178_v31, %s6322_s4  ;;  %v2088_v26 = vsel %vm10158_vm3, %v1929_v36, %v2087_v56  ;;  %v7971_v15 = vsel %vm10160_vm14, %v1837_v7, %v1913_v46  ;;  %v2119_v30 = vrot.slane %v7942_v39, 4  ;;  %v1857_v33 = vrot.slane %v7939_v25, 3 }
 0x4c9   :  { %v5188_v23 = vpack.i.bf16 %v2088_v26, %v7958_v48  ;;  %v2072_v50 = vsel %vm10159_vm13, %v1913_v46, %v2071_v32  ;;  %v7980_v4 = vsel %vm10161_vm6, %v10044_v45, %v1961_v60  ;;  %v1945_v14 = vrot.slane %v7933_v54, 3  ;;  %vm10173_vm6 = vmmov %vm10169_vm0 }
 0x4ca   :  { %v5183_v12 = vpack.i.bf16 %v2072_v50, %v7971_v15  ;;  %v2103_v21 = vrot.slane %v7942_v39, 3  ;;  %v7987_v57 = vsel %vm10162_vm12, %v1961_v60, %v2119_v30  ;;  %v10040_v51 = vrot.slane %v7939_v25, 6  ;;  %vm10174_vm12 = vmmov %vm10169_vm0 }
 0x4cb   :  { %5189 = vrot.lane.b32.xlu1 %v5188_v23, %s6300_s21  ;;  %v1993_v2 = vrot.slane %v7933_v54, 6  ;;  %v5198_v20 = vpack.i.bf16 %v7987_v57, %v7980_v4  ;;  %v7996_v55 = vsel %vm10163_vm2, %v1857_v33, %v1945_v14  ;;  %v8000_v61 = vsel %vm10165_vm11, 0.0, %v1822_v41 }
 0x4cc   :  { %5184 = vrot.lane.b32.xlu0 %v5183_v12, %s6304_s22  ;;  %v2104_v18 = vsel %vm10164_vm15, %v1945_v14, %v2103_v21  ;;  %vm10166_vm9 = vcmask 1041408   ;;  %v2151_v58 = vrot.slane %v7942_v39, 6  ;;  %v10041_v1 = vrot.slane %v7939_v25, 5 }
 0x4cd   :  { %v5193_v37 = vpack.i.bf16 %v2104_v18, %v7996_v55  ;;  %v8007_v16 = vsel %vm10166_vm9, %v10040_v51, %v1993_v2  ;;  %v1977_v24 = vrot.slane %v7933_v54, 5  ;;  %v2135_v0 = vrot.slane %v7942_v39, 5  ;;  %vm10167_vm8 = vmmov %vm10166_vm9 }
 0x4ce   :  { %v10039_v35 = vrot.slane %v7939_v25, 7  ;;  %v2009_v17 = vrot.slane %v7933_v54, 7  ;;  %v2167_v52 = vrot.slane %v7942_v39, 7  ;;  %v8020_v53 = vsel %vm10167_vm8, %v1993_v2, %v2151_v58  ;;  %vm10178_vm8 = vmmov %vm10163_vm2 }
 0x4cf   :  { %5199 = vrot.lane.b32.xlu1 %v5198_v20, %s6324_s17  ;;  %v8025_v9 = vsel %vm10168_vm10, %v10041_v1, %v1977_v24  ;;  %v5208_v38 = vpack.i.bf16 %v8020_v53, %v8007_v16  ;;  %v2136_v42 = vsel %vm10156_vm4, %v1977_v24, %v2135_v0  ;;  %v8032_v22 = vsel %vm10169_vm0, %v2071_v32, %v6757_v3  ;;  %vm10179_vm10 = vmmov %vm10163_vm2 }
 0x4d0   :  { %5194 = vrot.lane.b32.xlu0 %v5193_v37, %s6323_s29  ;;  %v5203_v44 = vpack.i.bf16 %v2136_v42, %v8025_v9  ;;  %v1839_v11 = vrot.slane %v8000_v61, 1  ;;  %vm10170_vm3 = vcmask 1040384   ;;  %v1915_v6 = vrot.slane %v7936_v59, 1 }
 0x4d1   :  { %v8040_v27 = vsel %vm10170_vm3, %v10039_v35, %v2009_v17  ;;  %vm10171_vm13 = vmmov %vm10170_vm3  ;;  %v2073_v34 = vrot.slane %v7945_v5, 1  ;;  %v5223_v41 = vpack.i.bf16 %v8032_v22, %v2072_v50  ;;  %vm10172_vm14 = vcmask 1045504  }
 0x4d2   :  { %v8045_v47 = vsel %vm10171_vm13, %v2009_v17, %v2167_v52  ;;  %v8053_v40 = vsel %vm10172_vm14, %v2087_v56, %v6760_v8  ;;  %v1931_v31 = vrot.slane %v7936_v59, 2  ;;  %v2089_v13 = vrot.slane %v7945_v5, 2  ;;  %vm10175_vm15 = vmmov %vm10172_vm14 }
 0x4d3   :  { %5209 = vrot.lane.b32.xlu1 %v5208_v38, %s6326_s28  ;;  %v5213_v36 = vpack.i.bf16 %v8045_v47, %v8040_v27  ;;  %v8063_v46 = vsel %vm10173_vm6, %v1915_v6, %v2073_v34  ;;  %v8068_v32 = vsel %vm10174_vm12, %v1839_v11, %v1915_v6  ;;  %v1849_v56 = vrot.slane %v8000_v61, 2  ;;  %vm10176_vm11 = vmmov %vm10172_vm14 }
 0x4d4   :  { %5204 = vrot.lane.b32.xlu0 %v5203_v44, %s6325_s30  ;;  %v5233_v23 = vpack.i.bf16 %v8053_v40, %v2088_v26  ;;  %v5218_v50 = vpack.i.bf16 %v8063_v46, %v8068_v32  ;;  %v8077_v60 = vsel %vm10163_vm2, %v2103_v21, %v6763_v10  ;;  %v8082_v12 = vsel %vm10175_vm15, %v1931_v31, %v2089_v13  ;;  %vm10185_vm12 = vmmov %vm10156_vm4 }
 0x4d5   :  { %v8088_v14 = vsel %vm10176_vm11, %v1849_v56, %v1931_v31  ;;  %v1859_v26 = vrot.slane %v8000_v61, 3  ;;  %v1947_v2 = vrot.slane %v7936_v59, 3  ;;  %v2105_v20 = vrot.slane %v7945_v5, 3  ;;  %vm10186_vm2 = vmmov %vm10156_vm4 }
 0x4d6   :  { %v5243_v21 = vpack.i.bf16 %v8077_v60, %v2104_v18  ;;  %v5228_v37 = vpack.i.bf16 %v8082_v12, %v8088_v14  ;;  %v2121_v24 = vrot.slane %v7945_v5, 4  ;;  %vm10177_vm9 = vcmask 1043456  }
 0x4d7   :  { %5224 = vrot.lane.b32.xlu1 %v5223_v41, %s6328_s5  ;;  %v8100_v17 = vsel %vm10177_vm9, %v2119_v30, %v6936_v28  ;;  %v1963_v38 = vrot.slane %v7936_v59, 4  ;;  %v8107_v44 = vsel %vm10178_vm8, %v1859_v26, %v1947_v2  ;;  %v2106_v18 = vsel %vm10179_vm10, %v1947_v2, %v2105_v20  ;;  %vm10180_vm0 = vmmov %vm10177_vm9 }
 0x4d8   :  { %5214 = vrot.lane.b32.xlu0 %v5213_v36, %s6327_s9  ;;  %v10042_v6 = vrot.slane %v8000_v61, 4  ;;  %v1889_v41 = vrot.slane %v8000_v61, 6  ;;  %v1995_v30 = vrot.slane %v7936_v59, 6  ;;  %v5253_v36 = vpack.i.bf16 %v8100_v17, %v7987_v57  ;;  %vm10182_vm13 = vmmov %vm10180_vm0 }
 0x4d9   :  { %v2137_v31 = vrot.slane %v7945_v5, 5  ;;  %v2122_v2 = vsel %vm10180_vm0, %v1963_v38, %v2121_v24  ;;  %vm10181_vm3 = vcmask 1041408   ;;  %v1979_v35 = vrot.slane %v7936_v59, 5 }
 0x4da   :  { %v8131_v57 = vsel %vm10182_vm13, %v10042_v6, %v1963_v38  ;;  %vm10183_vm14 = vmmov %vm10181_vm3  ;;  %v2153_v51 = vrot.slane %v7945_v5, 6  ;;  %vm10187_vm15 = vcmask 1040384   ;;  %vm10189_vm9 = vcmask 1046528  }
 0x4db   :  { %5234 = vrot.lane.b32.xlu1 %v5233_v23, %s6329_s8  ;;  %v5238_v23 = vpack.i.bf16 %v2106_v18, %v8107_v44  ;;  %vm10184_vm6 = vmmov %vm10181_vm3  ;;  %v8176_v45 = vsel %vm10189_vm9, %v2073_v34, %v6757_v3  ;;  %vm10193_vm0 = vcmask 1045504  }
 0x4dc   :  { %5219 = vrot.lane.b32.xlu0 %v5218_v50, %s6304_s22  ;;  %v8120_v50 = vsel %vm10156_vm4, %v2135_v0, %v6939_v29  ;;  %v8136_v0 = vsel %vm10183_vm14, %v1889_v41, %v1995_v30  ;;  %v8147_v38 = vsel %vm10184_vm6, %v2151_v58, %v6964_v43  ;;  %v2279_v58 = vsel %vm10187_vm15, %v2167_v52, %v7020_v62  ;;  %vm10188_vm11 = vmmov %vm10181_vm3 }
 0x4dd   :  { %v5263_v1 = vpack.i.bf16 %v8120_v50, %v2136_v42  ;;  %v5273_v42 = vpack.i.bf16 %v8147_v38, %v8020_v53  ;;  %v5283_v53 = vpack.i.bf16 %v2279_v58, %v8045_v47  ;;  %vm10190_vm8 = vmmov %vm10187_vm15  ;;  %v5288_v47 = vpack.i.bf16 %v8176_v45, %v8063_v46 }
 0x4de   :  { %vm10191_vm10 = vmmov %vm10190_vm8  ;;  %vm10192_vm4 = vcmask 1044480   ;;  %v2210_v58 = vsel %vm10193_vm0, %v2089_v13, %v6760_v8 }
 0x4df   :  { %5244 = vrot.lane.b32.xlu1 %v5243_v21, %s6330_s7  ;;  %v8125_v21 = vsel %vm10181_vm3, %v6964_v43, %v1889_v41  ;;  %v2138_v41 = vsel %vm10185_vm12, %v1979_v35, %v2137_v31  ;;  %v8190_v34 = vsel %vm10192_vm4, %v2105_v20, %v6763_v10  ;;  %vm10194_vm3 = vmmov %vm10186_vm2  ;;  %v2238_v20 = vsel %vm10182_vm13, %v2121_v24, %v6936_v28 }
 0x4e0   :  { %5229 = vrot.lane.b32.xlu0 %v5228_v37, %s6300_s21  ;;  %v10043_v37 = vrot.slane %v8000_v61, 5  ;;  %v8202_v46 = vsel %vm10194_vm3, %v2137_v31, %v6939_v29  ;;  %vm10195_vm14 = vmmov %vm10190_vm8 }
 0x4e1   :  { %v5308_v13 = vpack.i.bf16 %v8202_v46, %v2138_v41  ;;  %vm10196_vm12 = vmmov %vm10189_vm9 }
 0x4e2   :  { %v1838_v31 = vsel %vm10196_vm12, %v6757_v3, %v1837_v7  ;;  %vm10198_vm15 = vmmov %vm10193_vm0  ;;  %vm10215_vm12 = vcmask 31744  }
 0x4e3   :  { %5254 = vrot.lane.b32.xlu1 %v5253_v36, %s6331_s15  ;;  %v5248_v36 = vpack.i.bf16 %v2122_v2, %v8131_v57 }
 0x4e4   :  { %5239 = vrot.lane.b32.xlu0 %v5238_v23, %s6323_s29  ;;  %v8154_v23 = vsel %vm10186_vm2, %v10043_v37, %v1979_v35  ;;  %v1899_v35 = vrot.slane %v8000_v61, 7  ;;  %v2011_v37 = vrot.slane %v7936_v59, 7  ;;  %vm10197_vm2 = vmmov %vm10189_vm9 }
 0x4e5   :  { %v5258_v6 = vpack.i.bf16 %v2138_v41, %v8154_v23  ;;  %v1848_v41 = vsel %vm10198_vm15, %v6760_v8, %v1847_v19  ;;  %vm10200_vm9 = vmmov %vm10192_vm4  ;;  %vm10217_vm15 = vcmask 64512  }
 0x4e7   :  { %5264 = vrot.lane.b32.xlu1 %v5263_v1, %s6332_s12  ;;  %v2154_v1 = vsel %vm10188_vm11, %v1995_v30, %v2153_v51  ;;  %vm10199_vm11 = vmmov %vm10193_vm0 }
 0x4e8   :  { %5249 = vrot.lane.b32.xlu0 %v5248_v36, %s6324_s17  ;;  %v2169_v36 = vrot.slane %v7945_v5, 7  ;;  %v5268_v52 = vpack.i.bf16 %v2154_v1, %v8136_v0  ;;  %v1850_v7 = vsel %vm10199_vm11, %v6760_v8, %v1849_v56  ;;  %vm10207_vm0 = vmmov %vm10194_vm3 }
 0x4e9   :  { %v5333_v19 = vpack.i.bf16 %v1850_v7, %v1848_v41  ;;  %vm10209_vm3 = vmmov %vm10207_vm0 }
 0x4ea   :  { %v2170_v30 = vsel %vm10190_vm8, %v2011_v37, %v2169_v36  ;;  %vm10201_vm8 = vmmov %vm10192_vm4 }
 0x4eb   :  { %5274 = vrot.lane.b32.xlu1 %v5273_v42, %s6333_s16  ;;  %v8182_v42 = vsel %vm10191_vm10, %v1899_v35, %v2011_v37  ;;  %v5298_v37 = vpack.i.bf16 %v8190_v34, %v2106_v18  ;;  %vm10203_vm10 = vmmov %vm10182_vm13 }
 0x4ec   :  { %5259 = vrot.lane.b32.xlu0 %v5258_v6, %s6325_s30  ;;  %v5278_v6 = vpack.i.bf16 %v2170_v30, %v8182_v42  ;;  %vm10205_vm4 = vmmov %vm10203_vm10 }
 0x4ed   :  { %vm10211_vm13 = vmmov %vm10184_vm6 }
 0x4ee   :  { %vm10218_vm11 = vmmov %vm10217_vm15 }
 0x4ef   :  { %5284 = vrot.lane.b32.xlu1 %v5283_v53, %s6334_s25  ;;  %v5293_v53 = vpack.i.bf16 %v2210_v58, %v8082_v12  ;;  %v8213_v12 = vsel %vm10184_vm6, %v2153_v51, %v6964_v43  ;;  %v5323_v51 = vpack.i.bf16 %v8000_v61, %v7939_v25  ;;  %vm10213_vm6 = vmmov %vm10195_vm14 }
 0x4f0   :  { %5269 = vrot.lane.b32.xlu0 %v5268_v52, %s6326_s28  ;;  %v5303_v52 = vpack.i.bf16 %v2238_v20, %v2122_v2  ;;  %v5313_v24 = vpack.i.bf16 %v8213_v12, %v2154_v1  ;;  %v1840_v2 = vsel %vm10197_vm2, %v6757_v3, %v1839_v11  ;;  %v1858_v11 = vsel %vm10200_vm9, %v6763_v10, %v1857_v33  ;;  %vm10216_vm2 = vmmov %vm10215_vm12 }
 0x4f1   :  { %v5328_v1 = vpack.i.bf16 %v1840_v2, %v1838_v31  ;;  %vm10219_vm9 = vcmask 97280  }
 0x4f3   :  { %5289 = vrot.lane.b32.xlu1 %v5288_v47, %s6328_s5  ;;  %v2280_v47 = vsel %vm10195_vm14, %v2169_v36, %v7020_v62  ;;  %v1860_v36 = vsel %vm10201_vm8, %v6763_v10, %v1859_v26  ;;  %vm10220_vm8 = vmmov %vm10219_vm9 }
 0x4f4   :  { %5279 = vrot.lane.b32.xlu0 %v5278_v6, %s6327_s9  ;;  %v5318_v18 = vpack.i.bf16 %v2280_v47, %v2170_v30  ;;  %v10202_v30 = vrot.slane %v7939_v25, 4  ;;  %v10204_v6 = vrot.slane %v8000_v61, 4 }
 0x4f6   :  { %v1868_v56 = vsel %vm10203_vm10, %v6936_v28, %v10202_v30  ;;  %v1870_v33 = vsel %vm10205_vm4, %v6936_v28, %v10204_v6  ;;  %v1900_v6 = vsel %vm10213_vm6, %v7020_v62, %v1899_v35  ;;  %v5378_v35 = vpack.i.bf16 %v7996_v55, %v1858_v11 }
 0x4f7   :  { %5299 = vrot.lane.b32.xlu1 %v5298_v37, %s6330_s7  ;;  %v5338_v37 = vpack.i.bf16 %v1860_v36, %v1858_v11  ;;  %v5343_v47 = vpack.i.bf16 %v1870_v33, %v1868_v56  ;;  %v5403_v55 = vpack.i.bf16 %v2238_v20, %v8100_v17  ;;  %v5433_v17 = vpack.i.bf16 %v8107_v44, %v1860_v36 }
 0x4f8   :  { %5294 = vrot.lane.b32.xlu0 %v5293_v53, %s6329_s8  ;;  %v10206_v53 = vrot.slane %v7939_v25, 5  ;;  %v5458_v44 = vpack.i.bf16 %v8182_v42, %v1900_v6  ;;  %v5781_v42 = vld [vmem:[#allocation16 + $0x30] sm:$0xff]   ;;  %vm10221_vm10 = vcmask 130048   ;;  %vm10227_vm6 = vcmask 228352  }
 0x4f9   :  { %vm10222_vm4 = vmmov %vm10221_vm10 }
 0x4fa   :  { %v1878_v26 = vsel %vm10207_vm0, %v6939_v29, %v10206_v53  ;;  %v5368_v53 = vpack.i.bf16 %v7958_v48, %v1848_v41  ;;  %vm10223_vm0 = vcmask 162816  }
 0x4fb   :  { %5309 = vrot.lane.b32.xlu1 %v5308_v13, %s6332_s12  ;;  %v10208_v13 = vrot.slane %v8000_v61, 5  ;;  %v5398_v48 = vpack.i.bf16 %v8025_v9, %v1878_v26  ;;  %v5413_v9 = vpack.i.bf16 %v8202_v46, %v8120_v50  ;;  %v10214_v50 = vmov 0  }
 0x4fc   :  { %5304 = vrot.lane.b32.xlu0 %v5303_v52, %s6331_s15 }
 0x4fd   :  { %v1880_v52 = vsel %vm10209_vm3, %v6939_v29, %v10208_v13  ;;  %v5363_v13 = vpack.i.bf16 %v7971_v15, %v1838_v31  ;;  %v5393_v15 = vpack.i.bf16 %v8190_v34, %v8077_v60  ;;  %v5776_v60 = vld [vmem:[#allocation16 + $0x8] sm:$0xff]   ;;  %v5778_v34 = vld [vmem:[#allocation16 + $0x18] sm:$0xff]   ;;  %vm10224_vm3 = vmmov %vm10223_vm0 }
 0x4ff   :  { %5319 = vrot.lane.b32.xlu1 %v5318_v18, %s6334_s25  ;;  %v10210_v18 = vrot.slane %v7939_v25, 6 }
 0x500   :  { %5314 = vrot.lane.b32.xlu0 %v5313_v24, %s6333_s16 }
 0x501   :  { %v1888_v24 = vsel %vm10211_vm13, %v6964_v43, %v10210_v18  ;;  %v5388_v18 = vpack.i.bf16 %v7980_v4, %v1868_v56  ;;  %vm10225_vm13 = vcmask 195584  }
 0x503   :  { %5324 = vrot.lane.b32.xlu1 %v5323_v51, %s6322_s4  ;;  %v5348_v51 = vpack.i.bf16 %v1880_v52, %v1878_v26 }
 0x504   :  { %5329 = vrot.lane.b32.xlu0 %v5328_v1, %s6304_s22  ;;  %v10212_v1 = vrot.slane %v7939_v25, 7 }
 0x506   :  { %v1898_v30 = vsel %vm10195_vm14, %v7020_v62, %v10212_v1  ;;  %vm10226_vm14 = vmmov %vm10225_vm13 }
 0x507   :  { %5334 = vrot.lane.b32.xlu1 %v5333_v19, %s6300_s21  ;;  %v5353_v19 = vpack.i.bf16 %v8125_v21, %v1888_v24  ;;  %v5418_v4 = vpack.i.bf16 %v8040_v27, %v1898_v30  ;;  %v5775_v27 = vld [vmem:[#allocation16] sm:$0xff]  }
 0x508   :  { %5339 = vrot.lane.b32.xlu0 %v5338_v37, %s6323_s29  ;;  %v5358_v37 = vpack.i.bf16 %v1900_v6, %v1898_v30  ;;  %2494 = vmatpush1.bf16.msra.mxu1 %v5775_v27  ;;  %v5782_v6 = vld [vmem:[#allocation16 + $0x38] sm:$0xff]  }
 0x509   :  { %2495 = vmatprep.subr.bf16.mxu1 %v10214_v50 }
 0x50b   :  { %5344 = vrot.lane.b32.xlu1 %v5343_v47, %s6324_s17  ;;  %v5373_v47 = vpack.i.bf16 %v8176_v45, %v8032_v22  ;;  %v5408_v45 = vpack.i.bf16 %v8007_v16, %v1888_v24  ;;  %v5428_v22 = vpack.i.bf16 %v8088_v14, %v1850_v7  ;;  %v5438_v16 = vpack.i.bf16 %v8131_v57, %v1870_v33  ;;  %v5777_v14 = vld [vmem:[#allocation16 + $0x10] sm:$0xff]  }
 0x50c   :  { %5349 = vrot.lane.b32.xlu0 %v5348_v51, %s6325_s30  ;;  %v5383_v51 = vpack.i.bf16 %v2210_v58, %v8053_v40  ;;  %v5423_v40 = vpack.i.bf16 %v8068_v32, %v1840_v2  ;;  %2496 = vmatpush1.bf16.msra.mxu1 %v5776_v60  ;;  %v5780_v2 = vld [vmem:[#allocation16 + $0x28] sm:$0xff]  }
 0x50d   :  { %2497 = vmatprep.subr.bf16.mxu1 %v10214_v50 }
 0x50f   :  { %5354 = vrot.lane.b32.xlu1 %v5353_v19, %s6326_s28 }
 0x510   :  { %5359 = vrot.lane.b32.xlu0 %v5358_v37, %s6327_s9  ;;  %2498 = vmatpush1.bf16.msra.mxu1 %v5777_v14 }
 0x511   :  { %2499 = vmatprep.subr.bf16.mxu1 %v10214_v50 }
 0x513   :  { %5369 = vrot.lane.b32.xlu1 %v5368_v53, %s6329_s8 }
 0x514   :  { %5364 = vrot.lane.b32.xlu0 %v5363_v13, %s6328_s5  ;;  %2500 = vmatpush1.bf16.msra.mxu1 %v5778_v34 }
 0x515   :  { %2501 = vmatprep.subr.bf16.mxu1 %v10214_v50 }
 0x517   :  { %5379 = vrot.lane.b32.xlu1 %v5378_v35, %s6330_s7 }
 0x518   :  { %5374 = vrot.lane.b32.xlu0 %v5373_v47, %s6304_s22 }
 0x51b   :  { %5389 = vrot.lane.b32.xlu1 %v5388_v18, %s6331_s15 }
 0x51c   :  { %5384 = vrot.lane.b32.xlu0 %v5383_v51, %s6300_s21 }
 0x51f   :  { %5399 = vrot.lane.b32.xlu1 %v5398_v48, %s6332_s12  ;;  %v5783_v48 = vld [vmem:[#allocation16 + $0x40] sm:$0xff]  }
 0x520   :  { %5394 = vrot.lane.b32.xlu0 %v5393_v15, %s6323_s29 }
 0x523   :  { %5409 = vrot.lane.b32.xlu1 %v5408_v45, %s6333_s16 }
 0x524   :  { %5404 = vrot.lane.b32.xlu0 %v5403_v55, %s6324_s17 }
 0x527   :  { %5419 = vrot.lane.b32.xlu1 %v5418_v4, %s6334_s25 }
 0x528   :  { %5414 = vrot.lane.b32.xlu0 %v5413_v9, %s6325_s30 }
 0x52b   :  { %5429 = vrot.lane.b32.xlu1 %v5428_v22, %s6329_s8 }
 0x52c   :  { %2383 = vrot.lane.b32.xlu0 %v8147_v38, %s6326_s28  ;;  %v5443_v38 = vpack.i.bf16 %v8154_v23, %v1880_v52  ;;  %v5779_v23 = vld [vmem:[#allocation16 + $0x20] sm:$0xff]  }
 0x52d   :  { %2502 = vmatpush1.bf16.msra.mxu1 %v5779_v23 }
 0x52e   :  { %2503 = vmatprep.subr.bf16.mxu1 %v10214_v50 }
 0x52f   :  { %5439 = vrot.lane.b32.xlu1 %v5438_v16, %s6331_s15 }
 0x530   :  { %5424 = vrot.lane.b32.xlu0 %v5423_v40, %s6328_s5 }
 0x531   :  { %2504 = vmatpush1.bf16.msra.mxu1 %v5780_v2 }
 0x532   :  { %2505 = vmatprep.subr.bf16.mxu1 %v10214_v50 }
 0x534   :  { %5434 = vrot.lane.b32.xlu0 %v5433_v17, %s6330_s7 }
 0x535   :  { %2506 = vmatpush1.bf16.msra.mxu1 %v5781_v42 }
 0x536   :  { %2507 = vmatprep.subr.bf16.mxu1 %v10214_v50 }
 0x538   :  { %5444 = vrot.lane.b32.xlu0 %v5443_v38, %s6332_s12 }
 0x539   :  { %v8324_v57 = vpop.permute.xlu1 %5174  ;;  %2508 = vmatpush1.bf16.msra.mxu1 %v5782_v6 }
 0x53a   :  { %v8322_v32 = vpop.permute.xlu0 %5179  ;;  %2509 = vmatprep.subr.bf16.mxu1 %v10214_v50 }
 0x53c   :  { %5459 = vrot.lane.b32.xlu0 %v5458_v44, %s6334_s25 }
 0x53d   :  { %v5190_v58 = vpop.permute.xlu1 %5189  ;;  %2510 = vmatpush1.bf16.msra.mxu1 %v5783_v48 }
 0x53e   :  { %v5185_v46 = vpop.permute.xlu0 %5184  ;;  %v5192_v56 = vunpack.i.h.bf16 %v5190_v58  ;;  %v5191_v33 = vunpack.i.l.bf16 %v5190_v58  ;;  %2511 = vmatprep.subr.bf16.mxu1 %v10214_v50  ;;  %v5177_v58 = vunpack.i.h.bf16 %v8324_v57 }
 0x53f   :  { %v5187_v41 = vunpack.i.h.bf16 %v5185_v46  ;;  %v5186_v7 = vunpack.i.l.bf16 %v5185_v46  ;;  %v5176_v46 = vunpack.i.l.bf16 %v8324_v57 }
 0x541   :  { %v5200_v20 = vpop.permute.xlu1 %5199  ;;  %v2294_v26 = vsel %vm10215_vm12, %v7933_v54, %v5187_v41  ;;  %v2293_v52 = vsel %vm10216_vm2, %v7939_v25, %v5186_v7  ;;  %vm10228_vm12 = vmmov %vm10227_vm6  ;;  %vm10229_vm2 = vcmask 261120  }
 0x542   :  { %v5195_v31 = vpop.permute.xlu0 %5194  ;;  %v5202_v37 = vunpack.i.h.bf16 %v5200_v20  ;;  %v5201_v53 = vunpack.i.l.bf16 %v5200_v20  ;;  %v2297_v13 = vsel %vm10217_vm15, %v2293_v52, %v5191_v33  ;;  %v2298_v35 = vsel %vm10218_vm11, %v2294_v26, %v5192_v56  ;;  %vm10230_vm15 = vmmov %vm10229_vm2 }
 0x543   :  { %v5197_v24 = vunpack.i.h.bf16 %v5195_v31  ;;  %v5196_v1 = vunpack.i.l.bf16 %v5195_v31  ;;  %vm10231_vm11 = vcmask 293888  }
 0x545   :  { %v5210_v11 = vpop.permute.xlu1 %5209  ;;  %v2301_v47 = vsel %vm10219_vm9, %v2297_v13, %v5196_v1  ;;  %v2302_v54 = vsel %vm10220_vm8, %v2298_v35, %v5197_v24  ;;  %vm10232_vm9 = vmmov %vm10231_vm11  ;;  %v5784_v1 = vld [vmem:[#allocation16 + $0x48] sm:$0x3f]   ;;  %vm10233_vm8 = vcmask 1045504  }
 0x546   :  { %v5205_v36 = vpop.permute.xlu0 %5204  ;;  %v5212_v45 = vunpack.i.h.bf16 %v5210_v11  ;;  %v5211_v55 = vunpack.i.l.bf16 %v5210_v11  ;;  %v2305_v4 = vsel %vm10221_vm10, %v2301_v47, %v5201_v53  ;;  %v2306_v9 = vsel %vm10222_vm4, %v2302_v54, %v5202_v37 }
 0x547   :  { %v5207_v18 = vunpack.i.h.bf16 %v5205_v36  ;;  %v5206_v25 = vunpack.i.l.bf16 %v5205_v36  ;;  %v2491_v53 = vsel %vm10233_vm8, %v5784_v1, 0  ;;  %vm10234_vm10 = vcmask 326656  }
 0x548   :  { %vm10235_vm4 = vmmov %vm10234_vm10  ;;  %2512 = vmatpush1.bf16.msra.mxu1 %v2491_v53  ;;  %vm10246_vm8 = vcmask 457728   ;;  %v5182_v53 = vunpack.i.h.bf16 %v8322_v32 }
 0x549   :  { %v5225_v30 = vpop.permute.xlu1 %5224  ;;  %v2309_v22 = vsel %vm10223_vm0, %v2305_v4, %v5206_v25  ;;  %v2310_v16 = vsel %vm10224_vm3, %v2306_v9, %v5207_v18  ;;  %vm10236_vm0 = vcmask 31744   ;;  %3879 = vmatprep.subr.bf16.mxu1 %v10214_v50 }
 0x54a   :  { %v5215_v19 = vpop.permute.xlu0 %5214  ;;  %v2313_v14 = vsel %vm10225_vm13, %v2309_v22, %v5211_v55  ;;  %v2314_v38 = vsel %vm10226_vm14, %v2310_v16, %v5212_v45  ;;  %v5227_v41 = vunpack.i.h.bf16 %v5225_v30  ;;  %v5226_v7 = vunpack.i.l.bf16 %v5225_v30  ;;  %vm10237_vm3 = vmmov %vm10236_vm0 }
 0x54b   :  { %v5217_v40 = vunpack.i.h.bf16 %v5215_v19  ;;  %v5216_v27 = vunpack.i.l.bf16 %v5215_v19  ;;  %vm10238_vm13 = vcmask 359424  }
 0x54c   :  { %vm10239_vm14 = vmmov %vm10238_vm13 }
 0x54d   :  { %v5235_v51 = vpop.permute.xlu1 %5234  ;;  %v2317_v34 = vsel %vm10227_vm6, %v2313_v14, %v5216_v27  ;;  %v2318_v44 = vsel %vm10228_vm12, %v2314_v38, %v5217_v40  ;;  %vm10240_vm6 = vcmask 64512  }
 0x54e   :  { %v5220_v15 = vpop.permute.xlu0 %5219  ;;  %v2321_v31 = vsel %vm10229_vm2, %v2317_v34, %v5176_v46  ;;  %v2322_v2 = vsel %vm10230_vm15, %v2318_v44, %v5177_v58  ;;  %v5237_v11 = vunpack.i.h.bf16 %v5235_v51  ;;  %v5236_v42 = vunpack.i.l.bf16 %v5235_v51  ;;  %vm10241_vm12 = vmmov %vm10240_vm6 }
 0x54f   :  { %v2325_v56 = vsel %vm10231_vm11, %v2321_v31, %v5226_v7  ;;  %v2326_v33 = vsel %vm10232_vm9, %v2322_v2, %v5227_v41  ;;  %v5222_v26 = vunpack.i.h.bf16 %v5220_v15  ;;  %v5221_v52 = vunpack.i.l.bf16 %v5220_v15 }
 0x550   :  { %v2329_v13 = vsel %vm10234_vm10, %v2325_v56, %v5236_v42  ;;  %v2330_v30 = vsel %vm10235_vm4, %v2326_v33, %v5237_v11  ;;  %vm10242_vm2 = vcmask 392192   ;;  %vm10244_vm11 = vcmask 424960   ;;  %vm10247_vm10 = vmmov %vm10246_vm8 }
 0x551   :  { %v5245_v60 = vpop.permute.xlu1 %5244  ;;  %v2296_v18 = vsel %vm10236_vm0, %v7936_v59, %v5222_v26  ;;  %v2295_v25 = vsel %vm10237_vm3, %v8000_v61, %v5221_v52  ;;  %vm10243_vm15 = vmmov %vm10242_vm2  ;;  %vm10248_vm4 = vcmask 490496   ;;  %vm10250_vm3 = vcmask 97280  }
 0x552   :  { %v5230_v17 = vpop.permute.xlu0 %5229  ;;  %v5247_v57 = vunpack.i.h.bf16 %v5245_v60  ;;  %v5246_v6 = vunpack.i.l.bf16 %v5245_v60  ;;  %vm10245_vm9 = vmmov %vm10244_vm11 }
 0x553   :  { %v5232_v19 = vunpack.i.h.bf16 %v5230_v17  ;;  %v5231_v37 = vunpack.i.l.bf16 %v5230_v17  ;;  %vm10249_vm0 = vmmov %vm10248_vm4 }
 0x554   :  { %v2333_v45 = vsel %vm10238_vm13, %v2329_v13, %v5246_v6  ;;  %v2334_v55 = vsel %vm10239_vm14, %v2330_v30, %v5247_v57  ;;  %vm10251_vm13 = vmmov %vm10250_vm3  ;;  %vm10252_vm14 = vcmask 130048   ;;  %v5181_v13 = vunpack.i.l.bf16 %v8322_v32 }
 0x555   :  { %v5255_v23 = vpop.permute.xlu1 %5254  ;;  %v2299_v22 = vsel %vm10240_vm6, %v2295_v25, %v5231_v37  ;;  %v2300_v16 = vsel %vm10241_vm12, %v2296_v18, %v5232_v19  ;;  %vm10253_vm6 = vmmov %vm10252_vm14  ;;  %vm10254_vm12 = vcmask 162816  }
 0x556   :  { %v5240_v20 = vpop.permute.xlu0 %5239  ;;  %v5257_v35 = vunpack.i.h.bf16 %v5255_v23  ;;  %v5256_v47 = vunpack.i.l.bf16 %v5255_v23 }
 0x557   :  { %v5242_v40 = vunpack.i.h.bf16 %v5240_v20  ;;  %v5241_v59 = vunpack.i.l.bf16 %v5240_v20 }
 0x558   :  { %v2337_v27 = vsel %vm10242_vm2, %v2333_v45, %v5256_v47  ;;  %v2338_v61 = vsel %vm10243_vm15, %v2334_v55, %v5257_v35  ;;  %vm10255_vm2 = vmmov %vm10254_vm12  ;;  %vm10256_vm15 = vcmask 195584  }
 0x559   :  { %v5265_v36 = vpop.permute.xlu1 %5264  ;;  %v2304_v56 = vsel %vm10251_vm13, %v2300_v16, %v5242_v40  ;;  %vm10265_vm13 = vcmask 326656  }
 0x55a   :  { %v5250_v24 = vpop.permute.xlu0 %5249  ;;  %v5267_v51 = vunpack.i.h.bf16 %v5265_v36  ;;  %v5266_v48 = vunpack.i.l.bf16 %v5265_v36  ;;  %v2303_v36 = vsel %vm10250_vm3, %v2299_v22, %v5241_v59  ;;  %v10264_v22 = vpack.i.bf16 %v8136_v0, %v8125_v21 }
 0x55b   :  { %v5252_v60 = vunpack.i.h.bf16 %v5250_v24  ;;  %v5251_v17 = vunpack.i.l.bf16 %v5250_v24 }
 0x55c   :  { %v2341_v38 = vsel %vm10244_vm11, %v2337_v27, %v5266_v48  ;;  %v2342_v34 = vsel %vm10245_vm9, %v2338_v61, %v5267_v51  ;;  %vm10257_vm11 = vmmov %vm10256_vm15  ;;  %vm10258_vm9 = vcmask 228352  }
 0x55d   :  { %v5275_v54 = vpop.permute.xlu1 %5274  ;;  %v2307_v52 = vsel %vm10252_vm14, %v2303_v36, %v5251_v17  ;;  %v2308_v24 = vsel %vm10253_vm6, %v2304_v56, %v5252_v60  ;;  %vm10266_vm14 = vmmov %vm10265_vm13  ;;  %vm10267_vm6 = vcmask 359424  }
 0x55e   :  { %v5260_v15 = vpop.permute.xlu0 %5259  ;;  %v5277_v4 = vunpack.i.h.bf16 %v5275_v54  ;;  %v5276_v9 = vunpack.i.l.bf16 %v5275_v54 }
 0x55f   :  { %v5262_v23 = vunpack.i.h.bf16 %v5260_v15  ;;  %v5261_v31 = vunpack.i.l.bf16 %v5260_v15 }
 0x560   :  { %v2345_v2 = vsel %vm10246_vm8, %v2341_v38, %v5276_v9  ;;  %v2346_v20 = vsel %vm10247_vm10, %v2342_v34, %v5277_v4  ;;  %vm10259_vm8 = vmmov %vm10258_vm9  ;;  %vm10260_vm10 = vcmask 261120  }
 0x561   :  { %v5285_v14 = vpop.permute.xlu1 %5284  ;;  %v2311_v57 = vsel %vm10254_vm12, %v2307_v52, %v5261_v31  ;;  %v2312_v6 = vsel %vm10255_vm2, %v2308_v24, %v5262_v23  ;;  %vm10268_vm12 = vmmov %vm10267_vm6  ;;  %vm10269_vm2 = vcmask 392192  }
 0x562   :  { %v5287_v44 = vunpack.i.h.bf16 %v5285_v14  ;;  %v5286_v58 = vunpack.i.l.bf16 %v5285_v14  ;;  %v5270_v46 = vpop.permute.xlu0 %5269 }
 0x563   :  { %v5272_v41 = vunpack.i.h.bf16 %v5270_v46  ;;  %v5271_v7 = vunpack.i.l.bf16 %v5270_v46 }
 0x564   :  { %v2349_v11 = vsel %vm10248_vm4, %v2345_v2, %v5286_v58  ;;  %v2350_v42 = vsel %vm10249_vm0, %v2346_v20, %v5287_v44  ;;  %vm10261_vm4 = vmmov %vm10260_vm10  ;;  %vm10262_vm0 = vcmask 293888  }
 0x565   :  { %v5290_v33 = vpop.permute.xlu1 %5289  ;;  %v5448_v26 = vpack.i.bf16 %v2350_v42, %v2349_v11  ;;  %v2315_v30 = vsel %vm10256_vm15, %v2311_v57, %v5271_v7  ;;  %v2316_v35 = vsel %vm10257_vm11, %v2312_v6, %v5272_v41  ;;  %vm10263_vm3 = vmmov %vm10262_vm0  ;;  %vm10271_vm11 = vcmask 424960  }
 0x566   :  { %v5280_v1 = vpop.permute.xlu0 %5279  ;;  %v5292_v47 = vunpack.i.h.bf16 %v5290_v33  ;;  %v5291_v54 = vunpack.i.l.bf16 %v5290_v33  ;;  %vm10270_vm15 = vmmov %vm10269_vm2 }
 0x567   :  { %v5282_v19 = vunpack.i.h.bf16 %v5280_v1  ;;  %v5281_v37 = vunpack.i.l.bf16 %v5280_v1  ;;  %5449 = vrot.lane.b32.xlu1 %v5448_v26, %s6303_s26 }
 0x569   :  { %v2319_v18 = vsel %vm10258_vm9, %v2315_v30, %v5281_v37  ;;  %v2320_v25 = vsel %vm10259_vm8, %v2316_v35, %v5282_v19  ;;  %v5300_v51 = vpop.permute.xlu1 %5299  ;;  %vm10272_vm9 = vmmov %vm10271_vm11  ;;  %vm10273_vm8 = vcmask 457728  }
 0x56a   :  { %v2323_v48 = vsel %vm10260_vm10, %v2319_v18, %v5181_v13  ;;  %v2324_v15 = vsel %vm10261_vm4, %v2320_v25, %v5182_v53  ;;  %v5295_v45 = vpop.permute.xlu0 %5294  ;;  %v5302_v16 = vunpack.i.h.bf16 %v5300_v51  ;;  %v5301_v40 = vunpack.i.l.bf16 %v5300_v51  ;;  %vm10274_vm10 = vmmov %vm10273_vm8 }
 0x56b   :  { %v5297_v55 = vunpack.i.h.bf16 %v5295_v45  ;;  %v5296_v4 = vunpack.i.l.bf16 %v5295_v45  ;;  %v2327_v32 = vsel %vm10262_vm0, %v2323_v48, %v5291_v54  ;;  %v2328_v9 = vsel %vm10263_vm3, %v2324_v15, %v5292_v47  ;;  %5454 = vrot.lane.b32.xlu1 %v10264_v22, %s6333_s16 }
 0x56c   :  { %vm10275_vm4 = vcmask 490496   ;;  %vm10277_vm3 = vcmask 31744  }
 0x56d   :  { %v2331_v59 = vsel %vm10265_vm13, %v2327_v32, %v5296_v4  ;;  %v2332_v27 = vsel %vm10266_vm14, %v2328_v9, %v5297_v55  ;;  %v5310_v61 = vpop.permute.xlu1 %5309  ;;  %vm10276_vm0 = vmmov %vm10275_vm4  ;;  %vm10279_vm14 = vcmask 64512  }
 0x56e   :  { %v5305_v60 = vpop.permute.xlu0 %5304  ;;  %v5312_v38 = vunpack.i.h.bf16 %v5310_v61  ;;  %v5311_v34 = vunpack.i.l.bf16 %v5310_v61  ;;  %v2335_v44 = vsel %vm10267_vm6, %v2331_v59, %v5301_v40  ;;  %v2336_v21 = vsel %vm10268_vm12, %v2332_v27, %v5302_v16  ;;  %vm10278_vm13 = vmmov %vm10277_vm3 }
 0x56f   :  { %v5307_v17 = vunpack.i.h.bf16 %v5305_v60  ;;  %v5306_v14 = vunpack.i.l.bf16 %v5305_v60  ;;  %2385 = vrot.lane.b32.xlu1 %v8213_v12, %s6326_s28  ;;  %vm10280_vm6 = vmmov %vm10279_vm14  ;;  %vm10281_vm12 = vcmask 97280  }
 0x571   :  { %v2339_v0 = vsel %vm10269_vm2, %v2335_v44, %v5306_v14  ;;  %v2340_v58 = vsel %vm10270_vm15, %v2336_v21, %v5307_v17  ;;  %v5320_v46 = vpop.permute.xlu1 %5319  ;;  %vm10282_vm2 = vmmov %vm10281_vm12  ;;  %vm10283_vm15 = vcmask 130048  }
 0x572   :  { %v5322_v23 = vunpack.i.h.bf16 %v5320_v46  ;;  %v5321_v31 = vunpack.i.l.bf16 %v5320_v46  ;;  %v5315_v2 = vpop.permute.xlu0 %5314  ;;  %v2343_v7 = vsel %vm10271_vm11, %v2339_v0, %v5311_v34  ;;  %v2344_v12 = vsel %vm10272_vm9, %v2340_v58, %v5312_v38  ;;  %vm10284_vm11 = vmmov %vm10283_vm15 }
 0x573   :  { %v5317_v20 = vunpack.i.h.bf16 %v5315_v2  ;;  %v5316_v41 = vunpack.i.l.bf16 %v5315_v2  ;;  %vm10285_vm9 = vcmask 162816  }
 0x575   :  { %v8408_v11 = vpop.permute.xlu1 %5324  ;;  %v2347_v42 = vsel %vm10273_vm8, %v2343_v7, %v5316_v41  ;;  %v2348_v36 = vsel %vm10274_vm10, %v2344_v12, %v5317_v20  ;;  %vm10286_vm8 = vmmov %vm10285_vm9  ;;  %vm10287_vm10 = vcmask 195584  }
 0x576   :  { %v5330_v56 = vpop.permute.xlu0 %5329  ;;  %v2351_v33 = vsel %vm10275_vm4, %v2347_v42, %v5321_v31  ;;  %v2352_v26 = vsel %vm10276_vm0, %v2348_v36, %v5322_v23  ;;  %v5326_v14 = vunpack.i.l.bf16 %v8408_v11  ;;  %vm10288_vm4 = vmmov %vm10287_vm10  ;;  %vm10289_vm0 = vcmask 228352  }
 0x577   :  { %v5332_v52 = vunpack.i.h.bf16 %v5330_v56  ;;  %v5331_v24 = vunpack.i.l.bf16 %v5330_v56  ;;  %v5463_v1 = vpack.i.bf16 %v2352_v26, %v2351_v33 }
 0x579   :  { %5464 = vrot.lane.b32.xlu0 %v5463_v1, %s6303_s26  ;;  %v5335_v57 = vpop.permute.xlu1 %5334  ;;  %v2026_v53 = vsel %vm10277_vm3, 0.0, %v5332_v52  ;;  %v2025_v13 = vsel %vm10278_vm13, 0.0, %v5331_v24  ;;  %vm10290_vm3 = vmmov %vm10289_vm0  ;;  %vm10291_vm13 = vcmask 261120  }
 0x57a   :  { %v5337_v6 = vunpack.i.h.bf16 %v5335_v57  ;;  %v5336_v19 = vunpack.i.l.bf16 %v5335_v57  ;;  %v5340_v37 = vpop.permute.xlu0 %5339 }
 0x57b   :  { %v5342_v30 = vunpack.i.h.bf16 %v5340_v37  ;;  %v5341_v35 = vunpack.i.l.bf16 %v5340_v37 }
 0x57c   :  { %v2027_v47 = vsel %vm10279_vm14, %v2025_v13, %v5336_v19  ;;  %v2028_v54 = vsel %vm10280_vm6, %v2026_v53, %v5337_v6  ;;  %vm10292_vm14 = vcmask 293888   ;;  %vm10293_vm6 = vcmask 31744  }
 0x57d   :  { %v5345_v18 = vpop.permute.xlu1 %5344  ;;  %v2029_v15 = vsel %vm10281_vm12, %v2027_v47, %v5341_v35  ;;  %v2030_v45 = vsel %vm10282_vm2, %v2028_v54, %v5342_v30  ;;  %vm10294_vm12 = vcmask 64512  }
 0x57e   :  { %v5347_v25 = vunpack.i.h.bf16 %v5345_v18  ;;  %v5346_v51 = vunpack.i.l.bf16 %v5345_v18  ;;  %v5350_v48 = vpop.permute.xlu0 %5349 }
 0x57f   :  { %v5352_v55 = vunpack.i.h.bf16 %v5350_v48  ;;  %v5351_v4 = vunpack.i.l.bf16 %v5350_v48 }
 0x580   :  { %v2031_v32 = vsel %vm10283_vm15, %v2029_v15, %v5346_v51  ;;  %v2032_v9 = vsel %vm10284_vm11, %v2030_v45, %v5347_v25  ;;  %vm10295_vm15 = vmmov %vm10293_vm6 }
 0x581   :  { %v2033_v22 = vsel %vm10285_vm9, %v2031_v32, %v5351_v4  ;;  %v2034_v16 = vsel %vm10286_vm8, %v2032_v9, %v5352_v55  ;;  %v5355_v40 = vpop.permute.xlu1 %5354  ;;  %vm10296_vm9 = vmmov %vm10294_vm12 }
 0x582   :  { %v5357_v59 = vunpack.i.h.bf16 %v5355_v40  ;;  %v5356_v27 = vunpack.i.l.bf16 %v5355_v40  ;;  %v5360_v61 = vpop.permute.xlu0 %5359  ;;  %vm10297_vm8 = vmmov %vm10282_vm2  ;;  %v10303_v40 = vld [vmem:[#allocation48_spill] sm:$0xff] }
 0x583   :  { %v5362_v60 = vunpack.i.h.bf16 %v5360_v61  ;;  %v5361_v17 = vunpack.i.l.bf16 %v5360_v61 }
 0x584   :  { %v2035_v38 = vsel %vm10287_vm10, %v2033_v22, %v5356_v27  ;;  %v2036_v34 = vsel %vm10288_vm4, %v2034_v16, %v5357_v59  ;;  %vm10298_vm10 = vmmov %vm10284_vm11  ;;  %vm10299_vm4 = vcmask 162816  }
 0x585   :  { %v2037_v44 = vsel %vm10289_vm0, %v2035_v38, %v5361_v17  ;;  %v8430_v21 = vsel %vm10290_vm3, %v2036_v34, %v5362_v60  ;;  %vm10300_vm0 = vmmov %vm10299_vm4  ;;  %vm10301_vm3 = vcmask 195584   ;;  %v5370_v51 = vpop.permute.xlu1 %5369 }
 0x586   :  { %v5365_v0 = vpop.permute.xlu0 %5364  ;;  %v2039_v58 = vsel %vm10291_vm13, %v2037_v44, %v5326_v14  ;;  %vm10302_vm13 = vcmask 228352   ;;  %v5372_v22 = vunpack.i.h.bf16 %v5370_v51  ;;  %v5371_v16 = vunpack.i.l.bf16 %v5370_v51 }
 0x587   :  { %v5367_v46 = vunpack.i.h.bf16 %v5365_v0  ;;  %v5366_v32 = vunpack.i.l.bf16 %v5365_v0 }
 0x589   :  { %v2042_v23 = vsel %vm10292_vm14, %v2039_v58, %v5367_v46  ;;  %v5380_v48 = vpop.permute.xlu1 %5379  ;;  %v2041_v59 = vsel %vm10292_vm14, %v10303_v40, %v5366_v32  ;;  %vm10316_vm14 = vcmask 523264  }
 0x58a   :  { %v5375_v31 = vpop.permute.xlu0 %5374  ;;  %v5382_v27 = vunpack.i.h.bf16 %v5380_v48  ;;  %v5381_v61 = vunpack.i.l.bf16 %v5380_v48 }
 0x58b   :  { %v5377_v2 = vunpack.i.h.bf16 %v5375_v31  ;;  %v5376_v56 = vunpack.i.l.bf16 %v5375_v31 }
 0x58d   :  { %v2390_v7 = vsel %vm10293_vm6, %v7945_v5, %v5377_v2  ;;  %v2389_v6 = vsel %vm10295_vm15, %v7942_v39, %v5376_v56  ;;  %v5390_v15 = vpop.permute.xlu1 %5389  ;;  %vm10304_vm6 = vcmask 326656  }
 0x58e   :  { %v5385_v20 = vpop.permute.xlu0 %5384  ;;  %v5392_v60 = vunpack.i.h.bf16 %v5390_v15  ;;  %v5391_v17 = vunpack.i.l.bf16 %v5390_v15  ;;  %v2045_v58 = vsel %vm10304_vm6, %v2041_v59, %v5371_v16 }
 0x58f   :  { %v5387_v41 = vunpack.i.h.bf16 %v5385_v20  ;;  %v5386_v26 = vunpack.i.l.bf16 %v5385_v20 }
 0x591   :  { %v2392_v12 = vsel %vm10294_vm12, %v2390_v7, %v5387_v41  ;;  %v2391_v37 = vsel %vm10296_vm9, %v2389_v6, %v5386_v26  ;;  %v5400_v45 = vpop.permute.xlu1 %5399  ;;  %vm10305_vm12 = vmmov %vm10304_vm6 }
 0x592   :  { %v5395_v42 = vpop.permute.xlu0 %5394  ;;  %v5402_v14 = vunpack.i.h.bf16 %v5400_v45  ;;  %v5401_v38 = vunpack.i.l.bf16 %v5400_v45  ;;  %v2046_v46 = vsel %vm10305_vm12, %v2042_v23, %v5372_v22  ;;  %vm10317_vm6 = vmmov %vm10316_vm14  ;;  %vm10318_vm12 = vcmask 261120  }
 0x593   :  { %v5397_v36 = vunpack.i.h.bf16 %v5395_v42  ;;  %v5396_v24 = vunpack.i.l.bf16 %v5395_v42 }
 0x595   :  { %v2394_v33 = vsel %vm10282_vm2, %v2392_v12, %v5397_v36  ;;  %v2393_v53 = vsel %vm10297_vm8, %v2391_v37, %v5396_v24  ;;  %v5410_v55 = vpop.permute.xlu1 %5409  ;;  %vm10306_vm2 = vcmask 359424   ;;  %vm10310_vm8 = vcmask 424960  }
 0x596   :  { %v5405_v52 = vpop.permute.xlu0 %5404  ;;  %v5412_v31 = vunpack.i.h.bf16 %v5410_v55  ;;  %v5411_v0 = vunpack.i.l.bf16 %v5410_v55  ;;  %v2049_v2 = vsel %vm10306_vm2, %v2045_v58, %v5381_v61  ;;  %vm10307_vm15 = vmmov %vm10306_vm2  ;;  %vm10319_vm2 = vcmask 293888  }
 0x597   :  { %v5407_v1 = vunpack.i.h.bf16 %v5405_v52  ;;  %v5406_v57 = vunpack.i.l.bf16 %v5405_v52  ;;  %v2050_v20 = vsel %vm10307_vm15, %v2046_v46, %v5382_v27  ;;  %vm10320_vm15 = vmmov %vm10319_vm2 }
 0x599   :  { %v2396_v19 = vsel %vm10284_vm11, %v2394_v33, %v5407_v1  ;;  %v2395_v35 = vsel %vm10298_vm10, %v2393_v53, %v5406_v57  ;;  %v5420_v4 = vpop.permute.xlu1 %5419  ;;  %vm10308_vm11 = vcmask 392192   ;;  %vm10311_vm10 = vmmov %vm10310_vm8 }
 0x59a   :  { %v5415_v5 = vpop.permute.xlu0 %5414  ;;  %v5422_v41 = vunpack.i.h.bf16 %v5420_v4  ;;  %v5421_v7 = vunpack.i.l.bf16 %v5420_v4  ;;  %v2053_v12 = vsel %vm10308_vm11, %v2049_v2, %v5391_v17  ;;  %vm10309_vm9 = vmmov %vm10308_vm11  ;;  %vm10321_vm11 = vcmask 195584  }
 0x59b   :  { %v5417_v13 = vunpack.i.h.bf16 %v5415_v5  ;;  %v5416_v30 = vunpack.i.l.bf16 %v5415_v5  ;;  %v2054_v42 = vsel %vm10309_vm9, %v2050_v20, %v5392_v60  ;;  %v2057_v36 = vsel %vm10310_vm8, %v2053_v12, %v5401_v38 }
 0x59c   :  { %v2058_v56 = vsel %vm10311_vm10, %v2054_v42, %v5402_v14  ;;  %vm10322_vm9 = vcmask 326656   ;;  %vm10324_vm10 = vcmask 359424  }
 0x59d   :  { %v2397_v47 = vsel %vm10299_vm4, %v2395_v35, %v5416_v30  ;;  %v2398_v54 = vsel %vm10300_vm0, %v2396_v19, %v5417_v13  ;;  %v5430_v9 = vpop.permute.xlu1 %5429  ;;  %vm10312_vm4 = vcmask 457728   ;;  %v5327_v35 = vunpack.i.h.bf16 %v8408_v11  ;;  %vm10323_vm8 = vmmov %vm10322_vm9 }
 0x59e   :  { %v2384_v18 = vpop.permute.xlu0 %2383  ;;  %v2061_v26 = vsel %vm10312_vm4, %v2057_v36, %v5411_v0  ;;  %vm10313_vm0 = vmmov %vm10312_vm4  ;;  %v5432_v45 = vunpack.i.h.bf16 %v5430_v9  ;;  %v5431_v55 = vunpack.i.l.bf16 %v5430_v9 }
 0x59f   :  { %v2399_v25 = vsel %vm10301_vm3, %v2397_v47, %v2384_v18  ;;  %v2062_v23 = vsel %vm10313_vm0, %v2058_v56, %v5412_v31  ;;  %vm10314_vm3 = vcmask 490496   ;;  %v2040_v47 = vsel %vm10318_vm12, %v8430_v21, %v5327_v35  ;;  %vm10325_vm4 = vmmov %vm10324_vm10  ;;  %v8498_v35 = vld [vmem:[#allocation7 + $0x18] sm:$0xff] }
 0x5a0   :  { %v2422_v39 = vpack.c.bf16 %v7382_v63, %v2399_v25  ;;  %v2065_v1 = vsel %vm10314_vm3, %v2061_v26, %v5421_v7  ;;  %vm10326_vm0 = vcmask 228352   ;;  %vm10331_vm12 = vcmask 457728   ;;  %v5786_v26 = vld [vmem:[#allocation17 + $0x8] ss:$0 sps:$4 sm:$0xff]  }
 0x5a1   :  { %v5440_v34 = vpop.permute.xlu1 %5439 }
 0x5a2   :  { %4755 = vmatprep.mubr.msk.bf16.mxu1 %vm10302_vm13, %v2422_v39  ;;  %v5425_v44 = vpop.permute.xlu0 %5424  ;;  %vm10315_vm13 = vmmov %vm10314_vm3  ;;  %v5442_v61 = vunpack.i.h.bf16 %v5440_v34  ;;  %v5441_v60 = vunpack.i.l.bf16 %v5440_v34  ;;  %vm10327_vm3 = vcmask 392192  }
 0x5a3   :  { %v2066_v57 = vsel %vm10315_vm13, %v2062_v23, %v5422_v41  ;;  %v5427_v5 = vunpack.i.h.bf16 %v5425_v44  ;;  %v5426_v53 = vunpack.i.l.bf16 %v5425_v44  ;;  %vm10328_vm13 = vmmov %vm10327_vm3 }
 0x5a5   :  { %v2043_v18 = vsel %vm10319_vm2, %v10303_v40, %v5426_v53  ;;  %v2044_v25 = vsel %vm10320_vm15, %v2040_v47, %v5427_v5  ;;  %vm10332_vm2 = vmmov %vm10331_vm12  ;;  %vm10333_vm15 = vcmask 490496  }
 0x5a6   :  { %v5435_v6 = vpop.permute.xlu0 %5434  ;;  %v2047_v11 = vsel %vm10322_vm9, %v2043_v18, %v5431_v55  ;;  %v2048_v22 = vsel %vm10323_vm8, %v2044_v25, %v5432_v45  ;;  %vm10335_vm9 = vcmask 523264   ;;  %v8502_v18 = vld [vmem:[#allocation7] sm:$0xff] }
 0x5a7   :  { %v5437_v39 = vunpack.i.h.bf16 %v5435_v6  ;;  %v5436_v51 = vunpack.i.l.bf16 %v5435_v6  ;;  %vm10336_vm8 = vmmov %vm10335_vm9 }
 0x5a9   :  { %v2051_v21 = vsel %vm10324_vm10, %v2047_v11, %v5436_v51  ;;  %v2052_v16 = vsel %vm10325_vm4, %v2048_v22, %v5437_v39  ;;  %vm10337_vm10 = vcmask 1043456   ;;  %v8512_v39 = vld [vmem:[#allocation7 + $0x8] sm:$0xff] }
 0x5aa   :  { %v5445_v48 = vpop.permute.xlu0 %5444  ;;  %v2056_v38 = vsel %vm10328_vm13, %v2052_v16, %v5442_v61  ;;  %vm10338_vm4 = vmmov %vm10337_vm10  ;;  %vm2543_vm1 = vcmp.eq.s32.totalorder %v8512_v39, 0  ;;  %vm2549_vm7 = vcmp.eq.s32.totalorder %v8512_v39, 3  ;;  %vm2551_vm5 = vcmp.eq.s32.totalorder %v8512_v39, 4 }
 0x5ab   :  { %v5447_v59 = vunpack.i.h.bf16 %v5445_v48  ;;  %v5446_v27 = vunpack.i.l.bf16 %v5445_v48  ;;  %v2992_v23 = vsel %vm10338_vm4, %v5786_v26, 0  ;;  %vm2557_vm4 = vcmp.eq.s32.totalorder %v8512_v39, 7 }
 0x5ae   :  { %v5460_v14 = vpop.permute.xlu0 %5459 }
 0x5af   :  { %v5462_v0 = vunpack.i.h.bf16 %v5460_v14  ;;  %v5461_v2 = vunpack.i.l.bf16 %v5460_v14 }
 0x5d9   :  { %v5450_v33 = vpop.permute.xlu1 %5449 }
 0x5da   :  { %v5452_v52 = vunpack.i.h.bf16 %v5450_v33  ;;  %v5451_v24 = vunpack.i.l.bf16 %v5450_v33  ;;  %v5785_v33 = vld [vmem:[#allocation17] sm:$0xff]  }
 0x5db   :  { %4806 = vmatprep.subr.bf16.mxu0 %v5785_v33 }
 0x5dc   :  { %v2417_v19 = vsel %vm10316_vm14, %v2065_v1, %v5451_v24  ;;  %v2418_v37 = vsel %vm10317_vm6, %v2066_v57, %v5452_v52  ;;  %vm10329_vm14 = vcmask 424960   ;;  %4807 = vmatpush3.bf16.msra.mxu0 %v5785_v33 }
 0x5dd   :  { %v5455_v13 = vpop.permute.xlu1 %5454  ;;  %v2421_v30 = vpack.c.bf16 %v2418_v37, %v2417_v19  ;;  %vm10330_vm6 = vmmov %vm10329_vm14  ;;  %4829 = vmatprep.subr.msk.bf16.mxu0 %vm10337_vm10, %v5786_v26  ;;  %vm2546_vm10 = vcmp.eq.s32.totalorder %v8502_v18, 2 }
 0x5de   :  { %v5457_v17 = vunpack.i.h.bf16 %v5455_v13  ;;  %v5456_v9 = vunpack.i.l.bf16 %v5455_v13  ;;  %v2060_v58 = vsel %vm10330_vm6, %v2056_v38, %v5447_v59 }
 0x5df   :  { %2526 = vmatmul.mubr.bf16.vlgmr.msra.gmra.mrb[0].mxu1 %v2421_v30  ;;  %v8496_v30 = vld [vmem:[#allocation7 + $0x10] sm:$0xff] }
 0x5e0   :  { %v2064_v46 = vsel %vm10331_vm12, %v2060_v58, %v5457_v17  ;;  %4809 = vmatpush3.bf16.msra.mxu0 %v2992_v23  ;;  %vm2574_vm13 = vcmp.eq.s32.totalorder %v8496_v30, 0  ;;  %vm2576_vm6 = vcmp.eq.s32.totalorder %v8496_v30, 1  ;;  %vm2577_vm12 = vcmp.eq.s32.totalorder %v8498_v35, 1 }
 0x5e1   :  { %v2386_v15 = vpop.permute.xlu1 %2385 }
 0x5e2   :  { %v2400_v4 = vsel %vm10321_vm11, %v2398_v54, %v2386_v15  ;;  %v2055_v54 = vsel %vm10327_vm3, %v2051_v21, %v5441_v60  ;;  %vm10334_vm11 = vmmov %vm10333_vm15 }
 0x5e3   :  { %v2424_v32 = vpack.c.bf16 %v7382_v63, %v2400_v4  ;;  %v2059_v44 = vsel %vm10329_vm14, %v2055_v54, %v5446_v27  ;;  %v2068_v12 = vsel %vm10334_vm11, %v2064_v46, %v5462_v0  ;;  %vm2575_vm14 = vcmp.eq.s32.totalorder %v8498_v35, 0 }
 0x5e4   :  { %v2063_v31 = vsel %vm10332_vm2, %v2059_v44, %v5456_v9  ;;  %vm2585_vm11 = vcmp.eq.s32.totalorder %v8498_v35, 5  ;;  %vm2553_vm2 = vcmp.eq.s32.totalorder %v8512_v39, 5 }
 0x5e5   :  { %4756 = vmatprep.mubr.msk.bf16.mxu1 %vm10326_vm0, %v2424_v32  ;;  %v2067_v7 = vsel %vm10333_vm15, %v2063_v31, %v5461_v2  ;;  %vm10339_vm0 = vcmask 195584   ;;  %vm2555_vm15 = vcmp.eq.s32.totalorder %v8512_v39, 6 }
 0x5e6   :  { %vm10340_vm3 = vmmov %vm10339_vm0 }
 0x5eb   :  { %v5465_v20 = vpop.permute.xlu0 %5464 }
 0x5ec   :  { %v5467_v41 = vunpack.i.h.bf16 %v5465_v20  ;;  %v5466_v34 = vunpack.i.l.bf16 %v5465_v20 }
 0x5ee   :  { %v2419_v42 = vsel %vm10335_vm9, %v2067_v7, %v5466_v34  ;;  %v2420_v36 = vsel %vm10336_vm8, %v2068_v12, %v5467_v41  ;;  %vm2542_vm9 = vcmp.eq.s32.totalorder %v8502_v18, 0  ;;  %vm2544_vm8 = vcmp.eq.s32.totalorder %v8502_v18, 1 }
 0x5ef   :  { %v2423_v56 = vpack.c.bf16 %v2420_v36, %v2419_v42 }
 0x5f1   :  { %2534 = vmatmul.mubr.bf16.gmra.mrb[4].mxu1 %v2423_v56 }
 0x6b2   :  { %v2527_v52 = vpop.f32.mrb[0].mxu1 }
 0x6b3   :  { %2610 = vrot.lane.b32.xlu1 %v2527_v52, %s6336_s2  ;;  %v2529_v24 = vpop.f32.mrb[1].mxu1 }
 0x6b4   :  { %v2530_v1 = vpop.f32.mrb[2].mxu1 }
 0x6b5   :  { %v2974_v57 = vpack.c.bf16 %v2530_v1, %v2527_v52  ;;  %2612 = vrot.lane.b32.xlu0 %v2530_v1, %s6336_s2  ;;  %v2532_v6 = vpop.f32.mrb[3].mxu1 }
 0x6b7   :  { %4810 = vmatprep.mubr.msk.bf16.mxu0 %vm10339_vm0, %v2974_v57  ;;  %vm2550_vm0 = vcmp.eq.s32.totalorder %v8502_v18, 4 }
 0x6c4   :  { %v2535_v19 = vpop.f32.mrb[4].mxu1 }
 0x6c5   :  { %2614 = vrot.lane.b32.xlu1 %v2535_v19, %s6336_s2  ;;  %v2537_v37 = vpop.f32.mrb[5].mxu1 }
 0x6c6   :  { %v2538_v5 = vpop.f32.mrb[6].mxu1 }
 0x6c7   :  { %v2975_v53 = vpack.c.bf16 %v2538_v5, %v2535_v19  ;;  %2616 = vrot.lane.b32.xlu0 %v2538_v5, %s6336_s2  ;;  %v2540_v13 = vpop.f32.mrb[7].mxu1 }
 0x6c9   :  { %4811 = vmatmul.mubr.msk.bf16.vlgmr.msra.gmra.mrb[12].mxu0 %vm10340_vm3, %v2975_v53  ;;  %vm2552_vm3 = vcmp.eq.s32.totalorder %v8502_v18, 5 }
 0x725   :  { %v8504_v25 = vpop.permute.xlu1 %2610 }
 0x726   :  { %v2622_v55 = vsel %vm2542_vm9, %v8504_v25, 0.0  ;;  %v2624_v11 = vsel %vm2544_vm8, %v8504_v25, 0.0  ;;  %v2626_v22 = vsel %vm2546_vm10, %v8504_v25, 0.0  ;;  %vm10341_vm9 = vcmp.eq.s32.totalorder %v8498_v35, 2 }
 0x727   :  { %v8500_v47 = vpop.permute.xlu0 %2612  ;;  %v2630_v60 = vsel %vm2550_vm0, %v8504_v25, 0.0  ;;  %v8578_v17 = vsel %vm2552_vm3, %v8504_v25, 0.0  ;;  %vm10346_vm8 = vcmp.eq.s32.totalorder %v8496_v30, 2  ;;  %vm10349_vm0 = vcmp.eq.s32.totalorder %v8512_v39, 1 }
 0x728   :  { %v2623_v61 = vsel %vm2543_vm1, %v8500_v47, 0.0  ;;  %v2625_v44 = vsel %vm10349_vm0, %v8500_v47, 0.0  ;;  %vm2587_vm3 = vcmp.eq.s32.totalorder %v8498_v35, 6  ;;  %v2629_v20 = vsel %vm2549_vm7, %v8500_v47, 0.0 }
 0x729   :  { %v2631_v41 = vsel %vm2551_vm5, %v8500_v47, 0.0  ;;  %v2633_v34 = vsel %vm2553_vm2, %v8500_v47, 0.0  ;;  %vm2586_vm7 = vcmp.eq.s32.totalorder %v8496_v30, 6  ;;  %v8622_v33 = vsel %vm2555_vm15, %v8500_v47, 0.0 }
 0x72a   :  { %v8627_v26 = vsel %vm2557_vm4, %v8500_v47, 0.0  ;;  %vm2589_vm2 = vcmp.eq.s32.totalorder %v8498_v35, 7  ;;  %vm10360_vm15 = vcmp.eq.s32.totalorder %v8498_v35, 4 }
 0x737   :  { %v8524_v48 = vpop.permute.xlu1 %2614 }
 0x738   :  { %v2654_v4 = vsel %vm2574_vm13, %v8524_v48, 0.0  ;;  %v2656_v32 = vsel %vm2576_vm6, %v8524_v48, 0.0  ;;  %vm10344_vm13 = vcmp.eq.s32.totalorder %v8502_v18, 3  ;;  %vm10345_vm6 = vcmp.eq.s32.totalorder %v8502_v18, 6 }
 0x739   :  { %v8514_v51 = vpop.permute.xlu0 %2616  ;;  %v2628_v27 = vsel %vm10344_vm13, %v8504_v25, 0.0  ;;  %v8583_v9 = vsel %vm10345_vm6, %v8504_v25, 0.0  ;;  %v2658_v14 = vsel %vm10346_vm8, %v8524_v48, 0.0  ;;  %vm10353_vm13 = vcmp.eq.s32.totalorder %v8498_v35, 3 }
 0x73a   :  { %v2655_v15 = vsel %vm2575_vm14, %v8514_v51, 0.0  ;;  %v2657_v45 = vsel %vm2577_vm12, %v8514_v51, 0.0  ;;  %v2659_v21 = vsel %vm10341_vm9, %v8514_v51, 0.0  ;;  %vm10342_vm12 = vcmask 31744  }
 0x73b   :  { %v2831_v16 = vsel %vm10342_vm12, %v2655_v15, 0.0  ;;  %vm10343_vm14 = vmmov %vm10342_vm12  ;;  %vm10352_vm9 = vcmp.eq.s32.totalorder %v8512_v39, 2  ;;  %v2661_v7 = vsel %vm10353_vm13, %v8514_v51, 0.0  ;;  %v2663_v6 = vsel %vm10360_vm15, %v8514_v51, 0.0 }
 0x73c   :  { %v2840_v59 = vsel %vm10343_vm14, %v2657_v45, 0.0  ;;  %vm10347_vm10 = vmmov %vm10342_vm12  ;;  %vm10351_vm12 = vcmp.eq.s32.totalorder %v8502_v18, 7  ;;  %v2627_v2 = vsel %vm10352_vm9, %v8500_v47, 0.0  ;;  %v2665_v53 = vsel %vm2585_vm11, %v8514_v51, 0.0 }
 0x73d   :  { %v2830_v54 = vsel %vm10347_vm10, %v2654_v4, 0.0  ;;  %vm10348_vm1 = vmmov %vm10347_vm10  ;;  %v8598_v0 = vsel %vm10351_vm12, %v8504_v25, 0.0  ;;  %vm2588_vm13 = vcmp.eq.s32.totalorder %v8496_v30, 7 }
 0x73e   :  { %v2839_v38 = vsel %vm10348_vm1, %v2656_v32, 0.0  ;;  %v2832_v58 = vadd.f32 %v2831_v16, %v2830_v54  ;;  %vm10350_vm14 = vmmov %vm10348_vm1 }
 0x73f   :  { %v2841_v46 = vadd.f32 %v2840_v59, %v2839_v38  ;;  %v2849_v31 = vsel %vm10350_vm14, %v2659_v21, 0.0  ;;  %vm10354_vm6 = vmmov %vm10348_vm1 }
 0x740   :  { %v2848_v12 = vsel %vm10354_vm6, %v2658_v14, 0.0  ;;  %vm10355_vm8 = vmmov %vm10348_vm1  ;;  %v2833_v24 = vrot.slane %v2832_v58, 4  ;;  %vm10365_vm6 = vcmp.eq.s32.totalorder %v8496_v30, 4 }
 0x741   :  { %v2687_v42 = vsel %vm10355_vm8, %v2623_v61, 0.0  ;;  %vm10356_vm10 = vmmov %vm10348_vm1  ;;  %v2850_v56 = vadd.f32 %v2849_v31, %v2848_v12  ;;  %v2842_v1 = vrot.slane %v2841_v46, 4  ;;  %vm10366_vm8 = vcmp.eq.s32.totalorder %v8496_v30, 5 }
 0x742   :  { %v2696_v36 = vsel %vm10356_vm10, %v2625_v44, 0.0  ;;  %vm10357_vm5 = vmmov %vm10348_vm1  ;;  %vm10358_vm1 = vcmp.eq.s32.totalorder %v8496_v30, 3  ;;  %v2664_v4 = vsel %vm10366_vm8, %v8524_v48, 0.0  ;;  %v2834_v21 = vadd.f32 %v2833_v24, %v2832_v58 }
 0x743   :  { %v2686_v23 = vsel %vm10357_vm5, %v2622_v55, 0.0  ;;  %v2660_v52 = vsel %vm10358_vm1, %v8524_v48, 0.0  ;;  %vm10359_vm0 = vmmov %vm10357_vm5  ;;  %v2662_v55 = vsel %vm10365_vm6, %v8524_v48, 0.0  ;;  %v2851_v32 = vrot.slane %v2850_v56, 4 }
 0x744   :  { %v2695_v57 = vsel %vm10359_vm0, %v2624_v11, 0.0  ;;  %vm10361_vm14 = vmmov %vm10359_vm0  ;;  %v2688_v37 = vadd.f32 %v2687_v42, %v2686_v23  ;;  %v2843_v16 = vadd.f32 %v2842_v1, %v2841_v46  ;;  %v2722_v38 = vsel %vm10359_vm0, %v2630_v60, 0.0 }
 0x745   :  { %v2858_v19 = vsel %vm10361_vm14, %v2661_v7, 0.0  ;;  %v2697_v5 = vadd.f32 %v2696_v36, %v2695_v57  ;;  %vm10362_vm4 = vmmov %vm10359_vm0  ;;  %v2667_v58 = vsel %vm2587_vm3, %v8514_v51, 0.0  ;;  %v2852_v46 = vadd.f32 %v2851_v32, %v2850_v56 }
 0x746   :  { %v2704_v13 = vsel %vm10362_vm4, %v2626_v22, 0.0  ;;  %vm10363_vm12 = vmmov %vm10359_vm0  ;;  %v2689_v31 = vrot.slane %v2688_v37, 4  ;;  %v2835_v42 = vrot.slane %v2834_v21, 2  ;;  %v2844_v36 = vrot.slane %v2843_v16, 2 }
 0x747   :  { %v2705_v15 = vsel %vm10363_vm12, %v2627_v2, 0.0  ;;  %vm10364_vm9 = vmmov %vm10359_vm0 }
 0x748   :  { %v2714_v45 = vsel %vm10364_vm9, %v2629_v20, 0.0  ;;  %vm10367_vm10 = vmmov %vm10359_vm0  ;;  %v2706_v14 = vadd.f32 %v2705_v15, %v2704_v13  ;;  %v2690_v57 = vadd.f32 %v2689_v31, %v2688_v37 }
 0x749   :  { %v2857_v11 = vsel %vm10367_vm10, %v2660_v52, 0.0  ;;  %vm10368_vm11 = vmmov %vm10359_vm0  ;;  %v2698_v52 = vrot.slane %v2697_v5, 4  ;;  %vm2591_vm10 = vcmp.eq.s32.totalorder %v8498_v35, 8 }
 0x74a   :  { %v2859_v22 = vadd.f32 %v2858_v19, %v2857_v11  ;;  %v2867_v59 = vsel %vm10368_vm11, %v2663_v6, 0.0  ;;  %vm10369_vm5 = vmmov %vm10359_vm0  ;;  %v2707_v60 = vrot.slane %v2706_v14, 4  ;;  %v2669_v19 = vsel %vm2589_vm2, %v8514_v51, 0.0 }
 0x74b   :  { %v2876_v61 = vsel %vm10369_vm5, %v2665_v53, 0.0  ;;  %vm10370_vm1 = vmmov %vm10359_vm0  ;;  %v2853_v53 = vrot.slane %v2852_v46, 2  ;;  %v2699_v32 = vadd.f32 %v2698_v52, %v2697_v5 }
 0x74c   :  { %v2713_v54 = vsel %vm10370_vm1, %v2628_v27, 0.0  ;;  %vm10371_vm15 = vmmov %vm10359_vm0  ;;  %v2860_v23 = vrot.slane %v2859_v22, 4  ;;  %v2708_v11 = vadd.f32 %v2707_v60, %v2706_v14  ;;  %vm2590_vm1 = vcmp.eq.s32.totalorder %v8496_v30, 8 }
 0x74d   :  { %v2866_v44 = vsel %vm10371_vm15, %v2662_v55, 0.0  ;;  %v2715_v2 = vadd.f32 %v2714_v45, %v2713_v54  ;;  %vm10372_vm14 = vmmov %vm10359_vm0  ;;  %v2836_v45 = vadd.f32 %v2835_v42, %v2834_v21  ;;  %v2845_v55 = vadd.f32 %v2844_v36, %v2843_v16 }
 0x74e   :  { %v2723_v20 = vsel %vm10372_vm14, %v2631_v41, 0.0  ;;  %v2868_v7 = vadd.f32 %v2867_v59, %v2866_v44  ;;  %vm10373_vm4 = vmmov %vm10359_vm0  ;;  %v2666_v41 = vsel %vm2586_vm7, %v8524_v48, 0.0  ;;  %v2854_v44 = vadd.f32 %v2853_v53, %v2852_v46 }
 0x74f   :  { %v2875_v12 = vsel %vm10373_vm4, %v2664_v4, 0.0  ;;  %v2724_v24 = vadd.f32 %v2723_v20, %v2722_v38  ;;  %vm10374_vm12 = vmmov %vm10359_vm0  ;;  %v2716_v6 = vrot.slane %v2715_v2, 4  ;;  %v2861_v4 = vadd.f32 %v2860_v23, %v2859_v22 }
 0x750   :  { %v2877_v27 = vadd.f32 %v2876_v61, %v2875_v12  ;;  %v2731_v1 = vsel %vm10374_vm12, %v8578_v17, 0.0  ;;  %vm10375_vm3 = vmmov %vm10359_vm0  ;;  %v2869_v13 = vrot.slane %v2868_v7, 4  ;;  %v2837_v22 = vrot.slane %v2836_v45, 1 }
 0x751   :  { %v2732_v56 = vsel %vm10375_vm3, %v2633_v34, 0.0  ;;  %vm10376_vm9 = vmmov %vm10359_vm0  ;;  %v2725_v59 = vrot.slane %v2724_v24, 4  ;;  %v2668_v34 = vsel %vm2588_vm13, %v8524_v48, 0.0  ;;  %v2717_v54 = vadd.f32 %v2716_v6, %v2715_v2 }
 0x752   :  { %v2885_v15 = vsel %vm10376_vm9, %v2667_v58, 0.0  ;;  %v2878_v17 = vrot.slane %v2877_v27, 4  ;;  %v2733_v61 = vadd.f32 %v2732_v56, %v2731_v1  ;;  %vm10377_vm7 = vmmov %vm10359_vm0  ;;  %v2870_v31 = vadd.f32 %v2869_v13, %v2868_v7 }
 0x753   :  { %v2884_v37 = vsel %vm10377_vm7, %v2666_v41, 0.0  ;;  %vm10378_vm2 = vmmov %vm10359_vm0  ;;  %v2846_v5 = vrot.slane %v2845_v55, 1  ;;  %v2862_v14 = vrot.slane %v2861_v4, 2  ;;  %v2691_v12 = vrot.slane %v2690_v57, 2 }
 0x754   :  { %v2740_v38 = vsel %vm10378_vm2, %v8583_v9, 0.0  ;;  %v2886_v21 = vadd.f32 %v2885_v15, %v2884_v37  ;;  %vm10379_vm6 = vmmov %vm10359_vm0  ;;  %v2879_v20 = vadd.f32 %v2878_v17, %v2877_v27  ;;  %v2726_v42 = vadd.f32 %v2725_v59, %v2724_v24 }
 0x755   :  { %v2894_v16 = vsel %vm10379_vm6, %v2669_v19, 0.0  ;;  %vm10380_vm8 = vmmov %vm10359_vm0  ;;  %v2734_v36 = vrot.slane %v2733_v61, 4  ;;  %v2700_v52 = vrot.slane %v2699_v32, 2  ;;  %v2709_v2 = vrot.slane %v2708_v11, 2 }
 0x756   :  { %v2893_v58 = vsel %vm10380_vm8, %v2668_v34, 0.0  ;;  %vm10381_vm13 = vmmov %vm10359_vm0  ;;  %v2855_v46 = vrot.slane %v2854_v44, 1  ;;  %v2871_v7 = vrot.slane %v2870_v31, 2  ;;  %v2887_v60 = vrot.slane %v2886_v21, 4 }
 0x757   :  { %v2895_v23 = vadd.f32 %v2894_v16, %v2893_v58  ;;  %v2741_v9 = vsel %vm10381_vm13, %v8622_v33, 0.0  ;;  %v2718_v1 = vrot.slane %v2717_v54, 2  ;;  %v2838_v41 = vadd.f32 %v2837_v22, %v2836_v45  ;;  %vm10382_vm11 = vmmov %vm10359_vm0 }
 0x758   :  { %v2847_v6 = vadd.f32 %v2846_v5, %v2845_v55  ;;  %v2863_v56 = vadd.f32 %v2862_v14, %v2861_v4  ;;  %v2880_v19 = vrot.slane %v2879_v20, 2  ;;  %v2692_v27 = vadd.f32 %v2691_v12, %v2690_v57  ;;  %vm10383_vm5 = vmmov %vm10359_vm0 }
 0x759   :  { %v2727_v53 = vrot.slane %v2726_v42, 2  ;;  %v2735_v13 = vadd.f32 %v2734_v36, %v2733_v61  ;;  %v2742_v15 = vadd.f32 %v2741_v9, %v2740_v38  ;;  %v2896_v24 = vrot.slane %v2895_v23, 4 }
 0x75a   :  { %v2701_v17 = vadd.f32 %v2700_v52, %v2699_v32  ;;  %v2710_v59 = vadd.f32 %v2709_v2, %v2708_v11  ;;  %v2749_v33 = vsel %vm10382_vm11, %v8598_v0, 0.0  ;;  %v2856_v34 = vadd.f32 %v2855_v46, %v2854_v44 }
 0x75b   :  { %v2872_v37 = vadd.f32 %v2871_v7, %v2870_v31  ;;  %v2719_v16 = vadd.f32 %v2718_v1, %v2717_v54  ;;  %v2750_v45 = vsel %vm10383_vm5, %v8627_v26, 0.0  ;;  %v2864_v57 = vrot.slane %v2863_v56, 1 }
 0x75c   :  { %v2881_v55 = vadd.f32 %v2880_v19, %v2879_v20  ;;  %v2888_v4 = vadd.f32 %v2887_v60, %v2886_v21  ;;  %vm10384_vm0 = vcmask 1041409   ;;  %vm2592_vm15 = vcmp.eq.s32.totalorder %v8496_v30, 9 }
 0x75d   :  { %v3089_v61 = vsel %vm10384_vm0, %v2847_v6, %v2838_v41  ;;  %vm2593_vm14 = vcmp.eq.s32.totalorder %v8498_v35, 9  ;;  %vm2594_vm4 = vcmp.eq.s32.totalorder %v8496_v30, 10  ;;  %v2693_v0 = vrot.slane %v2692_v27, 1 }
 0x75e   :  { %v2728_v32 = vadd.f32 %v2727_v53, %v2726_v42  ;;  %v2736_v11 = vrot.slane %v2735_v13, 2  ;;  %v2743_v54 = vrot.slane %v2742_v15, 4  ;;  %vm2595_vm12 = vcmp.eq.s32.totalorder %v8498_v35, 10 }
 0x75f   :  { %vm2596_vm3 = vcmp.eq.s32.totalorder %v8496_v30, 11  ;;  %vm2597_vm9 = vcmp.eq.s32.totalorder %v8498_v35, 11  ;;  %vm2598_vm7 = vcmp.eq.s32.totalorder %v8496_v30, 12  ;;  %v2897_v26 = vadd.f32 %v2896_v24, %v2895_v23 }
 0x760   :  { %v2702_v38 = vrot.slane %v2701_v17, 1  ;;  %v2751_v44 = vadd.f32 %v2750_v45, %v2749_v33  ;;  %v2873_v31 = vrot.slane %v2872_v37, 1  ;;  %vm10385_vm8 = vcmask 1042434  }
 0x761   :  { %v3090_v21 = vsel %vm10385_vm8, %v2856_v34, %v3089_v61  ;;  %v2711_v22 = vrot.slane %v2710_v59, 1  ;;  %vm2601_vm13 = vcmp.eq.s32.totalorder %v8498_v35, 13  ;;  %v2865_v5 = vadd.f32 %v2864_v57, %v2863_v56 }
 0x762   :  { %v2882_v14 = vrot.slane %v2881_v55, 1  ;;  %v2889_v20 = vrot.slane %v2888_v4, 2  ;;  %v2720_v58 = vrot.slane %v2719_v16, 1  ;;  %v2694_v12 = vadd.f32 %v2693_v0, %v2692_v27 }
 0x763   :  { %v2729_v42 = vrot.slane %v2728_v32, 1  ;;  %v8706_v36 = vadd.f32 %v2736_v11, %v2735_v13  ;;  %v8708_v23 = vadd.f32 %v2743_v54, %v2742_v15  ;;  %vm2604_vm8 = vcmp.eq.s32.totalorder %v8496_v30, 15 }
 0x764   :  { %v2898_v52 = vrot.slane %v2897_v26, 2  ;;  %vm10386_vm11 = vcmask 1043459   ;;  %v2703_v9 = vadd.f32 %v2702_v38, %v2701_v17  ;;  %v2752_v46 = vrot.slane %v2751_v44, 4 }
 0x765   :  { %v3091_v2 = vsel %vm10386_vm11, %v2865_v5, %v3090_v21  ;;  %v2874_v7 = vadd.f32 %v2873_v31, %v2872_v37  ;;  %v8714_v60 = vadd.f32 %v2711_v22, %v2710_v59  ;;  %vm2603_vm6 = vcmp.eq.s32.totalorder %v8498_v35, 14 }
 0x766   :  { %vm2605_vm2 = vcmp.eq.s32.totalorder %v8498_v35, 15  ;;  %v8718_v1 = vadd.f32 %v2882_v14, %v2881_v55  ;;  %v8720_v41 = vadd.f32 %v2889_v20, %v2888_v4  ;;  %v8722_v6 = vadd.f32 %v2720_v58, %v2719_v16 }
 0x767   :  { %v2671_v56 = vsel %vm2591_vm10, %v8514_v51, 0.0  ;;  %vm10387_vm11 = vcmask 1044484   ;;  %v8730_v27 = vadd.f32 %v2729_v42, %v2728_v32  ;;  %vm2565_vm0 = vcmp.eq.s32.totalorder %v8512_v39, 11 }
 0x768   :  { %v8728_v19 = vsel %vm10387_vm11, %v2874_v7, %v3091_v2  ;;  %v8735_v15 = vadd.f32 %v2898_v52, %v2897_v26  ;;  %v8737_v24 = vadd.f32 %v2752_v46, %v2751_v44  ;;  %vm10388_vm5 = vcmask 1041409  }
 0x769   :  { %v8740_v17 = vsel %vm10388_vm5, %v2703_v9, %v2694_v12  ;;  %v2670_v59 = vsel %vm2590_vm1, %v8524_v48, 0.0  ;;  %v2672_v33 = vsel %vm2592_vm15, %v8524_v48, 0.0  ;;  %v2673_v34 = vsel %vm2593_vm14, %v8514_v51, 0.0 }
 0x76a   :  { %v2674_v37 = vsel %vm2594_vm4, %v8524_v48, 0.0  ;;  %vm10389_vm10 = vcmask 31744   ;;  %vm2564_vm5 = vcmp.eq.s32.totalorder %v8502_v18, 11  ;;  %v2675_v45 = vsel %vm2595_vm12, %v8514_v51, 0.0 }
 0x76b   :  { %v2903_v16 = vsel %vm10389_vm10, %v2671_v56, 0.0  ;;  %v2676_v57 = vsel %vm2596_vm3, %v8524_v48, 0.0  ;;  %v2677_v55 = vsel %vm2597_vm9, %v8514_v51, 0.0  ;;  %v2678_v4 = vsel %vm2598_vm7, %v8524_v48, 0.0  ;;  %vm10392_vm4 = vmmov %vm10389_vm10 }
 0x76c   :  { %vm2567_vm1 = vcmp.eq.s32.totalorder %v8512_v39, 12  ;;  %vm10390_vm15 = vcmp.eq.s32.totalorder %v8498_v35, 12  ;;  %vm10391_vm14 = vcmp.eq.s32.totalorder %v8496_v30, 13  ;;  %v2681_v32 = vsel %vm2601_vm13, %v8514_v51, 0.0  ;;  %vm10394_vm3 = vmmov %vm10392_vm4 }
 0x76d   :  { %v2679_v61 = vsel %vm10390_vm15, %v8514_v51, 0.0  ;;  %v2680_v0 = vsel %vm10391_vm14, %v8524_v48, 0.0  ;;  %v2902_v11 = vsel %vm10392_vm4, %v2670_v59, 0.0  ;;  %vm10393_vm12 = vcmp.eq.s32.totalorder %v8496_v30, 14  ;;  %vm10399_vm15 = vmmov %vm10394_vm3 }
 0x76e   :  { %v2682_v54 = vsel %vm10393_vm12, %v8524_v48, 0.0  ;;  %v8785_v26 = vsel %vm2603_vm6, %v8514_v51, 0.0  ;;  %v2904_v38 = vadd.f32 %v2903_v16, %v2902_v11  ;;  %v2912_v44 = vsel %vm10394_vm3, %v2673_v34, 0.0  ;;  %vm10400_vm14 = vmmov %vm10394_vm3 }
 0x76f   :  { %vm2566_vm9 = vcmp.eq.s32.totalorder %v8502_v18, 12  ;;  %vm2569_vm7 = vcmp.eq.s32.totalorder %v8512_v39, 13  ;;  %vm10395_vm13 = vcmp.eq.s32.totalorder %v8502_v18, 8  ;;  %vm10396_vm11 = vcmp.eq.s32.totalorder %v8512_v39, 8  ;;  %vm10401_vm4 = vmmov %vm10394_vm3 }
 0x770   :  { %v2638_v31 = vsel %vm10395_vm13, %v8504_v25, 0.0  ;;  %v2639_v21 = vsel %vm10396_vm11, %v8500_v47, 0.0  ;;  %vm10397_vm10 = vcmp.eq.s32.totalorder %v8502_v18, 9  ;;  %vm10398_vm6 = vcmp.eq.s32.totalorder %v8512_v39, 9  ;;  %vm10404_vm13 = vmmov %vm10401_vm4 }
 0x771   :  { %v2640_v22 = vsel %vm10397_vm10, %v8504_v25, 0.0  ;;  %v2641_v5 = vsel %vm10398_vm6, %v8500_v47, 0.0  ;;  %v8805_v14 = vsel %vm2604_vm8, %v8524_v48, 0.0  ;;  %v8810_v20 = vsel %vm2605_vm2, %v8514_v51, 0.0  ;;  %vm10405_vm11 = vmmov %vm10401_vm4 }
 0x772   :  { %v2911_v58 = vsel %vm10399_vm15, %v2672_v33, 0.0  ;;  %v2921_v12 = vsel %vm10400_vm14, %v2675_v45, 0.0  ;;  %v2920_v52 = vsel %vm10401_vm4, %v2674_v37, 0.0  ;;  %vm2568_vm12 = vcmp.eq.s32.totalorder %v8502_v18, 13  ;;  %vm10406_vm10 = vmmov %vm10401_vm4 }
 0x773   :  { %v2913_v42 = vadd.f32 %v2912_v44, %v2911_v58  ;;  %vm10402_vm3 = vcmp.eq.s32.totalorder %v8502_v18, 10  ;;  %vm10403_vm8 = vcmp.eq.s32.totalorder %v8512_v39, 10  ;;  %vm2571_vm2 = vcmp.eq.s32.totalorder %v8512_v39, 14  ;;  %vm10407_vm6 = vmmov %vm10401_vm4 }
 0x774   :  { %v2642_v30 = vsel %vm10402_vm3, %v8504_v25, 0.0  ;;  %v2643_v48 = vsel %vm10403_vm8, %v8500_v47, 0.0  ;;  %v2758_v35 = vsel %vm10404_vm13, %v2638_v31, 0.0  ;;  %v2759_v51 = vsel %vm10405_vm11, %v2639_v21, 0.0  ;;  %vm10408_vm15 = vmmov %vm10401_vm4 }
 0x775   :  { %v2767_v2 = vsel %vm10406_vm10, %v2640_v22, 0.0  ;;  %v2768_v9 = vsel %vm10407_vm6, %v2641_v5, 0.0  ;;  %v2905_v46 = vrot.slane %v2904_v38, 4  ;;  %v2922_v7 = vadd.f32 %v2921_v12, %v2920_v52  ;;  %vm10409_vm3 = vmmov %vm10401_vm4 }
 0x776   :  { %v2760_v56 = vadd.f32 %v2759_v51, %v2758_v35  ;;  %v2769_v59 = vadd.f32 %v2768_v9, %v2767_v2  ;;  %v2930_v33 = vsel %vm10408_vm15, %v2677_v55, 0.0  ;;  %vm2570_vm14 = vcmp.eq.s32.totalorder %v8502_v18, 14  ;;  %vm10410_vm8 = vmmov %vm10409_vm3 }
 0x777   :  { %v2645_v34 = vsel %vm2565_vm0, %v8500_v47, 0.0  ;;  %v2776_v37 = vsel %vm10401_vm4, %v2642_v30, 0.0  ;;  %v2777_v16 = vsel %vm10409_vm3, %v2643_v48, 0.0  ;;  %v2929_v45 = vsel %vm10410_vm8, %v2676_v57, 0.0  ;;  %vm10411_vm13 = vmmov %vm10409_vm3 }
 0x778   :  { %v2938_v11 = vsel %vm10411_vm13, %v2678_v4, 0.0  ;;  %vm10412_vm11 = vmmov %vm10409_vm3  ;;  %vm2573_vm10 = vcmp.eq.s32.totalorder %v8512_v39, 15  ;;  %v2778_v31 = vadd.f32 %v2777_v16, %v2776_v37  ;;  %v2914_v55 = vrot.slane %v2913_v42, 4 }
 0x779   :  { %v2939_v44 = vsel %vm10412_vm11, %v2679_v61, 0.0  ;;  %vm2572_vm6 = vcmp.eq.s32.totalorder %v8502_v18, 15  ;;  %v2644_v21 = vsel %vm2564_vm5, %v8504_v25, 0.0  ;;  %v2761_v22 = vrot.slane %v2760_v56, 4  ;;  %vm10413_vm0 = vmmov %vm10409_vm3 }
 0x77a   :  { %v2770_v5 = vrot.slane %v2769_v59, 4  ;;  %v2923_v58 = vrot.slane %v2922_v7, 4  ;;  %v2931_v12 = vadd.f32 %v2930_v33, %v2929_v45  ;;  %v2647_v57 = vsel %vm2567_vm1, %v8500_v47, 0.0  ;;  %vm10414_vm15 = vmmov %vm10413_vm0 }
 0x77b   :  { %v2786_v4 = vsel %vm10413_vm0, %v2645_v34, 0.0  ;;  %v2906_v61 = vadd.f32 %v2905_v46, %v2904_v38  ;;  %v2940_v52 = vadd.f32 %v2939_v44, %v2938_v11  ;;  %v2947_v30 = vsel %vm10414_vm15, %v2680_v0, 0.0  ;;  %vm10415_vm4 = vmmov %vm10413_vm0 }
 0x77c   :  { %v2948_v48 = vsel %vm10415_vm4, %v2681_v32, 0.0  ;;  %v2646_v35 = vsel %vm2566_vm9, %v8504_v25, 0.0  ;;  %v2649_v51 = vsel %vm2569_vm7, %v8500_v47, 0.0  ;;  %v2779_v2 = vrot.slane %v2778_v31, 4  ;;  %vm10416_vm5 = vmmov %vm10413_vm0 }
 0x77d   :  { %v2785_v9 = vsel %vm10416_vm5, %v2644_v21, 0.0  ;;  %v2762_v33 = vadd.f32 %v2761_v22, %v2760_v56  ;;  %v2771_v37 = vadd.f32 %v2770_v5, %v2769_v59  ;;  %vm10417_vm1 = vmmov %vm10413_vm0  ;;  %v2915_v46 = vadd.f32 %v2914_v55, %v2913_v42 }
 0x77e   :  { %v2787_v34 = vadd.f32 %v2786_v4, %v2785_v9  ;;  %v2795_v38 = vsel %vm10417_vm1, %v2647_v57, 0.0  ;;  %v2924_v0 = vadd.f32 %v2923_v58, %v2922_v7  ;;  %v2932_v16 = vrot.slane %v2931_v12, 4  ;;  %vm10418_vm3 = vmmov %vm10413_vm0 }
 0x77f   :  { %v2956_v32 = vsel %vm10418_vm3, %v2682_v54, 0.0  ;;  %v2907_v45 = vrot.slane %v2906_v61, 2  ;;  %v2941_v11 = vrot.slane %v2940_v52, 4  ;;  %v2648_v44 = vsel %vm2568_vm12, %v8504_v25, 0.0  ;;  %vm10419_vm9 = vmmov %vm10413_vm0 }
 0x780   :  { %v2794_v53 = vsel %vm10419_vm9, %v2646_v35, 0.0  ;;  %v2651_v56 = vsel %vm2571_vm2, %v8500_v47, 0.0  ;;  %v2780_v59 = vadd.f32 %v2779_v2, %v2778_v31  ;;  %vm10420_vm7 = vmmov %vm10413_vm0  ;;  %v2949_v7 = vadd.f32 %v2948_v48, %v2947_v30 }
 0x781   :  { %v2796_v21 = vadd.f32 %v2795_v38, %v2794_v53  ;;  %v2804_v42 = vsel %vm10420_vm7, %v2649_v51, 0.0  ;;  %v2763_v55 = vrot.slane %v2762_v33, 2  ;;  %v2772_v22 = vrot.slane %v2771_v37, 2  ;;  %vm10421_vm8 = vmmov %vm10413_vm0 }
 0x782   :  { %v2788_v54 = vrot.slane %v2787_v34, 4  ;;  %v2957_v5 = vsel %vm10421_vm8, %v8785_v26, 0.0  ;;  %vm10422_vm13 = vmmov %vm10413_vm0  ;;  %v2650_v57 = vsel %vm2570_vm14, %v8504_v25, 0.0  ;;  %v2916_v31 = vrot.slane %v2915_v46, 2 }
 0x783   :  { %v2965_v58 = vsel %vm10422_vm13, %v8805_v14, 0.0  ;;  %vm10423_vm12 = vmmov %vm10413_vm0  ;;  %v2653_v53 = vsel %vm2573_vm10, %v8500_v47, 0.0  ;;  %v2925_v35 = vrot.slane %v2924_v0, 2  ;;  %v2652_v26 = vsel %vm2572_vm6, %v8504_v25, 0.0 }
 0x784   :  { %v2803_v4 = vsel %vm10423_vm12, %v2648_v44, 0.0  ;;  %vm10424_vm2 = vmmov %vm10413_vm0  ;;  %v2781_v14 = vrot.slane %v2780_v59, 2  ;;  %v2797_v51 = vrot.slane %v2796_v21, 4  ;;  %v2764_v2 = vadd.f32 %v2763_v55, %v2762_v33 }
 0x785   :  { %v2805_v30 = vadd.f32 %v2804_v42, %v2803_v4  ;;  %v2813_v48 = vsel %vm10424_vm2, %v2651_v56, 0.0  ;;  %v2773_v9 = vadd.f32 %v2772_v22, %v2771_v37  ;;  %v2789_v38 = vadd.f32 %v2788_v54, %v2787_v34  ;;  %vm10425_vm14 = vmmov %vm10413_vm0 }
 0x786   :  { %v2812_v44 = vsel %vm10425_vm14, %v2650_v57, 0.0  ;;  %v2908_v13 = vadd.f32 %v2907_v45, %v2906_v61  ;;  %v2933_v40 = vadd.f32 %v2932_v16, %v2931_v12  ;;  %vm10426_vm11 = vmmov %vm10413_vm0  ;;  %v2917_v39 = vadd.f32 %v2916_v31, %v2915_v46 }
 0x787   :  { %v2814_v63 = vadd.f32 %v2813_v48, %v2812_v44  ;;  %v2822_v47 = vsel %vm10426_vm11, %v2653_v53, 0.0  ;;  %v2950_v42 = vrot.slane %v2949_v7, 4  ;;  %v2958_v56 = vadd.f32 %v2957_v5, %v2956_v32  ;;  %vm10427_vm10 = vmmov %vm10413_vm0 }
 0x788   :  { %v2806_v4 = vrot.slane %v2805_v30, 4  ;;  %v2966_v18 = vsel %vm10427_vm10, %v8810_v20, 0.0  ;;  %v2782_v25 = vadd.f32 %v2781_v14, %v2780_v59  ;;  %v2798_v50 = vadd.f32 %v2797_v51, %v2796_v21  ;;  %vm10428_vm6 = vmmov %vm10413_vm0 }
 0x789   :  { %v2821_v33 = vsel %vm10428_vm6, %v2652_v26, 0.0  ;;  %v2765_v37 = vrot.slane %v2764_v2, 1  ;;  %v2774_v34 = vrot.slane %v2773_v9, 1  ;;  %v2790_v55 = vrot.slane %v2789_v38, 2 }
 0x78a   :  { %v2823_v22 = vadd.f32 %v2822_v47, %v2821_v33  ;;  %v2926_v61 = vadd.f32 %v2925_v35, %v2924_v0  ;;  %v2934_v12 = vrot.slane %v2933_v40, 2  ;;  %v2942_v16 = vadd.f32 %v2941_v11, %v2940_v52 }
 0x78b   :  { %v2815_v45 = vrot.slane %v2814_v63, 4  ;;  %v2909_v54 = vrot.slane %v2908_v13, 1  ;;  %v2918_v46 = vrot.slane %v2917_v39, 1  ;;  %v2967_v57 = vadd.f32 %v2966_v18, %v2965_v58 }
 0x78c   :  { %v2807_v32 = vadd.f32 %v2806_v4, %v2805_v30  ;;  %v2951_v5 = vadd.f32 %v2950_v42, %v2949_v7  ;;  %v2959_v31 = vrot.slane %v2958_v56, 4  ;;  %v2783_v53 = vrot.slane %v2782_v25, 1 }
 0x78d   :  { %v2799_v20 = vrot.slane %v2798_v50, 2  ;;  %v2766_v59 = vadd.f32 %v2765_v37, %v2764_v2  ;;  %v2775_v21 = vadd.f32 %v2774_v34, %v2773_v9  ;;  %v2791_v48 = vadd.f32 %v2790_v55, %v2789_v38 }
 0x78e   :  { %v2824_v26 = vrot.slane %v2823_v22, 4  ;;  %v2927_v14 = vrot.slane %v2926_v61, 1  ;;  %v2935_v51 = vadd.f32 %v2934_v12, %v2933_v40  ;;  %v2943_v44 = vrot.slane %v2942_v16, 2 }
 0x78f   :  { %v2816_v47 = vadd.f32 %v2815_v45, %v2814_v63  ;;  %v2910_v0 = vadd.f32 %v2909_v54, %v2908_v13  ;;  %v2919_v35 = vadd.f32 %v2918_v46, %v2917_v39  ;;  %v2968_v52 = vrot.slane %v2967_v57, 4 }
 0x790   :  { %v2808_v11 = vrot.slane %v2807_v32, 2  ;;  %vm10429_vm0 = vcmask 1042434   ;;  %v2960_v7 = vadd.f32 %v2959_v31, %v2958_v56  ;;  %v2784_v30 = vadd.f32 %v2783_v53, %v2782_v25 }
 0x791   :  { %v3076_v58 = vsel %vm10429_vm0, %v8714_v60, %v8740_v17  ;;  %v2800_v42 = vadd.f32 %v2799_v20, %v2798_v50  ;;  %v2952_v4 = vrot.slane %v2951_v5, 2  ;;  %v2792_v2 = vrot.slane %v2791_v48, 1  ;;  %vm10433_vm5 = vmmov %vm10429_vm0 }
 0x792   :  { %v2825_v9 = vadd.f32 %v2824_v26, %v2823_v22  ;;  %vm10430_vm15 = vcmask 1041409   ;;  %v2754_v40 = vrot.slane %v8737_v24, 2  ;;  %v2928_v18 = vadd.f32 %v2927_v14, %v2926_v61  ;;  %vm10435_vm3 = vmmov %vm10429_vm0 }
 0x793   :  { %v3082_v38 = vsel %vm10430_vm15, %v2775_v21, %v2766_v59  ;;  %v2944_v63 = vadd.f32 %v2943_v44, %v2942_v16  ;;  %v2817_v13 = vrot.slane %v2816_v47, 2  ;;  %v2936_v39 = vrot.slane %v2935_v51, 1  ;;  %vm10431_vm4 = vmmov %vm10430_vm15 }
 0x794   :  { %v2969_v33 = vadd.f32 %v2968_v52, %v2967_v57  ;;  %v3096_v37 = vsel %vm10431_vm4, %v2919_v35, %v2910_v0  ;;  %v2809_v34 = vadd.f32 %v2808_v11, %v2807_v32  ;;  %v10432_v60 = vrot.slane %v8708_v23, 2 }
 0x795   :  { %v2961_v50 = vrot.slane %v2960_v7, 2  ;;  %v2801_v56 = vrot.slane %v2800_v42, 1  ;;  %v3083_v25 = vsel %vm10433_vm5, %v2784_v30, %v3082_v38  ;;  %vm10434_vm1 = vcmask 1043459  }
 0x796   :  { %v2746_v17 = vadd.f32 %v10432_v60, %v8708_v23  ;;  %v3077_v55 = vsel %vm10434_vm1, %v8722_v6, %v3076_v58  ;;  %v2953_v22 = vadd.f32 %v2952_v4, %v2951_v5  ;;  %v2793_v61 = vadd.f32 %v2792_v2, %v2791_v48  ;;  %vm10436_vm9 = vmmov %vm10434_vm1 }
 0x797   :  { %v2826_v12 = vrot.slane %v2825_v9, 2  ;;  %v2755_v16 = vadd.f32 %v2754_v40, %v8737_v24  ;;  %v2945_v45 = vrot.slane %v2944_v63, 1  ;;  %v3097_v54 = vsel %vm10435_vm3, %v2928_v18, %v3096_v37  ;;  %vm10439_vm8 = vmmov %vm10434_vm1 }
 0x798   :  { %v2818_v46 = vadd.f32 %v2817_v13, %v2816_v47  ;;  %v2937_v57 = vadd.f32 %v2936_v39, %v2935_v51  ;;  %v2970_v32 = vrot.slane %v2969_v33, 2  ;;  %v2810_v31 = vrot.slane %v2809_v34, 1 }
 0x799   :  { %v3084_v23 = vsel %vm10436_vm9, %v2793_v61, %v3083_v25  ;;  %v2747_v53 = vrot.slane %v2746_v17, 1  ;;  %vm10437_vm7 = vcmask 1044484   ;;  %v2962_v59 = vadd.f32 %v2961_v50, %v2960_v7 }
 0x79a   :  { %v3078_v20 = vsel %vm10437_vm7, %v8730_v27, %v3077_v55  ;;  %v2802_v6 = vadd.f32 %v2801_v56, %v2800_v42  ;;  %v10438_v5 = vrot.slane %v8706_v36, 1  ;;  %v2954_v24 = vrot.slane %v2953_v22, 1  ;;  %vm10440_vm13 = vmmov %vm10437_vm7 }
 0x79b   :  { %v3098_v48 = vsel %vm10439_vm8, %v2937_v57, %v3097_v54  ;;  %v2827_v26 = vadd.f32 %v2826_v12, %v2825_v9  ;;  %v2891_v14 = vrot.slane %v8720_v41, 1  ;;  %v2946_v51 = vadd.f32 %v2945_v45, %v2944_v63  ;;  %vm10443_vm14 = vmmov %vm10437_vm7 }
 0x79c   :  { %v2739_v21 = vadd.f32 %v10438_v5, %v8706_v36  ;;  %v2819_v44 = vrot.slane %v2818_v46, 1  ;;  %v3085_v47 = vsel %vm10440_vm13, %v2802_v6, %v3084_v23  ;;  %v2756_v0 = vrot.slane %v2755_v16, 1 }
 0x79d   :  { %vm10441_vm12 = vcmask 1045509   ;;  %v2971_v27 = vadd.f32 %v2970_v32, %v2969_v33  ;;  %v2811_v52 = vadd.f32 %v2810_v31, %v2809_v34  ;;  %v2748_v36 = vadd.f32 %v2747_v53, %v2746_v17 }
 0x79e   :  { %v3079_v35 = vsel %vm10441_vm12, %v2739_v21, %v3078_v20  ;;  %vm10442_vm2 = vmmov %vm10441_vm12  ;;  %v2963_v58 = vrot.slane %v2962_v59, 1  ;;  %v3099_v7 = vsel %vm10443_vm14, %v2946_v51, %v3098_v48  ;;  %v2900_v30 = vrot.slane %v8735_v15, 1 }
 0x79f   :  { %v3093_v11 = vsel %vm10442_vm2, %v8718_v1, %v8728_v19  ;;  %v2955_v42 = vadd.f32 %v2954_v24, %v2953_v22  ;;  %v2828_v4 = vrot.slane %v2827_v26, 1  ;;  %vm10444_vm11 = vmmov %vm10442_vm2  ;;  %v2892_v9 = vadd.f32 %v2891_v14, %v8720_v41  ;;  %v4812_v1 = vpop.f32.mrb[12].mxu0 }
 0x7a0   :  { %v3086_v2 = vsel %vm10444_vm11, %v2811_v52, %v3085_v47  ;;  %vm10445_vm10 = vcmask 1046534   ;;  %v2820_v40 = vadd.f32 %v2819_v44, %v2818_v46  ;;  %v2757_v18 = vadd.f32 %v2756_v0, %v2755_v16  ;;  %vm10446_vm6 = vmmov %vm10442_vm2  ;;  %v3028_v34 = vpop.f32.mrb[13].mxu0 }
 0x7a1   :  { %v3080_v38 = vsel %vm10445_vm10, %v2748_v36, %v3079_v35  ;;  %v2972_v63 = vrot.slane %v2971_v27, 1  ;;  %v3100_v13 = vsel %vm10446_vm6, %v2955_v42, %v3099_v7  ;;  %vm10447_vm0 = vmmov %vm10445_vm10  ;;  %v2964_v39 = vadd.f32 %v2963_v58, %v2962_v59  ;;  %v4813_v50 = vpop.f32.mrb[14].mxu0 }
 0x7a2   :  { %v3094_v19 = vsel %vm10447_vm0, %v2892_v9, %v3093_v11  ;;  %vm10448_vm15 = vmmov %vm10447_vm0  ;;  %v2901_v37 = vadd.f32 %v2900_v30, %v8735_v15  ;;  %vm10449_vm4 = vcmask 1047559   ;;  %v2829_v17 = vadd.f32 %v2828_v4, %v2827_v26  ;;  %v3031_v22 = vpop.f32.mrb[15].mxu0 }
 0x7a3   :  { %v3087_v33 = vsel %vm10448_vm15, %v2820_v40, %v3086_v2  ;;  %v3081_v60 = vsel %vm10449_vm4, %v2757_v18, %v3080_v38  ;;  %vm10450_vm5 = vmmov %vm10447_vm0  ;;  %v2973_v55 = vadd.f32 %v2972_v63, %v2971_v27  ;;  %vm10454_vm7 = vcmask 31744  }
 0x7a4   :  { %v3107_v41 = vadd.f32 %v3081_v60, %v3028_v34  ;;  %v3101_v56 = vsel %vm10450_vm5, %v2964_v39, %v3100_v13  ;;  %vm10451_vm1 = vmmov %vm10449_vm4  ;;  %vm10462_vm6 = vcmask 1042432  }
 0x7a5   :  { %v3095_v25 = vsel %vm10451_vm1, %v2901_v37, %v3094_v19  ;;  %vm10452_vm3 = vmmov %vm10451_vm1  ;;  %v4761_v37 = vld [vmem:[#allocation20] ss:$0 sm:$0xff] }
 0x7a6   :  { %v3088_v61 = vsel %vm10452_vm3, %v2829_v17, %v3087_v33  ;;  %v3109_v12 = vadd.f32 %v4812_v1, %v3095_v25  ;;  %vm10453_vm9 = vmmov %vm10451_vm1  ;;  %v3111_v15 = vsel %vm10454_vm7, %v3107_v41, 0.0  ;;  %v1813_v1 = vld [vmem:[#allocation19] sm:$0x1]  ;;  %vm10467_vm1 = vcmask 1045504  }
 0x7a7   :  { %v3108_v16 = vadd.f32 %v3088_v61, %v3031_v22  ;;  %v3102_v45 = vsel %vm10453_vm9, %v2973_v55, %v3101_v56  ;;  %vm10455_vm8 = vmmov %vm10454_vm7  ;;  %vm10469_vm9 = vcmask 1046528  }
 0x7a8   :  { %v3110_v54 = vadd.f32 %v4813_v50, %v3102_v45  ;;  %vm10456_vm13 = vmmov %vm10454_vm7 }
 0x7a9   :  { %v3112_v46 = vsel %vm10455_vm8, %v3108_v16, 0.0  ;;  %v3114_v32 = vsel %vm10456_vm13, %v3109_v12, 0.0  ;;  %vm10457_vm12 = vmmov %vm10454_vm7  ;;  %vm10471_vm8 = vcmask 1043456  }
 0x7aa   :  { %v3113_v57 = vadd.f32 %v3112_v46, %v3111_v15  ;;  %v3116_v23 = vsel %vm10457_vm12, %v3110_v54, 0.0  ;;  %vm10458_vm2 = vmmov %vm10454_vm7  ;;  %vm10473_vm12 = vcmask 1044480  }
 0x7ab   :  { %vm10459_vm14 = vmmov %vm10458_vm2 }
 0x7ac   :  { %v3115_v31 = vadd.f32 %v3114_v32, %v3113_v57  ;;  %vm10460_vm11 = vmmov %vm10458_vm2 }
 0x7ad   :  { %vm10461_vm10 = vmmov %vm10458_vm2 }
 0x7ae   :  { %v3117_v53 = vadd.f32 %v3116_v23, %v3115_v31  ;;  %vm10463_vm0 = vmmov %vm10462_vm6 }
 0x7af   :  { %vm10464_vm15 = vmmov %vm10463_vm0 }
 0x7b0   :  { %v3118_v20 = vrot.slane %v3117_v53, 4  ;;  %vm10465_vm4 = vmmov %vm10463_vm0 }
 0x7b1   :  { %vm10466_vm5 = vmmov %vm10463_vm0 }
 0x7b2   :  { %v3119_v59 = vadd.f32 %v3118_v20, %v3117_v53  ;;  %vm10468_vm3 = vmmov %vm10467_vm1 }
 0x7b3   :  { %vm10470_vm7 = vmmov %vm10469_vm9 }
 0x7b4   :  { %v3120_v6 = vrot.slane %v3119_v59, 2  ;;  %vm10472_vm13 = vmmov %vm10471_vm8 }
 0x7b6   :  { %v3121_v5 = vadd.f32 %v3120_v6, %v3119_v59 }
 0x7b8   :  { %v3122_v21 = vrot.slane %v3121_v5, 1 }
 0x7ba   :  { %v3123_v24 = vadd.f32 %v3122_v21, %v3121_v5 }
 0x7bc   :  { %v3124_v48 = vmul.f32 0.03125, %v3123_v24 }
 0x7be   :  { %v3125_v26 = vsub.f32 %v3107_v41, %v3124_v48  ;;  %v3126_v14 = vsub.f32 %v3108_v16, %v3124_v48  ;;  %v3127_v51 = vsub.f32 %v3109_v12, %v3124_v48  ;;  %v3128_v44 = vsub.f32 %v3110_v54, %v3124_v48 }
 0x7c0   :  { %v3129_v47 = vmul.f32 %v3125_v26, %v3125_v26  ;;  %v3130_v0 = vmul.f32 %v3126_v14, %v3126_v14  ;;  %v3131_v35 = vmul.f32 %v3127_v51, %v3127_v51  ;;  %v3132_v27 = vmul.f32 %v3128_v44, %v3128_v44 }
 0x7c2   :  { %v3133_v52 = vsel %vm10458_vm2, %v3129_v47, 0.0  ;;  %v3134_v11 = vsel %vm10459_vm14, %v3130_v0, 0.0  ;;  %v3136_v58 = vsel %vm10460_vm11, %v3131_v35, 0.0  ;;  %v3138_v30 = vsel %vm10461_vm10, %v3132_v27, 0.0  ;;  %vm10474_vm2 = vmmov %vm10463_vm0 }
 0x7c3   :  { %v3135_v36 = vadd.f32 %v3134_v11, %v3133_v52  ;;  %vm10475_vm14 = vmmov %vm10473_vm12  ;;  %vm10476_vm11 = vcmask 1041408  }
 0x7c4   :  { %vm10477_vm10 = vmmov %vm10476_vm11 }
 0x7c5   :  { %v3137_v7 = vadd.f32 %v3136_v58, %v3135_v36 }
 0x7c7   :  { %v3139_v42 = vadd.f32 %v3138_v30, %v3137_v7 }
 0x7c9   :  { %v3140_v4 = vrot.slane %v3139_v42, 4 }
 0x7cb   :  { %v3141_v2 = vadd.f32 %v3140_v4, %v3139_v42 }
 0x7cd   :  { %v3142_v9 = vrot.slane %v3141_v2, 2 }
 0x7cf   :  { %v3143_v38 = vadd.f32 %v3142_v9, %v3141_v2 }
 0x7d1   :  { %v3144_v40 = vrot.slane %v3143_v38, 1 }
 0x7d3   :  { %v3145_v18 = vadd.f32 %v3144_v40, %v3143_v38 }
 0x7d5   :  { %v3146_v63 = vmul.f32 0.03125, %v3145_v18 }
 0x7d7   :  { %v3147_v13 = vadd.f32 1e-05, %v3146_v63 }
 0x7d9   :  { %5801 = vrsqrt.f32 %v3147_v13 }
 0x7e3   :  { %v5802_v19 = vpop.eup %5801 }
 0x7e4   :  { %v3149_v39 = vmul.f32 %v5802_v19, %v1813_v1 }
 0x7e6   :  { %v3153_v33 = vrot.slane %v3149_v39, %v7929_v49 }
 0x7e8   :  { %v3154_v34 = vmul.f32 %v3153_v33, %v3125_v26  ;;  %v3155_v60 = vmul.f32 %v3153_v33, %v3126_v14  ;;  %v3156_v17 = vmul.f32 %v3153_v33, %v3127_v51  ;;  %v3157_v41 = vmul.f32 %v3153_v33, %v3128_v44 }
 0x7ea   :  { %v3164_v50 = vadd.f32 %v4761_v37, %v3154_v34  ;;  %v3165_v56 = vadd.f32 %v4761_v37, %v3155_v60  ;;  %v3166_v25 = vadd.f32 %v4761_v37, %v3156_v17  ;;  %v3167_v55 = vadd.f32 %v4761_v37, %v3157_v41 }
 0x7ec   :  { %v3168_v22 = vmax.f32 %v3164_v50, 0.0  ;;  %v3169_v61 = vmax.f32 %v3165_v56, 0.0  ;;  %v3170_v12 = vmax.f32 %v3166_v25, 0.0  ;;  %v3171_v16 = vmax.f32 %v3167_v55, 0.0 }
 0x7ee   :  { %v3205_v45 = vrot.slane %v3168_v22, 5  ;;  %v3206_v15 = vrot.slane %v3169_v61, 5  ;;  %v3208_v54 = vrot.slane %v3170_v12, 5  ;;  %v3209_v46 = vrot.slane %v3171_v16, 5 }
 0x7f0   :  { %v8936_v57 = vsel %vm10462_vm6, %v3205_v45, %v3206_v15  ;;  %v8939_v32 = vsel %vm10463_vm0, %v3208_v54, %v3209_v46  ;;  %v8942_v31 = vsel %vm10464_vm15, 0.0, %v3205_v45  ;;  %v8945_v23 = vsel %vm10465_vm4, %v3206_v15, 0.0  ;;  %vm10478_vm6 = vmmov %vm10463_vm0 }
 0x7f1   :  { %v8948_v53 = vsel %vm10466_vm5, %v3209_v46, 0.0  ;;  %v3233_v20 = vrot.slane %v8942_v31, 2  ;;  %v3315_v59 = vrot.slane %v8936_v57, 2  ;;  %v5468_v5 = vpack.i.bf16 %v8945_v23, %v8936_v57  ;;  %vm10479_vm15 = vmmov %vm10470_vm7 }
 0x7f2   :  { %v5473_v6 = vpack.i.bf16 %v8948_v53, %v8939_v32  ;;  %v3473_v21 = vrot.slane %v8945_v23, 2  ;;  %v3223_v24 = vrot.slane %v8942_v31, 1  ;;  %v3299_v26 = vrot.slane %v8936_v57, 1 }
 0x7f3   :  { %v8961_v48 = vsel %vm10467_vm1, %v3233_v20, %v3315_v59  ;;  %v3457_v14 = vrot.slane %v8945_v23, 1  ;;  %v10057_v51 = vrot.slane %v8942_v31, 4  ;;  %5469 = vrot.lane.b32.xlu0 %v5468_v5, %s6322_s4  ;;  %v3347_v47 = vrot.slane %v8936_v57, 4 }
 0x7f4   :  { %5474 = vrot.lane.b32.xlu1 %v5473_v6, %s6322_s4  ;;  %v3474_v44 = vsel %vm10468_vm3, %v3315_v59, %v3473_v21  ;;  %v3505_v0 = vrot.slane %v8945_v23, 4  ;;  %v8976_v52 = vsel %vm10470_vm7, %v3223_v24, %v3299_v26  ;;  %v3243_v7 = vrot.slane %v8942_v31, 3  ;;  %vm10482_vm3 = vmmov %vm10470_vm7 }
 0x7f5   :  { %v5483_v35 = vpack.i.bf16 %v3474_v44, %v8961_v48  ;;  %v3458_v27 = vsel %vm10469_vm9, %v3299_v26, %v3457_v14  ;;  %v8981_v11 = vsel %vm10471_vm8, %v10057_v51, %v3347_v47  ;;  %v3331_v30 = vrot.slane %v8936_v57, 3  ;;  %vm10483_vm9 = vmmov %vm10482_vm3 }
 0x7f6   :  { %v5478_v36 = vpack.i.bf16 %v3458_v27, %v8976_v52  ;;  %v8987_v58 = vsel %vm10472_vm13, %v3347_v47, %v3505_v0  ;;  %v3489_v42 = vrot.slane %v8945_v23, 3  ;;  %v10053_v4 = vrot.slane %v8942_v31, 6  ;;  %vm10484_vm7 = vmmov %vm10473_vm12 }
 0x7f7   :  { %5484 = vrot.lane.b32.xlu0 %v5483_v35, %s6300_s21  ;;  %v3379_v2 = vrot.slane %v8936_v57, 6  ;;  %v3537_v9 = vrot.slane %v8945_v23, 6  ;;  %v9000_v38 = vsel %vm10473_vm12, %v3243_v7, %v3331_v30  ;;  %v10055_v40 = vrot.slane %v8942_v31, 5  ;;  %vm10485_vm8 = vmmov %vm10467_vm1 }
 0x7f8   :  { %5479 = vrot.lane.b32.xlu1 %v5478_v36, %s6304_s22  ;;  %v3363_v18 = vrot.slane %v8936_v57, 5  ;;  %v3521_v63 = vrot.slane %v8945_v23, 5  ;;  %v9006_v13 = vsel %vm10474_vm2, 0.0, %v3208_v54  ;;  %v5493_v1 = vpack.i.bf16 %v8987_v58, %v8981_v11  ;;  %vm10486_vm13 = vmmov %vm10467_vm1 }
 0x7f9   :  { %v3490_v19 = vsel %vm10475_vm14, %v3331_v30, %v3489_v42  ;;  %v9015_v33 = vsel %vm10476_vm11, %v10053_v4, %v3379_v2  ;;  %v9020_v37 = vsel %vm10477_vm10, %v3379_v2, %v3537_v9  ;;  %v10052_v34 = vrot.slane %v8942_v31, 7  ;;  %vm10488_vm2 = vmmov %vm10484_vm7 }
 0x7fa   :  { %v5488_v39 = vpack.i.bf16 %v3490_v19, %v9000_v38  ;;  %v9027_v60 = vsel %vm10478_vm6, %v10055_v40, %v3363_v18  ;;  %v3522_v17 = vsel %vm10463_vm0, %v3363_v18, %v3521_v63  ;;  %v3395_v41 = vrot.slane %v8936_v57, 7  ;;  %vm10489_vm14 = vmmov %vm10488_vm2 }
 0x7fb   :  { %5494 = vrot.lane.b32.xlu0 %v5493_v1, %s6324_s17  ;;  %v3553_v50 = vrot.slane %v8945_v23, 7  ;;  %v5503_v56 = vpack.i.bf16 %v9020_v37, %v9015_v33  ;;  %v9037_v25 = vsel %vm10479_vm15, %v3457_v14, %v6757_v3  ;;  %v5498_v55 = vpack.i.bf16 %v3522_v17, %v9027_v60  ;;  %vm10490_vm11 = vmmov %vm10463_vm0 }
 0x7fc   :  { %5489 = vrot.lane.b32.xlu1 %v5488_v39, %s6323_s29  ;;  %v3225_v22 = vrot.slane %v9006_v13, 1  ;;  %vm10480_vm4 = vcmask 1040384   ;;  %v3301_v16 = vrot.slane %v8939_v32, 1  ;;  %v3459_v45 = vrot.slane %v8948_v53, 1  ;;  %vm10494_vm15 = vmmov %vm10490_vm11 }
 0x7fd   :  { %v9045_v61 = vsel %vm10480_vm4, %v10052_v34, %v3395_v41  ;;  %vm10481_vm5 = vmmov %vm10480_vm4  ;;  %v5518_v15 = vpack.i.bf16 %v9037_v25, %v3458_v27  ;;  %v9058_v54 = vsel %vm10467_vm1, %v3473_v21, %v6760_v8  ;;  %v3235_v59 = vrot.slane %v9006_v13, 2 }
 0x7fe   :  { %v9050_v12 = vsel %vm10481_vm5, %v3395_v41, %v3553_v50  ;;  %v9067_v6 = vsel %vm10482_vm3, %v3301_v16, %v3459_v45  ;;  %v9072_v5 = vsel %vm10483_vm9, %v3225_v22, %v3301_v16  ;;  %v3317_v21 = vrot.slane %v8939_v32, 2  ;;  %vm10495_vm4 = vmmov %vm10490_vm11 }
 0x7ff   :  { %5504 = vrot.lane.b32.xlu0 %v5503_v56, %s6326_s28  ;;  %v5508_v46 = vpack.i.bf16 %v9050_v12, %v9045_v61  ;;  %v3475_v26 = vrot.slane %v8948_v53, 2  ;;  %v5528_v14 = vpack.i.bf16 %v9058_v54, %v3474_v44  ;;  %v5513_v47 = vpack.i.bf16 %v9067_v6, %v9072_v5 }
 0x800   :  { %5499 = vrot.lane.b32.xlu1 %v5498_v55, %s6325_s30  ;;  %v9082_v35 = vsel %vm10484_vm7, %v3489_v42, %v6763_v10  ;;  %v3245_v27 = vrot.slane %v9006_v13, 3  ;;  %v3333_v36 = vrot.slane %v8939_v32, 3  ;;  %v9095_v44 = vsel %vm10486_vm13, %v3235_v59, %v3317_v21 }
 0x801   :  { %v9090_v30 = vsel %vm10485_vm8, %v3317_v21, %v3475_v26  ;;  %v3491_v2 = vrot.slane %v8948_v53, 3  ;;  %v5538_v42 = vpack.i.bf16 %v9082_v35, %v3490_v19  ;;  %vm10487_vm12 = vcmask 1043456  }
 0x802   :  { %v5523_v18 = vpack.i.bf16 %v9090_v30, %v9095_v44  ;;  %v9106_v1 = vsel %vm10487_vm12, %v3505_v0, %v6936_v28  ;;  %v9111_v39 = vsel %vm10488_vm2, %v3245_v27, %v3333_v36  ;;  %v10056_v19 = vrot.slane %v9006_v13, 4  ;;  %vm10491_vm10 = vmmov %vm10487_vm12 }
 0x803   :  { %5519 = vrot.lane.b32.xlu0 %v5518_v15, %s6328_s5  ;;  %v3492_v41 = vsel %vm10489_vm14, %v3333_v36, %v3491_v2  ;;  %v3349_v56 = vrot.slane %v8939_v32, 4  ;;  %v3507_v55 = vrot.slane %v8948_v53, 4  ;;  %v5548_v0 = vpack.i.bf16 %v9106_v1, %v8987_v58  ;;  %vm10492_vm6 = vmmov %vm10491_vm10 }
 0x804   :  { %5509 = vrot.lane.b32.xlu1 %v5508_v46, %s6327_s9  ;;  %v5533_v16 = vpack.i.bf16 %v3492_v41, %v9111_v39  ;;  %v9124_v15 = vsel %vm10490_vm11, %v3521_v63, %v6939_v29  ;;  %v10054_v46 = vrot.slane %v9006_v13, 5  ;;  %v3523_v58 = vrot.slane %v8948_v53, 5  ;;  %vm10503_vm12 = vmmov %vm10488_vm2 }
 0x805   :  { %v9131_v21 = vsel %vm10491_vm10, %v10056_v19, %v3349_v56  ;;  %v3275_v63 = vrot.slane %v9006_v13, 6  ;;  %v3381_v36 = vrot.slane %v8939_v32, 6  ;;  %vm10493_vm0 = vcmask 1041408   ;;  %vm10505_vm14 = vmmov %vm10495_vm4 }
 0x806   :  { %v3539_v34 = vrot.slane %v8948_v53, 6  ;;  %vm10496_vm5 = vmmov %vm10493_vm0  ;;  %vm10498_vm3 = vcmask 1040384   ;;  %v3397_v40 = vrot.slane %v8939_v32, 7  ;;  %vm10500_vm7 = vcmask 1046528  }
 0x807   :  { %5529 = vrot.lane.b32.xlu0 %v5528_v14, %s6329_s8  ;;  %v3508_v14 = vsel %vm10492_vm6, %v3349_v56, %v3507_v55  ;;  %vm10497_vm1 = vmmov %vm10493_vm0  ;;  %vm10504_vm2 = vcmask 1045504  }
 0x808   :  { %5514 = vrot.lane.b32.xlu1 %v5513_v47, %s6304_s22  ;;  %v3365_v47 = vrot.slane %v8939_v32, 5  ;;  %vm10499_vm9 = vmmov %vm10493_vm0 }
 0x809   :  { %vm10501_vm8 = vmmov %vm10498_vm3 }
 0x80a   :  { %v9151_v56 = vsel %vm10494_vm15, %v10054_v46, %v3365_v47  ;;  %v3285_v46 = vrot.slane %v9006_v13, 7  ;;  %vm10502_vm13 = vmmov %vm10498_vm3 }
 0x80b   :  { %5539 = vrot.lane.b32.xlu0 %v5538_v42, %s6330_s7  ;;  %v5558_v42 = vpack.i.bf16 %v9124_v15, %v3522_v17  ;;  %v9157_v17 = vsel %vm10496_vm5, %v3275_v63, %v3381_v36  ;;  %vm10506_vm11 = vmmov %vm10492_vm6 }
 0x80c   :  { %5524 = vrot.lane.b32.xlu1 %v5523_v18, %s6300_s21  ;;  %v5543_v18 = vpack.i.bf16 %v3508_v14, %v9131_v21  ;;  %vm10507_vm10 = vmmov %vm10498_vm3 }
 0x80d   :  { %vm10508_vm6 = vmmov %vm10493_vm0 }
 0x80e   :  { %vm10512_vm5 = vmmov %vm10504_vm2 }
 0x80f   :  { %5549 = vrot.lane.b32.xlu0 %v5548_v0, %s6331_s15  ;;  %v9145_v0 = vsel %vm10493_vm0, %v3537_v9, %v6964_v43  ;;  %v9161_v9 = vsel %vm10497_vm1, %v6964_v43, %v3275_v63  ;;  %v3555_v63 = vrot.slane %v8948_v53, 7  ;;  %vm10509_vm0 = vmmov %vm10500_vm7 }
 0x810   :  { %5534 = vrot.lane.b32.xlu1 %v5533_v16, %s6323_s29  ;;  %v3524_v16 = vsel %vm10495_vm4, %v3365_v47, %v3523_v58  ;;  %v3665_v47 = vsel %vm10498_vm3, %v3553_v50, %v7020_v62  ;;  %v9183_v50 = vsel %vm10500_vm7, %v3459_v45, %v6757_v3  ;;  %v9197_v45 = vsel %vm10503_vm12, %v3491_v2, %v6763_v10  ;;  %vm10510_vm15 = vmmov %vm10509_vm0 }
 0x811   :  { %v5553_v4 = vpack.i.bf16 %v3524_v16, %v9151_v56  ;;  %v5578_v19 = vpack.i.bf16 %v3665_v47, %v9050_v12  ;;  %v3556_v51 = vsel %vm10502_vm13, %v3397_v40, %v3555_v63  ;;  %v3624_v2 = vsel %vm10506_vm11, %v3507_v55, %v6936_v28  ;;  %vm10511_vm4 = vmmov %vm10504_vm2 }
 0x812   :  { %v3226_v55 = vsel %vm10509_vm0, %v6757_v3, %v3225_v22  ;;  %v3234_v22 = vsel %vm10512_vm5, %v6760_v8, %v3233_v20  ;;  %vm10513_vm1 = vmmov %vm10503_vm12  ;;  %v10517_v20 = vrot.slane %v9006_v13, 4  ;;  %vm10535_vm5 = vcmask 130048  }
 0x813   :  { %5559 = vrot.lane.b32.xlu0 %v5558_v42, %s6332_s12  ;;  %v5568_v42 = vpack.i.bf16 %v9145_v0, %v9020_v37  ;;  %v5748_v37 = vpack.i.bf16 %v9157_v17, %v9161_v9  ;;  %vm10514_vm3 = vmmov %vm10513_vm1 }
 0x814   :  { %5544 = vrot.lane.b32.xlu1 %v5543_v18, %s6324_s17  ;;  %v3540_v18 = vsel %vm10499_vm9, %v3381_v36, %v3539_v34  ;;  %v9188_v36 = vsel %vm10501_vm8, %v3285_v46, %v3397_v40  ;;  %v5593_v40 = vpack.i.bf16 %v9197_v45, %v3492_v41  ;;  %vm10516_vm9 = vmmov %vm10506_vm11  ;;  %vm10529_vm11 = vcmask 31744  }
 0x815   :  { %v5573_v12 = vpack.i.bf16 %v3556_v51, %v9188_v36  ;;  %vm10518_vm7 = vmmov %vm10516_vm9 }
 0x816   :  { %vm10520_vm8 = vmmov %vm10505_vm14 }
 0x817   :  { %5569 = vrot.lane.b32.xlu0 %v5568_v42, %s6333_s16  ;;  %v5563_v42 = vpack.i.bf16 %v3540_v18, %v9157_v17  ;;  %vm10522_vm13 = vmmov %vm10520_vm8 }
 0x818   :  { %5554 = vrot.lane.b32.xlu1 %v5553_v4, %s6325_s30  ;;  %v5583_v4 = vpack.i.bf16 %v9183_v50, %v9067_v6  ;;  %v9209_v6 = vsel %vm10505_vm14, %v3523_v58, %v6939_v29  ;;  %vm10524_vm12 = vmmov %vm10508_vm6 }
 0x81b   :  { %5579 = vrot.lane.b32.xlu0 %v5578_v19, %s6334_s25  ;;  %v3596_v19 = vsel %vm10504_vm2, %v3475_v26, %v6760_v8  ;;  %v5603_v26 = vpack.i.bf16 %v9209_v6, %v3524_v16  ;;  %v3236_v16 = vsel %vm10511_vm4, %v6760_v8, %v3235_v59  ;;  %vm10526_vm2 = vmmov %vm10507_vm10 }
 0x81c   :  { %5564 = vrot.lane.b32.xlu1 %v5563_v42, %s6326_s28  ;;  %v5588_v47 = vpack.i.bf16 %v3596_v19, %v9090_v30  ;;  %v5598_v42 = vpack.i.bf16 %v3624_v2, %v3508_v14  ;;  %v9221_v30 = vsel %vm10508_vm6, %v3539_v34, %v6964_v43  ;;  %v3224_v14 = vsel %vm10510_vm15, %v6757_v3, %v3223_v24  ;;  %vm10527_vm14 = vmmov %vm10526_vm2 }
 0x81d   :  { %v5608_v58 = vpack.i.bf16 %v9221_v30, %v3540_v18  ;;  %v5618_v34 = vpack.i.bf16 %v9006_v13, %v8942_v31  ;;  %v3244_v3 = vsel %vm10513_vm1, %v6763_v10, %v3243_v7  ;;  %v3246_v24 = vsel %vm10514_vm3, %v6763_v10, %v3245_v27  ;;  %vm10536_vm1 = vmmov %vm10535_vm5 }
 0x81e   :  { %v5628_v59 = vpack.i.bf16 %v3236_v16, %v3234_v22  ;;  %v5633_v18 = vpack.i.bf16 %v3246_v24, %v3244_v3  ;;  %v10519_v7 = vrot.slane %v8942_v31, 5  ;;  %v10521_v27 = vrot.slane %v9006_v13, 5 }
 0x81f   :  { %5584 = vrot.lane.b32.xlu0 %v5583_v4, %s6328_s5  ;;  %v3666_v4 = vsel %vm10507_vm10, %v3555_v63, %v7020_v62  ;;  %v10515_v63 = vrot.slane %v8942_v31, 4  ;;  %vm10530_vm10 = vmmov %vm10529_vm11  ;;  %vm10531_vm6 = vcmask 64512   ;;  %vm10533_vm15 = vcmask 97280  }
 0x820   :  { %5574 = vrot.lane.b32.xlu1 %v5573_v12, %s6327_s9  ;;  %v5613_v41 = vpack.i.bf16 %v3666_v4, %v3556_v51  ;;  %v5623_v51 = vpack.i.bf16 %v3226_v55, %v3224_v14  ;;  %v3256_v12 = vsel %vm10518_vm7, %v6936_v28, %v10517_v20  ;;  %v3264_v10 = vsel %vm10520_vm8, %v6939_v29, %v10519_v7  ;;  %vm10532_vm0 = vmmov %vm10531_vm6 }
 0x821   :  { %v3254_v8 = vsel %vm10516_vm9, %v6936_v28, %v10515_v63  ;;  %v10525_v4 = vrot.slane %v8942_v31, 7  ;;  %vm10534_vm4 = vmmov %vm10533_vm15  ;;  %vm10537_vm3 = vcmask 162816   ;;  %vm10539_vm7 = vcmask 195584  }
 0x822   :  { %vm10538_vm9 = vmmov %vm10537_vm3 }
 0x823   :  { %5594 = vrot.lane.b32.xlu0 %v5593_v40, %s6330_s7  ;;  %v3266_v40 = vsel %vm10522_vm13, %v6939_v29, %v10521_v27  ;;  %vm10540_vm8 = vmmov %vm10539_vm7  ;;  %vm10541_vm13 = vcmask 228352  }
 0x824   :  { %5589 = vrot.lane.b32.xlu1 %v5588_v47, %s6329_s8  ;;  %v5638_v47 = vpack.i.bf16 %v3256_v12, %v3254_v8 }
 0x827   :  { %5604 = vrot.lane.b32.xlu0 %v5603_v26, %s6332_s12  ;;  %v5643_v26 = vpack.i.bf16 %v3266_v40, %v3264_v10 }
 0x828   :  { %5599 = vrot.lane.b32.xlu1 %v5598_v42, %s6331_s15  ;;  %v10523_v42 = vrot.slane %v8942_v31, 6 }
 0x82a   :  { %v3274_v28 = vsel %vm10524_vm12, %v6964_v43, %v10523_v42  ;;  %v5663_v43 = vpack.i.bf16 %v8961_v48, %v3234_v22  ;;  %v5693_v48 = vpack.i.bf16 %v9027_v60, %v3264_v10  ;;  %v5708_v60 = vpack.i.bf16 %v9209_v6, %v9124_v15  ;;  %v5791_v6 = vld [vmem:[#allocation22 + $0x20] sm:$0xff]   ;;  %vm10542_vm12 = vmmov %vm10541_vm13 }
 0x82b   :  { %5614 = vrot.lane.b32.xlu0 %v5613_v41, %s6334_s25  ;;  %v3284_v41 = vsel %vm10526_vm2, %v7020_v62, %v10525_v4  ;;  %v5648_v29 = vpack.i.bf16 %v9161_v9, %v3274_v28  ;;  %v5728_v15 = vpack.i.bf16 %v9111_v39, %v3246_v24  ;;  %vm10543_vm2 = vcmask 261120  }
 0x82c   :  { %5609 = vrot.lane.b32.xlu1 %v5608_v58, %s6333_s16  ;;  %v3286_v58 = vsel %vm10527_vm14, %v7020_v62, %v3285_v46  ;;  %v5668_v62 = vpack.i.bf16 %v9183_v50, %v9037_v25  ;;  %v5683_v46 = vpack.i.bf16 %v8981_v11, %v3254_v8  ;;  %v5698_v25 = vpack.i.bf16 %v3624_v2, %v9106_v1  ;;  %v5788_v1 = vld [vmem:[#allocation22 + $0x8] sm:$0xff]   ;;  %vm10544_vm14 = vmmov %vm10543_vm2 }
 0x82d   :  { %v5713_v11 = vpack.i.bf16 %v9045_v61, %v3284_v41  ;;  %v5787_v61 = vld [vmem:[#allocation22] sm:$0xff]   ;;  %v10528_v50 = vmov 0   ;;  %v5753_v39 = vpack.i.bf16 %v9188_v36, %v3286_v58  ;;  %v5793_v36 = vld [vmem:[#allocation22 + $0x30] sm:$0xff]  }
 0x82e   :  { %3880 = vmatpush1.bf16.msra.mxu1 %v5787_v61 }
 0x82f   :  { %5619 = vrot.lane.b32.xlu0 %v5618_v34, %s6322_s4  ;;  %v5653_v34 = vpack.i.bf16 %v3286_v58, %v3284_v41  ;;  %3881 = vmatprep.subr.bf16.mxu1 %v10528_v50 }
 0x830   :  { %5624 = vrot.lane.b32.xlu1 %v5623_v51, %s6304_s22  ;;  %v5658_v51 = vpack.i.bf16 %v8976_v52, %v3224_v14  ;;  %v5688_v52 = vpack.i.bf16 %v9197_v45, %v9082_v35  ;;  %v5718_v35 = vpack.i.bf16 %v9072_v5, %v3226_v55  ;;  %v5790_v45 = vld [vmem:[#allocation22 + $0x18] sm:$0xff]   ;;  %v5792_v55 = vld [vmem:[#allocation22 + $0x28] sm:$0xff]  }
 0x832   :  { %3882 = vmatpush1.bf16.msra.mxu1 %v5788_v1 }
 0x833   :  { %5629 = vrot.lane.b32.xlu0 %v5628_v59, %s6300_s21  ;;  %v5673_v59 = vpack.i.bf16 %v9000_v38, %v3244_v3  ;;  %v5703_v38 = vpack.i.bf16 %v9015_v33, %v3274_v28  ;;  %v5733_v33 = vpack.i.bf16 %v9131_v21, %v3256_v12  ;;  %3883 = vmatprep.subr.bf16.mxu1 %v10528_v50 }
 0x834   :  { %5634 = vrot.lane.b32.xlu1 %v5633_v18, %s6323_s29  ;;  %v5678_v18 = vpack.i.bf16 %v3596_v19, %v9058_v54  ;;  %v5723_v54 = vpack.i.bf16 %v9095_v44, %v3236_v16  ;;  %v5789_v44 = vld [vmem:[#allocation22 + $0x10] sm:$0xff]  }
 0x836   :  { %3884 = vmatpush1.bf16.msra.mxu1 %v5789_v44 }
 0x837   :  { %5639 = vrot.lane.b32.xlu0 %v5638_v47, %s6324_s17  ;;  %3885 = vmatprep.subr.bf16.mxu1 %v10528_v50 }
 0x838   :  { %5644 = vrot.lane.b32.xlu1 %v5643_v26, %s6325_s30 }
 0x83a   :  { %3886 = vmatpush1.bf16.msra.mxu1 %v5790_v45 }
 0x83b   :  { %5649 = vrot.lane.b32.xlu0 %v5648_v29, %s6326_s28  ;;  %3887 = vmatprep.subr.bf16.mxu1 %v10528_v50 }
 0x83c   :  { %5654 = vrot.lane.b32.xlu1 %v5653_v34, %s6327_s9  ;;  %v5795_v34 = vld [vmem:[#allocation22 + $0x40] sm:$0xff]  }
 0x83e   :  { %3888 = vmatpush1.bf16.msra.mxu1 %v5791_v6 }
 0x83f   :  { %5664 = vrot.lane.b32.xlu0 %v5663_v43, %s6329_s8  ;;  %3889 = vmatprep.subr.bf16.mxu1 %v10528_v50 }
 0x840   :  { %5659 = vrot.lane.b32.xlu1 %v5658_v51, %s6328_s5 }
 0x842   :  { %3890 = vmatpush1.bf16.msra.mxu1 %v5792_v55 }
 0x843   :  { %5674 = vrot.lane.b32.xlu0 %v5673_v59, %s6330_s7  ;;  %3891 = vmatprep.subr.bf16.mxu1 %v10528_v50 }
 0x844   :  { %5669 = vrot.lane.b32.xlu1 %v5668_v62, %s6304_s22 }
 0x846   :  { %3892 = vmatpush1.bf16.msra.mxu1 %v5793_v36 }
 0x847   :  { %5684 = vrot.lane.b32.xlu0 %v5683_v46, %s6331_s15  ;;  %3893 = vmatprep.subr.bf16.mxu1 %v10528_v50 }
 0x848   :  { %5679 = vrot.lane.b32.xlu1 %v5678_v18, %s6300_s21 }
 0x84b   :  { %5694 = vrot.lane.b32.xlu0 %v5693_v48, %s6332_s12 }
 0x84c   :  { %5689 = vrot.lane.b32.xlu1 %v5688_v52, %s6323_s29 }
 0x84f   :  { %5704 = vrot.lane.b32.xlu0 %v5703_v38, %s6333_s16 }
 0x850   :  { %5699 = vrot.lane.b32.xlu1 %v5698_v25, %s6324_s17 }
 0x853   :  { %5714 = vrot.lane.b32.xlu0 %v5713_v11, %s6334_s25 }
 0x854   :  { %5709 = vrot.lane.b32.xlu1 %v5708_v60, %s6325_s30 }
 0x857   :  { %5724 = vrot.lane.b32.xlu0 %v5723_v54, %s6329_s8 }
 0x858   :  { %3769 = vrot.lane.b32.xlu1 %v9145_v0, %s6326_s28  ;;  %v5738_v0 = vpack.i.bf16 %v9151_v56, %v3266_v40  ;;  %v5794_v40 = vld [vmem:[#allocation22 + $0x38] sm:$0xff]  }
 0x859   :  { %3894 = vmatpush1.bf16.msra.mxu1 %v5794_v40 }
 0x85a   :  { %3895 = vmatprep.subr.bf16.mxu1 %v10528_v50 }
 0x85b   :  { %5734 = vrot.lane.b32.xlu0 %v5733_v33, %s6331_s15 }
 0x85c   :  { %5719 = vrot.lane.b32.xlu1 %v5718_v35, %s6328_s5 }
 0x85d   :  { %3896 = vmatpush1.bf16.msra.mxu1 %v5795_v34 }
 0x85e   :  { %3897 = vmatprep.subr.bf16.mxu1 %v10528_v50 }
 0x860   :  { %5729 = vrot.lane.b32.xlu1 %v5728_v15, %s6330_s7 }
 0x864   :  { %5739 = vrot.lane.b32.xlu1 %v5738_v0, %s6332_s12 }
 0x865   :  { %v9331_v21 = vpop.permute.xlu0 %5469 }
 0x866   :  { %v9329_v5 = vpop.permute.xlu1 %5474  ;;  %v5471_v35 = vunpack.i.l.bf16 %v9331_v21  ;;  %v5472_v1 = vunpack.i.h.bf16 %v9331_v21 }
 0x868   :  { %5754 = vrot.lane.b32.xlu1 %v5753_v39, %s6334_s25 }
 0x869   :  { %v5485_v19 = vpop.permute.xlu0 %5484 }
 0x86a   :  { %v5480_v56 = vpop.permute.xlu1 %5479  ;;  %v5486_v24 = vunpack.i.l.bf16 %v5485_v19  ;;  %v5487_v8 = vunpack.i.h.bf16 %v5485_v19 }
 0x86b   :  { %v5481_v16 = vunpack.i.l.bf16 %v5480_v56  ;;  %v5482_v22 = vunpack.i.h.bf16 %v5480_v56 }
 0x86d   :  { %v5495_v2 = vpop.permute.xlu0 %5494  ;;  %v3679_v20 = vsel %vm10529_vm11, %v8942_v31, %v5481_v16  ;;  %v3680_v7 = vsel %vm10530_vm10, %v8936_v57, %v5482_v22  ;;  %vm10545_vm11 = vcmask 293888  }
 0x86e   :  { %v5490_v14 = vpop.permute.xlu1 %5489  ;;  %v5496_v47 = vunpack.i.l.bf16 %v5495_v2  ;;  %v3683_v26 = vsel %vm10531_vm6, %v3679_v20, %v5486_v24  ;;  %v5497_v28 = vunpack.i.h.bf16 %v5495_v2  ;;  %v3684_v4 = vsel %vm10532_vm0, %v3680_v7, %v5487_v8  ;;  %vm10546_vm10 = vmmov %vm10545_vm11 }
 0x86f   :  { %v5491_v12 = vunpack.i.l.bf16 %v5490_v14  ;;  %v5492_v10 = vunpack.i.h.bf16 %v5490_v14  ;;  %vm10547_vm6 = vcmask 326656  }
 0x870   :  { %vm10548_vm0 = vmmov %vm10547_vm6 }
 0x871   :  { %v5505_v3 = vpop.permute.xlu0 %5504  ;;  %v3687_v41 = vsel %vm10533_vm15, %v3683_v26, %v5491_v12  ;;  %v3688_v58 = vsel %vm10534_vm4, %v3684_v4, %v5492_v10  ;;  %vm10549_vm15 = vcmask 31744  }
 0x872   :  { %v5500_v63 = vpop.permute.xlu1 %5499  ;;  %v5506_v43 = vunpack.i.l.bf16 %v5505_v3  ;;  %v3691_v51 = vsel %vm10535_vm5, %v3687_v41, %v5496_v47  ;;  %v5507_v62 = vunpack.i.h.bf16 %v5505_v3  ;;  %v3692_v46 = vsel %vm10536_vm1, %v3688_v58, %v5497_v28  ;;  %vm10550_vm4 = vmmov %vm10549_vm15 }
 0x873   :  { %v5501_v31 = vunpack.i.l.bf16 %v5500_v63  ;;  %v5502_v29 = vunpack.i.h.bf16 %v5500_v63  ;;  %vm10551_vm5 = vcmask 359424  }
 0x874   :  { %vm10552_vm1 = vmmov %vm10551_vm5 }
 0x875   :  { %v5520_v27 = vpop.permute.xlu0 %5519  ;;  %v3695_v18 = vsel %vm10537_vm3, %v3691_v51, %v5501_v31  ;;  %v3696_v52 = vsel %vm10538_vm9, %v3692_v46, %v5502_v29  ;;  %vm10553_vm3 = vcmask 1045504   ;;  %vm10554_vm9 = vcmask 64512  }
 0x876   :  { %v5510_v42 = vpop.permute.xlu1 %5509  ;;  %v3699_v11 = vsel %vm10539_vm7, %v3695_v18, %v5506_v43  ;;  %v3700_v54 = vsel %vm10540_vm8, %v3696_v52, %v5507_v62  ;;  %v5521_v45 = vunpack.i.l.bf16 %v5520_v27  ;;  %v5522_v19 = vunpack.i.h.bf16 %v5520_v27  ;;  %v5796_v27 = vld [vmem:[#allocation22 + $0x48] sm:$0x3f]   ;;  %vm10555_vm7 = vmmov %vm10554_vm9 }
 0x877   :  { %v5511_v48 = vunpack.i.l.bf16 %v5510_v42  ;;  %v5512_v38 = vunpack.i.h.bf16 %v5510_v42  ;;  %v3877_v58 = vsel %vm10553_vm3, %v5796_v27, 0  ;;  %vm10556_vm8 = vcmask 392192  }
 0x878   :  { %3898 = vmatpush1.bf16.msra.mxu1 %v3877_v58 }
 0x879   :  { %v5530_v57 = vpop.permute.xlu0 %5529  ;;  %v3703_v33 = vsel %vm10541_vm13, %v3699_v11, %v5511_v48  ;;  %v3704_v61 = vsel %vm10542_vm12, %v3700_v54, %v5512_v38  ;;  %vm10557_vm13 = vmmov %vm10556_vm8  ;;  %vm10558_vm12 = vcmask 424960  }
 0x87a   :  { %v5515_v59 = vpop.permute.xlu1 %5514  ;;  %v3707_v44 = vsel %vm10543_vm2, %v3703_v33, %v5471_v35  ;;  %v3708_v39 = vsel %vm10544_vm14, %v3704_v61, %v5472_v1  ;;  %v5531_v6 = vunpack.i.l.bf16 %v5530_v57  ;;  %v5532_v50 = vunpack.i.h.bf16 %v5530_v57  ;;  %vm10559_vm2 = vmmov %vm10558_vm12 }
 0x87b   :  { %v3711_v56 = vsel %vm10545_vm11, %v3707_v44, %v5521_v45  ;;  %v5517_v2 = vunpack.i.h.bf16 %v5515_v59  ;;  %v3712_v14 = vsel %vm10546_vm10, %v3708_v39, %v5522_v19  ;;  %v5516_v16 = vunpack.i.l.bf16 %v5515_v59 }
 0x87c   :  { %v3715_v36 = vsel %vm10547_vm6, %v3711_v56, %v5531_v6  ;;  %v3716_v8 = vsel %vm10548_vm0, %v3712_v14, %v5532_v50  ;;  %vm10560_vm14 = vcmask 457728   ;;  %vm10562_vm10 = vcmask 490496  }
 0x87d   :  { %v5540_v25 = vpop.permute.xlu0 %5539  ;;  %v3682_v20 = vsel %vm10549_vm15, %v8939_v32, %v5517_v2  ;;  %v3681_v40 = vsel %vm10550_vm4, %v9006_v13, %v5516_v16  ;;  %vm10561_vm11 = vmmov %vm10560_vm14  ;;  %vm10564_vm0 = vcmask 97280   ;;  %vm10566_vm4 = vcmask 130048  }
 0x87e   :  { %v5525_v60 = vpop.permute.xlu1 %5524  ;;  %v5541_v22 = vunpack.i.l.bf16 %v5540_v25  ;;  %v5542_v21 = vunpack.i.h.bf16 %v5540_v25  ;;  %vm10563_vm6 = vmmov %vm10562_vm10  ;;  %v5477_v14 = vunpack.i.h.bf16 %v9329_v5  ;;  %v5476_v16 = vunpack.i.l.bf16 %v9329_v5 }
 0x87f   :  { %v5527_v24 = vunpack.i.h.bf16 %v5525_v60  ;;  %v5526_v63 = vunpack.i.l.bf16 %v5525_v60  ;;  %vm10565_vm15 = vmmov %vm10564_vm0 }
 0x880   :  { %v3719_v47 = vsel %vm10551_vm5, %v3715_v36, %v5541_v22  ;;  %v3720_v4 = vsel %vm10552_vm1, %v3716_v8, %v5542_v21  ;;  %vm10567_vm5 = vmmov %vm10566_vm4  ;;  %vm10568_vm1 = vcmask 162816  }
 0x881   :  { %v5550_v15 = vpop.permute.xlu0 %5549  ;;  %v3685_v32 = vsel %vm10554_vm9, %v3681_v40, %v5526_v63  ;;  %v3686_v29 = vsel %vm10555_vm7, %v3682_v20, %v5527_v24  ;;  %vm10569_vm3 = vmmov %vm10568_vm1  ;;  %vm10570_vm9 = vcmask 195584  }
 0x882   :  { %v5535_v0 = vpop.permute.xlu1 %5534  ;;  %v5552_v12 = vunpack.i.h.bf16 %v5550_v15  ;;  %v5551_v7 = vunpack.i.l.bf16 %v5550_v15  ;;  %vm10571_vm7 = vmmov %vm10570_vm9 }
 0x883   :  { %v5537_v57 = vunpack.i.h.bf16 %v5535_v0  ;;  %v5536_v34 = vunpack.i.l.bf16 %v5535_v0 }
 0x884   :  { %v3723_v13 = vsel %vm10556_vm8, %v3719_v47, %v5551_v7  ;;  %v3724_v43 = vsel %vm10557_vm13, %v3720_v4, %v5552_v12  ;;  %vm10572_vm8 = vcmask 228352  }
 0x885   :  { %v5560_v55 = vpop.permute.xlu0 %5559  ;;  %v3689_v15 = vsel %vm10564_vm0, %v3685_v32, %v5536_v34  ;;  %v3690_v44 = vsel %vm10565_vm15, %v3686_v29, %v5537_v57  ;;  %vm10573_vm13 = vmmov %vm10572_vm8  ;;  %vm10580_vm0 = vcmask 359424  }
 0x886   :  { %v5545_v3 = vpop.permute.xlu1 %5544  ;;  %v5562_v26 = vunpack.i.h.bf16 %v5560_v55  ;;  %v5561_v42 = vunpack.i.l.bf16 %v5560_v55  ;;  %vm10581_vm15 = vmmov %vm10580_vm0 }
 0x887   :  { %v5547_v51 = vunpack.i.h.bf16 %v5545_v3  ;;  %v5546_v59 = vunpack.i.l.bf16 %v5545_v3 }
 0x888   :  { %v3727_v46 = vsel %vm10558_vm12, %v3723_v13, %v5561_v42  ;;  %v3728_v18 = vsel %vm10559_vm2, %v3724_v43, %v5562_v26  ;;  %vm10574_vm12 = vcmask 261120  }
 0x889   :  { %v5570_v10 = vpop.permute.xlu0 %5569  ;;  %v3693_v39 = vsel %vm10566_vm4, %v3689_v15, %v5546_v59  ;;  %v3694_v19 = vsel %vm10567_vm5, %v3690_v44, %v5547_v51  ;;  %vm10575_vm2 = vmmov %vm10574_vm12  ;;  %vm10582_vm4 = vcmask 392192  }
 0x88a   :  { %v5555_v28 = vpop.permute.xlu1 %5554  ;;  %v5572_v41 = vunpack.i.h.bf16 %v5570_v10  ;;  %v5571_v31 = vunpack.i.l.bf16 %v5570_v10  ;;  %vm10583_vm5 = vmmov %vm10582_vm4 }
 0x88b   :  { %v5557_v60 = vunpack.i.h.bf16 %v5555_v28  ;;  %v5556_v54 = vunpack.i.l.bf16 %v5555_v28 }
 0x88c   :  { %v3731_v25 = vsel %vm10560_vm14, %v3727_v46, %v5571_v31  ;;  %v3732_v11 = vsel %vm10561_vm11, %v3728_v18, %v5572_v41  ;;  %vm10576_vm14 = vcmask 293888  }
 0x88d   :  { %v5580_v62 = vpop.permute.xlu0 %5579  ;;  %v3697_v50 = vsel %vm10568_vm1, %v3693_v39, %v5556_v54  ;;  %v3698_v56 = vsel %vm10569_vm3, %v3694_v19, %v5557_v60  ;;  %vm10577_vm11 = vmmov %vm10576_vm14  ;;  %vm10584_vm1 = vcmask 424960  }
 0x88e   :  { %v5582_v48 = vunpack.i.h.bf16 %v5580_v62  ;;  %v5581_v52 = vunpack.i.l.bf16 %v5580_v62  ;;  %v5565_v38 = vpop.permute.xlu1 %5564  ;;  %vm10585_vm3 = vmmov %vm10584_vm1 }
 0x88f   :  { %v5567_v33 = vunpack.i.h.bf16 %v5565_v38  ;;  %v5566_v35 = vunpack.i.l.bf16 %v5565_v38 }
 0x890   :  { %v3735_v61 = vsel %vm10562_vm10, %v3731_v25, %v5581_v52  ;;  %v3736_v1 = vsel %vm10563_vm6, %v3732_v11, %v5582_v48  ;;  %vm10578_vm10 = vcmask 326656  }
 0x891   :  { %v5585_v0 = vpop.permute.xlu0 %5584  ;;  %v5743_v45 = vpack.i.bf16 %v3736_v1, %v3735_v61  ;;  %v3701_v22 = vsel %vm10570_vm9, %v3697_v50, %v5566_v35  ;;  %v3702_v3 = vsel %vm10571_vm7, %v3698_v56, %v5567_v33  ;;  %vm10579_vm6 = vmmov %vm10578_vm10  ;;  %vm10586_vm9 = vcmask 457728  }
 0x892   :  { %v5575_v6 = vpop.permute.xlu1 %5574  ;;  %v5587_v21 = vunpack.i.h.bf16 %v5585_v0  ;;  %v5586_v36 = vunpack.i.l.bf16 %v5585_v0  ;;  %vm10587_vm7 = vmmov %vm10586_vm9 }
 0x893   :  { %v5577_v2 = vunpack.i.h.bf16 %v5575_v6  ;;  %v5576_v55 = vunpack.i.l.bf16 %v5575_v6  ;;  %5744 = vrot.lane.b32.xlu0 %v5743_v45, %s6303_s26 }
 0x895   :  { %v3705_v24 = vsel %vm10572_vm8, %v3701_v22, %v5576_v55  ;;  %v3706_v63 = vsel %vm10573_vm13, %v3702_v3, %v5577_v2  ;;  %v5595_v8 = vpop.permute.xlu0 %5594  ;;  %vm10588_vm8 = vcmask 490496  }
 0x896   :  { %v3709_v20 = vsel %vm10574_vm12, %v3705_v24, %v5476_v16  ;;  %v3710_v12 = vsel %vm10575_vm2, %v3706_v63, %v5477_v14  ;;  %v5590_v7 = vpop.permute.xlu1 %5589  ;;  %v5597_v47 = vunpack.i.h.bf16 %v5595_v8  ;;  %v5596_v26 = vunpack.i.l.bf16 %v5595_v8  ;;  %vm10589_vm13 = vmmov %vm10588_vm8 }
 0x897   :  { %v5592_v10 = vunpack.i.h.bf16 %v5590_v7  ;;  %v5591_v27 = vunpack.i.l.bf16 %v5590_v7  ;;  %v3713_v5 = vsel %vm10576_vm14, %v3709_v20, %v5586_v36  ;;  %v3714_v40 = vsel %vm10577_vm11, %v3710_v12, %v5587_v21  ;;  %5749 = vrot.lane.b32.xlu0 %v5748_v37, %s6333_s16 }
 0x898   :  { %vm10590_vm12 = vcmask 31744   ;;  %vm10592_vm14 = vcmask 64512  }
 0x899   :  { %v3717_v42 = vsel %vm10578_vm10, %v3713_v5, %v5591_v27  ;;  %v3718_v28 = vsel %vm10579_vm6, %v3714_v40, %v5592_v10  ;;  %v5605_v4 = vpop.permute.xlu0 %5604  ;;  %vm10591_vm2 = vmmov %vm10590_vm12  ;;  %vm10594_vm10 = vcmask 97280  }
 0x89a   :  { %v5600_v41 = vpop.permute.xlu1 %5599  ;;  %v5607_v32 = vunpack.i.h.bf16 %v5605_v4  ;;  %v5606_v29 = vunpack.i.l.bf16 %v5605_v4  ;;  %v3721_v57 = vsel %vm10580_vm0, %v3717_v42, %v5596_v26  ;;  %v3722_v17 = vsel %vm10581_vm15, %v3718_v28, %v5597_v47  ;;  %vm10593_vm11 = vmmov %vm10592_vm14 }
 0x89b   :  { %v5602_v31 = vunpack.i.h.bf16 %v5600_v41  ;;  %v5601_v58 = vunpack.i.l.bf16 %v5600_v41  ;;  %3771 = vrot.lane.b32.xlu0 %v9221_v30, %s6326_s28  ;;  %vm10595_vm6 = vmmov %vm10594_vm10  ;;  %vm10596_vm0 = vcmask 130048  }
 0x89c   :  { %vm10597_vm15 = vmmov %vm10596_vm0 }
 0x89d   :  { %v3725_v9 = vsel %vm10582_vm4, %v3721_v57, %v5601_v58  ;;  %v3726_v37 = vsel %vm10583_vm5, %v3722_v17, %v5602_v31  ;;  %v5615_v34 = vpop.permute.xlu0 %5614  ;;  %vm10598_vm4 = vcmask 162816  }
 0x89e   :  { %v5617_v13 = vunpack.i.h.bf16 %v5615_v34  ;;  %v5616_v43 = vunpack.i.l.bf16 %v5615_v34  ;;  %v5610_v51 = vpop.permute.xlu1 %5609  ;;  %v3729_v46 = vsel %vm10584_vm1, %v3725_v9, %v5606_v29  ;;  %v3730_v30 = vsel %vm10585_vm3, %v3726_v37, %v5607_v32  ;;  %vm10599_vm5 = vmmov %vm10598_vm4 }
 0x89f   :  { %v5612_v59 = vunpack.i.h.bf16 %v5610_v51  ;;  %v5611_v62 = vunpack.i.l.bf16 %v5610_v51  ;;  %vm10600_vm1 = vcmask 195584  }
 0x8a0   :  { %vm10601_vm3 = vmmov %vm10600_vm1 }
 0x8a1   :  { %v3733_v18 = vsel %vm10586_vm9, %v3729_v46, %v5611_v62  ;;  %v3734_v48 = vsel %vm10587_vm7, %v3730_v30, %v5612_v59  ;;  %v9416_v52 = vpop.permute.xlu0 %5619  ;;  %vm10602_vm9 = vcmask 228352  }
 0x8a2   :  { %v5625_v38 = vpop.permute.xlu1 %5624  ;;  %v3737_v25 = vsel %vm10588_vm8, %v3733_v18, %v5616_v43  ;;  %v3738_v11 = vsel %vm10589_vm13, %v3734_v48, %v5617_v13  ;;  %v5621_v5 = vunpack.i.l.bf16 %v9416_v52  ;;  %vm10603_vm7 = vmmov %vm10602_vm9  ;;  %vm10604_vm8 = vcmask 261120  }
 0x8a3   :  { %v5627_v60 = vunpack.i.h.bf16 %v5625_v38  ;;  %v5626_v54 = vunpack.i.l.bf16 %v5625_v38  ;;  %v5758_v33 = vpack.i.bf16 %v3738_v11, %v3737_v25  ;;  %vm10605_vm13 = vcmask 293888  }
 0x8a5   :  { %5759 = vrot.lane.b32.xlu1 %v5758_v33, %s6303_s26  ;;  %v5630_v35 = vpop.permute.xlu0 %5629  ;;  %v3412_v44 = vsel %vm10590_vm12, 0.0, %v5627_v60  ;;  %v3411_v0 = vsel %vm10591_vm2, 0.0, %v5626_v54  ;;  %vm10606_vm12 = vmmov %vm10591_vm2  ;;  %s6337_s26 = smov [#allocation34]  }
 0x8a6   :  { %v5632_v61 = vunpack.i.h.bf16 %v5630_v35  ;;  %v5631_v1 = vunpack.i.l.bf16 %v5630_v35  ;;  %v5635_v15 = vpop.permute.xlu1 %5634  ;;  %vm10607_vm2 = vmmov %vm10593_vm11  ;;  %s4706_s22 = sshll.u32 %s6337_s26, 4  ;;  %s4707_s22 = int_to_ptr.vmem [resolvable:$true] %s4706_s22 }
 0x8a7   :  { %v5637_v45 = vunpack.i.h.bf16 %v5635_v15  ;;  %v5636_v39 = vunpack.i.l.bf16 %v5635_v15  ;;  %v10615_v15 = vld [vmem:[#allocation47_spill] sm:$0xff]  ;;  %s6251_s23 = scalar_lea.vmem %s4707_s22, 512  ;;  %p6256_p7 = scmp.lt.s32.totalorder %s4707_s22, %s4707_s22 }
 0x8a8   :  { %v3413_v19 = vsel %vm10592_vm14, %v3411_v0, %v5631_v1  ;;  %v3414_v6 = vsel %vm10593_vm11, %v3412_v44, %v5632_v61  ;;  %vm10608_vm14 = vmmov %vm10595_vm6  ;;  %p6252_p6 = scmp.ne.s32.totalorder %s4707_s22, %s6251_s23  ;;  %p6257_p8 = scmp.lt.s32.totalorder %s6251_s23, %s6251_s23 }
 0x8a9   :  { %v3415_v50 = vsel %vm10594_vm10, %v3413_v19, %v5636_v39  ;;  %v3416_v56 = vsel %vm10595_vm6, %v3414_v6, %v5637_v45  ;;  %v5640_v2 = vpop.permute.xlu0 %5639  ;;  %vm10609_vm11 = vmmov %vm10606_vm12 }
 0x8aa   :  { %v5642_v55 = vunpack.i.h.bf16 %v5640_v2  ;;  %v5641_v14 = vunpack.i.l.bf16 %v5640_v2  ;;  %v5645_v16 = vpop.permute.xlu1 %5644  ;;  %vm10610_vm10 = vmmov %vm10596_vm0  ;;  %p6258_p9 = por %p6257_p8, %p6256_p7 }
 0x8ab   :  { %v5647_v22 = vunpack.i.h.bf16 %v5645_v16  ;;  %v5646_v3 = vunpack.i.l.bf16 %v5645_v16  ;;  %vm10611_vm6 = vmmov %vm10607_vm2 }
 0x8ac   :  { %v3417_v21 = vsel %vm10596_vm0, %v3415_v50, %v5641_v14  ;;  %v3418_v36 = vsel %vm10597_vm15, %v3416_v56, %v5642_v55  ;;  %vm10612_vm0 = vmmov %vm10608_vm14  ;;  %v10617_v14 = vld [vmem:[#allocation48_spill] sm:$0xff]  ;;  %p6259_p10 = pnand %p6258_p9, %p6252_p6 }
 0x8ad   :  { %v3419_v24 = vsel %vm10598_vm4, %v3417_v21, %v5646_v3  ;;  %v3420_v63 = vsel %vm10599_vm5, %v3418_v36, %v5647_v22  ;;  %v5650_v8 = vpop.permute.xlu0 %5649  ;;  %vm10613_vm15 = vmmov %vm10610_vm10 }
 0x8ae   :  { %v5652_v20 = vunpack.i.h.bf16 %v5650_v8  ;;  %v5651_v12 = vunpack.i.l.bf16 %v5650_v8  ;;  %v5655_v7 = vpop.permute.xlu1 %5654  ;;  %vm10614_vm5 = vmmov %vm10598_vm4 }
 0x8af   :  { %v5657_v10 = vunpack.i.h.bf16 %v5655_v7  ;;  %v5656_v27 = vunpack.i.l.bf16 %v5655_v7 }
 0x8b0   :  { %v3421_v40 = vsel %vm10600_vm1, %v3419_v24, %v5651_v12  ;;  %v3422_v47 = vsel %vm10601_vm3, %v3420_v63, %v5652_v20  ;;  %vm10616_vm3 = vmmov %vm10603_vm7 }
 0x8b1   :  { %v3423_v26 = vsel %vm10602_vm9, %v3421_v40, %v5656_v27  ;;  %v9436_v42 = vsel %vm10603_vm7, %v3422_v47, %v5657_v10  ;;  %v5665_v44 = vpop.permute.xlu0 %5664  ;;  %vm10618_vm9 = vmmov %vm10605_vm13  ;;  %vm10619_vm7 = vcmask 326656  }
 0x8b2   :  { %v5660_v28 = vpop.permute.xlu1 %5659  ;;  %v3425_v4 = vsel %vm10604_vm8, %v3423_v26, %v5621_v5  ;;  %v5667_v2 = vunpack.i.h.bf16 %v5665_v44  ;;  %v5666_v55 = vunpack.i.l.bf16 %v5665_v44  ;;  %vm10620_vm8 = vmmov %vm10619_vm7 }
 0x8b3   :  { %v5662_v41 = vunpack.i.h.bf16 %v5660_v28  ;;  %v5661_v50 = vunpack.i.l.bf16 %v5660_v28 }
 0x8b5   :  { %v3428_v31 = vsel %vm10605_vm13, %v3425_v4, %v5662_v41  ;;  %v5675_v0 = vpop.permute.xlu0 %5674  ;;  %v3427_v16 = vsel %vm10618_vm9, %v10617_v14, %v5661_v50  ;;  %vm10621_vm13 = vcmask 359424  }
 0x8b6   :  { %v5670_v58 = vpop.permute.xlu1 %5669  ;;  %v5677_v22 = vunpack.i.h.bf16 %v5675_v0  ;;  %v5676_v3 = vunpack.i.l.bf16 %v5675_v0  ;;  %v3431_v12 = vsel %vm10619_vm7, %v3427_v16, %v5666_v55  ;;  %v3432_v7 = vsel %vm10620_vm8, %v3428_v31, %v5667_v2  ;;  %vm10634_vm7 = vmmov %vm10618_vm9 }
 0x8b7   :  { %v5672_v32 = vunpack.i.h.bf16 %v5670_v58  ;;  %v5671_v13 = vunpack.i.l.bf16 %v5670_v58  ;;  %vm10635_vm8 = vcmask 195584  }
 0x8b8   :  { %v3435_v5 = vsel %vm10621_vm13, %v3431_v12, %v5676_v3 }
 0x8b9   :  { %v3776_v17 = vsel %vm10606_vm12, %v8948_v53, %v5672_v32  ;;  %v3775_v18 = vsel %vm10609_vm11, %v8945_v23, %v5671_v13  ;;  %v5685_v45 = vpop.permute.xlu0 %5684  ;;  %vm10622_vm12 = vmmov %vm10621_vm13  ;;  %vm10625_vm11 = vcmask 424960   ;;  %vm10636_vm13 = vcmask 326656  }
 0x8ba   :  { %v5680_v29 = vpop.permute.xlu1 %5679  ;;  %v5687_v21 = vunpack.i.h.bf16 %v5685_v45  ;;  %v5686_v36 = vunpack.i.l.bf16 %v5685_v45  ;;  %v3436_v40 = vsel %vm10622_vm12, %v3432_v7, %v5677_v22  ;;  %vm10637_vm12 = vmmov %vm10636_vm13 }
 0x8bb   :  { %v5682_v57 = vunpack.i.h.bf16 %v5680_v29  ;;  %v5681_v51 = vunpack.i.l.bf16 %v5680_v29 }
 0x8bd   :  { %v3778_v9 = vsel %vm10607_vm2, %v3776_v17, %v5682_v57  ;;  %v3777_v38 = vsel %vm10611_vm6, %v3775_v18, %v5681_v51  ;;  %v5695_v39 = vpop.permute.xlu0 %5694  ;;  %vm10623_vm2 = vcmask 392192   ;;  %vm10627_vm6 = vcmask 457728  }
 0x8be   :  { %v5690_v37 = vpop.permute.xlu1 %5689  ;;  %v5697_v24 = vunpack.i.h.bf16 %v5695_v39  ;;  %v5696_v63 = vunpack.i.l.bf16 %v5695_v39  ;;  %v3439_v28 = vsel %vm10623_vm2, %v3435_v5, %v5686_v36 }
 0x8bf   :  { %v5692_v34 = vunpack.i.h.bf16 %v5690_v37  ;;  %v5691_v62 = vunpack.i.l.bf16 %v5690_v37 }
 0x8c0   :  { %v3443_v41 = vsel %vm10625_vm11, %v3439_v28, %v5696_v63 }
 0x8c1   :  { %v3780_v43 = vsel %vm10608_vm14, %v3778_v9, %v5692_v34  ;;  %v3779_v25 = vsel %vm10612_vm0, %v3777_v38, %v5691_v62  ;;  %v5705_v19 = vpop.permute.xlu0 %5704  ;;  %vm10624_vm14 = vmmov %vm10623_vm2  ;;  %vm10638_vm2 = vcmask 359424  }
 0x8c2   :  { %v5700_v59 = vpop.permute.xlu1 %5699  ;;  %v5707_v10 = vunpack.i.h.bf16 %v5705_v19  ;;  %v5706_v27 = vunpack.i.l.bf16 %v5705_v19  ;;  %v3440_v4 = vsel %vm10624_vm14, %v3436_v40, %v5687_v21  ;;  %vm10628_vm0 = vmmov %vm10627_vm6  ;;  %v4560_v40 = vld [vmem:[#allocation28] sm:$0x3] }
 0x8c3   :  { %v5702_v46 = vunpack.i.h.bf16 %v5700_v59  ;;  %v5701_v30 = vunpack.i.l.bf16 %v5700_v59  ;;  %vm10639_vm14 = vmmov %vm10638_vm2 }
 0x8c4   :  { %v3447_v29 = vsel %vm10627_vm6, %v3443_v41, %v5706_v27  ;;  %v5798_v27 = vld [vmem:[#allocation23 + $0x8] ss:$0 sps:$4 sm:$0xff]  }
 0x8c5   :  { %v3782_v48 = vsel %vm10610_vm10, %v3780_v43, %v5702_v46  ;;  %v3781_v54 = vsel %vm10613_vm15, %v3779_v25, %v5701_v30  ;;  %v5715_v6 = vpop.permute.xlu0 %5714  ;;  %vm10626_vm10 = vmmov %vm10625_vm11  ;;  %vm10629_vm15 = vcmask 490496   ;;  %v5622_v30 = vunpack.i.h.bf16 %v9416_v52 }
 0x8c6   :  { %v5710_v53 = vpop.permute.xlu1 %5709  ;;  %v5717_v47 = vunpack.i.h.bf16 %v5715_v6  ;;  %v5716_v26 = vunpack.i.l.bf16 %v5715_v6  ;;  %v3444_v58 = vsel %vm10626_vm10, %v3440_v4, %v5697_v24  ;;  %vm10640_vm11 = vcmask 228352  }
 0x8c7   :  { %v5712_v11 = vunpack.i.h.bf16 %v5710_v53  ;;  %v5711_v60 = vunpack.i.l.bf16 %v5710_v53  ;;  %v3448_v31 = vsel %vm10628_vm0, %v3444_v58, %v5707_v10  ;;  %vm10641_vm10 = vcmask 392192   ;;  %v5797_v10 = vld [vmem:[#allocation23] sm:$0xff]  }
 0x8c8   :  { %v3451_v9 = vsel %vm10629_vm15, %v3447_v29, %v5716_v26  ;;  %vm10642_vm6 = vmmov %vm10641_vm10  ;;  %vm10643_vm0 = vcmask 424960   ;;  %4814 = vmatprep.subr.bf16.mxu0 %v5797_v10 }
 0x8c9   :  { %v3783_v33 = vsel %vm10598_vm4, %v3781_v54, %v5711_v60  ;;  %v3784_v35 = vsel %vm10614_vm5, %v3782_v48, %v5712_v11  ;;  %v5725_v56 = vpop.permute.xlu0 %5724  ;;  %vm10630_vm4 = vmmov %vm10629_vm15  ;;  %vm10631_vm5 = vcmask 523264   ;;  %4815 = vmatpush3.bf16.msra.mxu0 %v5797_v10 }
 0x8ca   :  { %v3770_v61 = vpop.permute.xlu1 %3769  ;;  %v3452_v37 = vsel %vm10630_vm4, %v3448_v31, %v5717_v47  ;;  %v5727_v54 = vunpack.i.h.bf16 %v5725_v56  ;;  %vm10644_vm15 = vmmov %vm10643_vm0  ;;  %vm10645_vm4 = vcmask 457728   ;;  %v5807_v31 = vld [vmem:[#allocation2] sm:$0xff] }
 0x8cb   :  { %v3785_v1 = vsel %vm10600_vm1, %v3783_v33, %v3770_v61  ;;  %vm10632_vm1 = vmmov %vm10631_vm5  ;;  %v5726_v33 = vunpack.i.l.bf16 %v5725_v56 }
 0x8cc   :  { %v3808_v23 = vpack.c.bf16 %v10615_v15, %v3785_v1 }
 0x8cd   :  { %v5735_v8 = vpop.permute.xlu0 %5734 }
 0x8ce   :  { %4772 = vmatprep.mubr.msk.bf16.mxu1 %vm10616_vm3, %v3808_v23  ;;  %v5720_v20 = vpop.permute.xlu1 %5719  ;;  %vm10633_vm3 = vcmask 261120   ;;  %v5737_v39 = vunpack.i.h.bf16 %v5735_v8  ;;  %v5736_v19 = vunpack.i.l.bf16 %v5735_v8 }
 0x8cf   :  { %v5722_v51 = vunpack.i.h.bf16 %v5720_v20  ;;  %v5721_v59 = vunpack.i.l.bf16 %v5720_v20  ;;  %v3426_v18 = vsel %vm10633_vm3, %v9436_v42, %v5622_v30  ;;  %v9512_v30 = vld [vmem:[#allocation8] sm:$0xff] }
 0x8d1   :  { %v3429_v48 = vsel %vm10618_vm9, %v10617_v14, %v5721_v59  ;;  %v3430_v38 = vsel %vm10634_vm7, %v3426_v18, %v5722_v51  ;;  %vm10649_vm9 = vcmask 523264   ;;  %v9506_v59 = vld [vmem:[#allocation8 + $0x10] sm:$0xff] }
 0x8d2   :  { %v5730_v34 = vpop.permute.xlu1 %5729  ;;  %v3433_v52 = vsel %vm10636_vm13, %v3429_v48, %v5726_v33  ;;  %v3434_v23 = vsel %vm10637_vm12, %v3430_v38, %v5727_v54  ;;  %vm10650_vm7 = vmmov %vm10649_vm9  ;;  %vm10653_vm12 = vcmask 1041408   ;;  %v9522_v48 = vld [vmem:[#allocation8 + $0x8] sm:$0xff] }
 0x8d3   :  { %v5732_v53 = vunpack.i.h.bf16 %v5730_v34  ;;  %v5731_v25 = vunpack.i.l.bf16 %v5730_v34 }
 0x8d5   :  { %v3437_v42 = vsel %vm10638_vm2, %v3433_v52, %v5731_v25  ;;  %v3438_v44 = vsel %vm10639_vm14, %v3434_v23, %v5732_v53  ;;  %vm10654_vm2 = vcmask 195584   ;;  %vm10655_vm14 = vmmov %vm10653_vm12 }
 0x8d6   :  { %v5740_v11 = vpop.permute.xlu1 %5739  ;;  %v4568_v34 = vsel %vm10655_vm14, %v4560_v40, 0  ;;  %vm3938_vm14 = vcmp.eq.s32.totalorder %v9512_v30, 5 }
 0x8d7   :  { %v5742_v0 = vunpack.i.h.bf16 %v5740_v11  ;;  %v5741_v45 = vunpack.i.l.bf16 %v5740_v11 }
 0x8da   :  { %v5755_v56 = vpop.permute.xlu1 %5754 }
 0x8db   :  { %v5757_v22 = vunpack.i.h.bf16 %v5755_v56  ;;  %v5756_v3 = vunpack.i.l.bf16 %v5755_v56 }
 0x905   :  { %v5745_v32 = vpop.permute.xlu0 %5744 }
 0x906   :  { %v5747_v57 = vunpack.i.h.bf16 %v5745_v32  ;;  %v5746_v17 = vunpack.i.l.bf16 %v5745_v32 }
 0x908   :  { %v3804_v13 = vsel %vm10631_vm5, %v3452_v37, %v5747_v57  ;;  %v3803_v43 = vsel %vm10632_vm1, %v3451_v9, %v5746_v17  ;;  %vm10646_vm5 = vmmov %vm10645_vm4  ;;  %vm10647_vm1 = vcmask 490496   ;;  %v5808_v57 = vld [vmem:[#allocation2 + $0x8] sm:$0xff] }
 0x909   :  { %v3807_v62 = vpack.c.bf16 %v3804_v13, %v3803_v43  ;;  %v5750_v46 = vpop.permute.xlu0 %5749  ;;  %vm10648_vm3 = vmmov %vm10647_vm1  ;;  %v4558_v17 = vpack.c.bf16 %v5808_v57, %v5807_v31  ;;  %v5809_v13 = vld [vmem:[#allocation2 + $0x10] sm:$0xff]  ;;  %v5810_v43 = vld [vmem:[#allocation2 + $0x18] sm:$0xff] }
 0x90a   :  { %v5752_v6 = vunpack.i.h.bf16 %v5750_v46  ;;  %v5751_v50 = vunpack.i.l.bf16 %v5750_v46  ;;  %v4559_v51 = vpack.c.bf16 %v5810_v43, %v5809_v13 }
 0x90b   :  { %3912 = vmatmul.mubr.bf16.vlgmr.msra.gmra.mrb[8].mxu1 %v3807_v62  ;;  %v9508_v62 = vld [vmem:[#allocation8 + $0x18] sm:$0xff] }
 0x90d   :  { %v3772_v60 = vpop.permute.xlu0 %3771 }
 0x90e   :  { %v3786_v61 = vsel %vm10635_vm8, %v3784_v35, %v3772_v60  ;;  %v3441_v35 = vsel %vm10641_vm10, %v3437_v42, %v5736_v19  ;;  %vm10651_vm8 = vcmask 1043456   ;;  %vm10657_vm10 = vcmask 31744  }
 0x90f   :  { %v3810_v1 = vpack.c.bf16 %v10615_v15, %v3786_v61  ;;  %v3442_v15 = vsel %vm10642_vm6, %v3438_v44, %v5737_v39  ;;  %v3445_v2 = vsel %vm10643_vm0, %v3441_v35, %v5741_v45  ;;  %4830 = vmatprep.subr.msk.bf16.mxu0 %vm10651_vm8, %v5798_v27  ;;  %vm10652_vm13 = vmmov %vm10651_vm8  ;;  %vm3960_vm0 = vcmp.eq.s32.totalorder %v9506_v59, 0 }
 0x910   :  { %v3446_v55 = vsel %vm10644_vm15, %v3442_v15, %v5742_v0  ;;  %v3449_v16 = vsel %vm10646_vm5, %v3445_v2, %v5751_v50  ;;  %v4378_v5 = vsel %vm10652_vm13, %v5798_v27, 0  ;;  %vm10658_vm6 = vmmov %vm10657_vm10  ;;  %vm3961_vm15 = vcmp.eq.s32.totalorder %v9508_v62, 0 }
 0x911   :  { %4773 = vmatprep.mubr.msk.bf16.mxu1 %vm10640_vm11, %v3810_v1  ;;  %v3450_v14 = vsel %vm10645_vm4, %v3446_v55, %v5752_v6  ;;  %v3453_v63 = vsel %vm10647_vm1, %v3449_v16, %v5756_v3  ;;  %4817 = vmatpush3.bf16.msra.mxu0 %v4378_v5  ;;  %vm10656_vm11 = vmmov %vm10654_vm2  ;;  %vm3962_vm4 = vcmp.eq.s32.totalorder %v9506_v59, 1  ;;  %vm3963_vm5 = vcmp.eq.s32.totalorder %v9508_v62, 1 }
 0x912   :  { %v3454_v8 = vsel %vm10648_vm3, %v3450_v14, %v5757_v22  ;;  %4831 = vmatprep.subr.msk.bf16.mxu0 %vm10653_vm12, %v4560_v40  ;;  %vm3930_vm8 = vcmp.eq.s32.totalorder %v9512_v30, 1  ;;  %vm3932_vm13 = vcmp.eq.s32.totalorder %v9512_v30, 2  ;;  %vm3939_vm1 = vcmp.eq.s32.totalorder %v9522_v48, 5 }
 0x913   :  { %vm3941_vm3 = vcmp.eq.s32.totalorder %v9522_v48, 6  ;;  %vm3943_vm12 = vcmp.eq.s32.totalorder %v9522_v48, 7 }
 0x917   :  { %v5760_v21 = vpop.permute.xlu1 %5759 }
 0x918   :  { %v5762_v36 = vunpack.i.h.bf16 %v5760_v21  ;;  %v5761_v24 = vunpack.i.l.bf16 %v5760_v21 }
 0x91a   :  { %v3805_v20 = vsel %vm10649_vm9, %v3453_v63, %v5761_v24  ;;  %v3806_v12 = vsel %vm10650_vm7, %v3454_v8, %v5762_v36  ;;  %vm3928_vm7 = vcmp.eq.s32.totalorder %v9512_v30, 0  ;;  %vm3971_vm9 = vcmp.eq.s32.totalorder %v9508_v62, 5 }
 0x91b   :  { %v3809_v7 = vpack.c.bf16 %v3806_v12, %v3805_v20 }
 0x91d   :  { %3920 = vmatmul.mubr.bf16.gmra.mrb[12].mxu1 %v3809_v7 }
 0x9de   :  { %v3913_v47 = vpop.f32.mrb[8].mxu1 }
 0x9df   :  { %3996 = vrot.lane.b32.xlu0 %v3913_v47, %s6336_s2  ;;  %v3915_v26 = vpop.f32.mrb[9].mxu1 }
 0x9e0   :  { %v3916_v28 = vpop.f32.mrb[10].mxu1 }
 0x9e1   :  { %v4360_v4 = vpack.c.bf16 %v3916_v28, %v3913_v47  ;;  %3998 = vrot.lane.b32.xlu1 %v3916_v28, %s6336_s2  ;;  %v3918_v41 = vpop.f32.mrb[11].mxu1 }
 0x9e3   :  { %4818 = vmatprep.mubr.msk.bf16.mxu0 %vm10654_vm2, %v4360_v4  ;;  %vm3936_vm2 = vcmp.eq.s32.totalorder %v9512_v30, 4 }
 0x9f0   :  { %v3921_v58 = vpop.f32.mrb[12].mxu1 }
 0x9f1   :  { %4000 = vrot.lane.b32.xlu0 %v3921_v58, %s6336_s2  ;;  %v3923_v32 = vpop.f32.mrb[13].mxu1 }
 0x9f2   :  { %v3924_v29 = vpop.f32.mrb[14].mxu1 }
 0x9f3   :  { %v4361_v9 = vpack.c.bf16 %v3924_v29, %v3921_v58  ;;  %4002 = vrot.lane.b32.xlu1 %v3924_v29, %s6336_s2  ;;  %v3926_v37 = vpop.f32.mrb[15].mxu1 }
 0x9f5   :  { %4819 = vmatmul.mubr.msk.bf16.vlgmr.msra.gmra.mrb[16].mxu0 %vm10656_vm11, %v4361_v9  ;;  %vm3937_vm11 = vcmp.eq.s32.totalorder %v9522_v48, 4 }
 0x9f6   :  { %4823 = vmatpush3.bf16.msra.mxu0 %v4568_v34  ;;  %4824 = vmatprep.mubr.msk.bf16.mxu0 %vm10657_vm10, %v4558_v17  ;;  %vm3935_vm10 = vcmp.eq.s32.totalorder %v9522_v48, 3 }
 0x9fd   :  { %4825 = vmatmul.mubr.msk.bf16.vlgmr.msra.gmra.mrb[20].mxu0 %vm10658_vm6, %v4559_v51  ;;  %vm3929_vm6 = vcmp.eq.s32.totalorder %v9522_v48, 0 }
 0xa51   :  { %v9514_v18 = vpop.permute.xlu0 %3996 }
 0xa52   :  { %v4008_v60 = vsel %vm3928_vm7, %v9514_v18, 0.0  ;;  %v4010_v61 = vsel %vm3930_vm8, %v9514_v18, 0.0  ;;  %v4012_v1 = vsel %vm3932_vm13, %v9514_v18, 0.0  ;;  %vm10659_vm7 = vcmp.eq.s32.totalorder %v9508_v62, 2 }
 0xa53   :  { %v9510_v46 = vpop.permute.xlu1 %3998  ;;  %v4016_v45 = vsel %vm3936_vm2, %v9514_v18, 0.0  ;;  %v9588_v39 = vsel %vm3938_vm14, %v9514_v18, 0.0  ;;  %vm10664_vm8 = vcmp.eq.s32.totalorder %v9506_v59, 2  ;;  %vm10667_vm2 = vcmp.eq.s32.totalorder %v9522_v48, 1 }
 0xa54   :  { %v4009_v0 = vsel %vm3929_vm6, %v9510_v46, 0.0  ;;  %v4011_v35 = vsel %vm10667_vm2, %v9510_v46, 0.0  ;;  %vm3973_vm14 = vcmp.eq.s32.totalorder %v9508_v62, 6  ;;  %v4015_v22 = vsel %vm3935_vm10, %v9510_v46, 0.0 }
 0xa55   :  { %v4017_v3 = vsel %vm3937_vm11, %v9510_v46, 0.0  ;;  %v4019_v21 = vsel %vm3939_vm1, %v9510_v46, 0.0  ;;  %vm3972_vm10 = vcmp.eq.s32.totalorder %v9506_v59, 6  ;;  %v9632_v12 = vsel %vm3941_vm3, %v9510_v46, 0.0 }
 0xa56   :  { %v9637_v7 = vsel %vm3943_vm12, %v9510_v46, 0.0  ;;  %vm3975_vm11 = vcmp.eq.s32.totalorder %v9508_v62, 7  ;;  %vm10678_vm3 = vcmp.eq.s32.totalorder %v9508_v62, 4 }
 0xa63   :  { %v9534_v53 = vpop.permute.xlu0 %4000 }
 0xa64   :  { %v4040_v54 = vsel %vm3960_vm0, %v9534_v53, 0.0  ;;  %v4042_v33 = vsel %vm3962_vm4, %v9534_v53, 0.0  ;;  %vm10662_vm0 = vcmp.eq.s32.totalorder %v9512_v30, 3  ;;  %vm10663_vm4 = vcmp.eq.s32.totalorder %v9512_v30, 6 }
 0xa65   :  { %v9524_v38 = vpop.permute.xlu1 %4002  ;;  %v4014_v44 = vsel %vm10662_vm0, %v9514_v18, 0.0  ;;  %v9593_v19 = vsel %vm10663_vm4, %v9514_v18, 0.0  ;;  %v4044_v6 = vsel %vm10664_vm8, %v9534_v53, 0.0  ;;  %vm10671_vm0 = vcmp.eq.s32.totalorder %v9508_v62, 3 }
 0xa66   :  { %v4041_v25 = vsel %vm3961_vm15, %v9524_v38, 0.0  ;;  %v4043_v11 = vsel %vm3963_vm5, %v9524_v38, 0.0  ;;  %v4045_v52 = vsel %vm10659_vm7, %v9524_v38, 0.0  ;;  %vm10660_vm5 = vcmask 64512  }
 0xa67   :  { %v4217_v23 = vsel %vm10660_vm5, %v4041_v25, 0.0  ;;  %vm10661_vm15 = vmmov %vm10660_vm5  ;;  %vm10670_vm7 = vcmp.eq.s32.totalorder %v9522_v48, 2  ;;  %v4047_v36 = vsel %vm10671_vm0, %v9524_v38, 0.0  ;;  %v4049_v26 = vsel %vm10678_vm3, %v9524_v38, 0.0 }
 0xa68   :  { %v4226_v42 = vsel %vm10661_vm15, %v4043_v11, 0.0  ;;  %vm10665_vm13 = vmmov %vm10660_vm5  ;;  %v4013_v16 = vsel %vm10670_vm7, %v9510_v46, 0.0  ;;  %v4051_v58 = vsel %vm3971_vm9, %v9524_v38, 0.0  ;;  %vm3974_vm0 = vcmp.eq.s32.totalorder %v9506_v59, 7 }
 0xa69   :  { %v4216_v50 = vsel %vm10665_vm13, %v4040_v54, 0.0  ;;  %vm10666_vm6 = vmmov %vm10660_vm5 }
 0xa6a   :  { %v4225_v56 = vsel %vm10666_vm6, %v4042_v33, 0.0  ;;  %v4218_v15 = vadd.f32 %v4217_v23, %v4216_v50  ;;  %vm10668_vm15 = vmmov %vm10660_vm5  ;;  %vm10669_vm5 = vcmp.eq.s32.totalorder %v9512_v30, 7  ;;  %v4053_v23 = vsel %vm3973_vm14, %v9524_v38, 0.0 }
 0xa6b   :  { %v4227_v2 = vadd.f32 %v4226_v42, %v4225_v56  ;;  %v4235_v55 = vsel %vm10668_vm15, %v4045_v52, 0.0  ;;  %v9608_v14 = vsel %vm10669_vm5, %v9514_v18, 0.0  ;;  %vm10672_vm4 = vmmov %vm10666_vm6  ;;  %vm10676_vm6 = vcmp.eq.s32.totalorder %v9506_v59, 3 }
 0xa6c   :  { %v4234_v24 = vsel %vm10672_vm4, %v4044_v6, 0.0  ;;  %vm10673_vm8 = vmmov %vm10672_vm4  ;;  %v4046_v27 = vsel %vm10676_vm6, %v9534_v53, 0.0  ;;  %v4219_v5 = vrot.slane %v4218_v15, 4 }
 0xa6d   :  { %v4073_v63 = vsel %vm10673_vm8, %v4009_v0, 0.0  ;;  %vm10674_vm13 = vmmov %vm10672_vm4  ;;  %v4236_v20 = vadd.f32 %v4235_v55, %v4234_v24  ;;  %v4228_v40 = vrot.slane %v4227_v2, 4  ;;  %vm10684_vm8 = vcmp.eq.s32.totalorder %v9506_v59, 5 }
 0xa6e   :  { %v4082_v8 = vsel %vm10674_vm13, %v4011_v35, 0.0  ;;  %vm10675_vm1 = vmmov %vm10672_vm4  ;;  %vm10683_vm4 = vcmp.eq.s32.totalorder %v9506_v59, 4  ;;  %v4050_v17 = vsel %vm10684_vm8, %v9534_v53, 0.0  ;;  %v4220_v34 = vadd.f32 %v4219_v5, %v4218_v15 }
 0xa6f   :  { %v4072_v10 = vsel %vm10675_vm1, %v4008_v60, 0.0  ;;  %vm10677_vm2 = vmmov %vm10675_vm1  ;;  %v4048_v57 = vsel %vm10683_vm4, %v9534_v53, 0.0  ;;  %v4237_v9 = vrot.slane %v4236_v20, 4  ;;  %v4229_v13 = vadd.f32 %v4228_v40, %v4227_v2 }
 0xa70   :  { %v4081_v47 = vsel %vm10677_vm2, %v4010_v61, 0.0  ;;  %vm10679_vm15 = vmmov %vm10675_vm1  ;;  %v4074_v4 = vadd.f32 %v4073_v63, %v4072_v10  ;;  %v4262_v25 = vsel %vm10675_vm1, %v4051_v58, 0.0  ;;  %v4221_v50 = vrot.slane %v4220_v34, 2 }
 0xa71   :  { %v4244_v28 = vsel %vm10679_vm15, %v4047_v36, 0.0  ;;  %v4083_v41 = vadd.f32 %v4082_v8, %v4081_v47  ;;  %vm10680_vm12 = vmmov %vm10675_vm1  ;;  %v4238_v42 = vadd.f32 %v4237_v9, %v4236_v20  ;;  %v4230_v56 = vrot.slane %v4229_v13, 2 }
 0xa72   :  { %v4090_v32 = vsel %vm10680_vm12, %v4012_v1, 0.0  ;;  %vm10681_vm5 = vmmov %vm10675_vm1  ;;  %v4075_v61 = vrot.slane %v4074_v4, 4  ;;  %v4055_v24 = vsel %vm3975_vm11, %v9524_v38, 0.0  ;;  %v4222_v10 = vadd.f32 %v4221_v50, %v4220_v34 }
 0xa73   :  { %v4091_v29 = vsel %vm10681_vm5, %v4013_v16, 0.0  ;;  %vm10682_vm7 = vmmov %vm10675_vm1  ;;  %v4084_v15 = vrot.slane %v4083_v41, 4  ;;  %v4052_v16 = vsel %vm3972_vm10, %v9534_v53, 0.0  ;;  %v4239_v63 = vrot.slane %v4238_v42, 2 }
 0xa74   :  { %v4100_v31 = vsel %vm10682_vm7, %v4015_v22, 0.0  ;;  %vm10685_vm13 = vmmov %vm10675_vm1  ;;  %v4092_v11 = vadd.f32 %v4091_v29, %v4090_v32  ;;  %v4076_v22 = vadd.f32 %v4075_v61, %v4074_v4  ;;  %v4223_v9 = vrot.slane %v4222_v10, 1 }
 0xa75   :  { %v4243_v37 = vsel %vm10685_vm13, %v4046_v27, 0.0  ;;  %vm10686_vm9 = vmmov %vm10675_vm1  ;;  %v4231_v27 = vadd.f32 %v4230_v56, %v4229_v13  ;;  %v4085_v40 = vadd.f32 %v4084_v15, %v4083_v41  ;;  %v4240_v29 = vadd.f32 %v4239_v63, %v4238_v42 }
 0xa76   :  { %v4245_v43 = vadd.f32 %v4244_v28, %v4243_v37  ;;  %v4253_v51 = vsel %vm10686_vm9, %v4049_v26, 0.0  ;;  %vm10687_vm6 = vmmov %vm10675_vm1  ;;  %vm3977_vm13 = vcmp.eq.s32.totalorder %v9508_v62, 8 }
 0xa77   :  { %v4099_v60 = vsel %vm10687_vm6, %v4014_v44, 0.0  ;;  %vm10688_vm2 = vmmov %vm10675_vm1  ;;  %v4232_v41 = vrot.slane %v4231_v27, 1  ;;  %vm3976_vm6 = vcmp.eq.s32.totalorder %v9506_v59, 8 }
 0xa78   :  { %v4108_v54 = vsel %vm10688_vm2, %v4016_v45, 0.0  ;;  %vm10689_vm3 = vmmov %vm10675_vm1  ;;  %v4101_v1 = vadd.f32 %v4100_v31, %v4099_v60  ;;  %v4246_v35 = vrot.slane %v4245_v43, 4  ;;  %v4093_v45 = vrot.slane %v4092_v11, 4 }
 0xa79   :  { %v4252_v33 = vsel %vm10689_vm3, %v4048_v57, 0.0  ;;  %vm10690_vm15 = vmmov %vm10675_vm1  ;;  %v4086_v60 = vrot.slane %v4085_v40, 2  ;;  %v4233_v42 = vadd.f32 %v4232_v41, %v4231_v27  ;;  %vm10702_vm2 = vcmask 1041409  }
 0xa7a   :  { %v4109_v52 = vsel %vm10690_vm15, %v4017_v3, 0.0  ;;  %v4254_v0 = vadd.f32 %v4253_v51, %v4252_v33  ;;  %vm10691_vm12 = vmmov %vm10675_vm1  ;;  %v4102_v3 = vrot.slane %v4101_v1, 4  ;;  %v4247_v5 = vadd.f32 %v4246_v35, %v4245_v43 }
 0xa7b   :  { %v4261_v6 = vsel %vm10691_vm12, %v4050_v17, 0.0  ;;  %v4110_v2 = vadd.f32 %v4109_v52, %v4108_v54  ;;  %vm10692_vm5 = vmmov %vm10675_vm1  ;;  %v4094_v47 = vadd.f32 %v4093_v45, %v4092_v11  ;;  %v4077_v43 = vrot.slane %v4076_v22, 2 }
 0xa7c   :  { %v4263_v44 = vadd.f32 %v4262_v25, %v4261_v6  ;;  %v4117_v55 = vsel %vm10692_vm5, %v9588_v39, 0.0  ;;  %vm10693_vm14 = vmmov %vm10675_vm1  ;;  %v4255_v8 = vrot.slane %v4254_v0, 4  ;;  %v4103_v58 = vadd.f32 %v4102_v3, %v4101_v1 }
 0xa7d   :  { %v4118_v36 = vsel %vm10693_vm14, %v4019_v21, 0.0  ;;  %vm10694_vm7 = vmmov %vm10675_vm1  ;;  %v4111_v26 = vrot.slane %v4110_v2, 4  ;;  %v4054_v21 = vsel %vm3974_vm0, %v9534_v53, 0.0  ;;  %v4248_v37 = vrot.slane %v4247_v5, 2 }
 0xa7e   :  { %v4271_v20 = vsel %vm10694_vm7, %v4053_v23, 0.0  ;;  %v4264_v39 = vrot.slane %v4263_v44, 4  ;;  %v4119_v28 = vadd.f32 %v4118_v36, %v4117_v55  ;;  %vm10695_vm10 = vmmov %vm10675_vm1  ;;  %v4256_v31 = vadd.f32 %v4255_v8, %v4254_v0 }
 0xa7f   :  { %v4270_v4 = vsel %vm10695_vm10, %v4052_v16, 0.0  ;;  %vm10696_vm11 = vmmov %vm10675_vm1  ;;  %v4112_v51 = vadd.f32 %v4111_v26, %v4110_v2  ;;  %v4095_v54 = vrot.slane %v4094_v47, 2  ;;  %v4241_v33 = vrot.slane %v4240_v29, 1 }
 0xa80   :  { %v4126_v32 = vsel %vm10696_vm11, %v9593_v19, 0.0  ;;  %v4272_v57 = vadd.f32 %v4271_v20, %v4270_v4  ;;  %vm10697_vm4 = vmmov %vm10675_vm1  ;;  %v4265_v34 = vadd.f32 %v4264_v39, %v4263_v44  ;;  %v4120_v25 = vrot.slane %v4119_v28, 4 }
 0xa81   :  { %v4280_v17 = vsel %vm10697_vm4, %v4055_v24, 0.0  ;;  %vm10698_vm8 = vmmov %vm10675_vm1  ;;  %v4257_v61 = vrot.slane %v4256_v31, 2  ;;  %v4104_v52 = vrot.slane %v4103_v58, 2  ;;  %v4224_v23 = vadd.f32 %v4223_v9, %v4222_v10 }
 0xa82   :  { %v4279_v13 = vsel %vm10698_vm8, %v4054_v21, 0.0  ;;  %vm10699_vm0 = vmmov %vm10675_vm1  ;;  %v4273_v1 = vrot.slane %v4272_v57, 4  ;;  %v4249_v0 = vadd.f32 %v4248_v37, %v4247_v5  ;;  %v4266_v6 = vrot.slane %v4265_v34, 2 }
 0xa83   :  { %v4281_v11 = vadd.f32 %v4280_v17, %v4279_v13  ;;  %v4127_v19 = vsel %vm10699_vm0, %v9632_v12, 0.0  ;;  %v4078_v50 = vadd.f32 %v4077_v43, %v4076_v22  ;;  %v4113_v56 = vrot.slane %v4112_v51, 2  ;;  %vm10700_vm9 = vmmov %vm10699_vm0 }
 0xa84   :  { %v4121_v35 = vadd.f32 %v4120_v25, %v4119_v28  ;;  %v4128_v44 = vadd.f32 %v4127_v19, %v4126_v32  ;;  %v4087_v45 = vadd.f32 %v4086_v60, %v4085_v40  ;;  %v4096_v2 = vadd.f32 %v4095_v54, %v4094_v47  ;;  %vm10701_vm1 = vmmov %vm10699_vm0 }
 0xa85   :  { %v4282_v15 = vrot.slane %v4281_v11, 4  ;;  %v4135_v12 = vsel %vm10700_vm9, %v9608_v14, 0.0  ;;  %v4242_v55 = vadd.f32 %v4241_v33, %v4240_v29  ;;  %v4258_v16 = vadd.f32 %v4257_v61, %v4256_v31 }
 0xa86   :  { %v4105_v3 = vadd.f32 %v4104_v52, %v4103_v58  ;;  %v4136_v36 = vsel %vm10701_vm1, %v9637_v7, 0.0  ;;  %v4250_v22 = vrot.slane %v4249_v0, 1  ;;  %v4267_v24 = vadd.f32 %v4266_v6, %v4265_v34 }
 0xa87   :  { %v4274_v63 = vadd.f32 %v4273_v1, %v4272_v57  ;;  %v4475_v8 = vsel %vm10702_vm2, %v4233_v42, %v4224_v23  ;;  %vm3978_vm3 = vcmp.eq.s32.totalorder %v9506_v59, 9  ;;  %vm3979_vm15 = vcmp.eq.s32.totalorder %v9508_v62, 9 }
 0xa88   :  { %vm3980_vm12 = vcmp.eq.s32.totalorder %v9506_v59, 10  ;;  %v4079_v14 = vrot.slane %v4078_v50, 1  ;;  %v4114_v20 = vadd.f32 %v4113_v56, %v4112_v51  ;;  %v4122_v10 = vrot.slane %v4121_v35, 2 }
 0xa89   :  { %v4129_v27 = vrot.slane %v4128_v44, 4  ;;  %vm3981_vm5 = vcmp.eq.s32.totalorder %v9508_v62, 10  ;;  %vm3982_vm14 = vcmp.eq.s32.totalorder %v9506_v59, 11  ;;  %vm3983_vm7 = vcmp.eq.s32.totalorder %v9508_v62, 11 }
 0xa8a   :  { %vm3984_vm10 = vcmp.eq.s32.totalorder %v9506_v59, 12  ;;  %v4283_v7 = vadd.f32 %v4282_v15, %v4281_v11  ;;  %v4088_v5 = vrot.slane %v4087_v45, 1  ;;  %v4137_v39 = vadd.f32 %v4136_v36, %v4135_v12 }
 0xa8b   :  { %v4259_v40 = vrot.slane %v4258_v16, 1  ;;  %vm10703_vm8 = vcmask 1042434   ;;  %v4097_v26 = vrot.slane %v4096_v2, 1  ;;  %vm3987_vm0 = vcmp.eq.s32.totalorder %v9508_v62, 13 }
 0xa8c   :  { %v4476_v47 = vsel %vm10703_vm8, %v4242_v55, %v4475_v8  ;;  %v4251_v28 = vadd.f32 %v4250_v22, %v4249_v0  ;;  %v4268_v21 = vrot.slane %v4267_v24, 1  ;;  %v4275_v4 = vrot.slane %v4274_v63, 2 }
 0xa8d   :  { %v4106_v58 = vrot.slane %v4105_v3, 1  ;;  %v4080_v32 = vadd.f32 %v4079_v14, %v4078_v50  ;;  %v4115_v29 = vrot.slane %v4114_v20, 1  ;;  %v9716_v31 = vadd.f32 %v4122_v10, %v4121_v35 }
 0xa8e   :  { %v9718_v57 = vadd.f32 %v4129_v27, %v4128_v44  ;;  %vm3990_vm8 = vcmp.eq.s32.totalorder %v9506_v59, 15  ;;  %v4284_v17 = vrot.slane %v4283_v7, 2  ;;  %vm10704_vm9 = vcmask 1043459  }
 0xa8f   :  { %v4477_v9 = vsel %vm10704_vm9, %v4251_v28, %v4476_v47  ;;  %v4089_v41 = vadd.f32 %v4088_v5, %v4087_v45  ;;  %v4138_v37 = vrot.slane %v4137_v39, 4  ;;  %v4260_v34 = vadd.f32 %v4259_v40, %v4258_v16 }
 0xa90   :  { %v9724_v13 = vadd.f32 %v4097_v26, %v4096_v2  ;;  %vm3989_vm4 = vcmp.eq.s32.totalorder %v9508_v62, 14  ;;  %vm3991_vm11 = vcmp.eq.s32.totalorder %v9508_v62, 15  ;;  %v9728_v43 = vadd.f32 %v4268_v21, %v4267_v24 }
 0xa91   :  { %v9730_v51 = vadd.f32 %v4275_v4, %v4274_v63  ;;  %v9732_v25 = vadd.f32 %v4106_v58, %v4105_v3  ;;  %v4057_v11 = vsel %vm3977_vm13, %v9524_v38, 0.0  ;;  %vm10705_vm9 = vcmask 1044484  }
 0xa92   :  { %v9738_v60 = vsel %vm10705_vm9, %v4260_v34, %v4477_v9  ;;  %v9740_v54 = vadd.f32 %v4115_v29, %v4114_v20  ;;  %v4124_v19 = vrot.slane %v9716_v31, 1  ;;  %v4131_v33 = vrot.slane %v9718_v57, 2 }
 0xa93   :  { %vm3951_vm2 = vcmp.eq.s32.totalorder %v9522_v48, 11  ;;  %v9745_v61 = vadd.f32 %v4284_v17, %v4283_v7  ;;  %v9747_v1 = vadd.f32 %v4138_v37, %v4137_v39  ;;  %vm10706_vm1 = vcmask 1041409  }
 0xa94   :  { %v9750_v52 = vsel %vm10706_vm1, %v4089_v41, %v4080_v32  ;;  %v4056_v23 = vsel %vm3976_vm6, %v9534_v53, 0.0  ;;  %v4058_v42 = vsel %vm3978_vm3, %v9534_v53, 0.0  ;;  %v4059_v0 = vsel %vm3979_vm15, %v9524_v38, 0.0 }
 0xa95   :  { %v4060_v6 = vsel %vm3980_vm12, %v9534_v53, 0.0  ;;  %vm10707_vm13 = vcmask 64512   ;;  %vm3950_vm1 = vcmp.eq.s32.totalorder %v9512_v30, 11  ;;  %v4061_v56 = vsel %vm3981_vm5, %v9524_v38, 0.0 }
 0xa96   :  { %v4289_v50 = vsel %vm10707_vm13, %v4057_v11, 0.0  ;;  %v4062_v35 = vsel %vm3982_vm14, %v9534_v53, 0.0  ;;  %v4063_v44 = vsel %vm3983_vm7, %v9524_v38, 0.0  ;;  %v4064_v15 = vsel %vm3984_vm10, %v9534_v53, 0.0  ;;  %vm10710_vm12 = vmmov %vm10707_vm13 }
 0xa97   :  { %vm3953_vm6 = vcmp.eq.s32.totalorder %v9522_v48, 12  ;;  %vm10708_vm3 = vcmp.eq.s32.totalorder %v9508_v62, 12  ;;  %vm10709_vm15 = vcmp.eq.s32.totalorder %v9506_v59, 13  ;;  %v4067_v12 = vsel %vm3987_vm0, %v9524_v38, 0.0  ;;  %vm10712_vm14 = vmmov %vm10710_vm12 }
 0xa98   :  { %v4065_v45 = vsel %vm10708_vm3, %v9524_v38, 0.0  ;;  %v4066_v2 = vsel %vm10709_vm15, %v9534_v53, 0.0  ;;  %v4288_v55 = vsel %vm10710_vm12, %v4056_v23, 0.0  ;;  %vm10711_vm5 = vcmp.eq.s32.totalorder %v9506_v59, 14  ;;  %vm10717_vm3 = vmmov %vm10710_vm12 }
 0xa99   :  { %v4068_v16 = vsel %vm10711_vm5, %v9534_v53, 0.0  ;;  %v9795_v3 = vsel %vm3989_vm4, %v9524_v38, 0.0  ;;  %v4290_v36 = vadd.f32 %v4289_v50, %v4288_v55  ;;  %v4298_v22 = vsel %vm10712_vm14, %v4059_v0, 0.0  ;;  %vm10718_vm15 = vmmov %vm10717_vm3 }
 0xa9a   :  { %vm3952_vm7 = vcmp.eq.s32.totalorder %v9512_v30, 12  ;;  %vm3955_vm10 = vcmp.eq.s32.totalorder %v9522_v48, 13  ;;  %vm10713_vm0 = vcmp.eq.s32.totalorder %v9512_v30, 8  ;;  %vm10714_vm9 = vcmp.eq.s32.totalorder %v9522_v48, 8  ;;  %vm10719_vm12 = vmmov %vm10717_vm3 }
 0xa9b   :  { %v4024_v24 = vsel %vm10713_vm0, %v9514_v18, 0.0  ;;  %v4025_v63 = vsel %vm10714_vm9, %v9510_v46, 0.0  ;;  %vm10715_vm13 = vcmp.eq.s32.totalorder %v9512_v30, 9  ;;  %vm10716_vm4 = vcmp.eq.s32.totalorder %v9522_v48, 9  ;;  %vm10722_vm0 = vmmov %vm10717_vm3 }
 0xa9c   :  { %v4026_v8 = vsel %vm10715_vm13, %v9514_v18, 0.0  ;;  %v4027_v14 = vsel %vm10716_vm4, %v9510_v46, 0.0  ;;  %v9815_v20 = vsel %vm3990_vm8, %v9534_v53, 0.0  ;;  %v9820_v10 = vsel %vm3991_vm11, %v9524_v38, 0.0  ;;  %vm10723_vm9 = vmmov %vm10722_vm0 }
 0xa9d   :  { %v4297_v27 = vsel %vm10717_vm3, %v4058_v42, 0.0  ;;  %v4307_v7 = vsel %vm10718_vm15, %v4061_v56, 0.0  ;;  %v4306_v39 = vsel %vm10719_vm12, %v4060_v6, 0.0  ;;  %vm3954_vm5 = vcmp.eq.s32.totalorder %v9512_v30, 13  ;;  %vm10724_vm13 = vmmov %vm10722_vm0 }
 0xa9e   :  { %v4299_v5 = vadd.f32 %v4298_v22, %v4297_v27  ;;  %vm10720_vm14 = vcmp.eq.s32.totalorder %v9512_v30, 10  ;;  %vm10721_vm8 = vcmp.eq.s32.totalorder %v9522_v48, 10  ;;  %vm3957_vm11 = vcmp.eq.s32.totalorder %v9522_v48, 14  ;;  %vm10725_vm4 = vmmov %vm10722_vm0 }
 0xa9f   :  { %v4028_v59 = vsel %vm10720_vm14, %v9514_v18, 0.0  ;;  %v4029_v53 = vsel %vm10721_vm8, %v9510_v46, 0.0  ;;  %v4144_v62 = vsel %vm10722_vm0, %v4024_v24, 0.0  ;;  %v4145_v38 = vsel %vm10723_vm9, %v4025_v63, 0.0  ;;  %vm10726_vm3 = vmmov %vm10722_vm0 }
 0xaa0   :  { %v4153_v40 = vsel %vm10724_vm13, %v4026_v8, 0.0  ;;  %v4154_v47 = vsel %vm10725_vm4, %v4027_v14, 0.0  ;;  %v4291_v26 = vrot.slane %v4290_v36, 4  ;;  %v4308_v28 = vadd.f32 %v4307_v7, %v4306_v39  ;;  %vm10727_vm12 = vmmov %vm10722_vm0 }
 0xaa1   :  { %v4146_v21 = vadd.f32 %v4145_v38, %v4144_v62  ;;  %v4155_v4 = vadd.f32 %v4154_v47, %v4153_v40  ;;  %v4316_v58 = vsel %vm10726_vm3, %v4063_v44, 0.0  ;;  %vm3956_vm15 = vcmp.eq.s32.totalorder %v9512_v30, 14  ;;  %vm10728_vm14 = vmmov %vm10722_vm0 }
 0xaa2   :  { %v4031_v32 = vsel %vm3951_vm2, %v9510_v46, 0.0  ;;  %v4162_v29 = vsel %vm10727_vm12, %v4028_v59, 0.0  ;;  %v4163_v17 = vsel %vm10728_vm14, %v4029_v53, 0.0  ;;  %vm10729_vm8 = vmmov %vm10722_vm0  ;;  %v4324_v41 = vsel %vm10722_vm0, %v4064_v15, 0.0 }
 0xaa3   :  { %v4315_v9 = vsel %vm10729_vm8, %v4062_v35, 0.0  ;;  %vm10730_vm9 = vmmov %vm10722_vm0  ;;  %vm3959_vm13 = vcmp.eq.s32.totalorder %v9522_v48, 15  ;;  %v4164_v34 = vadd.f32 %v4163_v17, %v4162_v29  ;;  %v4300_v11 = vrot.slane %v4299_v5, 4 }
 0xaa4   :  { %v4325_v37 = vsel %vm10730_vm9, %v4065_v45, 0.0  ;;  %vm3958_vm4 = vcmp.eq.s32.totalorder %v9512_v30, 15  ;;  %v4030_v23 = vsel %vm3950_vm1, %v9514_v18, 0.0  ;;  %v4147_v42 = vrot.slane %v4146_v21, 4  ;;  %vm10731_vm2 = vmmov %vm10722_vm0 }
 0xaa5   :  { %v4156_v0 = vrot.slane %v4155_v4, 4  ;;  %v4309_v6 = vrot.slane %v4308_v28, 4  ;;  %v4317_v50 = vadd.f32 %v4316_v58, %v4315_v9  ;;  %v4033_v56 = vsel %vm3953_vm6, %v9510_v46, 0.0  ;;  %vm10732_vm3 = vmmov %vm10722_vm0 }
 0xaa6   :  { %v4172_v35 = vsel %vm10731_vm2, %v4031_v32, 0.0  ;;  %v4292_v44 = vadd.f32 %v4291_v26, %v4290_v36  ;;  %v4326_v15 = vadd.f32 %v4325_v37, %v4324_v41  ;;  %v4333_v45 = vsel %vm10732_vm3, %v4066_v2, 0.0  ;;  %vm10733_vm12 = vmmov %vm10722_vm0 }
 0xaa7   :  { %v4334_v55 = vsel %vm10733_vm12, %v4067_v12, 0.0  ;;  %v4032_v22 = vsel %vm3952_vm7, %v9514_v18, 0.0  ;;  %v4035_v24 = vsel %vm3955_vm10, %v9510_v46, 0.0  ;;  %v4165_v63 = vrot.slane %v4164_v34, 4  ;;  %vm10734_vm1 = vmmov %vm10722_vm0 }
 0xaa8   :  { %v4171_v8 = vsel %vm10734_vm1, %v4030_v23, 0.0  ;;  %v4148_v14 = vadd.f32 %v4147_v42, %v4146_v21  ;;  %v4157_v27 = vadd.f32 %v4156_v0, %v4155_v4  ;;  %vm10735_vm6 = vmmov %vm10722_vm0  ;;  %v4301_v39 = vadd.f32 %v4300_v11, %v4299_v5 }
 0xaa9   :  { %v4173_v7 = vadd.f32 %v4172_v35, %v4171_v8  ;;  %v4181_v36 = vsel %vm10735_vm6, %v4033_v56, 0.0  ;;  %v4310_v2 = vadd.f32 %v4309_v6, %v4308_v28  ;;  %v4318_v59 = vrot.slane %v4317_v50, 4  ;;  %vm10736_vm14 = vmmov %vm10722_vm0 }
 0xaaa   :  { %v4342_v12 = vsel %vm10736_vm14, %v4068_v16, 0.0  ;;  %v4293_v53 = vrot.slane %v4292_v44, 2  ;;  %v4327_v62 = vrot.slane %v4326_v15, 4  ;;  %v4034_v38 = vsel %vm3954_vm5, %v9514_v18, 0.0  ;;  %vm10737_vm7 = vmmov %vm10722_vm0 }
 0xaab   :  { %v4180_v40 = vsel %vm10737_vm7, %v4032_v22, 0.0  ;;  %v4037_v47 = vsel %vm3957_vm11, %v9510_v46, 0.0  ;;  %v4166_v26 = vadd.f32 %v4165_v63, %v4164_v34  ;;  %vm10738_vm10 = vmmov %vm10722_vm0  ;;  %v4335_v28 = vadd.f32 %v4334_v55, %v4333_v45 }
 0xaac   :  { %v4182_v21 = vadd.f32 %v4181_v36, %v4180_v40  ;;  %v4190_v5 = vsel %vm10738_vm10, %v4035_v24, 0.0  ;;  %v4149_v4 = vrot.slane %v4148_v14, 2  ;;  %v4158_v58 = vrot.slane %v4157_v27, 2  ;;  %vm10739_vm8 = vmmov %vm10722_vm0 }
 0xaad   :  { %v4174_v16 = vrot.slane %v4173_v7, 4  ;;  %v4343_v32 = vsel %vm10739_vm8, %v9795_v3, 0.0  ;;  %v4351_v29 = vsel %vm10722_vm0, %v9815_v20, 0.0  ;;  %v4036_v17 = vsel %vm3956_vm15, %v9514_v18, 0.0  ;;  %vm10740_vm5 = vmmov %vm10722_vm0 }
 0xaae   :  { %v4189_v9 = vsel %vm10740_vm5, %v4034_v38, 0.0  ;;  %v4302_v41 = vrot.slane %v4301_v39, 2  ;;  %v4039_v37 = vsel %vm3959_vm13, %v9510_v46, 0.0  ;;  %vm10741_vm11 = vmmov %vm10722_vm0  ;;  %v4311_v23 = vrot.slane %v4310_v2, 2 }
 0xaaf   :  { %v4191_v34 = vadd.f32 %v4190_v5, %v4189_v9  ;;  %v4199_v11 = vsel %vm10741_vm11, %v4037_v47, 0.0  ;;  %v4038_v3 = vsel %vm3958_vm4, %v9514_v18, 0.0  ;;  %v4167_v20 = vrot.slane %v4166_v26, 2  ;;  %vm10742_vm15 = vmmov %vm10722_vm0 }
 0xab0   :  { %v4183_v42 = vrot.slane %v4182_v21, 4  ;;  %v4150_v0 = vadd.f32 %v4149_v4, %v4148_v14  ;;  %v4159_v6 = vadd.f32 %v4158_v58, %v4157_v27  ;;  %v4175_v56 = vadd.f32 %v4174_v16, %v4173_v7  ;;  %vm10743_vm9 = vmmov %vm10722_vm0 }
 0xab1   :  { %v4198_v35 = vsel %vm10742_vm15, %v4036_v17, 0.0  ;;  %v4294_v45 = vadd.f32 %v4293_v53, %v4292_v44  ;;  %v4319_v55 = vadd.f32 %v4318_v59, %v4317_v50  ;;  %v4208_v46 = vsel %vm10743_vm9, %v4039_v37, 0.0  ;;  %vm10744_vm13 = vmmov %vm10722_vm0 }
 0xab2   :  { %v4200_v22 = vadd.f32 %v4199_v11, %v4198_v35  ;;  %v4303_v48 = vadd.f32 %v4302_v41, %v4301_v39  ;;  %v4336_v24 = vrot.slane %v4335_v28, 4  ;;  %v4344_v63 = vadd.f32 %v4343_v32, %v4342_v12  ;;  %vm10745_vm4 = vmmov %vm10722_vm0 }
 0xab3   :  { %v4192_v8 = vrot.slane %v4191_v34, 4  ;;  %v4352_v30 = vsel %vm10744_vm13, %v9820_v10, 0.0  ;;  %v4168_v18 = vadd.f32 %v4167_v20, %v4166_v26  ;;  %v4184_v36 = vadd.f32 %v4183_v42, %v4182_v21 }
 0xab4   :  { %v4207_v14 = vsel %vm10745_vm4, %v4038_v3, 0.0  ;;  %v4151_v27 = vrot.slane %v4150_v0, 1  ;;  %v4160_v7 = vrot.slane %v4159_v6, 1  ;;  %v4176_v38 = vrot.slane %v4175_v56, 2 }
 0xab5   :  { %v4209_v40 = vadd.f32 %v4208_v46, %v4207_v14  ;;  %v4312_v44 = vadd.f32 %v4311_v23, %v4310_v2  ;;  %v4320_v50 = vrot.slane %v4319_v55, 2  ;;  %v4328_v59 = vadd.f32 %v4327_v62, %v4326_v15 }
 0xab6   :  { %v4201_v53 = vrot.slane %v4200_v22, 4  ;;  %v4295_v47 = vrot.slane %v4294_v45, 1  ;;  %v4304_v39 = vrot.slane %v4303_v48, 1  ;;  %v4353_v5 = vadd.f32 %v4352_v30, %v4351_v29 }
 0xab7   :  { %v4193_v12 = vadd.f32 %v4192_v8, %v4191_v34  ;;  %v4337_v4 = vadd.f32 %v4336_v24, %v4335_v28  ;;  %v4345_v58 = vrot.slane %v4344_v63, 4  ;;  %v4169_v16 = vrot.slane %v4168_v18, 1 }
 0xab8   :  { %v4185_v10 = vrot.slane %v4184_v36, 2  ;;  %v4152_v26 = vadd.f32 %v4151_v27, %v4150_v0  ;;  %v4161_v21 = vadd.f32 %v4160_v7, %v4159_v6  ;;  %v4177_v32 = vadd.f32 %v4176_v38, %v4175_v56 }
 0xab9   :  { %v4210_v17 = vrot.slane %v4209_v40, 4  ;;  %v4313_v9 = vrot.slane %v4312_v44, 1  ;;  %v4321_v41 = vadd.f32 %v4320_v50, %v4319_v55  ;;  %v4329_v37 = vrot.slane %v4328_v59, 2 }
 0xaba   :  { %v4202_v11 = vadd.f32 %v4201_v53, %v4200_v22  ;;  %v4296_v2 = vadd.f32 %v4295_v47, %v4294_v45  ;;  %v4305_v23 = vadd.f32 %v4304_v39, %v4303_v48  ;;  %v4354_v15 = vrot.slane %v4353_v5, 4 }
 0xabb   :  { %v4194_v62 = vrot.slane %v4193_v12, 2  ;;  %vm10746_vm2 = vcmask 1042434   ;;  %v4346_v28 = vadd.f32 %v4345_v58, %v4344_v63  ;;  %v4170_v34 = vadd.f32 %v4169_v16, %v4168_v18 }
 0xabc   :  { %v4462_v29 = vsel %vm10746_vm2, %v9724_v13, %v9750_v52  ;;  %v4186_v3 = vadd.f32 %v4185_v10, %v4184_v36  ;;  %v4338_v20 = vrot.slane %v4337_v4, 2  ;;  %v4178_v42 = vrot.slane %v4177_v32, 1  ;;  %vm10749_vm1 = vmmov %vm10746_vm2 }
 0xabd   :  { %v4211_v0 = vadd.f32 %v4210_v17, %v4209_v40  ;;  %vm10747_vm3 = vcmask 1041409   ;;  %v4140_v56 = vrot.slane %v9747_v1, 2  ;;  %v4314_v35 = vadd.f32 %v4313_v9, %v4312_v44  ;;  %vm10751_vm14 = vmmov %vm10749_vm1 }
 0xabe   :  { %v4468_v6 = vsel %vm10747_vm3, %v4161_v21, %v4152_v26  ;;  %v4330_v55 = vadd.f32 %v4329_v37, %v4328_v59  ;;  %v4203_v45 = vrot.slane %v4202_v11, 2  ;;  %v4322_v22 = vrot.slane %v4321_v41, 1  ;;  %vm10748_vm12 = vmmov %vm10747_vm3 }
 0xabf   :  { %v4355_v46 = vadd.f32 %v4354_v15, %v4353_v5  ;;  %v4482_v48 = vsel %vm10748_vm12, %v4305_v23, %v4296_v2  ;;  %v4195_v24 = vadd.f32 %v4194_v62, %v4193_v12  ;;  %v4132_v13 = vadd.f32 %v4131_v33, %v9718_v57 }
 0xac0   :  { %v4347_v52 = vrot.slane %v4346_v28, 2  ;;  %v4187_v63 = vrot.slane %v4186_v3, 1  ;;  %v4469_v8 = vsel %vm10749_vm1, %v4170_v34, %v4468_v6  ;;  %vm10750_vm6 = vcmask 1043459  }
 0xac1   :  { %v4463_v30 = vsel %vm10750_vm6, %v9732_v25, %v4462_v29  ;;  %v4339_v18 = vadd.f32 %v4338_v20, %v4337_v4  ;;  %v4179_v36 = vadd.f32 %v4178_v42, %v4177_v32  ;;  %v4212_v14 = vrot.slane %v4211_v0, 2  ;;  %vm10752_vm7 = vmmov %vm10750_vm6 }
 0xac2   :  { %v4141_v27 = vadd.f32 %v4140_v56, %v9747_v1  ;;  %v4331_v7 = vrot.slane %v4330_v55, 1  ;;  %v4483_v38 = vsel %vm10751_vm14, %v4314_v35, %v4482_v48  ;;  %v4204_v40 = vadd.f32 %v4203_v45, %v4202_v11  ;;  %vm10754_vm8 = vmmov %vm10750_vm6 }
 0xac3   :  { %v4323_v44 = vadd.f32 %v4322_v22, %v4321_v41  ;;  %v4356_v50 = vrot.slane %v4355_v46, 2  ;;  %v4196_v59 = vrot.slane %v4195_v24, 1  ;;  %v4470_v57 = vsel %vm10752_vm7, %v4179_v36, %v4469_v8 }
 0xac4   :  { %v4133_v33 = vrot.slane %v4132_v13, 1  ;;  %vm10753_vm10 = vcmask 1044484   ;;  %v4348_v47 = vadd.f32 %v4347_v52, %v4346_v28  ;;  %v4188_v25 = vadd.f32 %v4187_v63, %v4186_v3 }
 0xac5   :  { %v4464_v53 = vsel %vm10753_vm10, %v9740_v54, %v4463_v30  ;;  %v4125_v39 = vadd.f32 %v4124_v19, %v9716_v31  ;;  %v4340_v1 = vrot.slane %v4339_v18, 1  ;;  %v4484_v5 = vsel %vm10754_vm8, %v4323_v44, %v4483_v38  ;;  %vm10755_vm0 = vmmov %vm10753_vm10 }
 0xac6   :  { %v4213_v12 = vadd.f32 %v4212_v14, %v4211_v0  ;;  %v4277_v4 = vrot.slane %v9730_v51, 1  ;;  %v4332_v58 = vadd.f32 %v4331_v7, %v4330_v55  ;;  %v4205_v16 = vrot.slane %v4204_v40, 1  ;;  %vm10758_vm15 = vmmov %vm10755_vm0 }
 0xac7   :  { %v4471_v10 = vsel %vm10755_vm0, %v4188_v25, %v4470_v57  ;;  %v4142_v26 = vrot.slane %v4141_v27, 1  ;;  %vm10756_vm5 = vcmask 1045509   ;;  %v4357_v54 = vadd.f32 %v4356_v50, %v4355_v46 }
 0xac8   :  { %v4465_v21 = vsel %vm10756_vm5, %v4125_v39, %v4464_v53  ;;  %v4197_v32 = vadd.f32 %v4196_v59, %v4195_v24  ;;  %vm10757_vm11 = vmmov %vm10756_vm5  ;;  %v4134_v31 = vadd.f32 %v4133_v33, %v4132_v13  ;;  %v4349_v19 = vrot.slane %v4348_v47, 1 }
 0xac9   :  { %v4479_v17 = vsel %vm10757_vm11, %v9728_v43, %v9738_v60  ;;  %v4485_v9 = vsel %vm10758_vm15, %v4332_v58, %v4484_v5  ;;  %v4286_v41 = vrot.slane %v9745_v61, 1  ;;  %v4341_v37 = vadd.f32 %v4340_v1, %v4339_v18  ;;  %vm10759_vm9 = vmmov %vm10756_vm5  ;;  %v4820_v43 = vpop.f32.mrb[16].mxu0  ;;  %v4781_v18 = vld [vmem:[#allocation29] ss:$0 sm:$0xff] }
 0xaca   :  { %v4214_v11 = vrot.slane %v4213_v12, 1  ;;  %v4472_v2 = vsel %vm10759_vm9, %v4197_v32, %v4471_v10  ;;  %v4278_v23 = vadd.f32 %v4277_v4, %v9730_v51  ;;  %vm10760_vm13 = vcmask 1046534   ;;  %vm10761_vm4 = vmmov %vm10756_vm5  ;;  %v4414_v0 = vpop.f32.mrb[17].mxu0 }
 0xacb   :  { %v4466_v15 = vsel %vm10760_vm13, %v4134_v31, %v4465_v21  ;;  %v4206_v62 = vadd.f32 %v4205_v16, %v4204_v40  ;;  %v4143_v29 = vadd.f32 %v4142_v26, %v4141_v27  ;;  %v4358_v28 = vrot.slane %v4357_v54, 1  ;;  %vm10762_vm2 = vmmov %vm10760_vm13  ;;  %v4821_v35 = vpop.f32.mrb[18].mxu0 }
 0xacc   :  { %v4486_v34 = vsel %vm10761_vm4, %v4341_v37, %v4485_v9  ;;  %v4480_v60 = vsel %vm10762_vm2, %v4278_v23, %v4479_v17  ;;  %v4350_v3 = vadd.f32 %v4349_v19, %v4348_v47  ;;  %vm10763_vm3 = vmmov %vm10762_vm2  ;;  %v4287_v42 = vadd.f32 %v4286_v41, %v9745_v61  ;;  %v4417_v46 = vpop.f32.mrb[19].mxu0 }
 0xacd   :  { %v4473_v20 = vsel %vm10763_vm3, %v4206_v62, %v4472_v2  ;;  %vm10764_vm12 = vcmask 1047559   ;;  %v4215_v56 = vadd.f32 %v4214_v11, %v4213_v12  ;;  %vm10765_vm1 = vmmov %vm10762_vm2  ;;  %v4359_v22 = vadd.f32 %v4358_v28, %v4357_v54 }
 0xace   :  { %v4467_v6 = vsel %vm10764_vm12, %v4143_v29, %v4466_v15  ;;  %v4487_v55 = vsel %vm10765_vm1, %v4350_v3, %v4486_v34  ;;  %vm10766_vm6 = vmmov %vm10764_vm12  ;;  %vm10769_vm10 = vcmask 64512  }
 0xacf   :  { %v4493_v51 = vadd.f32 %v4467_v6, %v4414_v0  ;;  %v4481_v45 = vsel %vm10766_vm6, %v4287_v42, %v4480_v60  ;;  %vm10767_vm14 = vmmov %vm10766_vm6 }
 0xad0   :  { %v4474_v48 = vsel %vm10767_vm14, %v4215_v56, %v4473_v20  ;;  %v4495_v24 = vadd.f32 %v4820_v43, %v4481_v45  ;;  %vm10768_vm7 = vmmov %vm10766_vm6  ;;  %v4826_v14 = vpop.f32.mrb[20].mxu0 }
 0xad1   :  { %v4494_v13 = vadd.f32 %v4474_v48, %v4417_v46  ;;  %v4488_v52 = vsel %vm10768_vm7, %v4359_v22, %v4487_v55  ;;  %v4497_v61 = vsel %vm10769_vm10, %v4493_v51, 0.0  ;;  %vm10770_vm8 = vmmov %vm10769_vm10  ;;  %v4604_v7 = vpop.f32.mrb[21].mxu0  ;;  %v4628_v57 = vadd.f32 %v4826_v14, %v4781_v18 }
 0xad2   :  { %v4496_v63 = vadd.f32 %v4821_v35, %v4488_v52  ;;  %vm10771_vm0 = vmmov %vm10770_vm8  ;;  %v4626_v40 = vadd.f32 %v4781_v18, %v4604_v7  ;;  %v4827_v44 = vpop.f32.mrb[22].mxu0 }
 0xad3   :  { %v4498_v8 = vsel %vm10770_vm8, %v4494_v13, 0.0  ;;  %v4500_v36 = vsel %vm10771_vm0, %v4495_v24, 0.0  ;;  %vm10772_vm5 = vmmov %vm10771_vm0  ;;  %v4607_v59 = vpop.f32.mrb[23].mxu0  ;;  %v4629_v25 = vadd.f32 %v4827_v44, %v4781_v18 }
 0xad4   :  { %v4499_v30 = vadd.f32 %v4498_v8, %v4497_v61  ;;  %v4502_v38 = vsel %vm10772_vm5, %v4496_v63, 0.0  ;;  %v4627_v33 = vadd.f32 %v4781_v18, %v4607_v59  ;;  %vm10773_vm11 = vmmov %vm10771_vm0 }
 0xad5   :  { %v4632_v47 = vsel %vm10773_vm11, %v4626_v40, 0.0  ;;  %vm10774_vm15 = vmmov %vm10771_vm0 }
 0xad6   :  { %v4501_v27 = vadd.f32 %v4500_v36, %v4499_v30  ;;  %v4633_v39 = vsel %vm10774_vm15, %v4627_v33, 0.0  ;;  %vm10775_vm9 = vmmov %vm10771_vm0 }
 0xad7   :  { %v4634_v5 = vadd.f32 %v4633_v39, %v4632_v47  ;;  %v4635_v12 = vsel %vm10775_vm9, %v4628_v57, 0.0  ;;  %vm10776_vm13 = vmmov %vm10771_vm0 }
 0xad8   :  { %v4503_v50 = vadd.f32 %v4502_v38, %v4501_v27  ;;  %v4637_v16 = vsel %vm10776_vm13, %v4629_v25, 0.0  ;;  %vm10777_vm4 = vmmov %vm10771_vm0 }
 0xad9   :  { %v4636_v58 = vadd.f32 %v4635_v12, %v4634_v5  ;;  %vm10778_vm2 = vmmov %vm10771_vm0  ;;  %v3199_v5 = vld [vmem:[#allocation25] sm:$0x1] }
 0xada   :  { %v4504_v53 = vrot.slane %v4503_v50, 4  ;;  %vm10779_vm3 = vmmov %vm10771_vm0 }
 0xadb   :  { %v4638_v26 = vadd.f32 %v4637_v16, %v4636_v58  ;;  %vm10780_vm12 = vmmov %vm10771_vm0 }
 0xadc   :  { %v4505_v1 = vadd.f32 %v4504_v53, %v4503_v50  ;;  %vm10781_vm1 = vmmov %vm10771_vm0 }
 0xadd   :  { %v4639_v54 = vrot.slane %v4638_v26, 4  ;;  %vm10782_vm6 = vmmov %vm10771_vm0 }
 0xade   :  { %v4506_v4 = vrot.slane %v4505_v1, 2  ;;  %vm10783_vm14 = vmmov %vm10771_vm0 }
 0xadf   :  { %v4640_v17 = vadd.f32 %v4639_v54, %v4638_v26  ;;  %vm10784_vm7 = vmmov %vm10771_vm0  ;;  %v4630_v54 = vld [vmem:[#allocation31] sm:$0x1] }
 0xae0   :  { %v4507_v10 = vadd.f32 %v4506_v4, %v4505_v1  ;;  %vm10785_vm10 = vmmov %vm10771_vm0 }
 0xae1   :  { %v4641_v19 = vrot.slane %v4640_v17, 2  ;;  %vm10786_vm8 = vmmov %vm10771_vm0 }
 0xae2   :  { %v4508_v21 = vrot.slane %v4507_v10, 1  ;;  %vm10787_vm5 = vmmov %vm10771_vm0 }
 0xae3   :  { %v4642_v2 = vadd.f32 %v4641_v19, %v4640_v17 }
 0xae4   :  { %v4509_v32 = vadd.f32 %v4508_v21, %v4507_v10 }
 0xae5   :  { %v4643_v29 = vrot.slane %v4642_v2, 1 }
 0xae6   :  { %v4510_v31 = vmul.f32 0.03125, %v4509_v32  ;;  %v4778_v32 = vld [vmem:[#allocation26] ss:$0 sm:$0xff] }
 0xae7   :  { %v4644_v3 = vadd.f32 %v4643_v29, %v4642_v2  ;;  %v4782_v29 = vld [vmem:[#allocation32] ss:$0 sm:$0xff] }
 0xae8   :  { %v4511_v9 = vsub.f32 %v4493_v51, %v4510_v31  ;;  %v4512_v41 = vsub.f32 %v4494_v13, %v4510_v31  ;;  %v4513_v37 = vsub.f32 %v4495_v24, %v4510_v31  ;;  %v4514_v11 = vsub.f32 %v4496_v63, %v4510_v31 }
 0xae9   :  { %v4645_v0 = vmul.f32 0.03125, %v4644_v3 }
 0xaea   :  { %v4515_v23 = vmul.f32 %v4511_v9, %v4511_v9  ;;  %v4516_v15 = vmul.f32 %v4512_v41, %v4512_v41  ;;  %v4517_v62 = vmul.f32 %v4513_v37, %v4513_v37  ;;  %v4518_v28 = vmul.f32 %v4514_v11, %v4514_v11 }
 0xaeb   :  { %v4646_v51 = vsub.f32 %v4626_v40, %v4645_v0  ;;  %v4647_v35 = vsub.f32 %v4627_v33, %v4645_v0  ;;  %v4648_v55 = vsub.f32 %v4628_v57, %v4645_v0  ;;  %v4649_v45 = vsub.f32 %v4629_v25, %v4645_v0 }
 0xaec   :  { %v4519_v34 = vsel %vm10777_vm4, %v4515_v23, 0.0  ;;  %v4520_v43 = vsel %vm10778_vm2, %v4516_v15, 0.0  ;;  %v4522_v20 = vsel %vm10779_vm3, %v4517_v62, 0.0  ;;  %v4524_v6 = vsel %vm10780_vm12, %v4518_v28, 0.0 }
 0xaed   :  { %v4521_v60 = vadd.f32 %v4520_v43, %v4519_v34  ;;  %v4650_v46 = vmul.f32 %v4646_v51, %v4646_v51  ;;  %v4651_v48 = vmul.f32 %v4647_v35, %v4647_v35  ;;  %v4652_v24 = vmul.f32 %v4648_v55, %v4648_v55 }
 0xaee   :  { %v4653_v52 = vmul.f32 %v4649_v45, %v4649_v45 }
 0xaef   :  { %v4523_v42 = vadd.f32 %v4522_v20, %v4521_v60  ;;  %v4654_v61 = vsel %vm10781_vm1, %v4650_v46, 0.0  ;;  %v4655_v63 = vsel %vm10782_vm6, %v4651_v48, 0.0  ;;  %v4657_v18 = vsel %vm10783_vm14, %v4652_v24, 0.0 }
 0xaf0   :  { %v4656_v8 = vadd.f32 %v4655_v63, %v4654_v61  ;;  %v4659_v27 = vsel %vm10784_vm7, %v4653_v52, 0.0 }
 0xaf1   :  { %v4525_v56 = vadd.f32 %v4524_v6, %v4523_v42 }
 0xaf2   :  { %v4658_v36 = vadd.f32 %v4657_v18, %v4656_v8 }
 0xaf3   :  { %v4526_v22 = vrot.slane %v4525_v56, 4 }
 0xaf4   :  { %v4660_v7 = vadd.f32 %v4659_v27, %v4658_v36 }
 0xaf5   :  { %v4527_v13 = vadd.f32 %v4526_v22, %v4525_v56 }
 0xaf6   :  { %v4661_v40 = vrot.slane %v4660_v7, 4 }
 0xaf7   :  { %v4528_v30 = vrot.slane %v4527_v13, 2 }
 0xaf8   :  { %v4662_v50 = vadd.f32 %v4661_v40, %v4660_v7 }
 0xaf9   :  { %v4529_v14 = vadd.f32 %v4528_v30, %v4527_v13 }
 0xafa   :  { %v4663_v57 = vrot.slane %v4662_v50, 2 }
 0xafb   :  { %v4530_v38 = vrot.slane %v4529_v14, 1 }
 0xafc   :  { %v4664_v53 = vadd.f32 %v4663_v57, %v4662_v50 }
 0xafd   :  { %v4531_v44 = vadd.f32 %v4530_v38, %v4529_v14 }
 0xafe   :  { %v4665_v47 = vrot.slane %v4664_v53, 1 }
 0xaff   :  { %v4532_v59 = vmul.f32 0.03125, %v4531_v44 }
 0xb00   :  { %v4666_v25 = vadd.f32 %v4665_v47, %v4664_v53 }
 0xb01   :  { %v4533_v33 = vadd.f32 1e-05, %v4532_v59 }
 0xb02   :  { %v4667_v39 = vmul.f32 0.03125, %v4666_v25 }
 0xb03   :  { %5803 = vrsqrt.f32 %v4533_v33 }
 0xb04   :  { %v4668_v1 = vadd.f32 1e-05, %v4667_v39 }
 0xb06   :  { %5805 = vrsqrt.f32 %v4668_v1 }
 0xb0d   :  { %v5804_v12 = vpop.eup %5803 }
 0xb0e   :  { %v4535_v4 = vmul.f32 %v5804_v12, %v3199_v5 }
 0xb10   :  { %v4539_v58 = vrot.slane %v4535_v4, %v7929_v49  ;;  %v5806_v17 = vpop.eup %5805 }
 0xb11   :  { %v4670_v31 = vmul.f32 %v5806_v17, %v4630_v54 }
 0xb12   :  { %v4540_v16 = vmul.f32 %v4539_v58, %v4511_v9  ;;  %v4541_v10 = vmul.f32 %v4539_v58, %v4512_v41  ;;  %v4542_v26 = vmul.f32 %v4539_v58, %v4513_v37  ;;  %v4543_v21 = vmul.f32 %v4539_v58, %v4514_v11 }
 0xb13   :  { %v4674_v62 = vrot.slane %v4670_v31, %v7929_v49 }
 0xb14   :  { %v4550_v19 = vadd.f32 %v4778_v32, %v4540_v16  ;;  %v4551_v2 = vadd.f32 %v4778_v32, %v4541_v10  ;;  %v4552_v23 = vadd.f32 %v4778_v32, %v4542_v26  ;;  %v4553_v15 = vadd.f32 %v4778_v32, %v4543_v21 }
 0xb15   :  { %v4675_v28 = vmul.f32 %v4674_v62, %v4646_v51  ;;  %v4676_v34 = vmul.f32 %v4674_v62, %v4647_v35  ;;  %v4677_v43 = vmul.f32 %v4674_v62, %v4648_v55  ;;  %v4678_v60 = vmul.f32 %v4674_v62, %v4649_v45 }
 0xb16   :  { %v4554_v3 = vmax.f32 %v4550_v19, 0.0  ;;  %v4555_v9 = vmax.f32 %v4551_v2, 0.0  ;;  %v4556_v41 = vmax.f32 %v4552_v23, 0.0  ;;  %v4557_v37 = vmax.f32 %v4553_v15, 0.0 }
 0xb17   :  { %v4685_v11 = vadd.f32 %v4782_v29, %v4675_v28  ;;  %v4686_v20 = vadd.f32 %v4782_v29, %v4676_v34  ;;  %v4687_v42 = vadd.f32 %v4782_v29, %v4677_v43  ;;  %v4688_v0 = vadd.f32 %v4782_v29, %v4678_v60 }
 0xb19   :  { %v4690_v6 = vadd.f32 %v4686_v20, %v4555_v9  ;;  %v4689_v56 = vadd.f32 %v4685_v11, %v4554_v3  ;;  %v4691_v22 = vadd.f32 %v4687_v42, %v4556_v41  ;;  %v4692_v46 = vadd.f32 %v4688_v0, %v4557_v37 }
 0xb1b   :  { %v4694_v49 = vmax.f32 %v4690_v6, 0.0  ;;  %v4693_v48 = vmax.f32 %v4689_v56, 0.0  ;;  %v4695_v51 = vmax.f32 %v4691_v22, 0.0  ;;  %v4696_v35 = vmax.f32 %v4692_v46, 0.0 }
 0xb1d   :  { %4698 = vst.msk [vmem:[#allocation34 + $0x8] sm:$0xff] %vm10785_vm10, %v4694_v49 }
 0xb1e   :  { %4697 = vst.msk [vmem:[#allocation34] sm:$0xff] %vm10786_vm8, %v4693_v48 }
 0xb1f   :  { %4699 = vst.msk [vmem:[#allocation34 + $0x10] sm:$0xff] %vm10771_vm0, %v4695_v51 }
 0xb20   :  { %4700 = vst.msk [vmem:[#allocation34 + $0x18] sm:$0xff] %vm10787_vm5, %v4696_v35 }
 0xb21   :  { %6262 = shalt.err (!%p6259_p10)
}
 0xb22   :  { %s10788_s3 = sld [smem:[#allocation55_spill]] }
 0xb28   :  { %s6263_s27 = scalar_lea.hbm %s10788_s3, 512 }
 0xb29   :  { %p6264_p11 = scmp.ne.s32.totalorder %s10788_s3, %s6263_s27  ;;  %p6267_p12 = scmp.lt.u32.totalorder %s6263_s27, %s10788_s3 }
 0xb2b   :  { %p6269_p13 = pnand %p6267_p12, %p6264_p11 }
 0xb2d   :  { %6272 = shalt.err (!%p6269_p13)
}
 0xb2e   :  { %4712 = dma.vmem_to_hbm [thread:$0]  %s4707_s22, 512, %s10788_s3, [#allocation4], %s6299_s0, %s6299_s0, %s6300_s21  }
 0xb2f   :  { %6295 = dma.done.wait [#allocation4], 512  }
 0xb30   :  { %6296 = vsyncadd [#allocation4], 4294966784 }
 0xb31   :  { %4716 = vsyncpa [#allocation3], 1 }
 0xb32   :  { %4717 = vsyncpa [#allocation6], 1 }
 0xb33   :  { %4718 = vsyncpa [#allocation9], 1 }
 0xb34   :  { %4719 = vsyncpa [#allocation12], 1 }
 0xb35   :  { %4720 = vsyncpa [#allocation15], 1 }
 0xb36   :  { %4721 = vsyncpa [#allocation18], 1 }
 0xb37   :  { %4722 = vsyncpa [#allocation21], 1 }
 0xb38   :  { %4723 = vsyncpa [#allocation24], 1 }
 0xb39   :  { %4724 = vsyncpa [#allocation27], 1 }
 0xb3a   :  { %4725 = vsyncpa [#allocation30], 1 }
 0xb3b   :  { %4726 = vsyncpa [#allocation33], 1 }
 0xb3c   :  { %4727 = vsyncpa [#allocation4], 1 }

</bundles_post_ra>
